<compile_context>
chip_gen: v7x
topology: tpu7x:2x2x1
jax: 0.10.0
libtpu: 0.0.40
codegen_flags: <defaults>
</compile_context>

<pallas_src>
import functools

import jax
import jax.numpy as jnp
import numpy as np
from jax.experimental import pallas as pl
from jax.experimental.pallas import tpu as pltpu

EPS = 1e-5
EXPANSION = 4


# ----------------------------------------------------------------------------
# helpers
# ----------------------------------------------------------------------------
def _fold_bn(gamma, beta, mean, var):
    scale = gamma / jnp.sqrt(var + EPS)
    bias = beta - mean * scale
    return (scale.reshape(1, -1).astype(jnp.float32),
            bias.reshape(1, -1).astype(jnp.float32))


def _strided_phase(a, stride, axis, offset):
    """a[..., offset::stride, ...] along `axis`.

    Built from static slices + jnp.concatenate only, so it lowers on all TPU
    generations without depending on strided vector loads.
    """
    if stride == 1 and offset == 0:
        return a
    idx = [slice(None)] * a.ndim
    pieces = []
    for i in range(offset, a.shape[axis], stride):
        idx[axis] = slice(i, i + 1)
        pieces.append(a[tuple(idx)])
    if len(pieces) == 1:
        return pieces[0]
    return jnp.concatenate(pieces, axis=axis)


# ----------------------------------------------------------------------------
# fused bottleneck kernel (one grid step == one image)
# ----------------------------------------------------------------------------
def _bottleneck_kernel(x_ref, w1_ref, w2_ref, w3_ref,
                       s1_ref, b1_ref, s2_ref, b2_ref, s3_ref, b3_ref,
                       *rest, stride, has_proj):
    if has_proj:
        wsc_ref, ssc_ref, bsc_ref, o_ref, y1p_ref, acc_ref = rest
    else:
        o_ref, y1p_ref, acc_ref = rest

    _, H, W, Cin = x_ref.shape
    Czip = w1_ref.shape[1]
    Cout = w3_ref.shape[1]
    Ho = (H - 1) // stride + 1
    Wo = (W - 1) // stride + 1

    x = x_ref[0]                           # (H, W, Cin), bf16
    xf = x.reshape(H * W, Cin)

    # --- conv1 (1x1) + BN + ReLU, stored zero-padded in VMEM scratch --------
    y1 = jnp.dot(xf, w1_ref[...], preferred_element_type=jnp.float32)
    y1 = jnp.maximum(y1 * s1_ref[...] + b1_ref[...], 0.0)
    y1_hw = y1.astype(y1p_ref.dtype).reshape(H, W, Czip)
    zrow = jnp.zeros((1, W, Czip), y1p_ref.dtype)
    zcol = jnp.zeros((H + 2, 1, Czip), y1p_ref.dtype)
    y1_pad = jnp.concatenate([zrow, y1_hw, zrow], axis=0)
    y1_pad = jnp.concatenate([zcol, y1_pad, zcol], axis=1)
    y1p_ref[...] = y1_pad                  # (H+2, W+2, Czip)

    # --- conv2 (3x3, stride, pad=1) + BN + ReLU ------------------------------
    # Strided output is computed directly at output resolution.
    if stride == 1:
        def patch(dy, dx):
            return y1p_ref[dy:dy + Ho, dx:dx + Wo, :]
    else:
        y1p = y1p_ref[...]
        phases = []
        for r in range(stride):
            rowp = _strided_phase(y1p, stride, 0, r)
            phases.append([_strided_phase(rowp, stride, 1, c)
                           for c in range(stride)])

        def patch(dy, dx):
            p = phases[dy % stride][dx % stride]
            return p[dy // stride:dy // stride + Ho,
                     dx // stride:dx // stride + Wo, :]

    for dy in range(3):
        for dx in range(3):
            lhs = patch(dy, dx).reshape(Ho * Wo, Czip)
            contrib = jnp.dot(lhs, w2_ref[dy, dx],
                              preferred_element_type=jnp.float32)
            if dy == 0 and dx == 0:
                acc_ref[...] = contrib
            else:
                acc_ref[...] += contrib

    y2 = jnp.maximum(acc_ref[...] * s2_ref[...] + b2_ref[...], 0.0)

    # --- conv3 (1x1) + BN + shortcut + ReLU ----------------------------------
    y3 = jnp.dot(y2.astype(jnp.bfloat16), w3_ref[...],
                 preferred_element_type=jnp.float32)
    y3 = y3 * s3_ref[...] + b3_ref[...]

    if has_proj:
        if stride == 1:
            xs = xf
        else:
            xs = _strided_phase(_strided_phase(x, stride, 0, 0), stride, 1, 0)
            xs = xs.reshape(Ho * Wo, Cin)
        sc = jnp.dot(xs, wsc_ref[...], preferred_element_type=jnp.float32)
        sc = sc * ssc_ref[...] + bsc_ref[...]
    else:
        sc = xf.astype(jnp.float32)

    out = jnp.maximum(y3 + sc, 0.0)
    o_ref[...] = out.reshape(1, Ho * Wo, Cout).astype(o_ref.dtype)


# ----------------------------------------------------------------------------
# public wrapper
# ----------------------------------------------------------------------------
def bottleneck_forward(x_nchw, params, stride=1):
    # NCHW -> NHWC boundary layout plumbing (PyTorch convention).
    x = jnp.transpose(x_nchw, (0, 2, 3, 1))
    N, H, W, Cin = x.shape
    Czip = params["w1"].shape[1]
    Cout = params["w3"].shape[1]
    Ho = (H - 1) // stride + 1
    Wo = (W - 1) // stride + 1
    if stride != 1:
        assert H % stride == 0 and W % stride == 0, "stride must divide H, W"

    has_proj = (stride != 1) or (Cin != Cout)

    xb = x.astype(jnp.bfloat16)
    w1 = params["w1"].astype(jnp.bfloat16)
    w2 = params["w2"].astype(jnp.bfloat16)
    w3 = params["w3"].astype(jnp.bfloat16)
    s1, b1 = _fold_bn(*params["bn1"])
    s2, b2 = _fold_bn(*params["bn2"])
    s3, b3 = _fold_bn(*params["bn3"])

    inputs = [xb, w1, w2, w3, s1, b1, s2, b2, s3, b3]
    in_specs = [
        pl.BlockSpec((1, H, W, Cin), lambda n: (n, 0, 0, 0)),
        pl.BlockSpec((Cin, Czip), lambda n: (0, 0)),
        pl.BlockSpec((3, 3, Czip, Czip), lambda n: (0, 0, 0, 0)),
        pl.BlockSpec((Czip, Cout), lambda n: (0, 0)),
        pl.BlockSpec((1, Czip), lambda n: (0, 0)),
        pl.BlockSpec((1, Czip), lambda n: (0, 0)),
        pl.BlockSpec((1, Czip), lambda n: (0, 0)),
        pl.BlockSpec((1, Czip), lambda n: (0, 0)),
        pl.BlockSpec((1, Cout), lambda n: (0, 0)),
        pl.BlockSpec((1, Cout), lambda n: (0, 0)),
    ]
    if has_proj:
        wsc = params["w_sc"].astype(jnp.bfloat16)
        ssc, bsc = _fold_bn(*params["bn_sc"])
        inputs += [wsc, ssc, bsc]
        in_specs += [
            pl.BlockSpec((Cin, Cout), lambda n: (0, 0)),
            pl.BlockSpec((1, Cout), lambda n: (0, 0)),
            pl.BlockSpec((1, Cout), lambda n: (0, 0)),
        ]

    # VMEM budget: double-buffered x/out blocks + weights + scratch, with
    # margin; clamped so it also fits v7x's 64 MiB physical VMEM.
    est = (2 * H * W * Cin * 2 + 2 * Ho * Wo * Cout * 4
           + (Cin * Czip + 9 * Czip * Czip + Czip * Cout + Cin * Cout) * 2
           + (H + 2) * (W + 2) * Czip * 2 + Ho * Wo * Czip * 4)
    vmem_limit = int(min(48 * 1024 * 1024, max(32 * 1024 * 1024, 2 * est)))

    out = pl.pallas_call(
        functools.partial(_bottleneck_kernel, stride=stride, has_proj=has_proj),
        out_shape=jax.ShapeDtypeStruct((N, Ho * Wo, Cout), jnp.float32),
        grid=(N,),
        in_specs=in_specs,
        out_specs=pl.BlockSpec((1, Ho * Wo, Cout), lambda n: (n, 0, 0)),
        scratch_shapes=[
            pltpu.VMEM((H + 2, W + 2, Czip), jnp.bfloat16),   # padded y1
            pltpu.VMEM((Ho * Wo, Czip), jnp.float32),          # conv2 accumulator
        ],
        compiler_params=pltpu.CompilerParams(
            dimension_semantics=("parallel",),
            vmem_limit_bytes=vmem_limit,
        ),
    )(*inputs)

    out = out.reshape(N, Ho, Wo, Cout)
    return jnp.transpose(out, (0, 3, 1, 2))   # -> NCHW


# ----------------------------------------------------------------------------
# reference (matches the kernel's bf16-matmul / f32-accumulate precision)
# ----------------------------------------------------------------------------
def _ref_forward(x_nchw, params, stride=1):
    x = jnp.transpose(x_nchw, (0, 2, 3, 1)).astype(jnp.bfloat16)
    dn = ("NHWC", "HWIO", "NHWC")

    def conv(v, w, strides, pad):
        return jax.lax.conv_general_dilated(
            v.astype(jnp.bfloat16), w.astype(jnp.bfloat16),
            window_strides=strides, padding=pad, dimension_numbers=dn,
            preferred_element_type=jnp.float32)

    def bn(v, p):
        gamma, beta, mean, var = p
        scale = gamma / jnp.sqrt(var + EPS)
        return v * scale + (beta - mean * scale)

    Cin = x.shape[-1]
    Cout = params["w3"].shape[1]
    y = jax.nn.relu(bn(conv(x, params["w1"][None, None], (1, 1), "VALID"),
                       params["bn1"]))
    y = jax.nn.relu(bn(conv(y, params["w2"], (stride, stride),
                            ((1, 1), (1, 1))), params["bn2"]))
    y = bn(conv(y, params["w3"][None, None], (1, 1), "VALID"), params["bn3"])
    if stride != 1 or Cin != Cout:
        sc = bn(conv(x, params["w_sc"][None, None], (stride, stride), "VALID"),
                params["bn_sc"])
    else:
        sc = x.astype(jnp.float32)
    out = jax.nn.relu(y + sc)
    return jnp.transpose(out, (0, 3, 1, 2))


# ----------------------------------------------------------------------------
# deterministic parameter construction
# ----------------------------------------------------------------------------
def make_params(key, in_channels, zip_channels):
    out_channels = EXPANSION * zip_channels
    keys = jax.random.split(key, 8)

    def bn_params(k, c):
        k1, k2, k3, k4 = jax.random.split(k, 4)
        gamma = 1.0 + 0.1 * jax.random.normal(k1, (c,), jnp.float32)
        beta = 0.1 * jax.random.normal(k2, (c,), jnp.float32)
        mean = 0.1 * jax.random.normal(k3, (c,), jnp.float32)
        var = 1.0 + 0.1 * jax.random.uniform(k4, (c,), jnp.float32)
        return (gamma, beta, mean, var)

    return {
        # 1x1 conv weights as (Cin, Cout); 3x3 as HWIO (3, 3, Cin, Cout)
        "w1": 0.1 * jax.random.normal(keys[0], (in_channels, zip_channels),
                                      jnp.float32),
        "w2": 0.1 * jax.random.normal(keys[1], (3, 3, zip_channels,
                                                zip_channels), jnp.float32),
        "w3": 0.1 * jax.random.normal(keys[2], (zip_channels, out_channels),
                                      jnp.float32),
        "w_sc": 0.1 * jax.random.normal(keys[3], (in_channels, out_channels),
                                        jnp.float32),
        "bn1": bn_params(keys[4], zip_channels),
        "bn2": bn_params(keys[5], zip_channels),
        "bn3": bn_params(keys[6], out_channels),
        "bn_sc": bn_params(keys[7], out_channels),
    }


if __name__ == "__main__":
    key = jax.random.PRNGKey(0)
    N = 2
    configs = [
        # (in_channels, zip_channels, H, W, stride)
        (64, 32, 16, 16, 1),    # projection shortcut (Cin != Cout)
        (64, 32, 16, 16, 2),    # strided (downsampling) block
        (128, 32, 16, 16, 1),   # identity shortcut (Cin == Cout)
    ]
    for i, (cin, czip, H, W, stride) in enumerate(configs):
        k_x, k_p = jax.random.split(jax.random.fold_in(key, i))
        x = jax.random.normal(k_x, (N, cin, H, W), jnp.float32)  # NCHW input
        params = make_params(k_p, cin, czip)

        out = jax.block_until_ready(bottleneck_forward(x, params, stride=stride))
        ref = jax.block_until_ready(_ref_forward(x, params, stride=stride))

        Ho = (H - 1) // stride + 1
        assert out.shape == (N, EXPANSION * czip, Ho, Ho)
        np.testing.assert_allclose(np.asarray(out), np.asarray(ref),
                                   rtol=1e-2, atol=1e-2)

    print("KERNEL_OK")
</pallas_src>

<mosaic_0001>
module attributes {stable_mosaic.version = 11 : i64} {
  func.func @_bottleneck_kernel(%arg0: i32, %arg1: memref<1x16x16x64xbf16, #tpu.memory_space<vmem>>, %arg2: memref<64x32xbf16, #tpu.memory_space<vmem>>, %arg3: memref<3x3x32x32xbf16, #tpu.memory_space<vmem>>, %arg4: memref<32x128xbf16, #tpu.memory_space<vmem>>, %arg5: memref<1x32xf32, #tpu.memory_space<vmem>>, %arg6: memref<1x32xf32, #tpu.memory_space<vmem>>, %arg7: memref<1x32xf32, #tpu.memory_space<vmem>>, %arg8: memref<1x32xf32, #tpu.memory_space<vmem>>, %arg9: memref<1x128xf32, #tpu.memory_space<vmem>>, %arg10: memref<1x128xf32, #tpu.memory_space<vmem>>, %arg11: memref<64x128xbf16, #tpu.memory_space<vmem>>, %arg12: memref<1x128xf32, #tpu.memory_space<vmem>>, %arg13: memref<1x128xf32, #tpu.memory_space<vmem>>, %arg14: memref<1x256x128xf32, #tpu.memory_space<vmem>>, %arg15: memref<18x18x32xbf16, #tpu.memory_space<vmem>>, %arg16: memref<256x32xf32, #tpu.memory_space<vmem>>) attributes {dimension_semantics = [#tpu.dimension_semantics<parallel>], iteration_bounds = array<i64: 2>, scalar_prefetch = 0 : i64, scratch_operands = 2 : i64, tpu.core_type = #tpu.core_type<tc>, window_params = [{transform_indices = @transform_0, window_bounds = array<i64: 1, 16, 16, 64>}, {pipeline_mode = #tpu.pipeline_mode<synchronous>, transform_indices = @transform_1, window_bounds = array<i64: 64, 32>}, {pipeline_mode = #tpu.pipeline_mode<synchronous>, transform_indices = @transform_2, window_bounds = array<i64: 3, 3, 32, 32>}, {pipeline_mode = #tpu.pipeline_mode<synchronous>, transform_indices = @transform_3, window_bounds = array<i64: 32, 128>}, {pipeline_mode = #tpu.pipeline_mode<synchronous>, transform_indices = @transform_4, window_bounds = array<i64: 1, 32>}, {pipeline_mode = #tpu.pipeline_mode<synchronous>, transform_indices = @transform_5, window_bounds = array<i64: 1, 32>}, {pipeline_mode = #tpu.pipeline_mode<synchronous>, transform_indices = @transform_6, window_bounds = array<i64: 1, 32>}, {pipeline_mode = #tpu.pipeline_mode<synchronous>, transform_indices = @transform_7, window_bounds = array<i64: 1, 32>}, {pipeline_mode = #tpu.pipeline_mode<synchronous>, transform_indices = @transform_8, window_bounds = array<i64: 1, 128>}, {pipeline_mode = #tpu.pipeline_mode<synchronous>, transform_indices = @transform_9, window_bounds = array<i64: 1, 128>}, {pipeline_mode = #tpu.pipeline_mode<synchronous>, transform_indices = @transform_10, window_bounds = array<i64: 64, 128>}, {pipeline_mode = #tpu.pipeline_mode<synchronous>, transform_indices = @transform_11, window_bounds = array<i64: 1, 128>}, {pipeline_mode = #tpu.pipeline_mode<synchronous>, transform_indices = @transform_12, window_bounds = array<i64: 1, 128>}, {transform_indices = @transform_13, window_bounds = array<i64: 1, 256, 128>}]} {
    %c0 = arith.constant 0 : index
    %c0_0 = arith.constant 0 : index
    %c0_1 = arith.constant 0 : index
    %c0_2 = arith.constant 0 : index
    %0 = vector.load %arg1[%c0, %c0_0, %c0_1, %c0_2] : memref<1x16x16x64xbf16, #tpu.memory_space<vmem>>, vector<1x16x16x64xbf16>
    %1 = vector.shape_cast %0 : vector<1x16x16x64xbf16> to vector<16x16x64xbf16>
    %2 = vector.shape_cast %1 : vector<16x16x64xbf16> to vector<256x64xbf16>
    %c0_3 = arith.constant 0 : index
    %c0_4 = arith.constant 0 : index
    %3 = vector.load %arg2[%c0_3, %c0_4] : memref<64x32xbf16, #tpu.memory_space<vmem>>, vector<64x32xbf16>
    %cst = arith.constant dense<0.000000e+00> : vector<256x32xf32>
    %4 = tpu.matmul %2, %3, %cst {dimension_numbers = #tpu.dot_dimension_numbers<[1], [0], [0], [1], [0, 0, 1, 1], [], []>} : vector<256x64xbf16>, vector<64x32xbf16>, vector<256x32xf32> -> vector<256x32xf32>
    %c0_5 = arith.constant 0 : index
    %c0_6 = arith.constant 0 : index
    %5 = vector.load %arg5[%c0_5, %c0_6] : memref<1x32xf32, #tpu.memory_space<vmem>>, vector<1x32xf32>
    %6 = vector.broadcast %5 : vector<1x32xf32> to vector<256x32xf32>
    %7 = arith.mulf %4, %6 : vector<256x32xf32>
    %c0_7 = arith.constant 0 : index
    %c0_8 = arith.constant 0 : index
    %8 = vector.load %arg6[%c0_7, %c0_8] : memref<1x32xf32, #tpu.memory_space<vmem>>, vector<1x32xf32>
    %9 = vector.broadcast %8 : vector<1x32xf32> to vector<256x32xf32>
    %10 = arith.addf %7, %9 : vector<256x32xf32>
    %cst_9 = arith.constant 0.000000e+00 : f32
    %11 = vector.broadcast %cst_9 : f32 to vector<256x32xf32>
    %12 = arith.maximumf %10, %11 : vector<256x32xf32>
    %13 = arith.truncf %12 : vector<256x32xf32> to vector<256x32xbf16>
    %14 = vector.shape_cast %13 : vector<256x32xbf16> to vector<16x16x32xbf16>
    %cst_10 = arith.constant 0.000000e+00 : bf16
    %15 = vector.broadcast %cst_10 : bf16 to vector<1x16x32xbf16>
    %cst_11 = arith.constant 0.000000e+00 : bf16
    %16 = vector.broadcast %cst_11 : bf16 to vector<18x1x32xbf16>
    %17 = tpu.concatenate %15, %14, %15 in 0 : vector<1x16x32xbf16>, vector<16x16x32xbf16>, vector<1x16x32xbf16> -> vector<18x16x32xbf16>
    %18 = tpu.concatenate %16, %17, %16 in 1 : vector<18x1x32xbf16>, vector<18x16x32xbf16>, vector<18x1x32xbf16> -> vector<18x18x32xbf16>
    %c0_12 = arith.constant 0 : index
    %c0_13 = arith.constant 0 : index
    %c0_14 = arith.constant 0 : index
    %19 = vector.load %arg15[%c0_12, %c0_13, %c0_14] : memref<18x18x32xbf16, #tpu.memory_space<vmem>>, vector<18x18x32xbf16>
    tpu.vector_store %arg15[%c0_12, %c0_13, %c0_14], %18 {strides = array<i32>} : memref<18x18x32xbf16, #tpu.memory_space<vmem>>, vector<18x18x32xbf16>,
    %c0_15 = arith.constant 0 : index
    %c0_16 = arith.constant 0 : index
    %c0_17 = arith.constant 0 : index
    %20 = vector.load %arg15[%c0_15, %c0_16, %c0_17] : memref<18x18x32xbf16, #tpu.memory_space<vmem>>, vector<16x16x32xbf16>
    %21 = vector.shape_cast %20 : vector<16x16x32xbf16> to vector<256x32xbf16>
    %c0_18 = arith.constant 0 : index
    %c0_19 = arith.constant 0 : index
    %c0_20 = arith.constant 0 : index
    %c0_21 = arith.constant 0 : index
    %22 = vector.load %arg3[%c0_18, %c0_19, %c0_20, %c0_21] : memref<3x3x32x32xbf16, #tpu.memory_space<vmem>>, vector<1x1x32x32xbf16>
    %23 = vector.shape_cast %22 : vector<1x1x32x32xbf16> to vector<32x32xbf16>
    %cst_22 = arith.constant dense<0.000000e+00> : vector<256x32xf32>
    %24 = tpu.matmul %21, %23, %cst_22 {dimension_numbers = #tpu.dot_dimension_numbers<[1], [0], [0], [1], [0, 0, 1, 1], [], []>} : vector<256x32xbf16>, vector<32x32xbf16>, vector<256x32xf32> -> vector<256x32xf32>
    %c0_23 = arith.constant 0 : index
    %c0_24 = arith.constant 0 : index
    %25 = vector.load %arg16[%c0_23, %c0_24] : memref<256x32xf32, #tpu.memory_space<vmem>>, vector<256x32xf32>
    tpu.vector_store %arg16[%c0_23, %c0_24], %24 {strides = array<i32>} : memref<256x32xf32, #tpu.memory_space<vmem>>, vector<256x32xf32>,
    %c0_25 = arith.constant 0 : index
    %c1 = arith.constant 1 : index
    %c0_26 = arith.constant 0 : index
    %26 = vector.load %arg15[%c0_25, %c1, %c0_26] : memref<18x18x32xbf16, #tpu.memory_space<vmem>>, vector<16x16x32xbf16>
    %27 = vector.shape_cast %26 : vector<16x16x32xbf16> to vector<256x32xbf16>
    %c0_27 = arith.constant 0 : index
    %c1_28 = arith.constant 1 : index
    %c0_29 = arith.constant 0 : index
    %c0_30 = arith.constant 0 : index
    %28 = vector.load %arg3[%c0_27, %c1_28, %c0_29, %c0_30] : memref<3x3x32x32xbf16, #tpu.memory_space<vmem>>, vector<1x1x32x32xbf16>
    %29 = vector.shape_cast %28 : vector<1x1x32x32xbf16> to vector<32x32xbf16>
    %cst_31 = arith.constant dense<0.000000e+00> : vector<256x32xf32>
    %30 = tpu.matmul %27, %29, %cst_31 {dimension_numbers = #tpu.dot_dimension_numbers<[1], [0], [0], [1], [0, 0, 1, 1], [], []>} : vector<256x32xbf16>, vector<32x32xbf16>, vector<256x32xf32> -> vector<256x32xf32>
    %c0_32 = arith.constant 0 : index
    %c0_33 = arith.constant 0 : index
    %31 = vector.load %arg16[%c0_32, %c0_33] : memref<256x32xf32, #tpu.memory_space<vmem>>, vector<256x32xf32>
    %32 = arith.addf %31, %30 : vector<256x32xf32>
    %c0_34 = arith.constant 0 : index
    %c0_35 = arith.constant 0 : index
    %33 = vector.load %arg16[%c0_34, %c0_35] : memref<256x32xf32, #tpu.memory_space<vmem>>, vector<256x32xf32>
    tpu.vector_store %arg16[%c0_34, %c0_35], %32 {strides = array<i32>} : memref<256x32xf32, #tpu.memory_space<vmem>>, vector<256x32xf32>,
    %c0_36 = arith.constant 0 : index
    %c2 = arith.constant 2 : index
    %c0_37 = arith.constant 0 : index
    %34 = vector.load %arg15[%c0_36, %c2, %c0_37] : memref<18x18x32xbf16, #tpu.memory_space<vmem>>, vector<16x16x32xbf16>
    %35 = vector.shape_cast %34 : vector<16x16x32xbf16> to vector<256x32xbf16>
    %c0_38 = arith.constant 0 : index
    %c2_39 = arith.constant 2 : index
    %c0_40 = arith.constant 0 : index
    %c0_41 = arith.constant 0 : index
    %36 = vector.load %arg3[%c0_38, %c2_39, %c0_40, %c0_41] : memref<3x3x32x32xbf16, #tpu.memory_space<vmem>>, vector<1x1x32x32xbf16>
    %37 = vector.shape_cast %36 : vector<1x1x32x32xbf16> to vector<32x32xbf16>
    %cst_42 = arith.constant dense<0.000000e+00> : vector<256x32xf32>
    %38 = tpu.matmul %35, %37, %cst_42 {dimension_numbers = #tpu.dot_dimension_numbers<[1], [0], [0], [1], [0, 0, 1, 1], [], []>} : vector<256x32xbf16>, vector<32x32xbf16>, vector<256x32xf32> -> vector<256x32xf32>
    %c0_43 = arith.constant 0 : index
    %c0_44 = arith.constant 0 : index
    %39 = vector.load %arg16[%c0_43, %c0_44] : memref<256x32xf32, #tpu.memory_space<vmem>>, vector<256x32xf32>
    %40 = arith.addf %39, %38 : vector<256x32xf32>
    %c0_45 = arith.constant 0 : index
    %c0_46 = arith.constant 0 : index
    %41 = vector.load %arg16[%c0_45, %c0_46] : memref<256x32xf32, #tpu.memory_space<vmem>>, vector<256x32xf32>
    tpu.vector_store %arg16[%c0_45, %c0_46], %40 {strides = array<i32>} : memref<256x32xf32, #tpu.memory_space<vmem>>, vector<256x32xf32>,
    %c1_47 = arith.constant 1 : index
    %c0_48 = arith.constant 0 : index
    %c0_49 = arith.constant 0 : index
    %42 = vector.load %arg15[%c1_47, %c0_48, %c0_49] : memref<18x18x32xbf16, #tpu.memory_space<vmem>>, vector<16x16x32xbf16>
    %43 = vector.shape_cast %42 : vector<16x16x32xbf16> to vector<256x32xbf16>
    %c1_50 = arith.constant 1 : index
    %c0_51 = arith.constant 0 : index
    %c0_52 = arith.constant 0 : index
    %c0_53 = arith.constant 0 : index
    %44 = vector.load %arg3[%c1_50, %c0_51, %c0_52, %c0_53] : memref<3x3x32x32xbf16, #tpu.memory_space<vmem>>, vector<1x1x32x32xbf16>
    %45 = vector.shape_cast %44 : vector<1x1x32x32xbf16> to vector<32x32xbf16>
    %cst_54 = arith.constant dense<0.000000e+00> : vector<256x32xf32>
    %46 = tpu.matmul %43, %45, %cst_54 {dimension_numbers = #tpu.dot_dimension_numbers<[1], [0], [0], [1], [0, 0, 1, 1], [], []>} : vector<256x32xbf16>, vector<32x32xbf16>, vector<256x32xf32> -> vector<256x32xf32>
    %c0_55 = arith.constant 0 : index
    %c0_56 = arith.constant 0 : index
    %47 = vector.load %arg16[%c0_55, %c0_56] : memref<256x32xf32, #tpu.memory_space<vmem>>, vector<256x32xf32>
    %48 = arith.addf %47, %46 : vector<256x32xf32>
    %c0_57 = arith.constant 0 : index
    %c0_58 = arith.constant 0 : index
    %49 = vector.load %arg16[%c0_57, %c0_58] : memref<256x32xf32, #tpu.memory_space<vmem>>, vector<256x32xf32>
    tpu.vector_store %arg16[%c0_57, %c0_58], %48 {strides = array<i32>} : memref<256x32xf32, #tpu.memory_space<vmem>>, vector<256x32xf32>,
    %c1_59 = arith.constant 1 : index
    %c1_60 = arith.constant 1 : index
    %c0_61 = arith.constant 0 : index
    %50 = vector.load %arg15[%c1_59, %c1_60, %c0_61] : memref<18x18x32xbf16, #tpu.memory_space<vmem>>, vector<16x16x32xbf16>
    %51 = vector.shape_cast %50 : vector<16x16x32xbf16> to vector<256x32xbf16>
    %c1_62 = arith.constant 1 : index
    %c1_63 = arith.constant 1 : index
    %c0_64 = arith.constant 0 : index
    %c0_65 = arith.constant 0 : index
    %52 = vector.load %arg3[%c1_62, %c1_63, %c0_64, %c0_65] : memref<3x3x32x32xbf16, #tpu.memory_space<vmem>>, vector<1x1x32x32xbf16>
    %53 = vector.shape_cast %52 : vector<1x1x32x32xbf16> to vector<32x32xbf16>
    %cst_66 = arith.constant dense<0.000000e+00> : vector<256x32xf32>
    %54 = tpu.matmul %51, %53, %cst_66 {dimension_numbers = #tpu.dot_dimension_numbers<[1], [0], [0], [1], [0, 0, 1, 1], [], []>} : vector<256x32xbf16>, vector<32x32xbf16>, vector<256x32xf32> -> vector<256x32xf32>
    %c0_67 = arith.constant 0 : index
    %c0_68 = arith.constant 0 : index
    %55 = vector.load %arg16[%c0_67, %c0_68] : memref<256x32xf32, #tpu.memory_space<vmem>>, vector<256x32xf32>
    %56 = arith.addf %55, %54 : vector<256x32xf32>
    %c0_69 = arith.constant 0 : index
    %c0_70 = arith.constant 0 : index
    %57 = vector.load %arg16[%c0_69, %c0_70] : memref<256x32xf32, #tpu.memory_space<vmem>>, vector<256x32xf32>
    tpu.vector_store %arg16[%c0_69, %c0_70], %56 {strides = array<i32>} : memref<256x32xf32, #tpu.memory_space<vmem>>, vector<256x32xf32>,
    %c1_71 = arith.constant 1 : index
    %c2_72 = arith.constant 2 : index
    %c0_73 = arith.constant 0 : index
    %58 = vector.load %arg15[%c1_71, %c2_72, %c0_73] : memref<18x18x32xbf16, #tpu.memory_space<vmem>>, vector<16x16x32xbf16>
    %59 = vector.shape_cast %58 : vector<16x16x32xbf16> to vector<256x32xbf16>
    %c1_74 = arith.constant 1 : index
    %c2_75 = arith.constant 2 : index
    %c0_76 = arith.constant 0 : index
    %c0_77 = arith.constant 0 : index
    %60 = vector.load %arg3[%c1_74, %c2_75, %c0_76, %c0_77] : memref<3x3x32x32xbf16, #tpu.memory_space<vmem>>, vector<1x1x32x32xbf16>
    %61 = vector.shape_cast %60 : vector<1x1x32x32xbf16> to vector<32x32xbf16>
    %cst_78 = arith.constant dense<0.000000e+00> : vector<256x32xf32>
    %62 = tpu.matmul %59, %61, %cst_78 {dimension_numbers = #tpu.dot_dimension_numbers<[1], [0], [0], [1], [0, 0, 1, 1], [], []>} : vector<256x32xbf16>, vector<32x32xbf16>, vector<256x32xf32> -> vector<256x32xf32>
    %c0_79 = arith.constant 0 : index
    %c0_80 = arith.constant 0 : index
    %63 = vector.load %arg16[%c0_79, %c0_80] : memref<256x32xf32, #tpu.memory_space<vmem>>, vector<256x32xf32>
    %64 = arith.addf %63, %62 : vector<256x32xf32>
    %c0_81 = arith.constant 0 : index
    %c0_82 = arith.constant 0 : index
    %65 = vector.load %arg16[%c0_81, %c0_82] : memref<256x32xf32, #tpu.memory_space<vmem>>, vector<256x32xf32>
    tpu.vector_store %arg16[%c0_81, %c0_82], %64 {strides = array<i32>} : memref<256x32xf32, #tpu.memory_space<vmem>>, vector<256x32xf32>,
    %c2_83 = arith.constant 2 : index
    %c0_84 = arith.constant 0 : index
    %c0_85 = arith.constant 0 : index
    %66 = vector.load %arg15[%c2_83, %c0_84, %c0_85] : memref<18x18x32xbf16, #tpu.memory_space<vmem>>, vector<16x16x32xbf16>
    %67 = vector.shape_cast %66 : vector<16x16x32xbf16> to vector<256x32xbf16>
    %c2_86 = arith.constant 2 : index
    %c0_87 = arith.constant 0 : index
    %c0_88 = arith.constant 0 : index
    %c0_89 = arith.constant 0 : index
    %68 = vector.load %arg3[%c2_86, %c0_87, %c0_88, %c0_89] : memref<3x3x32x32xbf16, #tpu.memory_space<vmem>>, vector<1x1x32x32xbf16>
    %69 = vector.shape_cast %68 : vector<1x1x32x32xbf16> to vector<32x32xbf16>
    %cst_90 = arith.constant dense<0.000000e+00> : vector<256x32xf32>
    %70 = tpu.matmul %67, %69, %cst_90 {dimension_numbers = #tpu.dot_dimension_numbers<[1], [0], [0], [1], [0, 0, 1, 1], [], []>} : vector<256x32xbf16>, vector<32x32xbf16>, vector<256x32xf32> -> vector<256x32xf32>
    %c0_91 = arith.constant 0 : index
    %c0_92 = arith.constant 0 : index
    %71 = vector.load %arg16[%c0_91, %c0_92] : memref<256x32xf32, #tpu.memory_space<vmem>>, vector<256x32xf32>
    %72 = arith.addf %71, %70 : vector<256x32xf32>
    %c0_93 = arith.constant 0 : index
    %c0_94 = arith.constant 0 : index
    %73 = vector.load %arg16[%c0_93, %c0_94] : memref<256x32xf32, #tpu.memory_space<vmem>>, vector<256x32xf32>
    tpu.vector_store %arg16[%c0_93, %c0_94], %72 {strides = array<i32>} : memref<256x32xf32, #tpu.memory_space<vmem>>, vector<256x32xf32>,
    %c2_95 = arith.constant 2 : index
    %c1_96 = arith.constant 1 : index
    %c0_97 = arith.constant 0 : index
    %74 = vector.load %arg15[%c2_95, %c1_96, %c0_97] : memref<18x18x32xbf16, #tpu.memory_space<vmem>>, vector<16x16x32xbf16>
    %75 = vector.shape_cast %74 : vector<16x16x32xbf16> to vector<256x32xbf16>
    %c2_98 = arith.constant 2 : index
    %c1_99 = arith.constant 1 : index
    %c0_100 = arith.constant 0 : index
    %c0_101 = arith.constant 0 : index
    %76 = vector.load %arg3[%c2_98, %c1_99, %c0_100, %c0_101] : memref<3x3x32x32xbf16, #tpu.memory_space<vmem>>, vector<1x1x32x32xbf16>
    %77 = vector.shape_cast %76 : vector<1x1x32x32xbf16> to vector<32x32xbf16>
    %cst_102 = arith.constant dense<0.000000e+00> : vector<256x32xf32>
    %78 = tpu.matmul %75, %77, %cst_102 {dimension_numbers = #tpu.dot_dimension_numbers<[1], [0], [0], [1], [0, 0, 1, 1], [], []>} : vector<256x32xbf16>, vector<32x32xbf16>, vector<256x32xf32> -> vector<256x32xf32>
    %c0_103 = arith.constant 0 : index
    %c0_104 = arith.constant 0 : index
    %79 = vector.load %arg16[%c0_103, %c0_104] : memref<256x32xf32, #tpu.memory_space<vmem>>, vector<256x32xf32>
    %80 = arith.addf %79, %78 : vector<256x32xf32>
    %c0_105 = arith.constant 0 : index
    %c0_106 = arith.constant 0 : index
    %81 = vector.load %arg16[%c0_105, %c0_106] : memref<256x32xf32, #tpu.memory_space<vmem>>, vector<256x32xf32>
    tpu.vector_store %arg16[%c0_105, %c0_106], %80 {strides = array<i32>} : memref<256x32xf32, #tpu.memory_space<vmem>>, vector<256x32xf32>,
    %c2_107 = arith.constant 2 : index
    %c2_108 = arith.constant 2 : index
    %c0_109 = arith.constant 0 : index
    %82 = vector.load %arg15[%c2_107, %c2_108, %c0_109] : memref<18x18x32xbf16, #tpu.memory_space<vmem>>, vector<16x16x32xbf16>
    %83 = vector.shape_cast %82 : vector<16x16x32xbf16> to vector<256x32xbf16>
    %c2_110 = arith.constant 2 : index
    %c2_111 = arith.constant 2 : index
    %c0_112 = arith.constant 0 : index
    %c0_113 = arith.constant 0 : index
    %84 = vector.load %arg3[%c2_110, %c2_111, %c0_112, %c0_113] : memref<3x3x32x32xbf16, #tpu.memory_space<vmem>>, vector<1x1x32x32xbf16>
    %85 = vector.shape_cast %84 : vector<1x1x32x32xbf16> to vector<32x32xbf16>
    %cst_114 = arith.constant dense<0.000000e+00> : vector<256x32xf32>
    %86 = tpu.matmul %83, %85, %cst_114 {dimension_numbers = #tpu.dot_dimension_numbers<[1], [0], [0], [1], [0, 0, 1, 1], [], []>} : vector<256x32xbf16>, vector<32x32xbf16>, vector<256x32xf32> -> vector<256x32xf32>
    %c0_115 = arith.constant 0 : index
    %c0_116 = arith.constant 0 : index
    %87 = vector.load %arg16[%c0_115, %c0_116] : memref<256x32xf32, #tpu.memory_space<vmem>>, vector<256x32xf32>
    %88 = arith.addf %87, %86 : vector<256x32xf32>
    %c0_117 = arith.constant 0 : index
    %c0_118 = arith.constant 0 : index
    %89 = vector.load %arg16[%c0_117, %c0_118] : memref<256x32xf32, #tpu.memory_space<vmem>>, vector<256x32xf32>
    tpu.vector_store %arg16[%c0_117, %c0_118], %88 {strides = array<i32>} : memref<256x32xf32, #tpu.memory_space<vmem>>, vector<256x32xf32>,
    %c0_119 = arith.constant 0 : index
    %c0_120 = arith.constant 0 : index
    %90 = vector.load %arg16[%c0_119, %c0_120] : memref<256x32xf32, #tpu.memory_space<vmem>>, vector<256x32xf32>
    %c0_121 = arith.constant 0 : index
    %c0_122 = arith.constant 0 : index
    %91 = vector.load %arg7[%c0_121, %c0_122] : memref<1x32xf32, #tpu.memory_space<vmem>>, vector<1x32xf32>
    %92 = vector.broadcast %91 : vector<1x32xf32> to vector<256x32xf32>
    %93 = arith.mulf %90, %92 : vector<256x32xf32>
    %c0_123 = arith.constant 0 : index
    %c0_124 = arith.constant 0 : index
    %94 = vector.load %arg8[%c0_123, %c0_124] : memref<1x32xf32, #tpu.memory_space<vmem>>, vector<1x32xf32>
    %95 = vector.broadcast %94 : vector<1x32xf32> to vector<256x32xf32>
    %96 = arith.addf %93, %95 : vector<256x32xf32>
    %cst_125 = arith.constant 0.000000e+00 : f32
    %97 = vector.broadcast %cst_125 : f32 to vector<256x32xf32>
    %98 = arith.maximumf %96, %97 : vector<256x32xf32>
    %99 = arith.truncf %98 : vector<256x32xf32> to vector<256x32xbf16>
    %c0_126 = arith.constant 0 : index
    %c0_127 = arith.constant 0 : index
    %100 = vector.load %arg4[%c0_126, %c0_127] : memref<32x128xbf16, #tpu.memory_space<vmem>>, vector<32x128xbf16>
    %cst_128 = arith.constant dense<0.000000e+00> : vector<256x128xf32>
    %101 = tpu.matmul %99, %100, %cst_128 {dimension_numbers = #tpu.dot_dimension_numbers<[1], [0], [0], [1], [0, 0, 1, 1], [], []>} : vector<256x32xbf16>, vector<32x128xbf16>, vector<256x128xf32> -> vector<256x128xf32>
    %c0_129 = arith.constant 0 : index
    %c0_130 = arith.constant 0 : index
    %102 = vector.load %arg9[%c0_129, %c0_130] : memref<1x128xf32, #tpu.memory_space<vmem>>, vector<1x128xf32>
    %103 = vector.broadcast %102 : vector<1x128xf32> to vector<256x128xf32>
    %104 = arith.mulf %101, %103 : vector<256x128xf32>
    %c0_131 = arith.constant 0 : index
    %c0_132 = arith.constant 0 : index
    %105 = vector.load %arg10[%c0_131, %c0_132] : memref<1x128xf32, #tpu.memory_space<vmem>>, vector<1x128xf32>
    %106 = vector.broadcast %105 : vector<1x128xf32> to vector<256x128xf32>
    %107 = arith.addf %104, %106 : vector<256x128xf32>
    %c0_133 = arith.constant 0 : index
    %c0_134 = arith.constant 0 : index
    %108 = vector.load %arg11[%c0_133, %c0_134] : memref<64x128xbf16, #tpu.memory_space<vmem>>, vector<64x128xbf16>
    %cst_135 = arith.constant dense<0.000000e+00> : vector<256x128xf32>
    %109 = tpu.matmul %2, %108, %cst_135 {dimension_numbers = #tpu.dot_dimension_numbers<[1], [0], [0], [1], [0, 0, 1, 1], [], []>} : vector<256x64xbf16>, vector<64x128xbf16>, vector<256x128xf32> -> vector<256x128xf32>
    %c0_136 = arith.constant 0 : index
    %c0_137 = arith.constant 0 : index
    %110 = vector.load %arg12[%c0_136, %c0_137] : memref<1x128xf32, #tpu.memory_space<vmem>>, vector<1x128xf32>
    %111 = vector.broadcast %110 : vector<1x128xf32> to vector<256x128xf32>
    %112 = arith.mulf %109, %111 : vector<256x128xf32>
    %c0_138 = arith.constant 0 : index
    %c0_139 = arith.constant 0 : index
    %113 = vector.load %arg13[%c0_138, %c0_139] : memref<1x128xf32, #tpu.memory_space<vmem>>, vector<1x128xf32>
    %114 = vector.broadcast %113 : vector<1x128xf32> to vector<256x128xf32>
    %115 = arith.addf %112, %114 : vector<256x128xf32>
    %116 = arith.addf %107, %115 : vector<256x128xf32>
    %cst_140 = arith.constant 0.000000e+00 : f32
    %117 = vector.broadcast %cst_140 : f32 to vector<256x128xf32>
    %118 = arith.maximumf %116, %117 : vector<256x128xf32>
    %119 = vector.shape_cast %118 : vector<256x128xf32> to vector<1x256x128xf32>
    %c0_141 = arith.constant 0 : index
    %c0_142 = arith.constant 0 : index
    %c0_143 = arith.constant 0 : index
    %120 = vector.load %arg14[%c0_141, %c0_142, %c0_143] : memref<1x256x128xf32, #tpu.memory_space<vmem>>, vector<1x256x128xf32>
    tpu.vector_store %arg14[%c0_141, %c0_142, %c0_143], %119 {strides = array<i32>} : memref<1x256x128xf32, #tpu.memory_space<vmem>>, vector<1x256x128xf32>,
    return
  }
  func.func @transform_0(%arg0: i32) -> (i32, i32, i32, i32) {
    %c0_i32 = arith.constant 0 : i32
    %c0_i32_0 = arith.constant 0 : i32
    %c0_i32_1 = arith.constant 0 : i32
    %c0_i32_2 = arith.constant 0 : i32
    return %arg0, %c0_i32, %c0_i32_0, %c0_i32_1 : i32, i32, i32, i32
  }
  func.func @transform_1(%arg0: i32) -> (i32, i32) {
    %c0_i32 = arith.constant 0 : i32
    %c0_i32_0 = arith.constant 0 : i32
    %c0_i32_1 = arith.constant 0 : i32
    return %c0_i32, %c0_i32_0 : i32, i32
  }
  func.func @transform_2(%arg0: i32) -> (i32, i32, i32, i32) {
    %c0_i32 = arith.constant 0 : i32
    %c0_i32_0 = arith.constant 0 : i32
    %c0_i32_1 = arith.constant 0 : i32
    %c0_i32_2 = arith.constant 0 : i32
    %c0_i32_3 = arith.constant 0 : i32
    return %c0_i32, %c0_i32_0, %c0_i32_1, %c0_i32_2 : i32, i32, i32, i32
  }
  func.func @transform_3(%arg0: i32) -> (i32, i32) {
    %c0_i32 = arith.constant 0 : i32
    %c0_i32_0 = arith.constant 0 : i32
    %c0_i32_1 = arith.constant 0 : i32
    return %c0_i32, %c0_i32_0 : i32, i32
  }
  func.func @transform_4(%arg0: i32) -> (i32, i32) {
    %c0_i32 = arith.constant 0 : i32
    %c0_i32_0 = arith.constant 0 : i32
    %c0_i32_1 = arith.constant 0 : i32
    return %c0_i32, %c0_i32_0 : i32, i32
  }
  func.func @transform_5(%arg0: i32) -> (i32, i32) {
    %c0_i32 = arith.constant 0 : i32
    %c0_i32_0 = arith.constant 0 : i32
    %c0_i32_1 = arith.constant 0 : i32
    return %c0_i32, %c0_i32_0 : i32, i32
  }
  func.func @transform_6(%arg0: i32) -> (i32, i32) {
    %c0_i32 = arith.constant 0 : i32
    %c0_i32_0 = arith.constant 0 : i32
    %c0_i32_1 = arith.constant 0 : i32
    return %c0_i32, %c0_i32_0 : i32, i32
  }
  func.func @transform_7(%arg0: i32) -> (i32, i32) {
    %c0_i32 = arith.constant 0 : i32
    %c0_i32_0 = arith.constant 0 : i32
    %c0_i32_1 = arith.constant 0 : i32
    return %c0_i32, %c0_i32_0 : i32, i32
  }
  func.func @transform_8(%arg0: i32) -> (i32, i32) {
    %c0_i32 = arith.constant 0 : i32
    %c0_i32_0 = arith.constant 0 : i32
    %c0_i32_1 = arith.constant 0 : i32
    return %c0_i32, %c0_i32_0 : i32, i32
  }
  func.func @transform_9(%arg0: i32) -> (i32, i32) {
    %c0_i32 = arith.constant 0 : i32
    %c0_i32_0 = arith.constant 0 : i32
    %c0_i32_1 = arith.constant 0 : i32
    return %c0_i32, %c0_i32_0 : i32, i32
  }
  func.func @transform_10(%arg0: i32) -> (i32, i32) {
    %c0_i32 = arith.constant 0 : i32
    %c0_i32_0 = arith.constant 0 : i32
    %c0_i32_1 = arith.constant 0 : i32
    return %c0_i32, %c0_i32_0 : i32, i32
  }
  func.func @transform_11(%arg0: i32) -> (i32, i32) {
    %c0_i32 = arith.constant 0 : i32
    %c0_i32_0 = arith.constant 0 : i32
    %c0_i32_1 = arith.constant 0 : i32
    return %c0_i32, %c0_i32_0 : i32, i32
  }
  func.func @transform_12(%arg0: i32) -> (i32, i32) {
    %c0_i32 = arith.constant 0 : i32
    %c0_i32_0 = arith.constant 0 : i32
    %c0_i32_1 = arith.constant 0 : i32
    return %c0_i32, %c0_i32_0 : i32, i32
  }
  func.func @transform_13(%arg0: i32) -> (i32, i32, i32) {
    %c0_i32 = arith.constant 0 : i32
    %c0_i32_0 = arith.constant 0 : i32
    %c0_i32_1 = arith.constant 0 : i32
    return %arg0, %c0_i32, %c0_i32_0 : i32, i32, i32
  }
}

</mosaic_0001>

<bundles_post_ra>
// kernel: tpu_custom_call.1
= control target key start
LH: loop header
LB: loop body
LE: loop exit
PB: predicated region body
PF: predicated region fallthrough
CT: control target
= control target key end

     0   :  { %s12015_s0 = inlined_call_operand.hbm [shape: bf16[2,16,16,64], index: 0, kind: input, shape index: {}]   ;;  %s12016_s1 = inlined_call_operand.vmem [shape: bf16[64,32], index: 1, kind: input, shape index: {}]   ;;  %s12017_s2 = inlined_call_operand.hbm [shape: bf16[3,3,32,32], index: 2, kind: input, shape index: {}]   ;;  %s12018_s3 = inlined_call_operand.vmem [shape: bf16[32,128], index: 3, kind: input, shape index: {}]   ;;  %s12019_s4 = inlined_call_operand.vmem [shape: f32[1,32], index: 4, kind: input, shape index: {}]   ;;  %s12020_s5 = inlined_call_operand.vmem [shape: f32[1,32], index: 5, kind: input, shape index: {}]   ;;  %s12021_s6 = inlined_call_operand.vmem [shape: f32[1,32], index: 6, kind: input, shape index: {}]   ;;  %s12022_s7 = inlined_call_operand.vmem [shape: f32[1,32], index: 7, kind: input, shape index: {}]   ;;  %s12023_s8 = inlined_call_operand.vmem [shape: f32[1,128], index: 8, kind: input, shape index: {}]   ;;  %s12024_s9 = inlined_call_operand.vmem [shape: f32[1,128], index: 9, kind: input, shape index: {}]   ;;  %s12025_s10 = inlined_call_operand.vmem [shape: bf16[64,128], index: 10, kind: input, shape index: {}]   ;;  %s12026_s11 = inlined_call_operand.vmem [shape: f32[1,128], index: 11, kind: input, shape index: {}]   ;;  %s12027_s12 = inlined_call_operand.vmem [shape: f32[1,128], index: 12, kind: input, shape index: {}]   ;;  %s12028_s13 = inlined_call_operand.hbm [shape: f32[2,256,128], index: 13, kind: output, shape index: {}]  }
   0x1   :  { %12039 = sst [smem:[#allocation44_spill]] %s12023_s8 }
   0x2   :  { %12040 = sst [smem:[#allocation45_spill]] %s12024_s9 }
   0x3   :  { %12041 = sst [smem:[#allocation46_spill]] %s12028_s13 }
   0x4   :  { %18 = vsyncpa [#allocation5], 0 }
   0x5   :  { %20 = vsyncpa [#allocation5 + $0x1], 0 }
   0x6   :  { %21 = vsyncpa [#allocation8], 0 }
   0x7   :  { %22 = vsyncpa [#allocation6], 0 }
   0x8   :  { %24 = vsyncpa [#allocation6 + $0x1], 0  ;;  %s9244_s25 = smov 0   ;;  %s9246_s26 = smov 0  }
   0x9   :  { %s9248_s27 = smov 0   ;;  %s9250_s28 = smov 0  }
   0xa LB: > { %12042 = sst [smem:[#allocation13_spill]] %s9152_s25  ;;  %s9265_s29 = sadd.s32 4294967295, %s9164_s28   ;;  %s9164_s28 = sphi %s9250_s28, %s12174_s28   ;;  %s9160_s27 = sphi %s9248_s27, %s12177_s27   ;;  %s9156_s26 = sphi %s9246_s26, %s12176_s26   ;;  %s9152_s25 = sphi %s9244_s25, %s12175_s25  }
   0xb   : > { %s7699_s30 = sadd.s32 4294967294, %s9164_s28   ;;  %p50_p0 = scmp.ne.s32.totalorder %s9156_s26, %s9152_s25 }
   0xc   : > { %p12034_p1 = scmp.eq.s32.totalorder %s9265_s29, 0  ;;  %p332_p3 = scmp.eq.s32.totalorder %s7699_s30, 1 }
   0xd   : > { %p7700_p5 = scmp.ge.s32.totalorder %s9164_s28, 1  ;;  %p339_p7 = scmp.lt.s32.totalorder %s9164_s28, 3 }
   0xe   : > { %p9274_p4 = por %p12034_p1, %p50_p0  ;;  %p9279_p6 = por %p332_p3, %p50_p0 }
   0xf   : > { %p9284_p8 = pnand %p7700_p5, %p339_p7  ;;  %s9166_s17 = smov [#allocation7]  }
  0x10   : > { %s12043_s14 = scalar_select %p9274_p4, 1, 0 }
  0x11   : > { %s12044_s15 = scalar_select %p9279_p6, 1, 0 }
  0x12   : > { %s12046_s16 = scalar_select %p9284_p8, 1, 0 }
  0x13   : > { %12045 = sst [smem:[#allocation14_spill]] %s12044_s15  ;;  %s354_s18 = sshll.u32 %s9166_s17, 4  ;;  %s9288_s18 = int_to_ptr.vmem [resolvable:$true] %s354_s18 }
  0x14   : > { %p8872_p9 = pneg %p9284_p8  ;;  %s9300_s20 = sadd.s32 1, %s9164_s28  }
  0x15   : > { %12048 = sst [smem:[#allocation15_spill]] %s9300_s20  ;;  %s37_s21 = sadd.s32 1, %s9160_s27 }
  0x16   : > { %p9295_p11 = pnand %p8872_p9, %p12034_p1  ;;  %s34_s22 = ssub.s32 %s9164_s28, %s9300_s20 }
  0x17   : > { %s9036_s30 = scalar_lea.hbm %s12017_s2, 2304 }
  0x18   : > { %p9037_p12 = scmp.ne.s32.totalorder %s12017_s2, %s9036_s30  ;;  %p9038_p13 = pneg %p9295_p11 }
  0x19   : > { %p9043_p5 = scmp.lt.u32.totalorder %s9036_s30, %s12017_s2 }
  0x1a   : > { %p9039_p0 = pnand %p9038_p13, %p9037_p12 }
  0x1c   : > { %p9040_p3 = pneg %p9039_p0 }
  0x1e   : > { %p9045_p7 = pnand %p9043_p5, %p9040_p3 }
  0x20   : > { %9048 = shalt.err (!%p9045_p7)
}
  0x21   : > { %s9049_s20 = scalar_lea.vmem %s9288_s18, 2304  ;;  %p9057_p2 = scmp.lt.s32.totalorder %s9288_s18, %s9288_s18 }
  0x22   : > { %p9050_p9 = scmp.ne.s32.totalorder %s9288_s18, %s9049_s20  ;;  %p9058_p6 = scmp.lt.s32.totalorder %s9049_s20, %s9049_s20 }
  0x24   : > { %p9052_p10 = pnand %p9050_p9, %p9038_p13  ;;  %p9059_p4 = por %p9058_p6, %p9057_p2 }
  0x26   : > { %p9053_p1 = pneg %p9052_p10 }
  0x28   : > { %p9060_p8 = pnand %p9059_p4, %p9053_p1 }
  0x2a   : > { %9063 = shalt.err (!%p9060_p8)
}
  0x2b   : > { %s12037_s15 = smov 64   ;;  %s9168_s13 = smov 4  }
  0x2c   : > { %8875 = dma.hbm_to_vmem [thread:$0]  (!%p9295_p11), %s12017_s2, 2304, %s9288_s18, [#allocation8], %s12037_s15, %s12037_s15, %s9168_s13  }
  0x2d   : > { %p35_p1 = scmp.eq.s32.totalorder %s34_s22, 0  ;;  %p44_p2 = scmp.ne.s32.totalorder %s9160_s27, %s9156_s26 }
  0x2e   : > { %p45_p4 = scmp.eq.s32.totalorder %s9164_s28, 0  ;;  %p8885_p6 = scmp.lt.s32.totalorder %s9164_s28, 2 }
  0x2f   : > { %s9334_s23 = scalar_select %p35_p1, %s9160_s27, %s37_s21  }
  0x30   : > { %p46_p8 = por %p45_p4, %p44_p2  ;;  %p12049_p10 = scmp.eq.s32.totalorder %s9265_s29, 1 }
  0x31   : > { %s398_s19 = sand.u32 1, %s9160_s27   ;;  %s8202_s30 = sshll.u32 %s9164_s28, 11 }
  0x32   : > { %p9338_p12 = por %p12049_p10, %p44_p2  ;;  %s7703_s17 = sshll.u32 %s398_s19, 7 }
  0x33   : > { %s9347_s25 = scalar_lea.hbm %s12015_s0, %s8202_s30  ;;  %s402_s18 = scalar_lea.vmem [#allocation4], %s7703_s17 }
  0x34   : > { %s409_s21 = sshll.u32 %s402_s18, 4  ;;  %p9349_p11 = pnand %p8885_p6, %p46_p8  ;;  %s9353_s21 = int_to_ptr.vmem [resolvable:$true] %s409_s21 }
  0x35   : > { %s9355_s20 = scalar_lea.sflag [#allocation5], %s398_s19  ;;  %s9064_s15 = scalar_lea.hbm %s9347_s25, 2048 }
  0x36   : > { %p9065_p13 = scmp.ne.s32.totalorder %s9347_s25, %s9064_s15  ;;  %p9066_p0 = pneg %p9349_p11 }
  0x37   : > { %s9069_s30 = scalar_lea.hbm %s12015_s0, 4096  ;;  %p9070_p7 = scmp.lt.u32.totalorder %s9347_s25, %s12015_s0 }
  0x38   : > { %p9067_p3 = pnand %p9066_p0, %p9065_p13  ;;  %p9071_p9 = scmp.lt.u32.totalorder %s9069_s30, %s9064_s15 }
  0x39   : > { %p9073_p2 = scmp.lt.u32.totalorder %s9064_s15, %s9347_s25 }
  0x3a   : > { %p9068_p5 = pneg %p9067_p3  ;;  %p9072_p1 = por %p9071_p9, %p9070_p7 }
  0x3c   : > { %p9074_p4 = por %p9073_p2, %p9072_p1 }
  0x3e   : > { %p9075_p6 = pnand %p9074_p4, %p9068_p5 }
  0x40   : > { %9078 = shalt.err (!%p9075_p6)
}
  0x41   : > { %s9079_s19 = scalar_lea.vmem %s9353_s21, 2048  ;;  %s9169_s8 = smov [#allocation4]  }
  0x42   : > { %p9080_p8 = scmp.ne.s32.totalorder %s9353_s21, %s9079_s19  ;;  %s9084_s9 = sshll.u32 %s9169_s8, 4  ;;  %s9085_s9 = int_to_ptr.vmem [resolvable:$false] %s9084_s9 }
  0x43   : > { %s9086_s17 = scalar_lea.vmem %s9085_s9, 4096  ;;  %p9087_p3 = scmp.lt.s32.totalorder %s9353_s21, %s9085_s9 }
  0x44   : > { %p9082_p10 = pnand %p9080_p8, %p9066_p0  ;;  %p9088_p7 = scmp.lt.s32.totalorder %s9086_s17, %s9079_s19 }
  0x46   : > { %p9083_p13 = pneg %p9082_p10  ;;  %p9089_p9 = por %p9088_p7, %p9087_p3 }
  0x48   : > { %p9090_p1 = pnand %p9089_p9, %p9083_p13 }
  0x4a   : > { %9093 = shalt.err (!%p9090_p1)
}
  0x4b   : > { %s12052_s15 = smov 64   ;;  %p12053_p0 = scmp.ne.s32.totalorder %s12046_s16, 0 }
  0x4c   : > { %8879 = dma.hbm_to_vmem [thread:$0]  (!%p9349_p11), %s9347_s25, 2048, %s9353_s21, %s9355_s20, %s12052_s15, %s12052_s15, %s9168_s13  }
  0x4d   : > { %421 = sbr.rel (%p12053_p0) target bundleno = 1233 (0x4d1), region = 72 }
  0x54   : > { %s9389_s30 = sand.u32 1, %s9156_s26   ;;  %p12054_p5 = scmp.ne.s32.totalorder %s12043_s14, 0 }
  0x55   : > { %s7707_s18 = sshll.u32 %s9389_s30, 7  ;;  %s424_s19 = scalar_lea.sflag [#allocation5], %s9389_s30 }
  0x56   : > { %s9393_s8 = scalar_lea.vmem [#allocation4], %s7707_s18 }
  0x57   : > { %9139 = dma.done.wait (%p12054_p5), %s424_s19, 2048  }
  0x58   : > { %9141 = vsyncadd (%p12054_p5), %s424_s19, 4294965248  ;;  %p12055_p11 = scmp.eq.s32.totalorder %s9265_s29, 0 }
  0x5a   : > { %9143 = dma.done.wait (%p12055_p11), [#allocation8], 2304   ;;  %p12056_p2 = pmov %p12055_p11 }
  0x5b   : > { %v8926_v0 = vld [vmem:[%s12016_s1] sm:$0xff]   ;;  %v8927_v1 = vld [vmem:[%s12016_s1 + $0x8] sm:$0xff]   ;;  %v8928_v2 = vld [vmem:[%s12016_s1 + $0x10] sm:$0xff]   ;;  %vm619_vm0 = vcmask 523264   ;;  %vm1108_vm1 = vcmask 1040384   ;;  %v9170_v20 = vmov 0  }
  0x5c   : > { %9145 = vsyncadd (%p12056_p2), [#allocation8], 4294964992  ;;  %8424 = vmatprep.subr.bf16.mxu0 %v8926_v0  ;;  %v8930_v3 = vld [vmem:[%s9393_s8] sm:$0xff]   ;;  %v8931_v5 = vld [vmem:[%s9393_s8 + $0x8] sm:$0xff]   ;;  %vm1109_vm2 = vsmask.f32 256 }
  0x5d   : > { %8425 = vmatpush3.bf16.msra.mxu0 %v8926_v0  ;;  %8432 = vmatprep.mubr.msk.bf16.mxu0 %vm619_vm0, %v8930_v3  ;;  %v8929_v4 = vld [vmem:[%s12016_s1 + $0x18] sm:$0xff]   ;;  %v8932_v6 = vld [vmem:[%s9393_s8 + $0x10] sm:$0xff]   ;;  %v8933_v7 = vld [vmem:[%s9393_s8 + $0x18] sm:$0xff]   ;;  %v958_v21 = vrot.slane %v9170_v20, 7  ;;  %vm1332_vm4 = vcmask 257024   ;;  %vm1335_vm5 = vcmask 253952  }
  0x5e   : > { %8426 = vmatprep.subr.bf16.mxu0 %v8927_v1  ;;  %v8934_v8 = vld [vmem:[%s9393_s8 + $0x20] sm:$0xff]   ;;  %v8935_v9 = vld [vmem:[%s9393_s8 + $0x28] sm:$0xff]   ;;  %v8936_v10 = vld [vmem:[%s9393_s8 + $0x30] sm:$0xff]   ;;  %vm1516_vm6 = vcmask 261120   ;;  %vm2659_vm7 = vcmask 1042432   ;;  %vm2660_vm8 = vcmask 1046532  }
  0x5f   : > { %v8937_v11 = vld [vmem:[%s9393_s8 + $0x38] sm:$0xff]   ;;  %v8938_v12 = vld [vmem:[%s9393_s8 + $0x40] sm:$0xff]   ;;  %v8939_v13 = vld [vmem:[%s9393_s8 + $0x48] sm:$0xff]   ;;  %vm1806_vm10 = vsmask.f32 3328  ;;  %s12167_s15 = sld [smem:[#allocation44_spill]] }
  0x60   : > { %v8940_v14 = vld [vmem:[%s9393_s8 + $0x50] sm:$0xff]   ;;  %v8941_v15 = vld [vmem:[%s9393_s8 + $0x58] sm:$0xff]   ;;  %v8942_v16 = vld [vmem:[%s9393_s8 + $0x60] sm:$0xff]   ;;  %vm1807_vm11 = vsmask.f32 7440  ;;  %s7709_s16 = sshll.u32 %s9389_s30, 8 }
  0x61   : > { %8427 = vmatpush3.bf16.msra.mxu0 %v8927_v1  ;;  %v8943_v17 = vld [vmem:[%s9393_s8 + $0x68] sm:$0xff]   ;;  %v8944_v18 = vld [vmem:[%s9393_s8 + $0x70] sm:$0xff]   ;;  %v8945_v19 = vld [vmem:[%s9393_s8 + $0x78] sm:$0xff]   ;;  %s11794_s13 = scalar_lea.vmem [#allocation9], %s7709_s16  ;;  %s8203_s25 = sshll.u32 %s9265_s29, 12 }
  0x62   : > { %8428 = vmatprep.subr.bf16.mxu0 %v8928_v2  ;;  %vm9447_vm3 = vmand %vm1108_vm1, %vm1109_vm2  ;;  %v8946_v27 = vld [vmem:[#allocation7] sm:$0xff]   ;;  %v8947_v29 = vld [vmem:[#allocation7 + $0x8] sm:$0xff]   ;;  %s7616_s21 = sshll.u32 %s11794_s13, 4  ;;  %s12169_s20 = sld [smem:[#allocation46_spill]]  ;;  %s11968_s21 = int_to_ptr.vmem [resolvable:$true] %s7616_s21 }
  0x63   : > { %v1111_v23 = vsel %vm9447_vm3, 0, %v958_v21  ;;  %v1128_v26 = vsel %vm9447_vm3, %v958_v21, 0  ;;  %8464 = vmatprep.subr.bf16.mxu1 %v8946_v27  ;;  %v8948_v30 = vld [vmem:[#allocation7 + $0x20] sm:$0xff]   ;;  %v8953_v34 = vld [vmem:[#allocation7 + $0x28] sm:$0xff]   ;;  %vm9462_vm9 = vmor %vm2659_vm7, %vm2660_vm8  ;;  %s7603_s29 = scalar_lea.sflag [#allocation6], %s9389_s30  ;;  %s9094_s17 = scalar_lea.vmem %s11968_s21, 4096 }
  0x64   : > { %v7748_v24 = vcombine.low %v1111_v23, %v1111_v23  ;;  %v7749_v25 = vcombine.high %v1111_v23, %v1111_v23  ;;  %v7750_v28 = vcombine.low %v1128_v26, %v1128_v26  ;;  %8465 = vmatpush3.bf16.msra.mxu1 %v8946_v27  ;;  %v9471_v44 = vld [vmem:[#allocation7 + $0x10] sm:$0xff]   ;;  %v9474_v45 = vld [vmem:[#allocation7 + $0x40] sm:$0xff]   ;;  %v9480_v46 = vld [vmem:[%s12019_s4] ss:$0 sm:$0xff]  ;;  %p9095_p4 = scmp.ne.s32.totalorder %s11968_s21, %s9094_s17 }
  0x65   : > { %8429 = vmatpush3.bf16.msra.mxu0 %v8928_v2  ;;  %8466 = vmatprep.subr.bf16.mxu1 %v8947_v29  ;;  %v9485_v48 = vld [vmem:[%s12020_s5] ss:$0 sm:$0xff]  ;;  %vm9607_vm12 = vmor %vm1806_vm10, %vm1807_vm11 }
  0x66   : > { %8430 = vmatprep.subr.bf16.mxu0 %v8929_v4  ;;  %1333 = vst.msk [vmem:[#allocation2] sm:$0xf] %vm1332_vm4, %v7748_v24  ;;  %1334 = vst.msk [vmem:[#allocation2 + $0x4] sm:$0xf] %vm1332_vm4, %v7749_v25  ;;  %p9096_p6 = pnand %p9095_p4, %p9338_p12 }
  0x67   : > { %1385 = vst.msk [vmem:[#allocation2 + $0xcc] sm:$0xf] %vm1332_vm4, %v7748_v24  ;;  %1386 = vst.msk [vmem:[#allocation2 + $0xd0] sm:$0xf] %vm1332_vm4, %v7749_v25 }
  0x68   : > { %1336 = vst.msk [vmem:[#allocation2 + $0x8] sm:$0x1] %vm1335_vm5, %v7750_v28  ;;  %1387 = vst.msk [vmem:[#allocation2 + $0xd4] sm:$0x1] %vm1335_vm5, %v7750_v28  ;;  %8467 = vmatpush3.bf16.msra.mxu1 %v8947_v29  ;;  %s11966_s9 = scalar_lea.hbm %s12169_s20, %s8203_s25  ;;  %p9097_p8 = pneg %p9096_p6 }
  0x69   : > { %8431 = vmatpush3.bf16.msra.mxu0 %v8929_v4  ;;  %8500 = vmatprep.subr.bf16.mxu1 %v9471_v44 }
  0x6a   : > { %8536 = vmatprep.subr.bf16.mxu0 %v8948_v30 }
  0x6c   : > { %8433 = vmatmul.mubr.msk.bf16.vlgmr.msra.gmra.mrb[0].mxu0 %vm619_vm0, %v8931_v5 }
  0x6d   : > { %8436 = vmatprep.mubr.msk.bf16.mxu0 %vm619_vm0, %v8932_v6  ;;  %v8949_v31 = vld [vmem:[#allocation2] sm:$0xff]   ;;  %8537 = vmatpush3.bf16.msra.mxu0 %v8948_v30 }
  0x6e   : > { %8468 = vmatprep.mubr.msk.bf16.mxu1 %vm1516_vm6, %v8949_v31  ;;  %v2564_v32 = vld [vmem:[#allocation2 + $0x4] sm:$0xf]  ;;  %v2563_v35 = vld [vmem:[#allocation2] sm:$0xe]  ;;  %8538 = vmatprep.subr.bf16.mxu0 %v8953_v34 }
  0x6f   : > { %v2664_v33 = vrot.slane %v2564_v32, 5  ;;  %v2565_v36 = vld [vmem:[#allocation2 + $0x8] sm:$0x1]  ;;  %v7867_v37 = vrot.slane %v2563_v35, 9  ;;  %v1758_v51 = vld [vmem:[#allocation2] sm:$0xf] }
  0x70   : > { %v2667_v39 = vrot.slane %v2565_v36, 5  ;;  %v1759_v54 = vld [vmem:[#allocation2 + $0x4] sm:$0xf]  ;;  %v1760_v60 = vld [vmem:[#allocation2 + $0x8] sm:$0x1]  ;;  %v1810_v61 = vshrl.u32 %v1758_v51, 16 }
  0x71   : > { %v2666_v38 = vrot.slane %v2664_v33, 4  ;;  %8539 = vmatpush3.bf16.msra.mxu0 %v8953_v34  ;;  %v2665_v41 = vsel %vm9462_vm9, %v7867_v37, %v2664_v33  ;;  %v1813_v62 = vshll.u32 %v1758_v51, 16  ;;  %v1819_v0 = vshll.u32 %v1759_v54, 16 }
  0x72   : > { %8608 = vmatprep.subr.bf16.mxu0 %v9474_v45  ;;  %v1823_v1 = vshrl.u32 %v1759_v54, 16  ;;  %v1829_v5 = vshll.u32 %v1760_v60, 16 }
  0x73   : > { %v2668_v42 = vsel %vm9462_vm9, %v2666_v38, %v2667_v39 }
  0x74   : > { %8437 = vmatmul.mubr.msk.bf16.gmra.mrb[4].mxu0 %vm619_vm0, %v8933_v7  ;;  %v7883_v43 = vcombine.low %v2665_v41, %v2668_v42  ;;  %v9501_v24 = vrot.slane %v1829_v5, 5 }
  0x75   : > { %8440 = vmatprep.mubr.msk.bf16.mxu0 %vm619_vm0, %v8934_v8 }
  0x7c   : > { %8441 = vmatmul.mubr.msk.bf16.gmra.mrb[8].mxu0 %vm619_vm0, %v8935_v9  ;;  %v1812_v9 = vrot.slane %v1810_v61, 4 }
  0x7d   : > { %8444 = vmatprep.mubr.msk.bf16.mxu0 %vm619_vm0, %v8936_v10  ;;  %v1815_v10 = vrot.slane %v1813_v62, 5 }
  0x7f   : > { %v1816_v28 = vor.u32 %v1815_v10, %v1812_v9 }
  0x84   : > { %8445 = vmatmul.mubr.msk.bf16.gmra.mrb[12].mxu0 %vm619_vm0, %v8937_v11 }
  0x85   : > { %8448 = vmatprep.mubr.msk.bf16.mxu0 %vm619_vm0, %v8938_v12 }
  0x8c   : > { %8449 = vmatmul.mubr.msk.bf16.gmra.mrb[16].mxu0 %vm619_vm0, %v8939_v13 }
  0x8d   : > { %8452 = vmatprep.mubr.msk.bf16.mxu0 %vm619_vm0, %v8940_v14  ;;  %v9496_v14 = vrot.slane %v1819_v0, 5 }
  0x94   : > { %8453 = vmatmul.mubr.msk.bf16.gmra.mrb[20].mxu0 %vm619_vm0, %v8941_v15  ;;  %v1825_v15 = vrot.slane %v1823_v1, 4  ;;  %v9519_v1 = vrot.slane %v1816_v28, 4 }
  0x95   : > { %8456 = vmatprep.mubr.msk.bf16.mxu0 %vm619_vm0, %v8942_v16 }
  0x96   : > { %v1826_v32 = vor.u32 %v1825_v15, %v9496_v14 }
  0x98   : > { %v9525_v5 = vrot.slane %v1826_v32, 4 }
  0x9c   : > { %8457 = vmatmul.mubr.msk.bf16.gmra.mrb[24].mxu0 %vm619_vm0, %v8943_v17 }
  0x9d   : > { %8460 = vmatprep.mubr.msk.bf16.mxu0 %vm619_vm0, %v8944_v18 }
  0xa4   : > { %8461 = vmatmul.mubr.msk.bf16.gmra.mrb[28].mxu0 %vm619_vm0, %v8945_v19 }
  0xa5   : > { %8540 = vmatprep.mubr.msk.bf16.mxu0 %vm1516_vm6, %v7883_v43 }
 0x13f   : > { %v8434_v47 = vpop.f32.mrb[0].mxu0 }
 0x140   : > { %v838_v49 = vmul.f32 %v8434_v47, %v9480_v46  ;;  %v702_v50 = vpop.f32.mrb[1].mxu0 }
 0x141   : > { %v836_v52 = vmul.f32 %v9480_v46, %v702_v50  ;;  %v8435_v53 = vpop.f32.mrb[2].mxu0 }
 0x142   : > { %v877_v55 = vadd.f32 %v9485_v48, %v838_v49  ;;  %v839_v56 = vmul.f32 %v8435_v53, %v9480_v46  ;;  %v705_v57 = vpop.f32.mrb[3].mxu0 }
 0x143   : > { %v875_v58 = vadd.f32 %v9485_v48, %v836_v52  ;;  %v837_v59 = vmul.f32 %v9480_v46, %v705_v57 }
 0x144   : > { %v878_v63 = vadd.f32 %v9485_v48, %v839_v56  ;;  %v909_v3 = vmax.f32 %v877_v55, 0.0 }
 0x145   : > { %v876_v2 = vadd.f32 %v9485_v48, %v837_v59  ;;  %v907_v6 = vmax.f32 %v875_v58, 0.0 }
 0x146   : > { %v910_v4 = vmax.f32 %v878_v63, 0.0 }
 0x147   : > { %v908_v7 = vmax.f32 %v876_v2, 0.0  ;;  %v8438_v8 = vpop.f32.mrb[4].mxu0 }
 0x148   : > { %v940_v11 = vpack.c.bf16 %v910_v4, %v909_v3  ;;  %v842_v12 = vmul.f32 %v8438_v8, %v9480_v46  ;;  %v718_v13 = vpop.f32.mrb[5].mxu0 }
 0x149   : > { %v939_v16 = vpack.c.bf16 %v908_v7, %v907_v6  ;;  %v840_v17 = vmul.f32 %v9480_v46, %v718_v13  ;;  %v8439_v18 = vpop.f32.mrb[6].mxu0 }
 0x14a   : > { %v970_v19 = vshrl.u32 %v940_v11, 16  ;;  %v881_v20 = vadd.f32 %v9485_v48, %v842_v12  ;;  %v843_v21 = vmul.f32 %v8439_v18, %v9480_v46  ;;  %v721_v23 = vpop.f32.mrb[7].mxu0  ;;  %v973_v30 = vshll.u32 %v940_v11, 16 }
 0x14b   : > { %v963_v25 = vshrl.u32 %v939_v16, 16  ;;  %v879_v26 = vadd.f32 %v9485_v48, %v840_v17  ;;  %v841_v27 = vmul.f32 %v9480_v46, %v721_v23  ;;  %v966_v34 = vshll.u32 %v939_v16, 16 }
 0x14c   : > { %v972_v29 = vrot.slane %v970_v19, 7  ;;  %v882_v31 = vadd.f32 %v9485_v48, %v843_v21  ;;  %v913_v35 = vmax.f32 %v881_v20, 0.0 }
 0x14d   : > { %v965_v33 = vrot.slane %v963_v25, 7  ;;  %v880_v36 = vadd.f32 %v9485_v48, %v841_v27  ;;  %v911_v39 = vmax.f32 %v879_v26, 0.0 }
 0x14e   : > { %v975_v37 = vor.u32 %v973_v30, %v972_v29  ;;  %v1130_v38 = vsel %vm9447_vm3, %v972_v29, 0  ;;  %v914_v41 = vmax.f32 %v882_v31, 0.0 }
 0x14f   : > { %v7756_v42 = vcombine.low %v1130_v38, %v1130_v38  ;;  %v968_v43 = vor.u32 %v966_v34, %v965_v33  ;;  %v1129_v47 = vsel %vm9447_vm3, %v965_v33, 0  ;;  %v912_v49 = vmax.f32 %v880_v36, 0.0  ;;  %v8442_v50 = vpop.f32.mrb[8].mxu0  ;;  %v8960_v36 = vld [vmem:[#allocation7 + $0x18] sm:$0xff]  }
 0x150   : > { %v1113_v51 = vsel %vm9447_vm3, 0, %v975_v37  ;;  %v7753_v52 = vcombine.low %v1129_v47, %v1129_v47  ;;  %v942_v53 = vpack.c.bf16 %v914_v41, %v913_v35  ;;  %v846_v54 = vmul.f32 %v8442_v50, %v9480_v46  ;;  %v734_v55 = vpop.f32.mrb[9].mxu0 }
 0x151   : > { %v7754_v56 = vcombine.low %v1113_v51, %v1113_v51  ;;  %v7755_v57 = vcombine.high %v1113_v51, %v1113_v51  ;;  %1342 = vst.msk [vmem:[#allocation2 + $0x20] sm:$0x1] %vm1335_vm5, %v7756_v42  ;;  %v1112_v58 = vsel %vm9447_vm3, 0, %v968_v43  ;;  %v941_v59 = vpack.c.bf16 %v912_v49, %v911_v39  ;;  %v8443_v60 = vpop.f32.mrb[10].mxu0 }
 0x152   : > { %v7751_v61 = vcombine.low %v1112_v58, %v1112_v58  ;;  %v7752_v62 = vcombine.high %v1112_v58, %v1112_v58  ;;  %1339 = vst.msk [vmem:[#allocation2 + $0x14] sm:$0x1] %vm1335_vm5, %v7753_v52  ;;  %v984_v63 = vshrl.u32 %v942_v53, 16  ;;  %v737_v0 = vpop.f32.mrb[11].mxu0  ;;  %v885_v3 = vadd.f32 %v9485_v48, %v846_v54 }
 0x153   : > { %1340 = vst.msk [vmem:[#allocation2 + $0x18] sm:$0xf] %vm1332_vm4, %v7754_v56  ;;  %1341 = vst.msk [vmem:[#allocation2 + $0x1c] sm:$0xf] %vm1332_vm4, %v7755_v57  ;;  %v977_v2 = vshrl.u32 %v941_v59, 16  ;;  %v844_v4 = vmul.f32 %v9480_v46, %v734_v55  ;;  %v987_v7 = vshll.u32 %v942_v53, 16  ;;  %v847_v8 = vmul.f32 %v8443_v60, %v9480_v46 }
 0x154   : > { %1337 = vst.msk [vmem:[#allocation2 + $0xc] sm:$0xf] %vm1332_vm4, %v7751_v61  ;;  %1338 = vst.msk [vmem:[#allocation2 + $0x10] sm:$0xf] %vm1332_vm4, %v7752_v62  ;;  %v986_v6 = vrot.slane %v984_v63, 7  ;;  %v845_v9 = vmul.f32 %v9480_v46, %v737_v0  ;;  %v980_v11 = vshll.u32 %v941_v59, 16 }
 0x155   : > { %v979_v10 = vrot.slane %v977_v2, 7  ;;  %v917_v12 = vmax.f32 %v885_v3, 0.0  ;;  %v883_v13 = vadd.f32 %v9485_v48, %v844_v4  ;;  %v886_v17 = vadd.f32 %v9485_v48, %v847_v8 }
 0x156   : > { %v989_v15 = vor.u32 %v987_v7, %v986_v6  ;;  %v1132_v16 = vsel %vm9447_vm3, %v986_v6, 0  ;;  %v884_v18 = vadd.f32 %v9485_v48, %v845_v9 }
 0x157   : > { %v7762_v19 = vcombine.low %v1132_v16, %v1132_v16  ;;  %v982_v20 = vor.u32 %v980_v11, %v979_v10  ;;  %v1131_v21 = vsel %vm9447_vm3, %v979_v10, 0  ;;  %v915_v23 = vmax.f32 %v883_v13, 0.0  ;;  %v8446_v25 = vpop.f32.mrb[12].mxu0  ;;  %v8969_v11 = vld [vmem:[#allocation7 + $0x30] sm:$0xff]  }
 0x158   : > { %v1115_v26 = vsel %vm9447_vm3, 0, %v989_v15  ;;  %v7759_v27 = vcombine.low %v1131_v21, %v1131_v21  ;;  %v918_v28 = vmax.f32 %v886_v17, 0.0  ;;  %v916_v29 = vmax.f32 %v884_v18, 0.0  ;;  %v750_v30 = vpop.f32.mrb[13].mxu0 }
 0x159   : > { %v7760_v31 = vcombine.low %v1115_v26, %v1115_v26  ;;  %v7761_v32 = vcombine.high %v1115_v26, %v1115_v26  ;;  %1348 = vst.msk [vmem:[#allocation2 + $0x38] sm:$0x1] %vm1335_vm5, %v7762_v19  ;;  %v1114_v33 = vsel %vm9447_vm3, 0, %v982_v20  ;;  %v850_v34 = vmul.f32 %v8446_v25, %v9480_v46  ;;  %v8447_v35 = vpop.f32.mrb[14].mxu0  ;;  %v9545_v47 = vld [vmem:[#allocation2 + $0x14] sm:$0x1] }
 0x15a   : > { %v7757_v37 = vcombine.low %v1114_v33, %v1114_v33  ;;  %v7758_v38 = vcombine.high %v1114_v33, %v1114_v33  ;;  %1345 = vst.msk [vmem:[#allocation2 + $0x2c] sm:$0x1] %vm1335_vm5, %v7759_v27  ;;  %v944_v39 = vpack.c.bf16 %v918_v28, %v917_v12  ;;  %v943_v41 = vpack.c.bf16 %v916_v29, %v915_v23  ;;  %v753_v42 = vpop.f32.mrb[15].mxu0  ;;  %v8952_v43 = vld [vmem:[#allocation2 + $0x18] sm:$0xff]  }
 0x15b   : > { %1346 = vst.msk [vmem:[#allocation2 + $0x30] sm:$0xf] %vm1332_vm4, %v7760_v31  ;;  %1347 = vst.msk [vmem:[#allocation2 + $0x34] sm:$0xf] %vm1332_vm4, %v7761_v32  ;;  %v889_v49 = vadd.f32 %v9485_v48, %v850_v34  ;;  %v848_v50 = vmul.f32 %v9480_v46, %v750_v30  ;;  %v851_v51 = vmul.f32 %v8447_v35, %v9480_v46  ;;  %v8951_v53 = vld [vmem:[#allocation2 + $0xc] sm:$0xff]   ;;  %v2674_v10 = vrot.slane %v9545_v47, 5 }
 0x15c   : > { %v849_v52 = vmul.f32 %v9480_v46, %v753_v42  ;;  %1343 = vst.msk [vmem:[#allocation2 + $0x24] sm:$0xf] %vm1332_vm4, %v7757_v37  ;;  %1344 = vst.msk [vmem:[#allocation2 + $0x28] sm:$0xf] %vm1332_vm4, %v7758_v38  ;;  %v998_v54 = vshrl.u32 %v944_v39, 16  ;;  %v1001_v55 = vshll.u32 %v944_v39, 16  ;;  %8469 = vmatmul.mubr.msk.bf16.vlgmr.msra.gmra.mrb[0].mxu1 %vm1516_vm6, %v8951_v53 }
 0x15d   : > { %v991_v56 = vshrl.u32 %v943_v41, 16  ;;  %v994_v57 = vshll.u32 %v943_v41, 16  ;;  %v9555_v58 = vld [vmem:[#allocation2 + $0xc] sm:$0xe]  ;;  %v921_v59 = vmax.f32 %v889_v49, 0.0  ;;  %v887_v60 = vadd.f32 %v9485_v48, %v848_v50  ;;  %8501 = vmatpush3.bf16.msra.mxu1 %v9471_v44  ;;  %8472 = vmatprep.mubr.msk.bf16.mxu1 %vm1516_vm6, %v8952_v43  ;;  %v8970_v47 = vld [vmem:[#allocation7 + $0x48] sm:$0xff]  }
 0x15e   : > { %v890_v61 = vadd.f32 %v9485_v48, %v851_v51  ;;  %v888_v62 = vadd.f32 %v9485_v48, %v849_v52  ;;  %v2567_v63 = vld [vmem:[#allocation2 + $0x10] sm:$0xf]  ;;  %v1000_v0 = vrot.slane %v998_v54, 7  ;;  %v7868_v3 = vrot.slane %v9555_v58, 9  ;;  %8502 = vmatprep.subr.bf16.mxu1 %v8960_v36 }
 0x15f   : > { %v993_v2 = vrot.slane %v991_v56, 7  ;;  %v2671_v4 = vrot.slane %v2567_v63, 5  ;;  %v919_v6 = vmax.f32 %v887_v60, 0.0  ;;  %v8450_v9 = vpop.f32.mrb[16].mxu0 }
 0x160   : > { %v922_v7 = vmax.f32 %v890_v61, 0.0  ;;  %v920_v8 = vmax.f32 %v888_v62, 0.0  ;;  %v1003_v12 = vor.u32 %v1001_v55, %v1000_v0  ;;  %v1134_v13 = vsel %vm9447_vm3, %v1000_v0, 0  ;;  %v766_v16 = vpop.f32.mrb[17].mxu0 }
 0x161   : > { %v996_v15 = vor.u32 %v994_v57, %v993_v2  ;;  %v1133_v44 = vsel %vm9447_vm3, %v993_v2, 0  ;;  %v7768_v17 = vcombine.low %v1134_v13, %v1134_v13  ;;  %v8451_v21 = vpop.f32.mrb[18].mxu0  ;;  %v854_v26 = vmul.f32 %v8450_v9, %v9480_v46  ;;  %8503 = vmatpush3.bf16.msra.mxu1 %v8960_v36  ;;  %v2569_v57 = vld [vmem:[#allocation2 + $0x18] sm:$0xe] }
 0x162   : > { %v7765_v18 = vcombine.low %v1133_v44, %v1133_v44  ;;  %v946_v19 = vpack.c.bf16 %v922_v7, %v921_v59  ;;  %v945_v20 = vpack.c.bf16 %v920_v8, %v919_v6  ;;  %v1117_v23 = vsel %vm9447_vm3, 0, %v1003_v12  ;;  %v769_v28 = vpop.f32.mrb[19].mxu0  ;;  %v8955_v29 = vld [vmem:[#allocation2 + $0x30] sm:$0xff]   ;;  %8572 = vmatprep.subr.bf16.mxu1 %v8969_v11  ;;  %v2570_v6 = vld [vmem:[#allocation2 + $0x1c] sm:$0xf] }
 0x163   : > { %v1116_v25 = vsel %vm9447_vm3, 0, %v996_v15  ;;  %v852_v27 = vmul.f32 %v9480_v46, %v766_v16  ;;  %v7766_v30 = vcombine.low %v1117_v23, %v1117_v23  ;;  %v7767_v31 = vcombine.high %v1117_v23, %v1117_v23  ;;  %1354 = vst.msk [vmem:[#allocation2 + $0x50] sm:$0x1] %vm1335_vm5, %v7768_v17  ;;  %v8954_v34 = vld [vmem:[#allocation2 + $0x24] sm:$0xff]  }
 0x164   : > { %v7763_v32 = vcombine.low %v1116_v25, %v1116_v25  ;;  %v7764_v33 = vcombine.high %v1116_v25, %v1116_v25  ;;  %1351 = vst.msk [vmem:[#allocation2 + $0x44] sm:$0x1] %vm1335_vm5, %v7765_v18  ;;  %v1012_v35 = vshrl.u32 %v946_v19, 16  ;;  %v1015_v37 = vshll.u32 %v946_v19, 16  ;;  %8473 = vmatmul.mubr.msk.bf16.gmra.mrb[4].mxu1 %vm1516_vm6, %v8954_v34  ;;  %v2571_v18 = vld [vmem:[#allocation2 + $0x20] sm:$0x1] }
 0x165   : > { %v1005_v38 = vshrl.u32 %v945_v20, 16  ;;  %v1008_v39 = vshll.u32 %v945_v20, 16  ;;  %1352 = vst.msk [vmem:[#allocation2 + $0x48] sm:$0xf] %vm1332_vm4, %v7766_v30  ;;  %1353 = vst.msk [vmem:[#allocation2 + $0x4c] sm:$0xf] %vm1332_vm4, %v7767_v31  ;;  %v893_v36 = vadd.f32 %v9485_v48, %v854_v26  ;;  %v891_v41 = vadd.f32 %v9485_v48, %v852_v27  ;;  %8476 = vmatprep.mubr.msk.bf16.mxu1 %vm1516_vm6, %v8955_v29 }
 0x166   : > { %1349 = vst.msk [vmem:[#allocation2 + $0x3c] sm:$0xf] %vm1332_vm4, %v7763_v32  ;;  %1350 = vst.msk [vmem:[#allocation2 + $0x40] sm:$0xf] %vm1332_vm4, %v7764_v33  ;;  %v855_v42 = vmul.f32 %v8451_v21, %v9480_v46  ;;  %v853_v43 = vmul.f32 %v9480_v46, %v769_v28  ;;  %v1014_v49 = vrot.slane %v1012_v35, 7  ;;  %v2672_v51 = vsel %vm9462_vm9, %v7868_v3, %v2671_v4 }
 0x167   : > { %v1007_v50 = vrot.slane %v1005_v38, 7  ;;  %v2673_v52 = vrot.slane %v2671_v4, 4  ;;  %v925_v53 = vmax.f32 %v893_v36, 0.0  ;;  %v923_v54 = vmax.f32 %v891_v41, 0.0  ;;  %v8454_v58 = vpop.f32.mrb[20].mxu0 }
 0x168   : > { %v894_v55 = vadd.f32 %v9485_v48, %v855_v42  ;;  %v892_v56 = vadd.f32 %v9485_v48, %v853_v43  ;;  %v1017_v59 = vor.u32 %v1015_v37, %v1014_v49  ;;  %v1136_v60 = vsel %vm9447_vm3, %v1014_v49, 0  ;;  %v782_v63 = vpop.f32.mrb[21].mxu0  ;;  %v2572_v35 = vld [vmem:[#allocation2 + $0x24] sm:$0xe] }
 0x169   : > { %v1010_v61 = vor.u32 %v1008_v39, %v1007_v50  ;;  %v1135_v62 = vsel %vm9447_vm3, %v1007_v50, 0  ;;  %v7774_v0 = vcombine.low %v1136_v60, %v1136_v60  ;;  %v8455_v7 = vpop.f32.mrb[22].mxu0  ;;  %v2675_v11 = vsel %vm9462_vm9, %v2673_v52, %v2674_v10 }
 0x16a   : > { %v7771_v2 = vcombine.low %v1135_v62, %v1135_v62  ;;  %v926_v3 = vmax.f32 %v894_v55, 0.0  ;;  %v924_v4 = vmax.f32 %v892_v56, 0.0  ;;  %v1119_v8 = vsel %vm9447_vm3, 0, %v1017_v59  ;;  %v785_v13 = vpop.f32.mrb[23].mxu0  ;;  %v2573_v55 = vld [vmem:[#allocation2 + $0x28] sm:$0xf] }
 0x16b   : > { %v1118_v9 = vsel %vm9447_vm3, 0, %v1010_v61  ;;  %v7869_v12 = vrot.slane %v2569_v57, 9  ;;  %v7772_v15 = vcombine.low %v1119_v8, %v1119_v8  ;;  %v7773_v44 = vcombine.high %v1119_v8, %v1119_v8  ;;  %1360 = vst.msk [vmem:[#allocation2 + $0x68] sm:$0x1] %vm1335_vm5, %v7774_v0  ;;  %v2574_v61 = vld [vmem:[#allocation2 + $0x2c] sm:$0x1] }
 0x16c   : > { %v7769_v16 = vcombine.low %v1118_v9, %v1118_v9  ;;  %v7770_v17 = vcombine.high %v1118_v9, %v1118_v9  ;;  %1357 = vst.msk [vmem:[#allocation2 + $0x5c] sm:$0x1] %vm1335_vm5, %v7771_v2  ;;  %v948_v20 = vpack.c.bf16 %v926_v3, %v925_v53  ;;  %v947_v10 = vpack.c.bf16 %v924_v4, %v923_v54  ;;  %v8957_v29 = vld [vmem:[#allocation2 + $0x48] sm:$0xff]   ;;  %v2575_v4 = vld [vmem:[#allocation2 + $0x30] sm:$0xe] }
 0x16d   : > { %v7884_v21 = vcombine.low %v2672_v51, %v2675_v11  ;;  %v2678_v23 = vrot.slane %v2570_v6, 5  ;;  %v8956_v25 = vld [vmem:[#allocation2 + $0x3c] sm:$0xff]   ;;  %1358 = vst.msk [vmem:[#allocation2 + $0x60] sm:$0xf] %vm1332_vm4, %v7772_v15  ;;  %1359 = vst.msk [vmem:[#allocation2 + $0x64] sm:$0xf] %vm1332_vm4, %v7773_v44  ;;  %v858_v26 = vmul.f32 %v8454_v58, %v9480_v46  ;;  %v856_v27 = vmul.f32 %v9480_v46, %v782_v63 }
 0x16e   : > { %1355 = vst.msk [vmem:[#allocation2 + $0x54] sm:$0xf] %vm1332_vm4, %v7769_v16  ;;  %1356 = vst.msk [vmem:[#allocation2 + $0x58] sm:$0xf] %vm1332_vm4, %v7770_v17  ;;  %v859_v28 = vmul.f32 %v8455_v7, %v9480_v46  ;;  %v1822_v30 = vsel %vm9607_vm12, %v9519_v1, %v9496_v14  ;;  %v1026_v31 = vshrl.u32 %v948_v20, 16  ;;  %v1029_v32 = vshll.u32 %v948_v20, 16  ;;  %8477 = vmatmul.mubr.msk.bf16.gmra.mrb[8].mxu1 %vm1516_vm6, %v8956_v25 }
 0x16f   : > { %v1019_v33 = vshrl.u32 %v947_v10, 16  ;;  %8541 = vmatmul.mubr.msk.bf16.vlgmr.msra.gmra.mrb[32].mxu0 %vm1516_vm6, %v7884_v21  ;;  %v2681_v34 = vrot.slane %v2571_v18, 5  ;;  %v1022_v37 = vshll.u32 %v947_v10, 16  ;;  %v2679_v38 = vsel %vm9462_vm9, %v7869_v12, %v2678_v23  ;;  %v8458_v41 = vpop.f32.mrb[24].mxu0  ;;  %8480 = vmatprep.mubr.msk.bf16.mxu1 %vm1516_vm6, %v8957_v29  ;;  %v2576_v6 = vld [vmem:[#allocation2 + $0x34] sm:$0xf] }
 0x170   : > { %v2680_v39 = vrot.slane %v2678_v23, 4  ;;  %v897_v36 = vadd.f32 %v9485_v48, %v858_v26  ;;  %8609 = vmatpush3.bf16.msra.mxu0 %v9474_v45  ;;  %v1028_v42 = vrot.slane %v1026_v31, 7  ;;  %v898_v49 = vadd.f32 %v9485_v48, %v859_v28  ;;  %v798_v51 = vpop.f32.mrb[25].mxu0  ;;  %v2577_v7 = vld [vmem:[#allocation2 + $0x38] sm:$0x1] }
 0x171   : > { %v1021_v43 = vrot.slane %v1019_v33, 7  ;;  %v857_v50 = vmul.f32 %v9480_v46, %v785_v13  ;;  %8610 = vmatprep.subr.bf16.mxu0 %v8970_v47  ;;  %v895_v54 = vadd.f32 %v9485_v48, %v856_v27  ;;  %v7870_v56 = vrot.slane %v2572_v35, 9  ;;  %v8459_v57 = vpop.f32.mrb[26].mxu0 }
 0x172   : > { %v2682_v52 = vsel %vm9462_vm9, %v2680_v39, %v2681_v34  ;;  %v929_v53 = vmax.f32 %v897_v36, 0.0  ;;  %v1031_v58 = vor.u32 %v1029_v32, %v1028_v42  ;;  %v1138_v45 = vsel %vm9447_vm3, %v1028_v42, 0  ;;  %v9638_v62 = vpop.f32.mrb[27].mxu0 }
 0x173   : > { %v1024_v59 = vor.u32 %v1022_v37, %v1021_v43  ;;  %v1137_v60 = vsel %vm9447_vm3, %v1021_v43, 0  ;;  %v7780_v63 = vcombine.low %v1138_v45, %v1138_v45  ;;  %v7885_v2 = vcombine.low %v2679_v38, %v2682_v52 }
 0x174   : > { %v7777_v0 = vcombine.low %v1137_v60, %v1137_v60  ;;  %v930_v3 = vmax.f32 %v898_v49, 0.0  ;;  %8611 = vmatpush3.bf16.msra.mxu0 %v8970_v47  ;;  %v1121_v8 = vsel %vm9447_vm3, 0, %v1031_v58  ;;  %v896_v11 = vadd.f32 %v9485_v48, %v857_v50  ;;  %v8959_v21 = vld [vmem:[#allocation2 + $0x60] sm:$0xff]  }
 0x175   : > { %v1120_v9 = vsel %vm9447_vm3, 0, %v1024_v59  ;;  %v2685_v12 = vrot.slane %v2573_v55, 5  ;;  %v8958_v13 = vld [vmem:[#allocation2 + $0x54] sm:$0xff]   ;;  %v7778_v15 = vcombine.low %v1121_v8, %v1121_v8  ;;  %v7779_v44 = vcombine.high %v1121_v8, %v1121_v8  ;;  %1366 = vst.msk [vmem:[#allocation2 + $0x80] sm:$0x1] %vm1335_vm5, %v7780_v63  ;;  %8544 = vmatprep.mubr.msk.bf16.mxu0 %vm1516_vm6, %v7885_v2 }
 0x176   : > { %v7775_v16 = vcombine.low %v1120_v9, %v1120_v9  ;;  %v7776_v17 = vcombine.high %v1120_v9, %v1120_v9  ;;  %1363 = vst.msk [vmem:[#allocation2 + $0x74] sm:$0x1] %vm1335_vm5, %v7777_v0  ;;  %v927_v18 = vmax.f32 %v895_v54, 0.0  ;;  %v950_v47 = vpack.c.bf16 %v930_v3, %v929_v53  ;;  %8481 = vmatmul.mubr.msk.bf16.gmra.mrb[12].mxu1 %vm1516_vm6, %v8958_v13  ;;  %v2578_v59 = vld [vmem:[#allocation2 + $0x3c] sm:$0xe] }
 0x177   : > { %v928_v20 = vmax.f32 %v896_v11, 0.0  ;;  %v2687_v10 = vrot.slane %v2685_v12, 4  ;;  %1364 = vst.msk [vmem:[#allocation2 + $0x78] sm:$0xf] %vm1332_vm4, %v7778_v15  ;;  %1365 = vst.msk [vmem:[#allocation2 + $0x7c] sm:$0xf] %vm1332_vm4, %v7779_v44  ;;  %v2686_v23 = vsel %vm9462_vm9, %v7870_v56, %v2685_v12  ;;  %v862_v33 = vmul.f32 %v8458_v41, %v9480_v46  ;;  %8484 = vmatprep.mubr.msk.bf16.mxu1 %vm1516_vm6, %v8959_v21 }
 0x178   : > { %1361 = vst.msk [vmem:[#allocation2 + $0x6c] sm:$0xf] %vm1332_vm4, %v7775_v16  ;;  %1362 = vst.msk [vmem:[#allocation2 + $0x70] sm:$0xf] %vm1332_vm4, %v7776_v17  ;;  %v2688_v25 = vrot.slane %v2574_v61, 5  ;;  %v7871_v26 = vrot.slane %v2575_v4, 9  ;;  %v860_v39 = vmul.f32 %v9480_v46, %v798_v51  ;;  %v863_v55 = vmul.f32 %v8459_v57, %v9480_v46 }
 0x179   : > { %v2692_v27 = vrot.slane %v2576_v6, 5  ;;  %v9655_v28 = vpop.f32.mrb[28].mxu0  ;;  %v1040_v29 = vshrl.u32 %v950_v47, 16  ;;  %v949_v31 = vpack.c.bf16 %v928_v20, %v927_v18  ;;  %v2695_v32 = vrot.slane %v2577_v7, 5  ;;  %v2579_v2 = vld [vmem:[#allocation2 + $0x40] sm:$0xf] }
 0x17a   : > { %v9659_v34 = vpop.f32.mrb[29].mxu0  ;;  %v1043_v35 = vshll.u32 %v950_v47, 16  ;;  %v2689_v37 = vsel %vm9462_vm9, %v2687_v10, %v2688_v25  ;;  %v901_v54 = vadd.f32 %v9485_v48, %v862_v33  ;;  %v899_v63 = vadd.f32 %v9485_v48, %v860_v39  ;;  %v2580_v3 = vld [vmem:[#allocation2 + $0x44] sm:$0x1]  ;;  %v2581_v4 = vld [vmem:[#allocation2 + $0x48] sm:$0xe] }
 0x17b   : > { %v2694_v38 = vrot.slane %v2692_v27, 4  ;;  %v9664_v36 = vpop.f32.mrb[30].mxu0  ;;  %v1042_v42 = vrot.slane %v1040_v29, 7  ;;  %v1033_v43 = vshrl.u32 %v949_v31, 16  ;;  %v7886_v49 = vcombine.low %v2686_v23, %v2689_v37  ;;  %v2582_v47 = vld [vmem:[#allocation2 + $0x4c] sm:$0xf] }
 0x17c   : > { %v2693_v50 = vsel %vm9462_vm9, %v7871_v26, %v2692_v27  ;;  %v9668_v41 = vpop.f32.mrb[31].mxu0  ;;  %v1036_v52 = vshll.u32 %v949_v31, 16  ;;  %v933_v61 = vmax.f32 %v901_v54, 0.0  ;;  %v902_v0 = vadd.f32 %v9485_v48, %v863_v55  ;;  %v2583_v29 = vld [vmem:[#allocation2 + $0x50] sm:$0x1] }
 0x17d   : > { %v2696_v53 = vsel %vm9462_vm9, %v2694_v38, %v2695_v32  ;;  %v1045_v56 = vor.u32 %v1043_v35, %v1042_v42  ;;  %v1140_v51 = vsel %vm9447_vm3, %v1042_v42, 0  ;;  %v1035_v58 = vrot.slane %v1033_v43, 7  ;;  %8545 = vmatmul.mubr.msk.bf16.gmra.mrb[36].mxu0 %vm1516_vm6, %v7886_v49 }
 0x17e   : > { %v7887_v45 = vcombine.low %v2693_v50, %v2696_v53  ;;  %v7786_v60 = vcombine.low %v1140_v51, %v1140_v51  ;;  %v861_v8 = vmul.f32 %v9480_v46, %v9638_v62  ;;  %v934_v13 = vmax.f32 %v902_v0, 0.0  ;;  %v8962_v20 = vld [vmem:[#allocation2 + $0x78] sm:$0xff]  }
 0x17f   : > { %v1123_v57 = vsel %vm9447_vm3, 0, %v1045_v56  ;;  %v1038_v6 = vor.u32 %v1036_v52, %v1035_v58  ;;  %v1139_v7 = vsel %vm9447_vm3, %v1035_v58, 0  ;;  %v8961_v15 = vld [vmem:[#allocation2 + $0x6c] sm:$0xff]   ;;  %v7872_v17 = vrot.slane %v2578_v59, 9  ;;  %v2584_v59 = vld [vmem:[#allocation2 + $0x54] sm:$0xe] }
 0x180   : > { %8548 = vmatprep.mubr.msk.bf16.mxu0 %vm1516_vm6, %v7887_v45  ;;  %v7784_v9 = vcombine.low %v1123_v57, %v1123_v57  ;;  %v7785_v11 = vcombine.high %v1123_v57, %v1123_v57  ;;  %1372 = vst.msk [vmem:[#allocation2 + $0x98] sm:$0x1] %vm1335_vm5, %v7786_v60  ;;  %v7783_v12 = vcombine.low %v1139_v7, %v1139_v7  ;;  %v2699_v18 = vrot.slane %v2579_v2, 5  ;;  %v2586_v7 = vld [vmem:[#allocation2 + $0x5c] sm:$0x1] }
 0x181   : > { %v1122_v44 = vsel %vm9447_vm3, 0, %v1038_v6  ;;  %v900_v16 = vadd.f32 %v9485_v48, %v861_v8  ;;  %v931_v21 = vmax.f32 %v899_v63, 0.0  ;;  %v952_v23 = vpack.c.bf16 %v934_v13, %v933_v61  ;;  %8485 = vmatmul.mubr.msk.bf16.gmra.mrb[16].mxu1 %vm1516_vm6, %v8961_v15  ;;  %v2585_v6 = vld [vmem:[#allocation2 + $0x58] sm:$0xf]  ;;  %v2587_v8 = vld [vmem:[#allocation2 + $0x60] sm:$0xe] }
 0x182   : > { %1370 = vst.msk [vmem:[#allocation2 + $0x90] sm:$0xf] %vm1332_vm4, %v7784_v9  ;;  %1371 = vst.msk [vmem:[#allocation2 + $0x94] sm:$0xf] %vm1332_vm4, %v7785_v11  ;;  %v7781_v62 = vcombine.low %v1122_v44, %v1122_v44  ;;  %v7782_v10 = vcombine.high %v1122_v44, %v1122_v44  ;;  %v2701_v26 = vrot.slane %v2699_v18, 4  ;;  %v2702_v27 = vrot.slane %v2580_v3, 5  ;;  %8488 = vmatprep.mubr.msk.bf16.mxu1 %vm1516_vm6, %v8962_v20 }
 0x183   : > { %1369 = vst.msk [vmem:[#allocation2 + $0x8c] sm:$0x1] %vm1335_vm5, %v7783_v12  ;;  %v932_v25 = vmax.f32 %v900_v16, 0.0  ;;  %v7873_v31 = vrot.slane %v2581_v4, 9  ;;  %v1054_v32 = vshrl.u32 %v952_v23, 16  ;;  %v1057_v33 = vshll.u32 %v952_v23, 16 }
 0x184   : > { %1367 = vst.msk [vmem:[#allocation2 + $0x84] sm:$0xf] %vm1332_vm4, %v7781_v62  ;;  %1368 = vst.msk [vmem:[#allocation2 + $0x88] sm:$0xf] %vm1332_vm4, %v7782_v10  ;;  %v2700_v35 = vsel %vm9462_vm9, %v7872_v17, %v2699_v18  ;;  %v2706_v37 = vrot.slane %v2582_v47, 5  ;;  %v2703_v39 = vsel %vm9462_vm9, %v2701_v26, %v2702_v27  ;;  %v866_v42 = vmul.f32 %v9655_v28, %v9480_v46 }
 0x185   : > { %v951_v38 = vpack.c.bf16 %v932_v25, %v931_v21  ;;  %v864_v43 = vmul.f32 %v9480_v46, %v9659_v34  ;;  %v1056_v49 = vrot.slane %v1054_v32, 7  ;;  %v7888_v50 = vcombine.low %v2700_v35, %v2703_v39  ;;  %v2589_v62 = vld [vmem:[#allocation2 + $0x68] sm:$0x1]  ;;  %v2590_v26 = vld [vmem:[#allocation2 + $0x6c] sm:$0xe] }
 0x186   : > { %v2708_v52 = vrot.slane %v2706_v37, 4  ;;  %v2709_v53 = vrot.slane %v2583_v29, 5  ;;  %v2707_v56 = vsel %vm9462_vm9, %v7873_v31, %v2706_v37  ;;  %v905_v51 = vadd.f32 %v9485_v48, %v866_v42  ;;  %v2591_v27 = vld [vmem:[#allocation2 + $0x70] sm:$0xf]  ;;  %v2592_v42 = vld [vmem:[#allocation2 + $0x74] sm:$0x1] }
 0x187   : > { %v1047_v54 = vshrl.u32 %v951_v38, 16  ;;  %v1050_v55 = vshll.u32 %v951_v38, 16  ;;  %v1059_v58 = vor.u32 %v1057_v33, %v1056_v49  ;;  %v1142_v45 = vsel %vm9447_vm3, %v1056_v49, 0  ;;  %8549 = vmatmul.mubr.msk.bf16.gmra.mrb[40].mxu0 %vm1516_vm6, %v7888_v50 }
 0x188   : > { %v2710_v28 = vsel %vm9462_vm9, %v2708_v52, %v2709_v53  ;;  %v867_v34 = vmul.f32 %v9664_v36, %v9480_v46  ;;  %v7792_v60 = vcombine.low %v1142_v45, %v1142_v45  ;;  %v903_v0 = vadd.f32 %v9485_v48, %v864_v43 }
 0x189   : > { %v1049_v61 = vrot.slane %v1047_v54, 7  ;;  %v7889_v63 = vcombine.low %v2707_v56, %v2710_v28  ;;  %v1125_v2 = vsel %vm9447_vm3, 0, %v1059_v58  ;;  %v937_v3 = vmax.f32 %v905_v51, 0.0  ;;  %v2594_v51 = vld [vmem:[#allocation2 + $0x7c] sm:$0xf] }
 0x18a   : > { %v906_v4 = vadd.f32 %v9485_v48, %v867_v34  ;;  %v865_v57 = vmul.f32 %v9480_v46, %v9668_v41  ;;  %v7790_v9 = vcombine.low %v1125_v2, %v1125_v2  ;;  %v7791_v36 = vcombine.high %v1125_v2, %v1125_v2  ;;  %1378 = vst.msk [vmem:[#allocation2 + $0xb0] sm:$0x1] %vm1335_vm5, %v7792_v60  ;;  %v2588_v46 = vld [vmem:[#allocation2 + $0x64] sm:$0xf]  ;;  %v8964_v41 = vld [vmem:[#allocation2 + $0x90] sm:$0xff]  }
 0x18b   : > { %v1052_v11 = vor.u32 %v1050_v55, %v1049_v61  ;;  %v1141_v12 = vsel %vm9447_vm3, %v1049_v61, 0  ;;  %8552 = vmatprep.mubr.msk.bf16.mxu0 %vm1516_vm6, %v7889_v63  ;;  %v8963_v13 = vld [vmem:[#allocation2 + $0x84] sm:$0xff]   ;;  %v7874_v17 = vrot.slane %v2584_v59, 9  ;;  %v935_v47 = vmax.f32 %v903_v0, 0.0  ;;  %v2593_v59 = vld [vmem:[#allocation2 + $0x78] sm:$0xe] }
 0x18c   : > { %v7789_v15 = vcombine.low %v1141_v12, %v1141_v12  ;;  %v938_v44 = vmax.f32 %v906_v4, 0.0  ;;  %v904_v16 = vadd.f32 %v9485_v48, %v865_v57  ;;  %1376 = vst.msk [vmem:[#allocation2 + $0xa8] sm:$0xf] %vm1332_vm4, %v7790_v9  ;;  %1377 = vst.msk [vmem:[#allocation2 + $0xac] sm:$0xf] %vm1332_vm4, %v7791_v36  ;;  %v2713_v20 = vrot.slane %v2585_v6, 5  ;;  %8489 = vmatmul.mubr.msk.bf16.gmra.mrb[20].mxu1 %vm1516_vm6, %v8963_v13 }
 0x18d   : > { %v1124_v18 = vsel %vm9447_vm3, 0, %v1052_v11  ;;  %v7875_v10 = vrot.slane %v2587_v8, 9  ;;  %8492 = vmatprep.mubr.msk.bf16.mxu1 %vm1516_vm6, %v8964_v41  ;;  %v2716_v32 = vrot.slane %v2586_v7, 5  ;;  %v2720_v33 = vrot.slane %v2588_v46, 5  ;;  %v2595_v60 = vld [vmem:[#allocation2 + $0x80] sm:$0x1] }
 0x18e   : > { %v7787_v21 = vcombine.low %v1124_v18, %v1124_v18  ;;  %v7788_v23 = vcombine.high %v1124_v18, %v1124_v18  ;;  %1375 = vst.msk [vmem:[#allocation2 + $0xa4] sm:$0x1] %vm1335_vm5, %v7789_v15  ;;  %v954_v48 = vpack.c.bf16 %v938_v44, %v937_v3  ;;  %v936_v25 = vmax.f32 %v904_v16, 0.0  ;;  %v2596_v6 = vld [vmem:[#allocation2 + $0x84] sm:$0xe] }
 0x18f   : > { %v2714_v29 = vsel %vm9462_vm9, %v7874_v17, %v2713_v20  ;;  %v2715_v31 = vrot.slane %v2713_v20, 4  ;;  %v2723_v39 = vrot.slane %v2589_v62, 5  ;;  %v2722_v49 = vrot.slane %v2720_v33, 4  ;;  %v2597_v7 = vld [vmem:[#allocation2 + $0x88] sm:$0xf] }
 0x190   : > { %1373 = vst.msk [vmem:[#allocation2 + $0x9c] sm:$0xf] %vm1332_vm4, %v7787_v21  ;;  %1374 = vst.msk [vmem:[#allocation2 + $0xa0] sm:$0xf] %vm1332_vm4, %v7788_v23  ;;  %v1068_v35 = vshrl.u32 %v954_v48, 16  ;;  %v1071_v37 = vshll.u32 %v954_v48, 16  ;;  %v953_v38 = vpack.c.bf16 %v936_v25, %v935_v47  ;;  %v2721_v56 = vsel %vm9462_vm9, %v7875_v10, %v2720_v33 }
 0x191   : > { %v2717_v43 = vsel %vm9462_vm9, %v2715_v31, %v2716_v32  ;;  %v7876_v50 = vrot.slane %v2590_v26, 9  ;;  %v2727_v52 = vrot.slane %v2591_v27, 5  ;;  %v2724_v45 = vsel %vm9462_vm9, %v2722_v49, %v2723_v39  ;;  %v2598_v13 = vld [vmem:[#allocation2 + $0x8c] sm:$0x1]  ;;  %v9757_v15 = vld [vmem:[#allocation2 + $0x94] sm:$0xf] }
 0x192   : > { %v1070_v53 = vrot.slane %v1068_v35, 7  ;;  %v1061_v54 = vshrl.u32 %v953_v38, 16  ;;  %v7890_v55 = vcombine.low %v2714_v29, %v2717_v43  ;;  %v1064_v58 = vshll.u32 %v953_v38, 16  ;;  %v2599_v62 = vld [vmem:[#allocation2 + $0x90] sm:$0xe] }
 0x193   : > { %v2729_v28 = vrot.slane %v2727_v52, 4  ;;  %v2730_v34 = vrot.slane %v2592_v42, 5  ;;  %v7891_v2 = vcombine.low %v2721_v56, %v2724_v45  ;;  %v2734_v57 = vrot.slane %v2594_v51, 5  ;;  %v8966_v10 = vld [vmem:[#allocation2 + $0xa8] sm:$0xff]   ;;  %v2607_v22 = vld [vmem:[#allocation2 + $0xb0] sm:$0x1] }
 0x194   : > { %v1073_v61 = vor.u32 %v1071_v37, %v1070_v53  ;;  %v1144_v63 = vsel %vm9447_vm3, %v1070_v53, 0  ;;  %v1063_v0 = vrot.slane %v1061_v54, 7  ;;  %8553 = vmatmul.mubr.msk.bf16.gmra.mrb[44].mxu0 %vm1516_vm6, %v7890_v55  ;;  %v1832_v8 = vsel %vm9607_vm12, %v9525_v5, %v9501_v24  ;;  %v2601_v5 = vld [vmem:[#allocation2 + $0x98] sm:$0x1]  ;;  %v2606_v33 = vld [vmem:[#allocation2 + $0xac] sm:$0xf] }
 0x195   : > { %v7798_v3 = vcombine.low %v1144_v63, %v1144_v63  ;;  %v2731_v4 = vsel %vm9462_vm9, %v2729_v28, %v2730_v34  ;;  %8556 = vmatprep.mubr.msk.bf16.mxu0 %vm1516_vm6, %v7891_v2  ;;  %v7877_v12 = vrot.slane %v2593_v59, 9  ;;  %v2728_v24 = vsel %vm9462_vm9, %v7876_v50, %v2727_v52  ;;  %v2604_v39 = vld [vmem:[#allocation2 + $0xa4] sm:$0x1]  ;;  %v2605_v42 = vld [vmem:[#allocation2 + $0xa8] sm:$0xe] }
 0x196   : > { %v1127_v9 = vsel %vm9447_vm3, 0, %v1073_v61  ;;  %v1066_v36 = vor.u32 %v1064_v58, %v1063_v0  ;;  %v1143_v11 = vsel %vm9447_vm3, %v1063_v0, 0  ;;  %v7892_v18 = vcombine.low %v2728_v24, %v2731_v4  ;;  %v3579_v54 = vld [vmem:[#allocation2 + $0xc] sm:$0xf]  ;;  %v3580_v45 = vld [vmem:[#allocation2 + $0x10] sm:$0xf] }
 0x197   : > { %v7796_v44 = vcombine.low %v1127_v9, %v1127_v9  ;;  %v7797_v16 = vcombine.high %v1127_v9, %v1127_v9  ;;  %1384 = vst.msk [vmem:[#allocation2 + $0xc8] sm:$0x1] %vm1335_vm5, %v7798_v3  ;;  %v7795_v17 = vcombine.low %v1143_v11, %v1143_v11  ;;  %v8965_v46 = vld [vmem:[#allocation2 + $0x9c] sm:$0xff]   ;;  %v2736_v47 = vrot.slane %v2734_v57, 4  ;;  %v3581_v61 = vld [vmem:[#allocation2 + $0x14] sm:$0x1] }
 0x198   : > { %v1126_v41 = vsel %vm9447_vm3, 0, %v1066_v36  ;;  %v2737_v20 = vrot.slane %v2595_v60, 5  ;;  %v7878_v48 = vrot.slane %v2596_v6, 9  ;;  %v2741_v25 = vrot.slane %v2597_v7, 5  ;;  %8493 = vmatmul.mubr.msk.bf16.gmra.mrb[24].mxu1 %vm1516_vm6, %v8965_v46  ;;  %v2603_v26 = vld [vmem:[#allocation2 + $0xa0] sm:$0xf] }
 0x199   : > { %1382 = vst.msk [vmem:[#allocation2 + $0xc0] sm:$0xf] %vm1332_vm4, %v7796_v44  ;;  %1383 = vst.msk [vmem:[#allocation2 + $0xc4] sm:$0xf] %vm1332_vm4, %v7797_v16  ;;  %v7793_v21 = vcombine.low %v1126_v41, %v1126_v41  ;;  %v7794_v23 = vcombine.high %v1126_v41, %v1126_v41  ;;  %v2735_v27 = vsel %vm9462_vm9, %v7877_v12, %v2734_v57  ;;  %v2748_v31 = vrot.slane %v9757_v15, 5 }
 0x19a   : > { %1381 = vst.msk [vmem:[#allocation2 + $0xbc] sm:$0x1] %vm1335_vm5, %v7795_v17  ;;  %v2738_v29 = vsel %vm9462_vm9, %v2736_v47, %v2737_v20  ;;  %8496 = vmatprep.mubr.msk.bf16.mxu1 %vm1516_vm6, %v8966_v10  ;;  %v2602_v32 = vld [vmem:[#allocation2 + $0x9c] sm:$0xe]  ;;  %v2743_v37 = vrot.slane %v2741_v25, 4  ;;  %v2744_v38 = vrot.slane %v2598_v13, 5  ;;  %v7833_v43 = vcombine.low %v1822_v30, %v1832_v8 }
 0x19b   : > { %1379 = vst.msk [vmem:[#allocation2 + $0xb4] sm:$0xf] %vm1332_vm4, %v7793_v21  ;;  %1380 = vst.msk [vmem:[#allocation2 + $0xb8] sm:$0xf] %vm1332_vm4, %v7794_v23  ;;  %v7893_v35 = vcombine.low %v2735_v27, %v2738_v29  ;;  %v7879_v49 = vrot.slane %v2599_v62, 9  ;;  %v2750_v50 = vrot.slane %v2748_v31, 4  ;;  %v2742_v55 = vsel %vm9462_vm9, %v7878_v48, %v2741_v25 }
 0x19c   : > { %8557 = vmatmul.mubr.msk.bf16.gmra.mrb[48].mxu0 %vm1516_vm6, %v7892_v18  ;;  %v2751_v52 = vrot.slane %v2601_v5, 5  ;;  %v2755_v53 = vrot.slane %v2603_v26, 5  ;;  %v2745_v56 = vsel %vm9462_vm9, %v2743_v37, %v2744_v38  ;;  %v7880_v51 = vrot.slane %v2602_v32, 9  ;;  %v1761_v36 = vld [vmem:[#allocation2 + $0xc] sm:$0xf] }
 0x19d   : > { %8560 = vmatprep.mubr.msk.bf16.mxu0 %vm1516_vm6, %v7893_v35  ;;  %v2762_v58 = vrot.slane %v2606_v33, 5  ;;  %v2758_v1 = vrot.slane %v2604_v39, 5  ;;  %v7881_v30 = vrot.slane %v2605_v42, 9  ;;  %v2765_v28 = vrot.slane %v2607_v22, 5  ;;  %v1762_v11 = vld [vmem:[#allocation2 + $0x10] sm:$0xf] }
 0x19e   : > { %v2757_v14 = vrot.slane %v2755_v53, 4  ;;  %v7894_v34 = vcombine.low %v2742_v55, %v2745_v56  ;;  %v2752_v59 = vsel %vm9462_vm9, %v2750_v50, %v2751_v52  ;;  %v3628_v63 = vshrl.u32 %v3579_v54, 16  ;;  %v1763_v23 = vld [vmem:[#allocation2 + $0x14] sm:$0x1]  ;;  %v1764_v32 = vld [vmem:[#allocation2 + $0x18] sm:$0xf] }
 0x19f   : > { %v2764_v60 = vrot.slane %v2762_v58, 4  ;;  %v3631_v3 = vshll.u32 %v3579_v54, 16  ;;  %v3637_v4 = vshll.u32 %v3580_v45, 16  ;;  %v3641_v57 = vshrl.u32 %v3580_v45, 16  ;;  %v1765_v50 = vld [vmem:[#allocation2 + $0x1c] sm:$0xf] }
 0x1a0   : > { %v9791_v0 = vsel %vm9462_vm9, %v2757_v14, %v2758_v1  ;;  %v2749_v6 = vsel %vm9462_vm9, %v7879_v49, %v2748_v31  ;;  %v3630_v9 = vrot.slane %v3628_v63, 4  ;;  %v2756_v13 = vsel %vm9462_vm9, %v7880_v51, %v2755_v53  ;;  %v1766_v55 = vld [vmem:[#allocation2 + $0x20] sm:$0x1]  ;;  %v3582_v51 = vld [vmem:[#allocation2 + $0x18] sm:$0xf] }
 0x1a1   : > { %v2610_v2 = vld [vmem:[#allocation2 + $0xbc] sm:$0x1]  ;;  %v9797_v7 = vsel %vm9462_vm9, %v2764_v60, %v2765_v28  ;;  %v7895_v12 = vcombine.low %v2749_v6, %v2752_v59  ;;  %v2763_v15 = vsel %vm9462_vm9, %v7881_v30, %v2762_v58  ;;  %v3633_v16 = vrot.slane %v3631_v3, 5 }
 0x1a2   : > { %v2772_v8 = vrot.slane %v2610_v2, 5  ;;  %v8967_v44 = vld [vmem:[#allocation2 + $0xb4] sm:$0xff]   ;;  %v7896_v17 = vcombine.low %v2756_v13, %v9791_v0  ;;  %v7897_v24 = vcombine.low %v2763_v15, %v9797_v7  ;;  %v3639_v41 = vrot.slane %v3637_v4, 5  ;;  %v3583_v60 = vld [vmem:[#allocation2 + $0x1c] sm:$0xf] }
 0x1a3   : > { %v2608_v5 = vld [vmem:[#allocation2 + $0xb4] sm:$0xe]  ;;  %v2609_v46 = vld [vmem:[#allocation2 + $0xb8] sm:$0xf]  ;;  %v3643_v18 = vrot.slane %v3641_v57, 4  ;;  %8497 = vmatmul.mubr.msk.bf16.gmra.mrb[28].mxu1 %vm1516_vm6, %v8967_v44  ;;  %v3634_v62 = vor.u32 %v3633_v16, %v3630_v9  ;;  %v3647_v10 = vshll.u32 %v3581_v61, 16 }
 0x1a4   : > { %8561 = vmatmul.mubr.msk.bf16.gmra.mrb[52].mxu0 %vm1516_vm6, %v7894_v34  ;;  %v7882_v47 = vrot.slane %v2608_v5, 9  ;;  %v2769_v20 = vrot.slane %v2609_v46, 5  ;;  %8504 = vmatprep.mubr.msk.bf16.mxu1 %vm1516_vm6, %v7833_v43  ;;  %v1834_v48 = vshrl.u32 %v1761_v36, 16  ;;  %v1837_v25 = vshll.u32 %v1761_v36, 16  ;;  %v3584_v2 = vld [vmem:[#allocation2 + $0x20] sm:$0x1] }
 0x1a5   : > { %8564 = vmatprep.mubr.msk.bf16.mxu0 %vm1516_vm6, %v7895_v12  ;;  %v3644_v21 = vor.u32 %v3643_v18, %v3639_v41  ;;  %v1843_v26 = vshll.u32 %v1762_v11, 16  ;;  %v3635_v29 = vrot.slane %v3634_v62, 4  ;;  %v3649_v31 = vrot.slane %v3647_v10, 5  ;;  %v9827_v9 = vld [vmem:[#allocation7 + $0x60] sm:$0xff]  }
 0x1a6   : > { %v9811_v22 = vsel %vm9462_vm9, %v7882_v47, %v2769_v20  ;;  %v2771_v27 = vrot.slane %v2769_v20, 4  ;;  %v1836_v35 = vrot.slane %v1834_v48, 4  ;;  %v1839_v37 = vrot.slane %v1837_v25, 5  ;;  %8680 = vmatprep.subr.bf16.mxu0 %v9827_v9 }
 0x1a7   : > { %v3645_v33 = vrot.slane %v3644_v21, 4  ;;  %v1845_v38 = vrot.slane %v1843_v26, 5  ;;  %v3640_v42 = vsel %vm9607_vm12, %v3635_v29, %v3639_v41  ;;  %v1847_v43 = vshrl.u32 %v1762_v11, 16  ;;  %v3586_v41 = vld [vmem:[#allocation2 + $0x28] sm:$0xf] }
 0x1a8   : > { %v9815_v39 = vsel %vm9462_vm9, %v2771_v27, %v2772_v8  ;;  %v1853_v49 = vshll.u32 %v1763_v23, 16  ;;  %v1840_v54 = vor.u32 %v1839_v37, %v1836_v35  ;;  %v1858_v56 = vshrl.u32 %v1764_v32, 16  ;;  %v3585_v8 = vld [vmem:[#allocation2 + $0x24] sm:$0xf]  ;;  %v3587_v21 = vld [vmem:[#allocation2 + $0x2c] sm:$0x1] }
 0x1a9   : > { %v7898_v52 = vcombine.low %v9811_v22, %v9815_v39  ;;  %v3650_v53 = vsel %vm9607_vm12, %v3645_v33, %v3649_v31  ;;  %v1849_v45 = vrot.slane %v1847_v43, 4  ;;  %v1861_v1 = vshll.u32 %v1764_v32, 16  ;;  %v8971_v23 = vld [vmem:[#allocation7 + $0x38] sm:$0xff]   ;;  %v1767_v27 = vld [vmem:[#allocation2 + $0x24] sm:$0xf]  ;;  %v9018_v35 = vld [vmem:[#allocation7 + $0x30] sm:$0xff]  }
 0x1aa   : > { %v7951_v58 = vcombine.low %v3640_v42, %v3650_v53  ;;  %v1855_v14 = vrot.slane %v1853_v49, 5  ;;  %v1841_v30 = vrot.slane %v1840_v54, 4  ;;  %v1860_v28 = vrot.slane %v1858_v56, 4  ;;  %v1768_v43 = vld [vmem:[#allocation2 + $0x28] sm:$0xf] }
 0x1ab   : > { %v1867_v34 = vshll.u32 %v1765_v50, 16  ;;  %v1871_v59 = vshrl.u32 %v1765_v50, 16  ;;  %v1850_v61 = vor.u32 %v1849_v45, %v1845_v38  ;;  %v1863_v63 = vrot.slane %v1861_v1, 5  ;;  %v1769_v54 = vld [vmem:[#allocation2 + $0x2c] sm:$0x1] }
 0x1ac   : > { %8565 = vmatmul.mubr.msk.bf16.gmra.mrb[56].mxu0 %vm1516_vm6, %v7896_v17  ;;  %v1877_v0 = vshll.u32 %v1766_v55, 16  ;;  %v3652_v3 = vshrl.u32 %v3582_v51, 16  ;;  %v1846_v4 = vsel %vm9607_vm12, %v1841_v30, %v1845_v38  ;;  %v3655_v7 = vshll.u32 %v3582_v51, 16  ;;  %v8975_v56 = vld [vmem:[#allocation7 + $0x50] sm:$0xff]  }
 0x1ad   : > { %8568 = vmatprep.mubr.msk.bf16.mxu0 %vm1516_vm6, %v7897_v24  ;;  %v1869_v57 = vrot.slane %v1867_v34, 5  ;;  %v1873_v6 = vrot.slane %v1871_v59, 4  ;;  %v1851_v36 = vrot.slane %v1850_v61, 4  ;;  %v1864_v11 = vor.u32 %v1863_v63, %v1860_v28 }
 0x1ae   : > { %v1879_v12 = vrot.slane %v1877_v0, 5  ;;  %v3654_v13 = vrot.slane %v3652_v3, 4  ;;  %v3657_v44 = vrot.slane %v3655_v7, 5  ;;  %v3661_v16 = vshll.u32 %v3583_v60, 16  ;;  %v1771_v0 = vld [vmem:[#allocation2 + $0x34] sm:$0xf] }
 0x1af   : > { %v1874_v15 = vor.u32 %v1873_v6, %v1869_v57  ;;  %v3665_v17 = vshrl.u32 %v3583_v60, 16  ;;  %v1856_v24 = vsel %vm9607_vm12, %v1851_v36, %v1855_v14  ;;  %v1865_v5 = vrot.slane %v1864_v11, 4  ;;  %v8978_v11 = vld [vmem:[#allocation7 + $0x68] sm:$0xff]  }
 0x1b0   : > { %v3671_v46 = vshll.u32 %v3584_v2, 16  ;;  %v3676_v18 = vshrl.u32 %v3585_v8, 16  ;;  %v7834_v47 = vcombine.low %v1846_v4, %v1856_v24  ;;  %v3658_v62 = vor.u32 %v3657_v44, %v3654_v13 }
 0x1b1   : > { %v1875_v20 = vrot.slane %v1874_v15, 4  ;;  %v3663_v10 = vrot.slane %v3661_v16, 5  ;;  %v1870_v48 = vsel %vm9607_vm12, %v1865_v5, %v1869_v57  ;;  %v3667_v25 = vrot.slane %v3665_v17, 4  ;;  %v1772_v15 = vld [vmem:[#allocation2 + $0x38] sm:$0x1] }
 0x1b2   : > { %v3673_v26 = vrot.slane %v3671_v46, 5  ;;  %v3678_v22 = vrot.slane %v3676_v18, 4  ;;  %8505 = vmatmul.mubr.msk.bf16.vlgmr.msra.gmra.mrb[32].mxu1 %vm1516_vm6, %v7834_v47  ;;  %v3659_v31 = vrot.slane %v3658_v62, 4  ;;  %v3679_v32 = vshll.u32 %v3585_v8, 16  ;;  %v3588_v17 = vld [vmem:[#allocation2 + $0x30] sm:$0xf] }
 0x1b3   : > { %v1880_v29 = vsel %vm9607_vm12, %v1875_v20, %v1879_v12  ;;  %v3685_v33 = vshll.u32 %v3586_v41, 16  ;;  %8573 = vmatpush3.bf16.msra.mxu1 %v9018_v35  ;;  %v3668_v38 = vor.u32 %v3667_v25, %v3663_v10  ;;  %v3689_v39 = vshrl.u32 %v3586_v41, 16  ;;  %v3589_v18 = vld [vmem:[#allocation2 + $0x34] sm:$0xf] }
 0x1b4   : > { %8569 = vmatmul.mubr.msk.bf16.gmra.mrb[60].mxu0 %vm1516_vm6, %v7898_v52  ;;  %v7835_v37 = vcombine.low %v1870_v48, %v1880_v29  ;;  %v3695_v42 = vshll.u32 %v3587_v21, 16  ;;  %v3664_v49 = vsel %vm9607_vm12, %v3659_v31, %v3663_v10  ;;  %v3681_v50 = vrot.slane %v3679_v32, 5  ;;  %8574 = vmatprep.subr.bf16.mxu1 %v8971_v23  ;;  %v3591_v32 = vld [vmem:[#allocation2 + $0x3c] sm:$0xf] }
 0x1b5   : > { %8612 = vmatprep.mubr.msk.bf16.mxu0 %vm1516_vm6, %v7951_v58  ;;  %v3687_v53 = vrot.slane %v3685_v33, 5  ;;  %v1882_v55 = vshrl.u32 %v1767_v27, 16  ;;  %v3669_v52 = vrot.slane %v3668_v38, 4  ;;  %v3691_v51 = vrot.slane %v3689_v39, 4  ;;  %v1770_v58 = vld [vmem:[#allocation2 + $0x30] sm:$0xf] }
 0x1b6   : > { %8508 = vmatprep.mubr.msk.bf16.mxu1 %vm1516_vm6, %v7835_v37  ;;  %v3697_v45 = vrot.slane %v3695_v42, 5  ;;  %v1885_v14 = vshll.u32 %v1767_v27, 16  ;;  %v3682_v1 = vor.u32 %v3681_v50, %v3678_v22  ;;  %v1891_v28 = vshll.u32 %v1768_v43, 16  ;;  %v3590_v27 = vld [vmem:[#allocation2 + $0x38] sm:$0x1] }
 0x1b7   : > { %v1884_v30 = vrot.slane %v1882_v55, 4  ;;  %v1895_v34 = vshrl.u32 %v1768_v43, 16  ;;  %v3674_v59 = vsel %vm9607_vm12, %v3669_v52, %v3673_v26  ;;  %v3692_v60 = vor.u32 %v3691_v51, %v3687_v53  ;;  %8575 = vmatpush3.bf16.msra.mxu1 %v8971_v23  ;;  %v3592_v38 = vld [vmem:[#allocation2 + $0x40] sm:$0xf] }
 0x1b8   : > { %v1887_v61 = vrot.slane %v1885_v14, 5  ;;  %v1901_v63 = vshll.u32 %v1769_v54, 16  ;;  %v7952_v2 = vcombine.low %v3664_v49, %v3674_v59  ;;  %v3683_v3 = vrot.slane %v3682_v1, 4  ;;  %8644 = vmatprep.subr.bf16.mxu1 %v8975_v56  ;;  %v1773_v1 = vld [vmem:[#allocation2 + $0x3c] sm:$0xf] }
 0x1b9   : > { %v1893_v4 = vrot.slane %v1891_v28, 5  ;;  %v1897_v57 = vrot.slane %v1895_v34, 4  ;;  %v3693_v6 = vrot.slane %v3692_v60, 4  ;;  %v1906_v36 = vshrl.u32 %v1770_v58, 16  ;;  %v1774_v59 = vld [vmem:[#allocation2 + $0x40] sm:$0xf] }
 0x1ba   : > { %v1888_v7 = vor.u32 %v1887_v61, %v1884_v30  ;;  %v1903_v8 = vrot.slane %v1901_v63, 5  ;;  %v3688_v12 = vsel %vm9607_vm12, %v3683_v3, %v3687_v53  ;;  %v1909_v44 = vshll.u32 %v1770_v58, 16 }
 0x1bb   : > { %v1898_v13 = vor.u32 %v1897_v57, %v1893_v4  ;;  %v1915_v16 = vshll.u32 %v1771_v0, 16  ;;  %v3698_v24 = vsel %vm9607_vm12, %v3693_v6, %v3697_v45  ;;  %v1908_v46 = vrot.slane %v1906_v36, 4  ;;  %v3593_v45 = vld [vmem:[#allocation2 + $0x44] sm:$0x1] }
 0x1bc   : > { %8613 = vmatmul.mubr.msk.bf16.vlgmr.msra.gmra.mrb[64].mxu0 %vm1516_vm6, %v7952_v2  ;;  %v1889_v5 = vrot.slane %v1888_v7, 4  ;;  %v1919_v41 = vshrl.u32 %v1771_v0, 16  ;;  %v7953_v47 = vcombine.low %v3688_v12, %v3698_v24  ;;  %v1911_v62 = vrot.slane %v1909_v44, 5  ;;  %v1775_v57 = vld [vmem:[#allocation2 + $0x44] sm:$0x1] }
 0x1bd   : > { %v1899_v20 = vrot.slane %v1898_v13, 4  ;;  %v1917_v10 = vrot.slane %v1915_v16, 5  ;;  %8681 = vmatpush3.bf16.msra.mxu0 %v9827_v9  ;;  %v1925_v48 = vshll.u32 %v1772_v15, 16  ;;  %v3700_v25 = vshrl.u32 %v3588_v17, 16  ;;  %v1776_v12 = vld [vmem:[#allocation2 + $0x48] sm:$0xf] }
 0x1be   : > { %v1894_v21 = vsel %vm9607_vm12, %v1889_v5, %v1893_v4  ;;  %v1921_v23 = vrot.slane %v1919_v41, 4  ;;  %8682 = vmatprep.subr.bf16.mxu0 %v8978_v11  ;;  %8616 = vmatprep.mubr.msk.bf16.mxu0 %vm1516_vm6, %v7953_v47  ;;  %v1912_v22 = vor.u32 %v1911_v62, %v1908_v46  ;;  %v3703_v29 = vshll.u32 %v3588_v17, 16  ;;  %v1777_v17 = vld [vmem:[#allocation2 + $0x4c] sm:$0xf] }
 0x1bf   : > { %v1904_v26 = vsel %vm9607_vm12, %v1899_v20, %v1903_v8  ;;  %v3709_v31 = vshll.u32 %v3589_v18, 16  ;;  %v1927_v9 = vrot.slane %v1925_v48, 5  ;;  %v3702_v37 = vrot.slane %v3700_v25, 4 }
 0x1c0   : > { %v7836_v33 = vcombine.low %v1894_v21, %v1904_v26  ;;  %v1922_v35 = vor.u32 %v1921_v23, %v1917_v10  ;;  %v1913_v39 = vrot.slane %v1912_v22, 4  ;;  %v3705_v42 = vrot.slane %v3703_v29, 5  ;;  %v3594_v26 = vld [vmem:[#allocation2 + $0x48] sm:$0xf] }
 0x1c1   : > { %v3711_v43 = vrot.slane %v3709_v31, 5  ;;  %v3713_v49 = vshrl.u32 %v3589_v18, 16  ;;  %8683 = vmatpush3.bf16.msra.mxu0 %v8978_v11  ;;  %v3719_v53 = vshll.u32 %v3590_v27, 16  ;;  %v3724_v54 = vshrl.u32 %v3591_v32, 16 }
 0x1c2   : > { %8509 = vmatmul.mubr.msk.bf16.gmra.mrb[36].mxu1 %vm1516_vm6, %v7836_v33  ;;  %v1923_v50 = vrot.slane %v1922_v35, 4  ;;  %v3727_v55 = vshll.u32 %v3591_v32, 16  ;;  %v1918_v56 = vsel %vm9607_vm12, %v1913_v39, %v1917_v10  ;;  %v3706_v52 = vor.u32 %v3705_v42, %v3702_v37  ;;  %v1778_v10 = vld [vmem:[#allocation2 + $0x50] sm:$0x1]  ;;  %v3595_v32 = vld [vmem:[#allocation2 + $0x4c] sm:$0xf] }
 0x1c3   : > { %v3715_v51 = vrot.slane %v3713_v49, 4  ;;  %v3733_v14 = vshll.u32 %v3592_v38, 16  ;;  %v3721_v28 = vrot.slane %v3719_v53, 5  ;;  %v3726_v34 = vrot.slane %v3724_v54, 4  ;;  %v3596_v49 = vld [vmem:[#allocation2 + $0x50] sm:$0x1] }
 0x1c4   : > { %v1928_v30 = vsel %vm9607_vm12, %v1923_v50, %v1927_v9  ;;  %v3729_v58 = vrot.slane %v3727_v55, 5  ;;  %v3707_v61 = vrot.slane %v3706_v52, 4  ;;  %v3737_v3 = vshrl.u32 %v3592_v38, 16 }
 0x1c5   : > { %v7837_v60 = vcombine.low %v1918_v56, %v1928_v30  ;;  %v3716_v63 = vor.u32 %v3715_v51, %v3711_v43  ;;  %v3735_v0 = vrot.slane %v3733_v14, 5  ;;  %v3743_v4 = vshll.u32 %v3593_v45, 16  ;;  %v3597_v56 = vld [vmem:[#allocation2 + $0x54] sm:$0xf] }
 0x1c6   : > { %v3730_v2 = vor.u32 %v3729_v58, %v3726_v34  ;;  %v1930_v6 = vshrl.u32 %v1773_v1, 16  ;;  %v3712_v7 = vsel %vm9607_vm12, %v3707_v61, %v3711_v43  ;;  %v1933_v36 = vshll.u32 %v1773_v1, 16  ;;  %v3598_v1 = vld [vmem:[#allocation2 + $0x58] sm:$0xf] }
 0x1c7   : > { %8512 = vmatprep.mubr.msk.bf16.mxu1 %vm1516_vm6, %v7837_v60  ;;  %v3717_v8 = vrot.slane %v3716_v63, 4  ;;  %v1939_v11 = vshll.u32 %v1774_v59, 16  ;;  %v3739_v15 = vrot.slane %v3737_v3, 4  ;;  %v3745_v44 = vrot.slane %v3743_v4, 5 }
 0x1c8   : > { %v3731_v13 = vrot.slane %v3730_v2, 4  ;;  %v1932_v16 = vrot.slane %v1930_v6, 4  ;;  %v1935_v5 = vrot.slane %v1933_v36, 5  ;;  %v1943_v41 = vshrl.u32 %v1774_v59, 16  ;;  %v1779_v2 = vld [vmem:[#allocation2 + $0x54] sm:$0xf] }
 0x1c9   : > { %v3722_v24 = vsel %vm9607_vm12, %v3717_v8, %v3721_v28  ;;  %v1941_v46 = vrot.slane %v1939_v11, 5  ;;  %v3740_v20 = vor.u32 %v3739_v15, %v3735_v0  ;;  %v1949_v62 = vshll.u32 %v1775_v57, 16 }
 0x1ca   : > { %v7954_v18 = vcombine.low %v3712_v7, %v3722_v24  ;;  %v3736_v47 = vsel %vm9607_vm12, %v3731_v13, %v3735_v0  ;;  %v1936_v21 = vor.u32 %v1935_v5, %v1932_v16  ;;  %v1945_v23 = vrot.slane %v1943_v41, 4  ;;  %v3599_v0 = vld [vmem:[#allocation2 + $0x5c] sm:$0x1] }
 0x1cb   : > { %v1954_v48 = vshrl.u32 %v1776_v12, 16  ;;  %v1957_v25 = vshll.u32 %v1776_v12, 16  ;;  %v3741_v22 = vrot.slane %v3740_v20, 4  ;;  %v1951_v27 = vrot.slane %v1949_v62, 5  ;;  %v1780_v12 = vld [vmem:[#allocation2 + $0x58] sm:$0xf] }
 0x1cc   : > { %8617 = vmatmul.mubr.msk.bf16.gmra.mrb[68].mxu0 %vm1516_vm6, %v7954_v18  ;;  %v1963_v29 = vshll.u32 %v1777_v17, 16  ;;  %v1967_v31 = vshrl.u32 %v1777_v17, 16  ;;  %v1937_v33 = vrot.slane %v1936_v21, 4  ;;  %v1946_v35 = vor.u32 %v1945_v23, %v1941_v46  ;;  %v1781_v41 = vld [vmem:[#allocation2 + $0x5c] sm:$0x1] }
 0x1cd   : > { %v1956_v9 = vrot.slane %v1954_v48, 4  ;;  %v1959_v37 = vrot.slane %v1957_v25, 5  ;;  %v3746_v38 = vsel %vm9607_vm12, %v3741_v22, %v3745_v44  ;;  %v1973_v43 = vshll.u32 %v1778_v10, 16  ;;  %v1782_v18 = vld [vmem:[#allocation2 + $0x60] sm:$0xf] }
 0x1ce   : > { %v1965_v39 = vrot.slane %v1963_v29, 5  ;;  %v1969_v42 = vrot.slane %v1967_v31, 4  ;;  %v7955_v50 = vcombine.low %v3736_v47, %v3746_v38  ;;  %v1942_v53 = vsel %vm9607_vm12, %v1937_v33, %v1941_v46 }
 0x1cf   : > { %v1947_v54 = vrot.slane %v1946_v35, 4  ;;  %v1960_v55 = vor.u32 %v1959_v37, %v1956_v9  ;;  %v1975_v51 = vrot.slane %v1973_v43, 5  ;;  %v3748_v45 = vshrl.u32 %v3594_v26, 16  ;;  %v1784_v37 = vld [vmem:[#allocation2 + $0x68] sm:$0x1] }
 0x1d0   : > { %v1970_v52 = vor.u32 %v1969_v42, %v1965_v39  ;;  %v3751_v14 = vshll.u32 %v3594_v26, 16  ;;  %8620 = vmatprep.mubr.msk.bf16.mxu0 %vm1516_vm6, %v7955_v50  ;;  %v3757_v34 = vshll.u32 %v3595_v32, 16  ;;  %v3761_v58 = vshrl.u32 %v3595_v32, 16  ;;  %v1783_v26 = vld [vmem:[#allocation2 + $0x64] sm:$0xf] }
 0x1d1   : > { %v1952_v30 = vsel %vm9607_vm12, %v1947_v54, %v1951_v27  ;;  %v1961_v28 = vrot.slane %v1960_v55, 4  ;;  %v3750_v61 = vrot.slane %v3748_v45, 4  ;;  %v3767_v6 = vshll.u32 %v3596_v49, 16  ;;  %v3600_v49 = vld [vmem:[#allocation2 + $0x60] sm:$0xf] }
 0x1d2   : > { %v7838_v59 = vcombine.low %v1942_v53, %v1952_v30  ;;  %v1971_v60 = vrot.slane %v1970_v52, 4  ;;  %v3753_v63 = vrot.slane %v3751_v14, 5  ;;  %v3759_v4 = vrot.slane %v3757_v34, 5 }
 0x1d3   : > { %v1966_v3 = vsel %vm9607_vm12, %v1961_v28, %v1965_v39  ;;  %v3763_v57 = vrot.slane %v3761_v58, 4  ;;  %v3772_v36 = vshrl.u32 %v3597_v56, 16  ;;  %v3775_v11 = vshll.u32 %v3597_v56, 16  ;;  %v3601_v56 = vld [vmem:[#allocation2 + $0x64] sm:$0xf] }
 0x1d4   : > { %8513 = vmatmul.mubr.msk.bf16.gmra.mrb[40].mxu1 %vm1516_vm6, %v7838_v59  ;;  %v1976_v7 = vsel %vm9607_vm12, %v1971_v60, %v1975_v51  ;;  %v3754_v8 = vor.u32 %v3753_v63, %v3750_v61  ;;  %v3769_v44 = vrot.slane %v3767_v6, 5  ;;  %v3781_v16 = vshll.u32 %v3598_v1, 16  ;;  %v3602_v58 = vld [vmem:[#allocation2 + $0x68] sm:$0x1] }
 0x1d5   : > { %v7839_v13 = vcombine.low %v1966_v3, %v1976_v7  ;;  %v3764_v15 = vor.u32 %v3763_v57, %v3759_v4  ;;  %v3774_v24 = vrot.slane %v3772_v36, 4  ;;  %v3777_v5 = vrot.slane %v3775_v11, 5  ;;  %v3603_v57 = vld [vmem:[#allocation2 + $0x6c] sm:$0xf]  ;;  %v3604_v11 = vld [vmem:[#allocation2 + $0x70] sm:$0xf] }
 0x1d6   : > { %v3755_v17 = vrot.slane %v3754_v8, 4  ;;  %v3785_v46 = vshrl.u32 %v3598_v1, 16  ;;  %v3783_v20 = vrot.slane %v3781_v16, 5  ;;  %v3791_v62 = vshll.u32 %v3599_v0, 16 }
 0x1d7   : > { %8516 = vmatprep.mubr.msk.bf16.mxu1 %vm1516_vm6, %v7839_v13  ;;  %v3765_v47 = vrot.slane %v3764_v15, 4  ;;  %v1978_v10 = vshrl.u32 %v1779_v2, 16  ;;  %v3778_v23 = vor.u32 %v3777_v5, %v3774_v24  ;;  %v1981_v25 = vshll.u32 %v1779_v2, 16 }
 0x1d8   : > { %v3760_v21 = vsel %vm9607_vm12, %v3755_v17, %v3759_v4  ;;  %v3787_v48 = vrot.slane %v3785_v46, 4  ;;  %v3793_v27 = vrot.slane %v3791_v62, 5  ;;  %v1987_v31 = vshll.u32 %v1780_v12, 16  ;;  %v3605_v46 = vld [vmem:[#allocation2 + $0x74] sm:$0x1] }
 0x1d9   : > { %v3770_v22 = vsel %vm9607_vm12, %v3765_v47, %v3769_v44  ;;  %v1980_v29 = vrot.slane %v1978_v10, 4  ;;  %v3779_v33 = vrot.slane %v3778_v23, 4  ;;  %v1983_v9 = vrot.slane %v1981_v25, 5  ;;  %v1785_v62 = vld [vmem:[#allocation2 + $0x6c] sm:$0xf] }
 0x1da   : > { %v7956_v32 = vcombine.low %v3760_v21, %v3770_v22  ;;  %v3788_v35 = vor.u32 %v3787_v48, %v3783_v20  ;;  %v1989_v38 = vrot.slane %v1987_v31, 5  ;;  %v1991_v39 = vshrl.u32 %v1780_v12, 16  ;;  %v1786_v25 = vld [vmem:[#allocation2 + $0x70] sm:$0xf] }
 0x1db   : > { %v1997_v42 = vshll.u32 %v1781_v41, 16  ;;  %v2002_v43 = vshrl.u32 %v1782_v18, 16  ;;  %v3784_v50 = vsel %vm9607_vm12, %v3779_v33, %v3783_v20  ;;  %v1984_v54 = vor.u32 %v1983_v9, %v1980_v29  ;;  %v1787_v9 = vld [vmem:[#allocation2 + $0x74] sm:$0x1] }
 0x1dc   : > { %8621 = vmatmul.mubr.msk.bf16.gmra.mrb[72].mxu0 %vm1516_vm6, %v7956_v32  ;;  %v3789_v53 = vrot.slane %v3788_v35, 4  ;;  %v2005_v55 = vshll.u32 %v1782_v18, 16  ;;  %v1993_v52 = vrot.slane %v1991_v39, 4  ;;  %v2011_v14 = vshll.u32 %v1783_v26, 16 }
 0x1dd   : > { %v1999_v51 = vrot.slane %v1997_v42, 5  ;;  %v2004_v45 = vrot.slane %v2002_v43, 4  ;;  %v1985_v30 = vrot.slane %v1984_v54, 4  ;;  %v2015_v34 = vshrl.u32 %v1783_v26, 16  ;;  %v1788_v43 = vld [vmem:[#allocation2 + $0x78] sm:$0xf] }
 0x1de   : > { %v3794_v1 = vsel %vm9607_vm12, %v3789_v53, %v3793_v27  ;;  %v2007_v28 = vrot.slane %v2005_v55, 5  ;;  %v1994_v60 = vor.u32 %v1993_v52, %v1989_v38  ;;  %v2013_v61 = vrot.slane %v2011_v14, 5  ;;  %v1789_v55 = vld [vmem:[#allocation2 + $0x7c] sm:$0xf] }
 0x1df   : > { %v7957_v59 = vcombine.low %v3784_v50, %v3794_v1  ;;  %v2021_v63 = vshll.u32 %v1784_v37, 16  ;;  %v1990_v0 = vsel %vm9607_vm12, %v1985_v30, %v1989_v38  ;;  %v2017_v3 = vrot.slane %v2015_v34, 4  ;;  %v1790_v34 = vld [vmem:[#allocation2 + $0x80] sm:$0x1] }
 0x1e0   : > { %v2008_v2 = vor.u32 %v2007_v28, %v2004_v45  ;;  %v3796_v4 = vshrl.u32 %v3600_v49, 16  ;;  %v1995_v6 = vrot.slane %v1994_v60, 4  ;;  %v3799_v8 = vshll.u32 %v3600_v49, 16 }
 0x1e1   : > { %8624 = vmatprep.mubr.msk.bf16.mxu0 %vm1516_vm6, %v7957_v59  ;;  %v2023_v7 = vrot.slane %v2021_v63, 5  ;;  %v3805_v36 = vshll.u32 %v3601_v56, 16  ;;  %v2018_v13 = vor.u32 %v2017_v3, %v2013_v61  ;;  %v3809_v44 = vshrl.u32 %v3601_v56, 16  ;;  %v3606_v63 = vld [vmem:[#allocation2 + $0x78] sm:$0xf] }
 0x1e2   : > { %v2009_v12 = vrot.slane %v2008_v2, 4  ;;  %v3798_v15 = vrot.slane %v3796_v4, 4  ;;  %v2000_v16 = vsel %vm9607_vm12, %v1995_v6, %v1999_v51  ;;  %v3801_v17 = vrot.slane %v3799_v8, 5 }
 0x1e3   : > { %v3807_v24 = vrot.slane %v3805_v36, 5  ;;  %v3815_v5 = vshll.u32 %v3602_v58, 16  ;;  %v7840_v41 = vcombine.low %v1990_v0, %v2000_v16  ;;  %v2019_v47 = vrot.slane %v2018_v13, 4  ;;  %v3608_v16 = vld [vmem:[#allocation2 + $0x80] sm:$0x1] }
 0x1e4   : > { %v2014_v18 = vsel %vm9607_vm12, %v2009_v12, %v2013_v61  ;;  %v3811_v20 = vrot.slane %v3809_v44, 4  ;;  %v3802_v10 = vor.u32 %v3801_v17, %v3798_v15  ;;  %v3820_v23 = vshrl.u32 %v3603_v57, 16 }
 0x1e5   : > { %v3817_v21 = vrot.slane %v3815_v5, 5  ;;  %v3823_v48 = vshll.u32 %v3603_v57, 16  ;;  %8517 = vmatmul.mubr.msk.bf16.gmra.mrb[44].mxu1 %vm1516_vm6, %v7840_v41  ;;  %v2024_v26 = vsel %vm9607_vm12, %v2019_v47, %v2023_v7  ;;  %v3829_v27 = vshll.u32 %v3604_v11, 16  ;;  %v3607_v57 = vld [vmem:[#allocation2 + $0x7c] sm:$0xf] }
 0x1e6   : > { %v3812_v22 = vor.u32 %v3811_v20, %v3807_v24  ;;  %v3833_v29 = vshrl.u32 %v3604_v11, 16  ;;  %v7841_v31 = vcombine.low %v2014_v18, %v2024_v26  ;;  %v3803_v32 = vrot.slane %v3802_v10, 4  ;;  %v9910_v11 = vld [vmem:[#allocation7 + $0x80] sm:$0xff]  }
 0x1e7   : > { %v3822_v33 = vrot.slane %v3820_v23, 4  ;;  %v3825_v35 = vrot.slane %v3823_v48, 5  ;;  %v3831_v38 = vrot.slane %v3829_v27, 5  ;;  %v3839_v42 = vshll.u32 %v3605_v46, 16  ;;  %8752 = vmatprep.subr.bf16.mxu0 %v9910_v11 }
 0x1e8   : > { %v3813_v37 = vrot.slane %v3812_v22, 4  ;;  %v3835_v39 = vrot.slane %v3833_v29, 4  ;;  %8520 = vmatprep.mubr.msk.bf16.mxu1 %vm1516_vm6, %v7841_v31  ;;  %v3808_v49 = vsel %vm9607_vm12, %v3803_v32, %v3807_v24  ;;  %v2026_v53 = vshrl.u32 %v1785_v62, 16  ;;  %v3611_v31 = vld [vmem:[#allocation2 + $0x8c] sm:$0x1] }
 0x1e9   : > { %v3826_v50 = vor.u32 %v3825_v35, %v3822_v33  ;;  %v2029_v54 = vshll.u32 %v1785_v62, 16  ;;  %v3841_v51 = vrot.slane %v3839_v42, 5  ;;  %v2035_v45 = vshll.u32 %v1786_v25, 16  ;;  %v3609_v62 = vld [vmem:[#allocation2 + $0x84] sm:$0xf] }
 0x1ea   : > { %v3818_v56 = vsel %vm9607_vm12, %v3813_v37, %v3817_v21  ;;  %v3836_v52 = vor.u32 %v3835_v39, %v3831_v38  ;;  %v2028_v30 = vrot.slane %v2026_v53, 4  ;;  %v2039_v60 = vshrl.u32 %v1786_v25, 16  ;;  %v3610_v25 = vld [vmem:[#allocation2 + $0x88] sm:$0xf] }
 0x1eb   : > { %v7958_v14 = vcombine.low %v3808_v49, %v3818_v56  ;;  %v3827_v1 = vrot.slane %v3826_v50, 4  ;;  %v2031_v28 = vrot.slane %v2029_v54, 5  ;;  %v2037_v59 = vrot.slane %v2035_v45, 5 }
 0x1ec   : > { %v3837_v58 = vrot.slane %v3836_v52, 4  ;;  %v2045_v61 = vshll.u32 %v1787_v9, 16  ;;  %v2050_v3 = vshrl.u32 %v1788_v43, 16  ;;  %v2053_v4 = vshll.u32 %v1788_v43, 16  ;;  %v1791_v43 = vld [vmem:[#allocation2 + $0x84] sm:$0xf] }
 0x1ed   : > { %8625 = vmatmul.mubr.msk.bf16.gmra.mrb[76].mxu0 %vm1516_vm6, %v7958_v14  ;;  %v3832_v0 = vsel %vm9607_vm12, %v3827_v1, %v3831_v38  ;;  %v2032_v2 = vor.u32 %v2031_v28, %v2028_v30  ;;  %v2041_v7 = vrot.slane %v2039_v60, 4  ;;  %v2059_v36 = vshll.u32 %v1789_v55, 16 }
 0x1ee   : > { %v3842_v6 = vsel %vm9607_vm12, %v3837_v58, %v3841_v51  ;;  %v2047_v8 = vrot.slane %v2045_v61, 5  ;;  %v2052_v15 = vrot.slane %v2050_v3, 4  ;;  %v2055_v44 = vrot.slane %v2053_v4, 5 }
 0x1ef   : > { %v7959_v12 = vcombine.low %v3832_v0, %v3842_v6  ;;  %v2033_v13 = vrot.slane %v2032_v2, 4  ;;  %v2042_v17 = vor.u32 %v2041_v7, %v2037_v59  ;;  %v2061_v24 = vrot.slane %v2059_v36, 5  ;;  %v1793_v2 = vld [vmem:[#allocation2 + $0x8c] sm:$0x1] }
 0x1f0   : > { %v2063_v5 = vshrl.u32 %v1789_v55, 16  ;;  %v2069_v46 = vshll.u32 %v1790_v34, 16  ;;  %v2056_v18 = vor.u32 %v2055_v44, %v2052_v15  ;;  %v3844_v47 = vshrl.u32 %v3606_v63, 16  ;;  %v1792_v55 = vld [vmem:[#allocation2 + $0x88] sm:$0xf] }
 0x1f1   : > { %8628 = vmatprep.mubr.msk.bf16.mxu0 %vm1516_vm6, %v7959_v12  ;;  %v2038_v41 = vsel %vm9607_vm12, %v2033_v13, %v2037_v59  ;;  %v3847_v20 = vshll.u32 %v3606_v63, 16  ;;  %v2043_v10 = vrot.slane %v2042_v17, 4  ;;  %v3853_v48 = vshll.u32 %v3607_v57, 16  ;;  %v1795_v44 = vld [vmem:[#allocation2 + $0x94] sm:$0xf] }
 0x1f2   : > { %v2065_v21 = vrot.slane %v2063_v5, 4  ;;  %v2071_v23 = vrot.slane %v2069_v46, 5  ;;  %v2057_v26 = vrot.slane %v2056_v18, 4  ;;  %v3846_v22 = vrot.slane %v3844_v47, 4 }
 0x1f3   : > { %v3849_v27 = vrot.slane %v3847_v20, 5  ;;  %v3857_v29 = vshrl.u32 %v3607_v57, 16  ;;  %v2048_v32 = vsel %vm9607_vm12, %v2043_v10, %v2047_v8  ;;  %v3855_v35 = vrot.slane %v3853_v48, 5  ;;  %v1794_v8 = vld [vmem:[#allocation2 + $0x90] sm:$0xf] }
 0x1f4   : > { %v2066_v33 = vor.u32 %v2065_v21, %v2061_v24  ;;  %v3863_v9 = vshll.u32 %v3608_v16, 16  ;;  %v7842_v37 = vcombine.low %v2038_v41, %v2048_v32  ;;  %v2062_v38 = vsel %vm9607_vm12, %v2057_v26, %v2061_v24  ;;  %v1796_v21 = vld [vmem:[#allocation2 + $0x98] sm:$0x1]  ;;  %v3612_v48 = vld [vmem:[#allocation2 + $0x90] sm:$0xf] }
 0x1f5   : > { %v3850_v39 = vor.u32 %v3849_v27, %v3846_v22  ;;  %v3859_v42 = vrot.slane %v3857_v29, 4  ;;  %v3868_v53 = vshrl.u32 %v3609_v62, 16  ;;  %v3871_v54 = vshll.u32 %v3609_v62, 16  ;;  %v3613_v29 = vld [vmem:[#allocation2 + $0x94] sm:$0xf] }
 0x1f6   : > { %v2067_v49 = vrot.slane %v2066_v33, 4  ;;  %v3865_v50 = vrot.slane %v3863_v9, 5  ;;  %8521 = vmatmul.mubr.msk.bf16.gmra.mrb[48].mxu1 %vm1516_vm6, %v7842_v37  ;;  %v3877_v51 = vshll.u32 %v3610_v25, 16  ;;  %v3881_v45 = vshrl.u32 %v3610_v25, 16 }
 0x1f7   : > { %v3851_v56 = vrot.slane %v3850_v39, 4  ;;  %v3860_v52 = vor.u32 %v3859_v42, %v3855_v35  ;;  %v3870_v1 = vrot.slane %v3868_v53, 4  ;;  %v3873_v30 = vrot.slane %v3871_v54, 5  ;;  %v3615_v54 = vld [vmem:[#allocation2 + $0x9c] sm:$0xf] }
 0x1f8   : > { %v2072_v14 = vsel %vm9607_vm12, %v2067_v49, %v2071_v23  ;;  %v3887_v28 = vshll.u32 %v3611_v31, 16  ;;  %v3879_v60 = vrot.slane %v3877_v51, 5  ;;  %v3883_v63 = vrot.slane %v3881_v45, 4  ;;  %v3614_v49 = vld [vmem:[#allocation2 + $0x98] sm:$0x1] }
 0x1f9   : > { %v7843_v34 = vcombine.low %v2062_v38, %v2072_v14  ;;  %v3856_v58 = vsel %vm9607_vm12, %v3851_v56, %v3855_v35  ;;  %v3861_v59 = vrot.slane %v3860_v52, 4  ;;  %v3874_v61 = vor.u32 %v3873_v30, %v3870_v1  ;;  %v3616_v45 = vld [vmem:[#allocation2 + $0xa0] sm:$0xf] }
 0x1fa   : > { %v3889_v0 = vrot.slane %v3887_v28, 5  ;;  %v2074_v3 = vshrl.u32 %v1791_v43, 16  ;;  %v2077_v57 = vshll.u32 %v1791_v43, 16  ;;  %v2083_v6 = vshll.u32 %v1792_v55, 16 }
 0x1fb   : > { %8524 = vmatprep.mubr.msk.bf16.mxu1 %vm1516_vm6, %v7843_v34  ;;  %v3866_v4 = vsel %vm9607_vm12, %v3861_v59, %v3865_v50  ;;  %v2087_v7 = vshrl.u32 %v1792_v55, 16  ;;  %v3875_v12 = vrot.slane %v3874_v61, 4  ;;  %v3884_v13 = vor.u32 %v3883_v63, %v3879_v60 }
 0x1fc   : > { %v7960_v36 = vcombine.low %v3856_v58, %v3866_v4  ;;  %v2076_v15 = vrot.slane %v2074_v3, 4  ;;  %v2079_v16 = vrot.slane %v2077_v57, 5  ;;  %v2085_v17 = vrot.slane %v2083_v6, 5  ;;  %v1797_v4 = vld [vmem:[#allocation2 + $0x9c] sm:$0xf] }
 0x1fd   : > { %v2089_v24 = vrot.slane %v2087_v7, 4  ;;  %v2093_v5 = vshll.u32 %v1793_v2, 16  ;;  %v3880_v46 = vsel %vm9607_vm12, %v3875_v12, %v3879_v60  ;;  %v3885_v41 = vrot.slane %v3884_v13, 4  ;;  %v3617_v60 = vld [vmem:[#allocation2 + $0xa4] sm:$0x1] }
 0x1fe   : > { %8629 = vmatmul.mubr.msk.bf16.gmra.mrb[80].mxu0 %vm1516_vm6, %v7960_v36  ;;  %v2098_v18 = vshrl.u32 %v1794_v8, 16  ;;  %v2101_v47 = vshll.u32 %v1794_v8, 16  ;;  %v2080_v20 = vor.u32 %v2079_v16, %v2076_v15  ;;  %v2107_v23 = vshll.u32 %v1795_v44, 16 }
 0x1ff   : > { %v2090_v62 = vor.u32 %v2089_v24, %v2085_v17  ;;  %v2095_v10 = vrot.slane %v2093_v5, 5  ;;  %v3890_v25 = vsel %vm9607_vm12, %v3885_v41, %v3889_v0  ;;  %v2111_v27 = vshrl.u32 %v1795_v44, 16  ;;  %v1798_v44 = vld [vmem:[#allocation2 + $0xa0] sm:$0xf] }
 0x200   : > { %v2100_v26 = vrot.slane %v2098_v18, 4  ;;  %v2103_v22 = vrot.slane %v2101_v47, 5  ;;  %v7961_v31 = vcombine.low %v3880_v46, %v3890_v25  ;;  %v2081_v32 = vrot.slane %v2080_v20, 4  ;;  %v1799_v47 = vld [vmem:[#allocation2 + $0xa4] sm:$0x1] }
 0x201   : > { %v2091_v33 = vrot.slane %v2090_v62, 4  ;;  %v2109_v35 = vrot.slane %v2107_v23, 5  ;;  %v2113_v37 = vrot.slane %v2111_v27, 4  ;;  %v2117_v38 = vshll.u32 %v1796_v21, 16 }
 0x202   : > { %v2104_v9 = vor.u32 %v2103_v22, %v2100_v26  ;;  %v3892_v39 = vshrl.u32 %v3612_v48, 16  ;;  %8632 = vmatprep.mubr.msk.bf16.mxu0 %vm1516_vm6, %v7961_v31  ;;  %v2086_v42 = vsel %vm9607_vm12, %v2081_v32, %v2085_v17  ;;  %v3895_v50 = vshll.u32 %v3612_v48, 16  ;;  %v1800_v48 = vld [vmem:[#allocation2 + $0xa8] sm:$0xf] }
 0x203   : > { %v2096_v43 = vsel %vm9607_vm12, %v2091_v33, %v2095_v10  ;;  %v3901_v53 = vshll.u32 %v3613_v29, 16  ;;  %v2114_v52 = vor.u32 %v2113_v37, %v2109_v35  ;;  %v2119_v51 = vrot.slane %v2117_v38, 5 }
 0x204   : > { %v7844_v55 = vcombine.low %v2086_v42, %v2096_v43  ;;  %v2105_v56 = vrot.slane %v2104_v9, 4  ;;  %v3894_v14 = vrot.slane %v3892_v39, 4  ;;  %v3897_v1 = vrot.slane %v3895_v50, 5  ;;  %v1802_v39 = vld [vmem:[#allocation2 + $0xb0] sm:$0x1] }
 0x205   : > { %v3903_v30 = vrot.slane %v3901_v53, 5  ;;  %v3905_v28 = vshrl.u32 %v3613_v29, 16  ;;  %v2115_v58 = vrot.slane %v2114_v52, 4  ;;  %v3911_v59 = vshll.u32 %v3614_v49, 16  ;;  %v1801_v29 = vld [vmem:[#allocation2 + $0xac] sm:$0xf] }
 0x206   : > { %8525 = vmatmul.mubr.msk.bf16.gmra.mrb[52].mxu1 %vm1516_vm6, %v7844_v55  ;;  %v2110_v34 = vsel %vm9607_vm12, %v2105_v56, %v2109_v35  ;;  %v3916_v61 = vshrl.u32 %v3615_v54, 16  ;;  %v3898_v63 = vor.u32 %v3897_v1, %v3894_v14  ;;  %v3919_v2 = vshll.u32 %v3615_v54, 16  ;;  %v3618_v54 = vld [vmem:[#allocation2 + $0xa8] sm:$0xf] }
 0x207   : > { %v3907_v0 = vrot.slane %v3905_v28, 4  ;;  %v3925_v3 = vshll.u32 %v3616_v45, 16  ;;  %v2120_v57 = vsel %vm9607_vm12, %v2115_v58, %v2119_v51  ;;  %v3913_v6 = vrot.slane %v3911_v59, 5  ;;  %v3620_v59 = vld [vmem:[#allocation2 + $0xb0] sm:$0x1] }
 0x208   : > { %v3918_v7 = vrot.slane %v3916_v61, 4  ;;  %v3929_v8 = vshrl.u32 %v3616_v45, 16  ;;  %v7845_v36 = vcombine.low %v2110_v34, %v2120_v57  ;;  %v3899_v12 = vrot.slane %v3898_v63, 4  ;;  %v3619_v45 = vld [vmem:[#allocation2 + $0xac] sm:$0xf] }
 0x209   : > { %v3908_v13 = vor.u32 %v3907_v0, %v3903_v30  ;;  %v3921_v15 = vrot.slane %v3919_v2, 5  ;;  %v3927_v16 = vrot.slane %v3925_v3, 5  ;;  %v3935_v24 = vshll.u32 %v3617_v60, 16 }
 0x20a   : > { %v3931_v17 = vrot.slane %v3929_v8, 4  ;;  %v2122_v5 = vshrl.u32 %v1797_v4, 16  ;;  %8528 = vmatprep.mubr.msk.bf16.mxu1 %vm1516_vm6, %v7845_v36  ;;  %v3904_v46 = vsel %vm9607_vm12, %v3899_v12, %v3903_v30  ;;  %v2125_v20 = vshll.u32 %v1797_v4, 16  ;;  %v3621_v4 = vld [vmem:[#allocation2 + $0xb4] sm:$0xf] }
 0x20b   : > { %v3909_v41 = vrot.slane %v3908_v13, 4  ;;  %v3922_v18 = vor.u32 %v3921_v15, %v3918_v7  ;;  %v3937_v10 = vrot.slane %v3935_v24, 5  ;;  %v2131_v23 = vshll.u32 %v1798_v44, 16  ;;  %v3622_v36 = vld [vmem:[#allocation2 + $0xb8] sm:$0xf] }
 0x20c   : > { %v3932_v62 = vor.u32 %v3931_v17, %v3927_v16  ;;  %v2124_v21 = vrot.slane %v2122_v5, 4  ;;  %v2127_v22 = vrot.slane %v2125_v20, 5  ;;  %v2135_v27 = vshrl.u32 %v1798_v44, 16 }
 0x20d   : > { %v3914_v25 = vsel %vm9607_vm12, %v3909_v41, %v3913_v6  ;;  %v3923_v26 = vrot.slane %v3922_v18, 4  ;;  %v2133_v33 = vrot.slane %v2131_v23, 5  ;;  %v2141_v35 = vshll.u32 %v1799_v47, 16  ;;  %v3623_v18 = vld [vmem:[#allocation2 + $0xbc] sm:$0x1] }
 0x20e   : > { %v7962_v31 = vcombine.low %v3904_v46, %v3914_v25  ;;  %v3933_v32 = vrot.slane %v3932_v62, 4  ;;  %v2128_v37 = vor.u32 %v2127_v22, %v2124_v21  ;;  %v2137_v38 = vrot.slane %v2135_v27, 4 }
 0x20f   : > { %v3928_v9 = vsel %vm9607_vm12, %v3923_v26, %v3927_v16  ;;  %v2146_v42 = vshrl.u32 %v1800_v48, 16  ;;  %v2143_v49 = vrot.slane %v2141_v35, 5  ;;  %v2149_v50 = vshll.u32 %v1800_v48, 16  ;;  %v1803_v48 = vld [vmem:[#allocation2 + $0xb4] sm:$0xf] }
 0x210   : > { %8633 = vmatmul.mubr.msk.bf16.gmra.mrb[84].mxu0 %vm1516_vm6, %v7962_v31  ;;  %v3938_v43 = vsel %vm9607_vm12, %v3933_v32, %v3937_v10  ;;  %v2155_v53 = vshll.u32 %v1801_v29, 16  ;;  %v2129_v56 = vrot.slane %v2128_v37, 4  ;;  %v2138_v52 = vor.u32 %v2137_v38, %v2133_v33  ;;  %v1805_v38 = vld [vmem:[#allocation2 + $0xbc] sm:$0x1] }
 0x211   : > { %v7963_v55 = vcombine.low %v3928_v9, %v3938_v43  ;;  %v2148_v51 = vrot.slane %v2146_v42, 4  ;;  %v2151_v14 = vrot.slane %v2149_v50, 5  ;;  %v2159_v30 = vshrl.u32 %v1801_v29, 16  ;;  %v1804_v29 = vld [vmem:[#allocation2 + $0xb8] sm:$0xf] }
 0x212   : > { %v2157_v1 = vrot.slane %v2155_v53, 5  ;;  %v2165_v28 = vshll.u32 %v1802_v39, 16  ;;  %v2134_v34 = vsel %vm9607_vm12, %v2129_v56, %v2133_v33  ;;  %v2139_v58 = vrot.slane %v2138_v52, 4 }
 0x213   : > { %8636 = vmatprep.mubr.msk.bf16.mxu0 %vm1516_vm6, %v7963_v55  ;;  %v3940_v60 = vshrl.u32 %v3618_v54, 16  ;;  %v3943_v61 = vshll.u32 %v3618_v54, 16  ;;  %v2152_v63 = vor.u32 %v2151_v14, %v2148_v51  ;;  %v2161_v0 = vrot.slane %v2159_v30, 4  ;;  %v3624_v54 = vld [vmem:[#allocation2 + $0xc0] sm:$0xf] }
 0x214   : > { %v2167_v2 = vrot.slane %v2165_v28, 5  ;;  %v3949_v3 = vshll.u32 %v3619_v45, 16  ;;  %v2144_v57 = vsel %vm9607_vm12, %v2139_v58, %v2143_v49  ;;  %v3953_v8 = vshrl.u32 %v3619_v45, 16  ;;  %v3625_v45 = vld [vmem:[#allocation2 + $0xc4] sm:$0xf] }
 0x215   : > { %v3942_v6 = vrot.slane %v3940_v60, 4  ;;  %v3945_v7 = vrot.slane %v3943_v61, 5  ;;  %v7846_v12 = vcombine.low %v2134_v34, %v2144_v57  ;;  %v2153_v13 = vrot.slane %v2152_v63, 4 }
 0x216   : > { %v2162_v15 = vor.u32 %v2161_v0, %v2157_v1  ;;  %v3951_v44 = vrot.slane %v3949_v3, 5  ;;  %v3955_v17 = vrot.slane %v3953_v8, 4  ;;  %v3959_v24 = vshll.u32 %v3620_v59, 16 }
 0x217   : > { %v3946_v16 = vor.u32 %v3945_v7, %v3942_v6  ;;  %v3964_v5 = vshrl.u32 %v3621_v4, 16  ;;  %8529 = vmatmul.mubr.msk.bf16.gmra.mrb[56].mxu1 %vm1516_vm6, %v7846_v12  ;;  %v2158_v46 = vsel %vm9607_vm12, %v2153_v13, %v2157_v1  ;;  %v3967_v47 = vshll.u32 %v3621_v4, 16 }
 0x218   : > { %v2163_v41 = vrot.slane %v2162_v15, 4  ;;  %v3973_v20 = vshll.u32 %v3622_v36, 16  ;;  %v3956_v10 = vor.u32 %v3955_v17, %v3951_v44  ;;  %v3961_v21 = vrot.slane %v3959_v24, 5 }
 0x219   : > { %v3947_v62 = vrot.slane %v3946_v16, 4  ;;  %v3966_v23 = vrot.slane %v3964_v5, 4  ;;  %v3969_v26 = vrot.slane %v3967_v47, 5  ;;  %v3977_v27 = vshrl.u32 %v3622_v36, 16 }
 0x21a   : > { %v2168_v25 = vsel %vm9607_vm12, %v2163_v41, %v2167_v2  ;;  %v3975_v22 = vrot.slane %v3973_v20, 5  ;;  %v3957_v33 = vrot.slane %v3956_v10, 4  ;;  %v3983_v35 = vshll.u32 %v3623_v18, 16  ;;  %v3626_v2 = vld [vmem:[#allocation2 + $0xc8] sm:$0x1]  ;;  %v8972_v18 = vld [vmem:[#allocation2 + $0xc] sm:$0xff]  }
 0x21b   : > { %v7847_v31 = vcombine.low %v2158_v46, %v2168_v25  ;;  %v3952_v32 = vsel %vm9607_vm12, %v3947_v62, %v3951_v44  ;;  %v3970_v9 = vor.u32 %v3969_v26, %v3966_v23  ;;  %v3979_v37 = vrot.slane %v3977_v27, 4  ;;  %v8974_v23 = vld [vmem:[#allocation2 + $0x18] sm:$0xff]   ;;  %v8993_v25 = vld [vmem:[#allocation7 + $0x58] sm:$0xff]   ;;  %v8977_v26 = vld [vmem:[#allocation2 + $0x24] sm:$0xff]  }
 0x21c   : > { %v2170_v39 = vshrl.u32 %v1803_v48, 16  ;;  %v2173_v42 = vshll.u32 %v1803_v48, 16  ;;  %v3962_v43 = vsel %vm9607_vm12, %v3957_v33, %v3961_v21  ;;  %v3985_v49 = vrot.slane %v3983_v35, 5  ;;  %v8976_v48 = vld [vmem:[#allocation2 + $0x18] sm:$0xff]   ;;  %v9010_v33 = vld [vmem:[#allocation7 + $0x88] sm:$0xff]  }
 0x21d   : > { %8532 = vmatprep.mubr.msk.bf16.mxu1 %vm1516_vm6, %v7847_v31  ;;  %v2179_v50 = vshll.u32 %v1804_v29, 16  ;;  %v2183_v53 = vshrl.u32 %v1804_v29, 16  ;;  %v7964_v55 = vcombine.low %v3952_v32, %v3962_v43  ;;  %v3971_v56 = vrot.slane %v3970_v9, 4  ;;  %v8979_v31 = vld [vmem:[#allocation2 + $0x24] sm:$0xff]   ;;  %v8980_v9 = vld [vmem:[#allocation2 + $0x30] sm:$0xff]  }
 0x21e   : > { %v3980_v52 = vor.u32 %v3979_v37, %v3975_v22  ;;  %v2172_v51 = vrot.slane %v2170_v39, 4  ;;  %v2175_v14 = vrot.slane %v2173_v42, 5  ;;  %v2189_v28 = vshll.u32 %v1805_v38, 16  ;;  %v9989_v32 = vld [vmem:[#allocation7 + $0x70] sm:$0xff]   ;;  %v8981_v38 = vld [vmem:[#allocation2 + $0x30] sm:$0xff]   ;;  %v8982_v39 = vld [vmem:[#allocation2 + $0x3c] sm:$0xff]  }
 0x21f   : > { %v2181_v1 = vrot.slane %v2179_v50, 5  ;;  %v2185_v30 = vrot.slane %v2183_v53, 4  ;;  %8637 = vmatmul.mubr.msk.bf16.gmra.mrb[88].mxu0 %vm1516_vm6, %v7964_v55  ;;  %v3976_v34 = vsel %vm9607_vm12, %v3971_v56, %v3975_v22  ;;  %v3988_v59 = vshrl.u32 %v3624_v54, 16  ;;  %v9019_v22 = vld [vmem:[#allocation7 + $0x50] sm:$0xff]   ;;  %v8986_v55 = vld [vmem:[#allocation2 + $0x54] sm:$0xff]  }
 0x220   : > { %v3981_v58 = vrot.slane %v3980_v52, 4  ;;  %v3991_v60 = vshll.u32 %v3624_v54, 16  ;;  %v2176_v61 = vor.u32 %v2175_v14, %v2172_v51  ;;  %v2191_v0 = vrot.slane %v2189_v28, 5  ;;  %v8984_v53 = vld [vmem:[#allocation2 + $0x48] sm:$0xff]   ;;  %v8987_v51 = vld [vmem:[#allocation2 + $0x54] sm:$0xff]  }
 0x221   : > { %v2186_v63 = vor.u32 %v2185_v30, %v2181_v1  ;;  %v3997_v3 = vshll.u32 %v3625_v45, 16  ;;  %v3990_v57 = vrot.slane %v3988_v59, 4  ;;  %v4001_v7 = vshrl.u32 %v3625_v45, 16  ;;  %v8985_v54 = vld [vmem:[#allocation2 + $0x48] sm:$0xff]   ;;  %v8989_v59 = vld [vmem:[#allocation2 + $0x60] sm:$0xff]  }
 0x222   : > { %v3986_v4 = vsel %vm9607_vm12, %v3981_v58, %v3985_v49  ;;  %v3993_v6 = vrot.slane %v3991_v60, 5  ;;  %v2177_v36 = vrot.slane %v2176_v61, 4  ;;  %v4007_v16 = vshll.u32 %v3626_v2, 16  ;;  %v8983_v49 = vld [vmem:[#allocation2 + $0x3c] sm:$0xff]   ;;  %v8990_v60 = vld [vmem:[#allocation2 + $0x6c] sm:$0xff]  }
 0x223   : > { %v7965_v8 = vcombine.low %v3976_v34, %v3986_v4  ;;  %v2187_v12 = vrot.slane %v2186_v63, 4  ;;  %v3999_v13 = vrot.slane %v3997_v3, 5  ;;  %v4003_v44 = vrot.slane %v4001_v7, 4  ;;  %v8991_v63 = vld [vmem:[#allocation2 + $0x6c] sm:$0xff]   ;;  %v8992_v2 = vld [vmem:[#allocation2 + $0x78] sm:$0xff]  }
 0x224   : > { %v3994_v15 = vor.u32 %v3993_v6, %v3990_v57  ;;  %v2182_v17 = vsel %vm9607_vm12, %v2177_v36, %v2181_v1  ;;  %v4009_v62 = vrot.slane %v4007_v16, 5  ;;  %v8988_v1 = vld [vmem:[#allocation2 + $0x60] sm:$0xff]   ;;  %v10027_v4 = vld [vmem:[#allocation2 + $0x10] sm:$0xf]  ;;  %v8994_v6 = vld [vmem:[#allocation2 + $0x78] sm:$0xff]  }
 0x225   : > { %8640 = vmatprep.mubr.msk.bf16.mxu0 %vm1516_vm6, %v7965_v8  ;;  %v2192_v24 = vsel %vm9607_vm12, %v2187_v12, %v2191_v0  ;;  %v4004_v41 = vor.u32 %v4003_v44, %v3999_v13  ;;  %v6197_v7 = vld [vmem:[#allocation2 + $0x1c] sm:$0xf]  ;;  %v8995_v8 = vld [vmem:[#allocation2 + $0x84] sm:$0xff]   ;;  %v4479_v36 = vrot.slane %v10027_v4, 5  ;;  %v4381_v44 = vld [vmem:[#allocation2 + $0xc] sm:$0xe] }
 0x226   : > { %v7848_v5 = vcombine.low %v2182_v17, %v2192_v24  ;;  %v3995_v46 = vrot.slane %v3994_v15, 4  ;;  %v10034_v12 = vld [vmem:[#allocation2 + $0x1c] sm:$0xf]  ;;  %v8996_v15 = vld [vmem:[#allocation2 + $0x84] sm:$0xff]   ;;  %v6294_v16 = vrot.slane %v6197_v7, 5  ;;  %v8997_v24 = vld [vmem:[#allocation2 + $0x90] sm:$0xff]  }
 0x227   : > { %v4005_v20 = vrot.slane %v4004_v41, 4  ;;  %v9000_v4 = vld [vmem:[#allocation2 + $0x9c] sm:$0xff]  }
 0x228   : > { %8533 = vmatmul.mubr.msk.bf16.gmra.mrb[60].mxu1 %vm1516_vm6, %v7848_v5  ;;  %v4000_v47 = vsel %vm9607_vm12, %v3995_v46, %v3999_v13  ;;  %v4383_v5 = vld [vmem:[#allocation2 + $0x14] sm:$0x1]  ;;  %v6196_v46 = vld [vmem:[#allocation2 + $0x18] sm:$0xe] }
 0x229   : > { %8576 = vmatprep.mubr.msk.bf16.mxu1 %vm1516_vm6, %v8972_v18  ;;  %v4010_v10 = vsel %vm9607_vm12, %v4005_v20, %v4009_v62  ;;  %v6198_v18 = vld [vmem:[#allocation2 + $0x20] sm:$0x1]  ;;  %v4486_v20 = vrot.slane %v10034_v12, 5 }
 0x22a   : > { %v7966_v21 = vcombine.low %v4000_v47, %v4010_v10  ;;  %v4384_v47 = vld [vmem:[#allocation2 + $0x18] sm:$0xe]  ;;  %v8998_v10 = vld [vmem:[#allocation2 + $0x90] sm:$0xff]   ;;  %v10097_v12 = vld [vmem:[#allocation2 + $0x40] sm:$0xf] }
 0x22c   : > { %8641 = vmatmul.mubr.msk.bf16.gmra.mrb[92].mxu0 %vm1516_vm6, %v7966_v21  ;;  %v4481_v21 = vrot.slane %v4479_v36, 4 }
 0x22d   : > { %8684 = vmatprep.mubr.msk.bf16.mxu0 %vm1516_vm6, %v8974_v23  ;;  %v4386_v23 = vld [vmem:[#allocation2 + $0x20] sm:$0x1] }
 0x22f   : > { %v8470_v27 = vpop.f32.mrb[0].mxu1 }
 0x230   : > { %8577 = vmatmul.mubr.msk.bf16.vlgmr.msra.gmra.mrb[64].mxu1 %vm1516_vm6, %v8976_v48  ;;  %1728 = vst.msk [vmem:[#allocation3 + $0x10] sm:$0xff] %vm1516_vm6, %v8470_v27  ;;  %v1599_v29 = vpop.f32.mrb[1].mxu1  ;;  %v10046_v48 = vld [vmem:[#allocation2 + $0x28] sm:$0xf]  ;;  %v10053_v27 = vld [vmem:[#allocation2 + $0x34] sm:$0xf] }
 0x231   : > { %8645 = vmatpush3.bf16.msra.mxu1 %v9019_v22  ;;  %8580 = vmatprep.mubr.msk.bf16.mxu1 %vm1516_vm6, %v8977_v26  ;;  %1726 = vst.msk [vmem:[#allocation3] sm:$0xff] %vm1516_vm6, %v1599_v29  ;;  %v8471_v35 = vpop.f32.mrb[2].mxu1  ;;  %v6296_v26 = vrot.slane %v6294_v16, 4  ;;  %v10051_v22 = vld [vmem:[#allocation2 + $0x24] sm:$0xe] }
 0x232   : > { %8646 = vmatprep.subr.bf16.mxu1 %v8993_v25  ;;  %1729 = vst.msk [vmem:[#allocation3 + $0x18] sm:$0xff] %vm1516_vm6, %v8471_v35  ;;  %v1602_v37 = vpop.f32.mrb[3].mxu1  ;;  %v8103_v35 = vrot.slane %v6196_v46, 9 }
 0x233   : > { %1727 = vst.msk [vmem:[#allocation3 + $0x8] sm:$0xff] %vm1516_vm6, %v1602_v37 }
 0x234   : > { %8685 = vmatmul.mubr.msk.bf16.vlgmr.msra.gmra.mrb[96].mxu0 %vm1516_vm6, %v8979_v31  ;;  %v7985_v31 = vrot.slane %v4381_v44, 9  ;;  %v9001_v44 = vld [vmem:[#allocation2 + $0xa8] sm:$0xff]  }
 0x235   : > { %8647 = vmatpush3.bf16.msra.mxu1 %v8993_v25  ;;  %8688 = vmatprep.mubr.msk.bf16.mxu0 %vm1516_vm6, %v8980_v9  ;;  %v10048_v25 = vld [vmem:[#allocation2 + $0x28] sm:$0xf]  ;;  %v10056_v9 = vld [vmem:[#allocation2 + $0x34] sm:$0xf] }
 0x236   : > { %8753 = vmatpush3.bf16.msra.mxu0 %v9910_v11  ;;  %8716 = vmatprep.subr.bf16.mxu1 %v9989_v32 }
 0x237   : > { %8754 = vmatprep.subr.bf16.mxu0 %v9010_v33  ;;  %v8474_v42 = vpop.f32.mrb[4].mxu1 }
 0x238   : > { %8581 = vmatmul.mubr.msk.bf16.gmra.mrb[68].mxu1 %vm1516_vm6, %v8981_v38  ;;  %1732 = vst.msk [vmem:[#allocation3 + $0x30] sm:$0xff] %vm1516_vm6, %v8474_v42  ;;  %v1615_v43 = vpop.f32.mrb[5].mxu1  ;;  %v8999_v38 = vld [vmem:[#allocation2 + $0x9c] sm:$0xff]   ;;  %v4488_v42 = vrot.slane %v4486_v20, 4 }
 0x239   : > { %8584 = vmatprep.mubr.msk.bf16.mxu1 %vm1516_vm6, %v8982_v39  ;;  %1730 = vst.msk [vmem:[#allocation3 + $0x20] sm:$0xff] %vm1516_vm6, %v1615_v43  ;;  %v8475_v50 = vpop.f32.mrb[6].mxu1  ;;  %v6297_v39 = vrot.slane %v6198_v18, 5  ;;  %v4493_v43 = vrot.slane %v10046_v48, 5  ;;  %v10107_v18 = vld [vmem:[#allocation2 + $0x3c] sm:$0xe] }
 0x23a   : > { %8755 = vmatpush3.bf16.msra.mxu0 %v9010_v33  ;;  %1733 = vst.msk [vmem:[#allocation3 + $0x38] sm:$0xff] %vm1516_vm6, %v8475_v50  ;;  %v1618_v11 = vpop.f32.mrb[7].mxu1  ;;  %v4482_v33 = vrot.slane %v4383_v5, 5 }
 0x23b   : > { %1731 = vst.msk [vmem:[#allocation3 + $0x28] sm:$0xff] %vm1516_vm6, %v1618_v11  ;;  %v7986_v11 = vrot.slane %v4384_v47, 9  ;;  %v4495_v7 = vrot.slane %v4493_v43, 4  ;;  %v10109_v47 = vld [vmem:[#allocation2 + $0x4c] sm:$0xf] }
 0x23c   : > { %8689 = vmatmul.mubr.msk.bf16.gmra.mrb[100].mxu0 %vm1516_vm6, %v8983_v49  ;;  %v6301_v49 = vrot.slane %v10048_v25, 5  ;;  %v7989_v25 = vrot.slane %v10107_v18, 9  ;;  %v4396_v18 = vld [vmem:[#allocation2 + $0x48] sm:$0xe] }
 0x23d   : > { %8692 = vmatprep.mubr.msk.bf16.mxu0 %vm1516_vm6, %v8984_v53  ;;  %v10065_v53 = vsel %vm9462_vm9, %v4481_v21, %v4482_v33  ;;  %v9002_v21 = vld [vmem:[#allocation2 + $0xa8] sm:$0xff]  }
 0x240   : > { %8585 = vmatmul.mubr.msk.bf16.gmra.mrb[72].mxu1 %vm1516_vm6, %v8985_v54  ;;  %v4389_v54 = vld [vmem:[#allocation2 + $0x2c] sm:$0x1] }
 0x241   : > { %8588 = vmatprep.mubr.msk.bf16.mxu1 %vm1516_vm6, %v8986_v55  ;;  %v8478_v52 = vpop.f32.mrb[8].mxu1  ;;  %v6199_v55 = vld [vmem:[#allocation2 + $0x24] sm:$0xe] }
 0x242   : > { %v10008_v56 = vpop.f32.mrb[32].mxu0  ;;  %1736 = vst.msk [vmem:[#allocation3 + $0x50] sm:$0xff] %vm1516_vm6, %v8478_v52  ;;  %v1631_v14 = vpop.f32.mrb[9].mxu1  ;;  %v8104_v5 = vrot.slane %v6199_v55, 9  ;;  %v6207_v55 = vld [vmem:[#allocation2 + $0x44] sm:$0x1] }
 0x243   : > { %v10010_v45 = vpop.f32.mrb[33].mxu0  ;;  %1734 = vst.msk [vmem:[#allocation3 + $0x40] sm:$0xff] %vm1516_vm6, %v1631_v14  ;;  %v8479_v28 = vpop.f32.mrb[10].mxu1  ;;  %v4489_v14 = vrot.slane %v4386_v23, 5  ;;  %v4496_v23 = vrot.slane %v4389_v54, 5 }
 0x244   : > { %v10013_v30 = vpop.f32.mrb[34].mxu0  ;;  %8693 = vmatmul.mubr.msk.bf16.gmra.mrb[104].mxu0 %vm1516_vm6, %v8987_v51  ;;  %1737 = vst.msk [vmem:[#allocation3 + $0x58] sm:$0xff] %vm1516_vm6, %v8479_v28  ;;  %v1634_v58 = vpop.f32.mrb[11].mxu1  ;;  %v10071_v51 = vsel %vm9462_vm9, %v6296_v26, %v6297_v39  ;;  %v6202_v28 = vld [vmem:[#allocation2 + $0x30] sm:$0xe] }
 0x245   : > { %v10017_v34 = vpop.f32.mrb[35].mxu0  ;;  %8696 = vmatprep.mubr.msk.bf16.mxu0 %vm1516_vm6, %v8988_v1  ;;  %1735 = vst.msk [vmem:[#allocation3 + $0x48] sm:$0xff] %vm1516_vm6, %v1634_v58  ;;  %v6201_v1 = vld [vmem:[#allocation2 + $0x2c] sm:$0x1]  ;;  %v6308_v58 = vrot.slane %v10053_v27, 5  ;;  %v8105_v46 = vrot.slane %v6202_v28, 9 }
 0x246   : > { %v6304_v48 = vrot.slane %v6201_v1, 5  ;;  %v6205_v54 = vld [vmem:[#allocation2 + $0x3c] sm:$0xe]  ;;  %v6208_v28 = vld [vmem:[#allocation2 + $0x48] sm:$0xe] }
 0x247   : > { %v6310_v26 = vrot.slane %v6308_v58, 4 }
 0x248   : > { %8589 = vmatmul.mubr.msk.bf16.gmra.mrb[76].mxu1 %vm1516_vm6, %v8989_v59  ;;  %v10077_v59 = vsel %vm9462_vm9, %v7985_v31, %v4479_v36  ;;  %v4392_v36 = vld [vmem:[#allocation2 + $0x38] sm:$0x1] }
 0x249   : > { %8592 = vmatprep.mubr.msk.bf16.mxu1 %vm1516_vm6, %v8990_v60  ;;  %v8482_v61 = vpop.f32.mrb[12].mxu1  ;;  %v10081_v60 = vsel %vm9462_vm9, %v8103_v35, %v6294_v16  ;;  %v4395_v35 = vld [vmem:[#allocation2 + $0x44] sm:$0x1]  ;;  %v4503_v1 = vrot.slane %v4392_v36, 5  ;;  %v10184_v36 = vld [vmem:[#allocation2 + $0x54] sm:$0xe] }
 0x24a   : > { %1740 = vst.msk [vmem:[#allocation3 + $0x70] sm:$0xff] %vm1516_vm6, %v8482_v61  ;;  %v1647_v0 = vpop.f32.mrb[13].mxu1  ;;  %v7987_v61 = vrot.slane %v10051_v22, 9  ;;  %v6214_v16 = vld [vmem:[#allocation2 + $0x60] sm:$0xe] }
 0x24b   : > { %1738 = vst.msk [vmem:[#allocation3 + $0x60] sm:$0xff] %vm1516_vm6, %v1647_v0  ;;  %v8483_v3 = vpop.f32.mrb[14].mxu1  ;;  %v10084_v0 = vld [vmem:[#allocation2 + $0x30] sm:$0xe] }
 0x24c   : > { %8697 = vmatmul.mubr.msk.bf16.gmra.mrb[108].mxu0 %vm1516_vm6, %v8991_v63  ;;  %1741 = vst.msk [vmem:[#allocation3 + $0x78] sm:$0xff] %vm1516_vm6, %v8483_v3  ;;  %v1650_v57 = vpop.f32.mrb[15].mxu1  ;;  %v6204_v63 = vld [vmem:[#allocation2 + $0x38] sm:$0x1]  ;;  %v10087_v3 = vld [vmem:[#allocation2 + $0x40] sm:$0xf]  ;;  %v10122_v31 = vsel %vm9462_vm9, %v7987_v61, %v4493_v43 }
 0x24d   : > { %8700 = vmatprep.mubr.msk.bf16.mxu0 %vm1516_vm6, %v8992_v2  ;;  %1739 = vst.msk [vmem:[#allocation3 + $0x68] sm:$0xff] %vm1516_vm6, %v1650_v57  ;;  %v4500_v2 = vrot.slane %v10056_v9, 5  ;;  %v8001_v57 = vcombine.low %v10077_v59, %v10065_v53  ;;  %v4507_v22 = vrot.slane %v10087_v3, 5  ;;  %v6311_v43 = vrot.slane %v6204_v63, 5 }
 0x24e   : > { %v6322_v61 = vrot.slane %v10109_v47, 5  ;;  %v4398_v47 = vld [vmem:[#allocation2 + $0x50] sm:$0x1] }
 0x24f   : > { %v4502_v33 = vrot.slane %v4500_v2, 4  ;;  %v10155_v3 = vsel %vm9462_vm9, %v6310_v26, %v6311_v43  ;;  %v8106_v26 = vrot.slane %v6205_v54, 9  ;;  %v10179_v43 = vld [vmem:[#allocation2 + $0x58] sm:$0xf] }
 0x250   : > { %8593 = vmatmul.mubr.msk.bf16.gmra.mrb[80].mxu1 %vm1516_vm6, %v8994_v6  ;;  %v10036_v13 = vpop.f32.mrb[36].mxu0  ;;  %v10093_v6 = vsel %vm9462_vm9, %v4488_v42, %v4489_v14  ;;  %v10133_v42 = vsel %vm9462_vm9, %v4495_v7, %v4496_v23  ;;  %v10149_v14 = vsel %vm9462_vm9, %v8105_v46, %v6308_v58  ;;  %v10159_v58 = vld [vmem:[#allocation2 + $0x58] sm:$0xf] }
 0x251   : > { %12063 = vst [vmem:[#allocation16_spill] sm:$0xff] %v10036_v13  ;;  %8596 = vmatprep.mubr.msk.bf16.mxu1 %vm1516_vm6, %v8995_v8  ;;  %v10039_v17 = vpop.f32.mrb[37].mxu0  ;;  %v6303_v8 = vrot.slane %v6301_v49, 4  ;;  %v12038_v9 = vrot.slane %v10159_v58, 5 }
 0x252   : > { %12064 = vst [vmem:[#allocation17_spill] sm:$0xff] %v10039_v17  ;;  %v10041_v41 = vpop.f32.mrb[38].mxu0 }
 0x253   : > { %12065 = vst [vmem:[#allocation18_spill] sm:$0xff] %v10041_v41  ;;  %v10044_v62 = vpop.f32.mrb[39].mxu0 }
 0x254   : > { %12066 = vst [vmem:[#allocation19_spill] sm:$0xff] %v10044_v62  ;;  %8701 = vmatmul.mubr.msk.bf16.gmra.mrb[112].mxu0 %vm1516_vm6, %v8996_v15  ;;  %v8486_v29 = vpop.f32.mrb[16].mxu1 }
 0x255   : > { %8704 = vmatprep.mubr.msk.bf16.mxu0 %vm1516_vm6, %v8997_v24  ;;  %1744 = vst.msk [vmem:[#allocation3 + $0x90] sm:$0xff] %vm1516_vm6, %v8486_v29  ;;  %v1663_v37 = vpop.f32.mrb[17].mxu1  ;;  %v10105_v24 = vsel %vm9462_vm9, %v7986_v11, %v4486_v20  ;;  %v9003_v20 = vld [vmem:[#allocation2 + $0xb4] sm:$0xff]   ;;  %v7988_v11 = vrot.slane %v10084_v0, 9 }
 0x256   : > { %1742 = vst.msk [vmem:[#allocation3 + $0x80] sm:$0xff] %vm1516_vm6, %v1663_v37  ;;  %v8487_v50 = vpop.f32.mrb[18].mxu1  ;;  %v6315_v37 = vrot.slane %v10097_v12, 5  ;;  %v9004_v0 = vld [vmem:[#allocation2 + $0xb4] sm:$0xff]  }
 0x257   : > { %1745 = vst.msk [vmem:[#allocation3 + $0x98] sm:$0xff] %vm1516_vm6, %v8487_v50  ;;  %v1666_v52 = vpop.f32.mrb[19].mxu1  ;;  %v10137_v50 = vsel %vm9462_vm9, %v6303_v8, %v6304_v48  ;;  %v10177_v23 = vsel %vm9462_vm9, %v7988_v11, %v4500_v2  ;;  %v4510_v48 = vrot.slane %v4395_v35, 5  ;;  %v10187_v2 = vld [vmem:[#allocation2 + $0x64] sm:$0xf]  ;;  %v10195_v11 = vsel %vm9462_vm9, %v7989_v25, %v4507_v22 }
 0x258   : > { %8597 = vmatmul.mubr.msk.bf16.gmra.mrb[84].mxu1 %vm1516_vm6, %v8998_v10  ;;  %1743 = vst.msk [vmem:[#allocation3 + $0x88] sm:$0xff] %vm1516_vm6, %v1666_v52  ;;  %v10145_v52 = vsel %vm9462_vm9, %v8104_v5, %v6301_v49  ;;  %v4509_v49 = vrot.slane %v4507_v22, 4  ;;  %v10168_v5 = vsel %vm9462_vm9, %v4502_v33, %v4503_v1  ;;  %v6317_v46 = vrot.slane %v6315_v37, 4  ;;  %v9005_v1 = vld [vmem:[#allocation2 + $0xc0] sm:$0xff]   ;;  %v6213_v35 = vld [vmem:[#allocation2 + $0x5c] sm:$0x1] }
 0x259   : > { %8600 = vmatprep.mubr.msk.bf16.mxu1 %vm1516_vm6, %v8999_v38  ;;  %v10127_v38 = vld [vmem:[#allocation2 + $0x4c] sm:$0xf]  ;;  %v7990_v25 = vrot.slane %v4396_v18, 9  ;;  %v10233_v18 = vld [vmem:[#allocation2 + $0x60] sm:$0xe] }
 0x25a   : > { %v10099_v15 = vpop.f32.mrb[40].mxu0  ;;  %v4514_v7 = vrot.slane %v10127_v38, 5  ;;  %v10199_v54 = vsel %vm9462_vm9, %v4509_v49, %v4510_v48  ;;  %v6329_v49 = vrot.slane %v10179_v43, 5  ;;  %v10215_v48 = vsel %vm9462_vm9, %v8106_v26, %v6315_v37  ;;  %v10236_v26 = vld [vmem:[#allocation2 + $0x70] sm:$0xf] }
 0x25b   : > { %12067 = vst [vmem:[#allocation20_spill] sm:$0xff] %v10099_v15  ;;  %v10111_v10 = vpop.f32.mrb[41].mxu0  ;;  %v4523_v37 = vrot.slane %v12038_v9, 4  ;;  %v9007_v43 = vld [vmem:[#allocation2 + $0xcc] sm:$0xff]   ;;  %v10270_v38 = vld [vmem:[#allocation2 + $0x7c] sm:$0xf] }
 0x25c   : > { %12068 = vst [vmem:[#allocation21_spill] sm:$0xff] %v10111_v10  ;;  %8705 = vmatmul.mubr.msk.bf16.gmra.mrb[116].mxu0 %vm1516_vm6, %v9000_v4  ;;  %v10115_v27 = vpop.f32.mrb[42].mxu0  ;;  %v6210_v4 = vld [vmem:[#allocation2 + $0x50] sm:$0x1]  ;;  %v10259_v53 = vsel %vm9462_vm9, %v7990_v25, %v4514_v7  ;;  %v4416_v15 = vld [vmem:[#allocation2 + $0x98] sm:$0x1] }
 0x25d   : > { %12069 = vst [vmem:[#allocation22_spill] sm:$0xff] %v10115_v27  ;;  %8708 = vmatprep.mubr.msk.bf16.mxu0 %vm1516_vm6, %v9001_v44  ;;  %v10129_v39 = vpop.f32.mrb[43].mxu0  ;;  %v6324_v44 = vrot.slane %v6322_v61, 4  ;;  %v6325_v22 = vrot.slane %v6210_v4, 5  ;;  %v4404_v4 = vld [vmem:[#allocation2 + $0x68] sm:$0x1] }
 0x25e   : > { %12070 = vst [vmem:[#allocation23_spill] sm:$0xff] %v10129_v39  ;;  %v10251_v9 = vld [vmem:[#allocation2 + $0x70] sm:$0xf]  ;;  %v12076_v39 = vrot.slane %v10159_v58, 5  ;;  %v6219_v27 = vld [vmem:[#allocation2 + $0x74] sm:$0x1]  ;;  %v12077_v58 = vcombine.low %v10081_v60, %v10071_v51 }
 0x25f   : > { %v8490_v63 = vpop.f32.mrb[20].mxu1  ;;  %v10229_v12 = vsel %vm9462_vm9, %v6324_v44, %v6325_v22  ;;  %v8109_v44 = vrot.slane %v6214_v16, 9 }
 0x260   : > { %8601 = vmatmul.mubr.msk.bf16.gmra.mrb[88].mxu1 %vm1516_vm6, %v9002_v21  ;;  %1748 = vst.msk [vmem:[#allocation3 + $0xb0] sm:$0xff] %vm1516_vm6, %v8490_v63  ;;  %v1679_v8 = vpop.f32.mrb[21].mxu1  ;;  %v10203_v63 = vld [vmem:[#allocation2 + $0x64] sm:$0xf] }
 0x261   : > { %8604 = vmatprep.mubr.msk.bf16.mxu1 %vm1516_vm6, %v9003_v20  ;;  %1746 = vst.msk [vmem:[#allocation3 + $0xa0] sm:$0xff] %vm1516_vm6, %v1679_v8  ;;  %v8491_v21 = vpop.f32.mrb[22].mxu1  ;;  %v8107_v20 = vrot.slane %v6208_v28, 9  ;;  %v6318_v8 = vrot.slane %v6207_v55, 5  ;;  %v4516_v55 = vrot.slane %v4514_v7, 4 }
 0x262   : > { %1749 = vst.msk [vmem:[#allocation3 + $0xb8] sm:$0xff] %vm1516_vm6, %v8491_v21  ;;  %v1682_v33 = vpop.f32.mrb[23].mxu1  ;;  %v4401_v28 = vld [vmem:[#allocation2 + $0x5c] sm:$0x1]  ;;  %v6211_v21 = vld [vmem:[#allocation2 + $0x54] sm:$0xe] }
 0x263   : > { %1747 = vst.msk [vmem:[#allocation3 + $0xa8] sm:$0xff] %vm1516_vm6, %v1682_v33  ;;  %v10208_v33 = vsel %vm9462_vm9, %v6317_v46, %v6318_v8  ;;  %v10219_v29 = vsel %vm9462_vm9, %v8107_v20, %v6322_v61  ;;  %v6336_v46 = vrot.slane %v10187_v2, 5  ;;  %v6216_v61 = vld [vmem:[#allocation2 + $0x68] sm:$0x1]  ;;  %v8108_v22 = vrot.slane %v6211_v21, 9 }
 0x264   : > { %8709 = vmatmul.mubr.msk.bf16.gmra.mrb[120].mxu0 %vm1516_vm6, %v9004_v0  ;;  %v9006_v0 = vld [vmem:[#allocation2 + $0xc0] sm:$0xff]   ;;  %v4524_v59 = vrot.slane %v4401_v28, 5  ;;  %v6332_v21 = vrot.slane %v6213_v35, 5  ;;  %v12075_v28 = vrot.slane %v10203_v63, 5  ;;  %v6343_v35 = vrot.slane %v10251_v9, 5 }
 0x265   : > { %8712 = vmatprep.mubr.msk.bf16.mxu0 %vm1516_vm6, %v9005_v1  ;;  %v4517_v1 = vrot.slane %v4398_v47, 5  ;;  %v10295_v9 = vld [vmem:[#allocation2 + $0x7c] sm:$0xf] }
 0x266   : > { %v10276_v16 = vsel %vm9462_vm9, %v4523_v37, %v4524_v59  ;;  %v4530_v25 = vrot.slane %v12075_v28, 4  ;;  %v10292_v37 = vsel %vm9462_vm9, %v8108_v22, %v6329_v49  ;;  %v6339_v59 = vrot.slane %v6216_v61, 5 }
 0x267   : > { %v10222_v8 = vpop.f32.mrb[44].mxu0  ;;  %v10248_v2 = vsel %vm9462_vm9, %v4516_v55, %v4517_v1  ;;  %v6338_v1 = vrot.slane %v6336_v46, 4  ;;  %v7992_v28 = vrot.slane %v10233_v18, 9  ;;  %v4531_v61 = vrot.slane %v4404_v4, 5 }
 0x268   : > { %12071 = vst [vmem:[#allocation24_spill] sm:$0xff] %v10222_v8  ;;  %8605 = vmatmul.mubr.msk.bf16.gmra.mrb[92].mxu1 %vm1516_vm6, %v9006_v0  ;;  %v10238_v20 = vpop.f32.mrb[45].mxu0  ;;  %v7991_v0 = vrot.slane %v10184_v36, 9  ;;  %v10268_v8 = vld [vmem:[#allocation2 + $0x6c] sm:$0xe]  ;;  %v6350_v18 = vrot.slane %v10270_v38, 5  ;;  %v12080_v38 = vcombine.low %v10105_v24, %v10093_v6  ;;  %v12082_v6 = vcombine.low %v10122_v31, %v10133_v42 }
 0x269   : > { %12072 = vst [vmem:[#allocation25_spill] sm:$0xff] %v10238_v20  ;;  %8648 = vmatprep.mubr.msk.bf16.mxu1 %vm1516_vm6, %v8001_v57  ;;  %v10253_v47 = vpop.f32.mrb[46].mxu0  ;;  %v6331_v57 = vrot.slane %v6329_v49, 4  ;;  %v10261_v20 = vld [vmem:[#allocation2 + $0x6c] sm:$0xe]  ;;  %v10308_v49 = vsel %vm9462_vm9, %v8109_v44, %v6336_v46  ;;  %v10318_v60 = vsel %vm9462_vm9, %v6338_v1, %v6339_v59  ;;  %v12078_v46 = vrot.slane %v10236_v26, 5 }
 0x26a   : > { %12073 = vst [vmem:[#allocation26_spill] sm:$0xff] %v10253_v47  ;;  %v10263_v55 = vpop.f32.mrb[47].mxu0  ;;  %v10281_v36 = vld [vmem:[#allocation2 + $0x78] sm:$0xe]  ;;  %v10288_v7 = vsel %vm9462_vm9, %v7991_v0, %v12076_v39  ;;  %v10311_v0 = vld [vmem:[#allocation2 + $0x88] sm:$0xf]  ;;  %v10334_v1 = vsel %vm9462_vm9, %v4530_v25, %v4531_v61 }
 0x26b   : > { %12074 = vst [vmem:[#allocation27_spill] sm:$0xff] %v10263_v55  ;;  %v4407_v55 = vld [vmem:[#allocation2 + $0x74] sm:$0x1]  ;;  %v8494_v47 = vpop.f32.mrb[24].mxu1  ;;  %v10304_v39 = vsel %vm9462_vm9, %v6331_v57, %v6332_v21  ;;  %v7993_v22 = vrot.slane %v10261_v20, 9  ;;  %v4537_v4 = vrot.slane %v12078_v46, 4 }
 0x26c   : > { %8713 = vmatmul.mubr.msk.bf16.gmra.mrb[124].mxu0 %vm1516_vm6, %v9007_v43  ;;  %1752 = vst.msk [vmem:[#allocation3 + $0xd0] sm:$0xff] %vm1516_vm6, %v8494_v47  ;;  %v1695_v10 = vpop.f32.mrb[25].mxu1  ;;  %v9011_v43 = vld [vmem:[#allocation7 + $0x78] sm:$0xff]   ;;  %v6222_v44 = vld [vmem:[#allocation2 + $0x80] sm:$0x1]  ;;  %v8110_v20 = vrot.slane %v10268_v8, 9 }
 0x26d   : > { %8756 = vmatprep.mubr.msk.bf16.mxu0 %vm1516_vm6, %v12077_v58  ;;  %1750 = vst.msk [vmem:[#allocation3 + $0xc0] sm:$0xff] %vm1516_vm6, %v1695_v10  ;;  %v8495_v47 = vpop.f32.mrb[26].mxu1  ;;  %v10323_v57 = vld [vmem:[#allocation2 + $0x88] sm:$0xf]  ;;  %v6345_v59 = vrot.slane %v6343_v35, 4  ;;  %v4538_v8 = vrot.slane %v4407_v55, 5 }
 0x26e   : > { %1753 = vst.msk [vmem:[#allocation3 + $0xd8] sm:$0xff] %vm1516_vm6, %v8495_v47  ;;  %v1698_v10 = vpop.f32.mrb[27].mxu1  ;;  %v10337_v58 = vld [vmem:[#allocation2 + $0x78] sm:$0xe]  ;;  %v8111_v25 = vrot.slane %v10281_v36, 9  ;;  %v6346_v31 = vrot.slane %v6219_v27, 5  ;;  %v10385_v47 = vsel %vm9462_vm9, %v8110_v20, %v6343_v35 }
 0x26f   : > { %v10325_v21 = vpop.f32.mrb[48].mxu0  ;;  %1751 = vst.msk [vmem:[#allocation3 + $0xc8] sm:$0xff] %vm1516_vm6, %v1698_v10  ;;  %v4410_v61 = vld [vmem:[#allocation2 + $0x80] sm:$0x1]  ;;  %v12084_v10 = vrot.slane %v10203_v63, 5  ;;  %v6352_v42 = vrot.slane %v6350_v18, 4 }
 0x270   : > { %12079 = vst [vmem:[#allocation28_spill] sm:$0xff] %v10325_v21  ;;  %8649 = vmatmul.mubr.msk.bf16.vlgmr.msra.gmra.mrb[96].mxu1 %vm1516_vm6, %v12080_v38  ;;  %v10340_v51 = vpop.f32.mrb[49].mxu0  ;;  %v10363_v24 = vld [vmem:[#allocation2 + $0x94] sm:$0xf]  ;;  %v4413_v55 = vld [vmem:[#allocation2 + $0x8c] sm:$0x1]  ;;  %v10389_v63 = vsel %vm9462_vm9, %v6345_v59, %v6346_v31  ;;  %v10401_v35 = vsel %vm9462_vm9, %v8111_v25, %v6350_v18 }
 0x271   : > { %12081 = vst [vmem:[#allocation29_spill] sm:$0xff] %v10340_v51  ;;  %8717 = vmatpush3.bf16.msra.mxu1 %v9989_v32  ;;  %8652 = vmatprep.mubr.msk.bf16.mxu1 %vm1516_vm6, %v12082_v6  ;;  %v10352_v38 = vpop.f32.mrb[50].mxu0  ;;  %v10358_v32 = vsel %vm9462_vm9, %v7992_v28, %v12084_v10  ;;  %v10360_v6 = vld [vmem:[#allocation2 + $0x84] sm:$0xe]  ;;  %v12086_v28 = vmov %v12078_v46  ;;  %v10379_v10 = vsel %vm9462_vm9, %v4537_v4, %v4538_v8  ;;  %v6353_v26 = vrot.slane %v6222_v44, 5 }
 0x272   : > { %12083 = vst [vmem:[#allocation30_spill] sm:$0xff] %v10352_v38  ;;  %8718 = vmatprep.subr.bf16.mxu1 %v9011_v43  ;;  %v10365_v36 = vpop.f32.mrb[51].mxu0  ;;  %v10375_v27 = vsel %vm9462_vm9, %v7993_v22, %v12086_v28  ;;  %v10381_v46 = vld [vmem:[#allocation2 + $0x84] sm:$0xe]  ;;  %v12087_v22 = vrot.slane %v10295_v9, 5  ;;  %v12088_v4 = vcombine.low %v10145_v52, %v10137_v50  ;;  %v7994_v20 = vrot.slane %v10337_v58, 9 }
 0x273   : > { %12085 = vst [vmem:[#allocation31_spill] sm:$0xff] %v10365_v36  ;;  %v6225_v36 = vld [vmem:[#allocation2 + $0x8c] sm:$0x1]  ;;  %v6226_v38 = vld [vmem:[#allocation2 + $0x90] sm:$0xe]  ;;  %v12089_v44 = vrot.slane %v10311_v0, 5  ;;  %v12090_v50 = vcombine.low %v10149_v14, %v10155_v3  ;;  %v10419_v18 = vsel %vm9462_vm9, %v6352_v42, %v6353_v26 }
 0x274   : > { %v4544_v28 = vrot.slane %v12087_v22, 4  ;;  %v10393_v51 = vld [vmem:[#allocation2 + $0x94] sm:$0xf]  ;;  %8757 = vmatmul.mubr.msk.bf16.vlgmr.msra.gmra.mrb[128].mxu0 %vm1516_vm6, %v12088_v4  ;;  %v6364_v8 = vrot.slane %v10363_v24, 5  ;;  %v10407_v31 = vld [vmem:[#allocation2 + $0xa0] sm:$0xf] }
 0x275   : > { %8719 = vmatpush3.bf16.msra.mxu1 %v9011_v43  ;;  %v4551_v59 = vrot.slane %v12089_v44, 4  ;;  %v10409_v22 = vld [vmem:[#allocation2 + $0xa0] sm:$0xf]  ;;  %8760 = vmatprep.mubr.msk.bf16.mxu0 %vm1516_vm6, %v12090_v50  ;;  %v4545_v43 = vrot.slane %v4410_v61, 5  ;;  %v12091_v58 = vrot.slane %v10323_v57, 5  ;;  %v7995_v3 = vrot.slane %v10360_v6, 9 }
 0x276   : > { %v10423_v25 = vld [vmem:[#allocation2 + $0xac] sm:$0xf]  ;;  %v4552_v44 = vrot.slane %v4413_v55, 5  ;;  %v6228_v50 = vld [vmem:[#allocation2 + $0x98] sm:$0x1]  ;;  %v8498_v61 = vpop.f32.mrb[28].mxu1 }
 0x277   : > { %v6359_v24 = vrot.slane %v12091_v58, 4  ;;  %v10425_v4 = vld [vmem:[#allocation2 + $0xac] sm:$0xf]  ;;  %v10430_v52 = vld [vmem:[#allocation2 + $0x90] sm:$0xe]  ;;  %v10433_v26 = vpop.f32.mrb[52].mxu0  ;;  %v12093_v58 = vcombine.low %v10177_v23, %v10168_v5  ;;  %v10441_v21 = vsel %vm9462_vm9, %v4544_v28, %v4545_v43 }
 0x278   : > { %12092 = vst [vmem:[#allocation32_spill] sm:$0xff] %v10433_v26  ;;  %v8112_v6 = vrot.slane %v10381_v46, 9  ;;  %v6360_v55 = vrot.slane %v6225_v36, 5  ;;  %v8113_v14 = vrot.slane %v6226_v38, 9  ;;  %v10444_v62 = vpop.f32.mrb[53].mxu0  ;;  %1756 = vst.msk [vmem:[#allocation3 + $0xf0] sm:$0xff] %vm1516_vm6, %v8498_v61  ;;  %v12095_v26 = vcombine.low %v10195_v11, %v10199_v54 }
 0x279   : > { %8653 = vmatmul.mubr.msk.bf16.gmra.mrb[100].mxu1 %vm1516_vm6, %v12093_v58  ;;  %12094 = vst [vmem:[#allocation33_spill] sm:$0xff] %v10444_v62  ;;  %v1711_v42 = vpop.f32.mrb[29].mxu1  ;;  %v12096_v23 = vrot.slane %v10295_v9, 5  ;;  %v10461_v38 = vsel %vm9462_vm9, %v4551_v59, %v4552_v44  ;;  %v6366_v36 = vrot.slane %v6364_v8, 4  ;;  %v10463_v28 = vld [vmem:[#allocation2 + $0x9c] sm:$0xe] }
 0x27a   : > { %8656 = vmatprep.mubr.msk.bf16.mxu1 %vm1516_vm6, %v12095_v26  ;;  %v10465_v43 = vpop.f32.mrb[54].mxu0  ;;  %1754 = vst.msk [vmem:[#allocation3 + $0xe0] sm:$0xff] %vm1516_vm6, %v1711_v42  ;;  %v8499_v11 = vpop.f32.mrb[30].mxu1  ;;  %v10470_v54 = vsel %vm9462_vm9, %v6359_v24, %v6360_v55  ;;  %v4419_v9 = vld [vmem:[#allocation2 + $0xa4] sm:$0x1]  ;;  %v12099_v24 = vrot.slane %v10311_v0, 5  ;;  %v10500_v0 = vsel %vm9462_vm9, %v8113_v14, %v6364_v8 }
 0x27b   : > { %v10457_v46 = vsel %vm9462_vm9, %v7994_v20, %v12096_v23  ;;  %12097 = vst [vmem:[#allocation34_spill] sm:$0xff] %v10465_v43  ;;  %v10473_v26 = vld [vmem:[#allocation2 + $0x9c] sm:$0xe]  ;;  %v10477_v61 = vpop.f32.mrb[55].mxu0  ;;  %1757 = vst.msk [vmem:[#allocation3 + $0xf8] sm:$0xff] %vm1516_vm6, %v8499_v11  ;;  %v1714_v58 = vpop.f32.mrb[31].mxu1 }
 0x27c   : > { %12098 = vst [vmem:[#allocation35_spill] sm:$0xff] %v10477_v61  ;;  %v10486_v55 = vsel %vm9462_vm9, %v7995_v3, %v12099_v24  ;;  %v12100_v23 = vrot.slane %v10393_v51, 5  ;;  %v6231_v59 = vld [vmem:[#allocation2 + $0xa4] sm:$0x1]  ;;  %v6232_v20 = vld [vmem:[#allocation2 + $0xa8] sm:$0xe] }
 0x27d   : > { %v4570_v44 = vrot.slane %v10425_v4, 5  ;;  %1755 = vst.msk [vmem:[#allocation3 + $0xe8] sm:$0xff] %vm1516_vm6, %v1714_v58  ;;  %v12101_v11 = vrot.slane %v10323_v57, 5  ;;  %v6367_v3 = vrot.slane %v6228_v50, 5  ;;  %v7996_v24 = vrot.slane %v10430_v52, 9 }
 0x27e   : > { %v4558_v5 = vrot.slane %v12100_v23, 4  ;;  %v6234_v23 = vld [vmem:[#allocation2 + $0xb0] sm:$0x1]  ;;  %v4420_v61 = vld [vmem:[#allocation2 + $0xa8] sm:$0xe]  ;;  %v12102_v4 = vcombine.low %v10215_v48, %v10208_v33  ;;  %v4559_v58 = vrot.slane %v4416_v15, 5  ;;  %v12103_v52 = vcombine.low %v10219_v29, %v10229_v12 }
 0x27f   : > { %v10496_v42 = vsel %vm9462_vm9, %v8112_v6, %v12101_v11  ;;  %v7997_v8 = vrot.slane %v10463_v28, 9  ;;  %v4422_v14 = vld [vmem:[#allocation2 + $0xb0] sm:$0x1]  ;;  %v4424_v50 = vld [vmem:[#allocation2 + $0xb8] sm:$0xf]  ;;  %v10518_v33 = vsel %vm9462_vm9, %v6366_v36, %v6367_v3  ;;  %v12104_v48 = vrot.slane %v10407_v31, 5 }
 0x280   : > { %8761 = vmatmul.mubr.msk.bf16.gmra.mrb[132].mxu0 %vm1516_vm6, %v12102_v4  ;;  %v12105_v4 = vrot.slane %v10409_v22, 5  ;;  %v12106_v15 = vrot.slane %v10423_v25, 5  ;;  %v4423_v57 = vld [vmem:[#allocation2 + $0xb4] sm:$0xe]  ;;  %v10528_v29 = vsel %vm9462_vm9, %v4558_v5, %v4559_v58  ;;  %v4566_v12 = vrot.slane %v4419_v9, 5  ;;  %v10531_v62 = vpop.f32.mrb[56].mxu0 }
 0x281   : > { %8764 = vmatprep.mubr.msk.bf16.mxu0 %vm1516_vm6, %v12103_v52  ;;  %v4565_v11 = vrot.slane %v12104_v48, 4  ;;  %v6235_v43 = vld [vmem:[#allocation2 + $0xb4] sm:$0xe]  ;;  %v8114_v52 = vrot.slane %v10473_v26, 9  ;;  %v4572_v36 = vrot.slane %v4570_v44, 4  ;;  %v12107_v48 = vcombine.low %v10259_v53, %v10248_v2  ;;  %v10537_v13 = vpop.f32.mrb[57].mxu0 }
 0x282   : > { %v6373_v6 = vrot.slane %v12105_v4, 4  ;;  %v6380_v28 = vrot.slane %v12106_v15, 4  ;;  %v6236_v3 = vld [vmem:[#allocation2 + $0xb8] sm:$0xf]  ;;  %v6374_v4 = vrot.slane %v6231_v59, 5  ;;  %v8115_v15 = vrot.slane %v6232_v20, 9 }
 0x283   : > { %8657 = vmatmul.mubr.msk.bf16.gmra.mrb[104].mxu1 %vm1516_vm6, %v12107_v48  ;;  %v6381_v41 = vrot.slane %v6234_v23, 5  ;;  %v4577_v17 = vrot.slane %v4424_v50, 5  ;;  %v12108_v5 = vcombine.low %v10288_v7, %v10276_v16  ;;  %v12109_v26 = vrot.slane %v10393_v51, 5  ;;  %v10551_v59 = vpop.f32.mrb[58].mxu0  ;;  %v6238_v48 = vld [vmem:[#allocation2 + $0xc0] sm:$0xe] }
 0x284   : > { %v7998_v53 = vrot.slane %v4420_v61, 9  ;;  %v4573_v20 = vrot.slane %v4422_v14, 5  ;;  %v10557_v7 = vsel %vm9462_vm9, %v4565_v11, %v4566_v12  ;;  %v10561_v16 = vsel %vm9462_vm9, %v6373_v6, %v6374_v4  ;;  %v10567_v61 = vld [vmem:[#allocation2 + $0xbc] sm:$0x1]  ;;  %v10569_v58 = vpop.f32.mrb[59].mxu0 }
 0x285   : > { %8660 = vmatprep.mubr.msk.bf16.mxu1 %vm1516_vm6, %v12108_v5  ;;  %v10549_v2 = vsel %vm9462_vm9, %v7996_v24, %v12109_v26  ;;  %v10565_v51 = vsel %vm9462_vm9, %v6380_v28, %v6381_v41  ;;  %v4425_v24 = vld [vmem:[#allocation2 + $0xbc] sm:$0x1]  ;;  %12110 = vst [vmem:[#allocation36_spill] sm:$0xff] %v10569_v58  ;;  %v7999_v50 = vrot.slane %v4423_v57, 9  ;;  %v8116_v11 = vrot.slane %v6235_v43, 9  ;;  %v2470_v58 = vld [vmem:[#allocation3 + $0x18] sm:$0xff] }
 0x286   : > { %v10573_v14 = vsel %vm9462_vm9, %v4572_v36, %v4573_v20  ;;  %v6385_v12 = vrot.slane %v6236_v3, 5  ;;  %v12111_v6 = vrot.slane %v10407_v31, 5  ;;  %v12112_v41 = vrot.slane %v10409_v22, 5  ;;  %v6239_v36 = vld [vmem:[#allocation2 + $0xc4] sm:$0xf]  ;;  %v12157_v19 = vld [vmem:[#allocation34_spill] sm:$0xff] }
 0x287   : > { %v12113_v5 = vrot.slane %v10423_v25, 5  ;;  %v4579_v43 = vrot.slane %v4577_v17, 4  ;;  %v12114_v31 = vcombine.low %v10292_v37, %v10304_v39  ;;  %v5394_v3 = vld [vmem:[#allocation2 + $0x18] sm:$0xf]  ;;  %v10607_v26 = vld [vmem:[#allocation2 + $0x24] sm:$0xf]  ;;  %v12115_v37 = vcombine.low %v10308_v49, %v10318_v60 }
 0x288   : > { %v10579_v4 = vsel %vm9462_vm9, %v7997_v8, %v12111_v6  ;;  %v10585_v28 = vsel %vm9462_vm9, %v8114_v52, %v12112_v41  ;;  %v10605_v52 = vsel %vm9462_vm9, %v7998_v53, %v4570_v44  ;;  %v4580_v20 = vrot.slane %v4425_v24, 5  ;;  %v10616_v41 = vld [vmem:[#allocation2 + $0xc8] sm:$0x1]  ;;  %v10618_v44 = vld [vmem:[#allocation2 + $0xc0] sm:$0xe]  ;;  %v8506_v53 = vpop.f32.mrb[32].mxu1 }
 0x289   : > { %v10591_v57 = vsel %vm9462_vm9, %v8115_v15, %v12113_v5  ;;  %8765 = vmatmul.mubr.msk.bf16.gmra.mrb[136].mxu0 %vm1516_vm6, %v12114_v31  ;;  %v5395_v15 = vld [vmem:[#allocation2 + $0x1c] sm:$0xf]  ;;  %v6388_v6 = vrot.slane %v10567_v61, 5  ;;  %v8117_v5 = vrot.slane %v6238_v48, 9  ;;  %v2469_v31 = vld [vmem:[#allocation3 + $0x10] sm:$0xff]  ;;  %v10622_v25 = vsel %vm9462_vm9, %v7999_v50, %v4577_v17  ;;  %v10630_v61 = vpop.f32.mrb[60].mxu0 }
 0x28a   : > { %8768 = vmatprep.mubr.msk.bf16.mxu0 %vm1516_vm6, %v12115_v37  ;;  %v10626_v49 = vsel %vm9462_vm9, %v8116_v11, %v6385_v12  ;;  %v6392_v60 = vrot.slane %v6239_v36, 5  ;;  %v10628_v37 = vld [vmem:[#allocation2 + $0xc4] sm:$0xf]  ;;  %v5398_v24 = vld [vmem:[#allocation2 + $0x28] sm:$0xf]  ;;  %12116 = vst [vmem:[#allocation37_spill] sm:$0xff] %v10630_v61  ;;  %v2501_v39 = vadd.f32 %v8506_v53, %v2469_v31  ;;  %v12117_v22 = vcombine.low %v10358_v32, %v10334_v1 }
 0x28b   : > { %v2340_v48 = vpop.f32.mrb[33].mxu1  ;;  %v2467_v8 = vld [vmem:[#allocation3] sm:$0xff]  ;;  %v10638_v17 = vsel %vm9462_vm9, %v4579_v43, %v4580_v20  ;;  %v6387_v50 = vrot.slane %v6385_v12, 4  ;;  %v5443_v11 = vshrl.u32 %v5394_v3, 16  ;;  %v10640_v36 = vpop.f32.mrb[61].mxu0  ;;  %v12119_v53 = vcombine.low %v10375_v27, %v10379_v10  ;;  %v2468_v20 = vld [vmem:[#allocation3 + $0x8] sm:$0xff] }
 0x28c   : > { %8661 = vmatmul.mubr.msk.bf16.gmra.mrb[108].mxu1 %vm1516_vm6, %v12117_v22  ;;  %12118 = vst [vmem:[#allocation38_spill] sm:$0xff] %v10640_v36  ;;  %v2499_v23 = vadd.f32 %v2467_v8, %v2340_v48  ;;  %v8507_v9 = vpop.f32.mrb[34].mxu1  ;;  %v5446_v31 = vshll.u32 %v5394_v3, 16  ;;  %v5452_v1 = vshll.u32 %v5395_v15, 16  ;;  %v5456_v32 = vshrl.u32 %v5395_v15, 16  ;;  %v10646_v22 = vpop.f32.mrb[62].mxu0 }
 0x28d   : > { %8664 = vmatprep.mubr.msk.bf16.mxu1 %vm1516_vm6, %v12119_v53  ;;  %12120 = vst [vmem:[#allocation39_spill] sm:$0xff] %v10646_v22  ;;  %2533 = vst.msk [vmem:[#allocation3 + $0x10] sm:$0xff] %vm1516_vm6, %v2501_v39  ;;  %v2502_v43 = vadd.f32 %v8507_v9, %v2470_v58  ;;  %v2343_v12 = vpop.f32.mrb[35].mxu1  ;;  %v5467_v36 = vshrl.u32 %v10607_v26, 16  ;;  %v5470_v8 = vshll.u32 %v10607_v26, 16  ;;  %v5476_v48 = vshll.u32 %v5398_v24, 16 }
 0x28e   : > { %v10651_v61 = vpop.f32.mrb[63].mxu0  ;;  %2531 = vst.msk [vmem:[#allocation3] sm:$0xff] %vm1516_vm6, %v2499_v23  ;;  %v2500_v27 = vadd.f32 %v2468_v20, %v2343_v12  ;;  %v10656_v10 = vsel %vm9462_vm9, %v8117_v5, %v6392_v60  ;;  %v6395_v3 = vrot.slane %v10616_v41, 5  ;;  %v8000_v9 = vrot.slane %v10618_v44, 9  ;;  %v5400_v15 = vld [vmem:[#allocation2 + $0x30] sm:$0xf] }
 0x28f   : > { %12121 = vst [vmem:[#allocation40_spill] sm:$0xff] %v10651_v61  ;;  %v5480_v58 = vshrl.u32 %v5398_v24, 16  ;;  %2534 = vst.msk [vmem:[#allocation3 + $0x18] sm:$0xff] %vm1516_vm6, %v2502_v43  ;;  %v10665_v39 = vsel %vm9462_vm9, %v6387_v50, %v6388_v6  ;;  %v6394_v23 = vrot.slane %v6392_v60, 4  ;;  %v4428_v53 = vld [vmem:[#allocation2 + $0xc8] sm:$0x1]  ;;  %v12122_v41 = vcombine.low %v10385_v47, %v10389_v63 }
 0x290   : > { %v4584_v5 = vrot.slane %v10628_v37, 5  ;;  %v5401_v12 = vld [vmem:[#allocation2 + $0x34] sm:$0xf]  ;;  %2532 = vst.msk [vmem:[#allocation3 + $0x8] sm:$0xff] %vm1516_vm6, %v2500_v27  ;;  %v5445_v44 = vrot.slane %v5443_v11, 4  ;;  %v5448_v24 = vrot.slane %v5446_v31, 5  ;;  %v12123_v6 = vcombine.low %v10401_v35, %v10419_v18 }
 0x291   : > { %8769 = vmatmul.mubr.msk.bf16.gmra.mrb[140].mxu0 %vm1516_vm6, %v12122_v41  ;;  %v10673_v43 = vrot.slane %v5452_v1, 5  ;;  %v5458_v20 = vrot.slane %v5456_v32, 4  ;;  %v5403_v26 = vld [vmem:[#allocation2 + $0x3c] sm:$0xf]  ;;  %v5469_v60 = vrot.slane %v5467_v36, 4  ;;  %v5472_v37 = vrot.slane %v5470_v8, 5 }
 0x292   : > { %8772 = vmatprep.mubr.msk.bf16.mxu0 %vm1516_vm6, %v12123_v6  ;;  %v10679_v50 = vrot.slane %v5476_v48, 5  ;;  %v5491_v27 = vshrl.u32 %v5400_v15, 16  ;;  %v5404_v61 = vld [vmem:[#allocation2 + $0x40] sm:$0xf]  ;;  %v5482_v47 = vrot.slane %v5480_v58, 4  ;;  %v5494_v63 = vshll.u32 %v5400_v15, 16 }
 0x293   : > { %v5500_v41 = vshll.u32 %v5401_v12, 16  ;;  %v5504_v11 = vshrl.u32 %v5401_v12, 16  ;;  %v10681_v31 = vpop.f32.mrb[64].mxu0  ;;  %v12125_v1 = vcombine.low %v10457_v46, %v10441_v21  ;;  %v4587_v18 = vrot.slane %v4428_v53, 5  ;;  %v5396_v46 = vld [vmem:[#allocation2 + $0x20] sm:$0x1] }
 0x294   : > { %12124 = vst [vmem:[#allocation41_spill] sm:$0xff] %v10681_v31  ;;  %v5515_v36 = vshrl.u32 %v5403_v26, 16  ;;  %v5518_v32 = vshll.u32 %v5403_v26, 16  ;;  %v10689_v8 = vpop.f32.mrb[65].mxu0  ;;  %v12127_v48 = vcombine.low %v10486_v55, %v10461_v38  ;;  %v10697_v58 = vsel %vm9462_vm9, %v6394_v23, %v6395_v3  ;;  %v5399_v6 = vld [vmem:[#allocation2 + $0x2c] sm:$0x1] }
 0x295   : > { %8665 = vmatmul.mubr.msk.bf16.gmra.mrb[112].mxu1 %vm1516_vm6, %v12125_v1  ;;  %12126 = vst [vmem:[#allocation42_spill] sm:$0xff] %v10689_v8  ;;  %v4586_v21 = vrot.slane %v4584_v5, 4  ;;  %v5449_v15 = vor.u32 %v5448_v24, %v5445_v44  ;;  %v5459_v12 = vor.u32 %v5458_v20, %v10673_v43  ;;  %v10700_v53 = vpop.f32.mrb[66].mxu0  ;;  %v5473_v26 = vor.u32 %v5472_v37, %v5469_v60  ;;  %v5402_v44 = vld [vmem:[#allocation2 + $0x38] sm:$0x1] }
 0x296   : > { %8668 = vmatprep.mubr.msk.bf16.mxu1 %vm1516_vm6, %v12127_v48  ;;  %12128 = vst [vmem:[#allocation43_spill] sm:$0xff] %v10700_v53  ;;  %v5493_v1 = vrot.slane %v5491_v27, 4  ;;  %v5524_v35 = vshll.u32 %v5404_v61, 16  ;;  %v5528_v8 = vshrl.u32 %v5404_v61, 16  ;;  %v10702_v31 = vpop.f32.mrb[67].mxu0  ;;  %v5483_v38 = vor.u32 %v5482_v47, %v10679_v50 }
 0x297   : > { %v5496_v55 = vrot.slane %v5494_v63, 5  ;;  %v10705_v48 = vrot.slane %v5500_v41, 5  ;;  %v5506_v3 = vrot.slane %v5504_v11, 4  ;;  %v5462_v23 = vshll.u32 %v5396_v46, 16  ;;  %v5406_v47 = vld [vmem:[#allocation2 + $0x48] sm:$0xf] }
 0x298   : > { %v5486_v22 = vshll.u32 %v5399_v6, 16  ;;  %v5517_v24 = vrot.slane %v5515_v36, 4  ;;  %v5520_v20 = vrot.slane %v5518_v32, 5  ;;  %v12129_v53 = vcombine.low %v10496_v42, %v10470_v54  ;;  %v8510_v63 = vpop.f32.mrb[36].mxu1  ;;  %v2473_v41 = vld [vmem:[#allocation3 + $0x30] sm:$0xff]  ;;  %v2471_v32 = vld [vmem:[#allocation3 + $0x20] sm:$0xff] }
 0x299   : > { %v10713_v61 = vsel %vm9462_vm9, %v8000_v9, %v4584_v5  ;;  %v10717_v60 = vsel %vm9462_vm9, %v4586_v21, %v4587_v18  ;;  %v5450_v37 = vrot.slane %v5449_v15, 4  ;;  %v5460_v27 = vrot.slane %v5459_v12, 4  ;;  %v2356_v5 = vpop.f32.mrb[37].mxu1  ;;  %v2474_v6 = vld [vmem:[#allocation3 + $0x38] sm:$0xff] }
 0x29a   : > { %8773 = vmatmul.mubr.msk.bf16.gmra.mrb[144].mxu0 %vm1516_vm6, %v12129_v53  ;;  %v12130_v11 = vcombine.low %v10500_v0, %v10518_v33  ;;  %v5474_v54 = vrot.slane %v5473_v26, 4  ;;  %v10723_v42 = vrot.slane %v5524_v35, 5  ;;  %v5530_v36 = vrot.slane %v5528_v8, 4  ;;  %v8511_v12 = vpop.f32.mrb[38].mxu1  ;;  %v5405_v35 = vld [vmem:[#allocation2 + $0x44] sm:$0x1] }
 0x29b   : > { %v2505_v9 = vadd.f32 %v8510_v63, %v2473_v41  ;;  %v5484_v46 = vrot.slane %v5483_v38, 4  ;;  %v5497_v18 = vor.u32 %v5496_v55, %v5493_v1  ;;  %v5507_v21 = vor.u32 %v5506_v3, %v10705_v48  ;;  %v2359_v63 = vpop.f32.mrb[39].mxu1  ;;  %v2472_v38 = vld [vmem:[#allocation3 + $0x28] sm:$0xff]  ;;  %v5407_v3 = vld [vmem:[#allocation2 + $0x4c] sm:$0xf] }
 0x29c   : > { %8776 = vmatprep.mubr.msk.bf16.mxu0 %vm1516_vm6, %v12130_v11  ;;  %v2503_v15 = vadd.f32 %v2471_v32, %v2356_v5  ;;  %v12131_v53 = vcombine.low %v10549_v2, %v10528_v29  ;;  %v5464_v0 = vrot.slane %v5462_v23, 5  ;;  %v5488_v33 = vrot.slane %v5486_v22, 5 }
 0x29d   : > { %v5521_v26 = vor.u32 %v5520_v20, %v5517_v24  ;;  %2537 = vst.msk [vmem:[#allocation3 + $0x30] sm:$0xff] %vm1516_vm6, %v2505_v9  ;;  %v2506_v8 = vadd.f32 %v8511_v12, %v2474_v6  ;;  %v12132_v1 = vcombine.low %v10579_v4, %v10557_v7  ;;  %v5510_v55 = vshll.u32 %v5402_v44, 16  ;;  %v5409_v44 = vld [vmem:[#allocation2 + $0x54] sm:$0xf]  ;;  %v6241_v6 = vld [vmem:[#allocation2 + $0xcc] sm:$0xe] }
 0x29e   : > { %8669 = vmatmul.mubr.msk.bf16.gmra.mrb[116].mxu1 %vm1516_vm6, %v12131_v53  ;;  %v5539_v41 = vshrl.u32 %v5406_v47, 16  ;;  %v5542_v29 = vshll.u32 %v5406_v47, 16  ;;  %2535 = vst.msk [vmem:[#allocation3 + $0x20] sm:$0xff] %vm1516_vm6, %v2503_v15  ;;  %v2504_v2 = vadd.f32 %v2472_v38, %v2359_v63  ;;  %v5455_v22 = vsel %vm9607_vm12, %v5450_v37, %v10673_v43  ;;  %v6242_v53 = vld [vmem:[#allocation2 + $0xd0] sm:$0xf]  ;;  %v3050_v63 = vld [vmem:[#allocation3 + $0x10] sm:$0xff] }
 0x29f   : > { %8672 = vmatprep.mubr.msk.bf16.mxu1 %vm1516_vm6, %v12132_v1  ;;  %v5465_v23 = vsel %vm9607_vm12, %v5460_v27, %v5464_v0  ;;  %v5479_v7 = vsel %vm9607_vm12, %v5474_v54, %v10679_v50  ;;  %v5531_v4 = vor.u32 %v5530_v36, %v10723_v42  ;;  %2538 = vst.msk [vmem:[#allocation3 + $0x38] sm:$0xff] %vm1516_vm6, %v2506_v8  ;;  %v10748_v20 = vrot.slane %v5497_v18, 4  ;;  %v5408_v50 = vld [vmem:[#allocation2 + $0x50] sm:$0x1]  ;;  %v6243_v8 = vld [vmem:[#allocation2 + $0xd4] sm:$0x1] }
 0x2a0   : > { %v5489_v24 = vsel %vm9607_vm12, %v5484_v46, %v5488_v33  ;;  %v10750_v47 = vrot.slane %v5507_v21, 4  ;;  %v5534_v43 = vshll.u32 %v5405_v35, 16  ;;  %2536 = vst.msk [vmem:[#allocation3 + $0x28] sm:$0xff] %vm1516_vm6, %v2504_v2  ;;  %v8133_v37 = vcombine.low %v10656_v10, %v10697_v58  ;;  %v10767_v46 = vld [vmem:[#allocation2 + $0x58] sm:$0xf] }
 0x2a1   : > { %v10755_v27 = vrot.slane %v5521_v26, 4  ;;  %v5548_v11 = vshll.u32 %v5407_v3, 16  ;;  %v5552_v54 = vshrl.u32 %v5407_v3, 16  ;;  %v12133_v36 = vcombine.low %v10585_v28, %v10561_v16  ;;  %v10791_v35 = vld [vmem:[#allocation2 + $0x60] sm:$0xf]  ;;  %v10793_v26 = vpop.f32.mrb[68].mxu0 }
 0x2a2   : > { %v10761_v9 = vrot.slane %v5510_v55, 5  ;;  %v10763_v5 = vrot.slane %v5539_v41, 4  ;;  %v10765_v32 = vrot.slane %v5542_v29, 5  ;;  %v5563_v18 = vshrl.u32 %v5409_v44, 16  ;;  %v10805_v29 = vpop.f32.mrb[69].mxu0  ;;  %v3048_v2 = vld [vmem:[#allocation3] sm:$0xff] }
 0x2a3   : > { %8777 = vmatmul.mubr.msk.bf16.gmra.mrb[148].mxu0 %vm1516_vm6, %v12133_v36  ;;  %v12134_v21 = vcombine.low %v10591_v57, %v10565_v51  ;;  %v8016_v15 = vcombine.low %v10713_v61, %v10717_v60  ;;  %v10775_v16 = vcombine.low %v5455_v22, %v5465_v23  ;;  %v10777_v28 = vcombine.low %v5479_v7, %v5489_v24  ;;  %v10816_v7 = vpop.f32.mrb[70].mxu0  ;;  %v2478_v60 = vld [vmem:[#allocation3 + $0x58] sm:$0xff] }
 0x2a4   : > { %v10779_v12 = vrot.slane %v5531_v4, 4  ;;  %v5503_v0 = vsel %vm9607_vm12, %v10748_v20, %v10705_v48  ;;  %v5513_v51 = vsel %vm9607_vm12, %v10750_v47, %v10761_v9  ;;  %v10789_v57 = vrot.slane %v5534_v43, 5  ;;  %v10822_v43 = vpop.f32.mrb[71].mxu0  ;;  %v10908_v9 = vld [vmem:[#allocation2 + $0x74] sm:$0x1] }
 0x2a5   : > { %8780 = vmatprep.mubr.msk.bf16.mxu0 %vm1516_vm6, %v12134_v21  ;;  %v5566_v33 = vshll.u32 %v5409_v44, 16  ;;  %v12135_v38 = vcombine.low %v10605_v52, %v10573_v14  ;;  %v10803_v55 = vrot.slane %v5548_v11, 5  ;;  %v5554_v3 = vrot.slane %v5552_v54, 4  ;;  %v3051_v44 = vld [vmem:[#allocation3 + $0x18] sm:$0xff]  ;;  %v3049_v11 = vld [vmem:[#allocation3 + $0x8] sm:$0xff]  ;;  %v3054_v54 = vld [vmem:[#allocation3 + $0x30] sm:$0xff] }
 0x2a6   : > { %v5558_v41 = vshll.u32 %v5408_v50, 16  ;;  %v12136_v22 = vcombine.low %v10622_v25, %v10638_v17  ;;  %v5545_v14 = vor.u32 %v10765_v32, %v10763_v5  ;;  %v10813_v52 = vrot.slane %v5563_v18, 4  ;;  %v3052_v36 = vld [vmem:[#allocation3 + $0x20] sm:$0xff] }
 0x2a7   : > { %8673 = vmatmul.mubr.msk.bf16.gmra.mrb[120].mxu1 %vm1516_vm6, %v12135_v38  ;;  %v5572_v23 = vshll.u32 %v10767_v46, 16  ;;  %v6399_v4 = vrot.slane %v6242_v53, 5  ;;  %v5537_v24 = vsel %vm9607_vm12, %v10779_v12, %v10789_v57  ;;  %v8118_v25 = vrot.slane %v6241_v6, 9  ;;  %v3055_v53 = vld [vmem:[#allocation3 + $0x38] sm:$0xff]  ;;  %v3053_v38 = vld [vmem:[#allocation3 + $0x28] sm:$0xff] }
 0x2a8   : > { %8676 = vmatprep.mubr.msk.bf16.mxu1 %vm1516_vm6, %v12136_v22  ;;  %v6402_v17 = vrot.slane %v6243_v8, 5  ;;  %v3082_v50 = vadd.f32 %v10008_v56, %v3050_v63  ;;  %v5568_v5 = vrot.slane %v5566_v33, 5  ;;  %v5576_v32 = vshrl.u32 %v10767_v46, 16  ;;  %v5413_v46 = vld [vmem:[#allocation2 + $0x64] sm:$0xf]  ;;  %v12138_v63 = vld [vmem:[#allocation16_spill] sm:$0xff] }
 0x2a9   : > { %v6401_v18 = vrot.slane %v6399_v4, 4  ;;  %v3080_v21 = vadd.f32 %v3048_v2, %v10010_v45  ;;  %v5555_v22 = vor.u32 %v5554_v3, %v10803_v55  ;;  %v10828_v1 = vrot.slane %v5558_v41, 5  ;;  %v12139_v41 = vld [vmem:[#allocation17_spill] sm:$0xff] }
 0x2aa   : > { %v5587_v6 = vshrl.u32 %v10791_v35, 16  ;;  %3114 = vst.msk [vmem:[#allocation3 + $0x10] sm:$0xff] %vm1516_vm6, %v3082_v50  ;;  %v3083_v56 = vadd.f32 %v10013_v30, %v3051_v44  ;;  %v12137_v33 = vcombine.low %v10626_v49, %v10665_v39  ;;  %v5590_v45 = vshll.u32 %v10791_v35, 16  ;;  %v5411_v30 = vld [vmem:[#allocation2 + $0x5c] sm:$0x1] }
 0x2ab   : > { %3112 = vst.msk [vmem:[#allocation3] sm:$0xff] %vm1516_vm6, %v3080_v21  ;;  %v3081_v8 = vadd.f32 %v3049_v11, %v10017_v34  ;;  %v3086_v3 = vadd.f32 %v12138_v63, %v3054_v54  ;;  %v3084_v2 = vadd.f32 %v3052_v36, %v12139_v41  ;;  %v10846_v49 = vld [vmem:[#allocation2 + $0x68] sm:$0x1]  ;;  %v5415_v39 = vld [vmem:[#allocation2 + $0x6c] sm:$0xf]  ;;  %v6400_v35 = vsel %vm9462_vm9, %v8118_v25, %v6399_v4  ;;  %v12140_v34 = vld [vmem:[#allocation18_spill] sm:$0xff] }
 0x2ac   : > { %8781 = vmatmul.mubr.msk.bf16.gmra.mrb[152].mxu0 %vm1516_vm6, %v12137_v33  ;;  %v6403_v44 = vsel %vm9462_vm9, %v6401_v18, %v6402_v17  ;;  %3115 = vst.msk [vmem:[#allocation3 + $0x18] sm:$0xff] %vm1516_vm6, %v3083_v56  ;;  %v3087_v50 = vadd.f32 %v12140_v34, %v3055_v53  ;;  %v12141_v11 = vld [vmem:[#allocation19_spill] sm:$0xff]  ;;  %v5546_v36 = vrot.slane %v5545_v14, 4  ;;  %v5569_v10 = vor.u32 %v5568_v5, %v10813_v52  ;;  %v8514_v21 = vpop.f32.mrb[40].mxu1  ;;  %v2477_v33 = vld [vmem:[#allocation3 + $0x50] sm:$0xff]  ;;  %v2475_v25 = vld [vmem:[#allocation3 + $0x40] sm:$0xff] }
 0x2ad   : > { %8784 = vmatprep.mubr.msk.bf16.mxu0 %vm1516_vm6, %v8133_v37  ;;  %v3085_v54 = vadd.f32 %v3053_v38, %v12141_v11  ;;  %v10856_v58 = vrot.slane %v5572_v23, 5  ;;  %v5578_v37 = vrot.slane %v5576_v32, 4  ;;  %3113 = vst.msk [vmem:[#allocation3 + $0x8] sm:$0xff] %vm1516_vm6, %v3081_v8  ;;  %3118 = vst.msk [vmem:[#allocation3 + $0x30] sm:$0xff] %vm1516_vm6, %v3086_v3  ;;  %v5556_v40 = vrot.slane %v5555_v22, 4  ;;  %v2372_v23 = vpop.f32.mrb[41].mxu1 }
 0x2ae   : > { %3116 = vst.msk [vmem:[#allocation3 + $0x20] sm:$0xff] %vm1516_vm6, %v3084_v2  ;;  %v5589_v14 = vrot.slane %v5587_v6, 4  ;;  %v5596_v4 = vshll.u32 %v5413_v46, 16  ;;  %v2509_v52 = vadd.f32 %v8514_v21, %v2477_v33  ;;  %3119 = vst.msk [vmem:[#allocation3 + $0x38] sm:$0xff] %vm1516_vm6, %v3087_v50  ;;  %v5592_v17 = vrot.slane %v5590_v45, 5  ;;  %v8515_v61 = vpop.f32.mrb[42].mxu1 }
 0x2af   : > { %8677 = vmatmul.mubr.msk.bf16.gmra.mrb[124].mxu1 %vm1516_vm6, %v8016_v15  ;;  %3117 = vst.msk [vmem:[#allocation3 + $0x28] sm:$0xff] %vm1516_vm6, %v3085_v54  ;;  %v5600_v5 = vshrl.u32 %v5413_v46, 16  ;;  %v5416_v32 = vld [vmem:[#allocation2 + $0x70] sm:$0xf]  ;;  %v2507_v18 = vadd.f32 %v2475_v25, %v2372_v23  ;;  %v8134_v15 = vcombine.low %v6400_v35, %v6403_v44  ;;  %v5582_v53 = vshll.u32 %v5411_v30, 16  ;;  %v2375_v56 = vpop.f32.mrb[43].mxu1 }
 0x2b0   : > { %8720 = vmatprep.mubr.msk.bf16.mxu1 %vm1516_vm6, %v10775_v16  ;;  %v5611_v38 = vshrl.u32 %v5415_v39, 16  ;;  %v5614_v22 = vshll.u32 %v5415_v39, 16  ;;  %2541 = vst.msk [vmem:[#allocation3 + $0x50] sm:$0xff] %vm1516_vm6, %v2509_v52  ;;  %v2510_v6 = vadd.f32 %v8515_v61, %v2478_v60  ;;  %v2476_v8 = vld [vmem:[#allocation3 + $0x48] sm:$0xff]  ;;  %v10870_v63 = vrot.slane %v5569_v10, 4  ;;  %v9020_v50 = vld [vmem:[%s9393_s8] sm:$0xff]  }
 0x2b1   : > { %v5579_v3 = vor.u32 %v5578_v37, %v10856_v58  ;;  %v5606_v16 = vshll.u32 %v10846_v49, 16  ;;  %2539 = vst.msk [vmem:[#allocation3 + $0x40] sm:$0xff] %vm1516_vm6, %v2507_v18  ;;  %v2508_v46 = vadd.f32 %v2476_v8, %v2375_v56  ;;  %v5551_v45 = vsel %vm9607_vm12, %v5546_v36, %v10803_v55  ;;  %v5418_v35 = vld [vmem:[#allocation2 + $0x78] sm:$0xf]  ;;  %v5419_v44 = vld [vmem:[#allocation2 + $0x7c] sm:$0xf] }
 0x2b2   : > { %v5561_v41 = vsel %vm9607_vm12, %v5556_v40, %v10828_v1  ;;  %v5620_v2 = vshll.u32 %v5416_v32, 16  ;;  %v5624_v30 = vshrl.u32 %v5416_v32, 16  ;;  %2542 = vst.msk [vmem:[#allocation3 + $0x58] sm:$0xff] %vm1516_vm6, %v2510_v6  ;;  %v8071_v55 = vcombine.low %v5503_v0, %v5513_v51  ;;  %v5421_v34 = vld [vmem:[#allocation2 + $0x84] sm:$0xf]  ;;  %v12143_v32 = vld [vmem:[#allocation20_spill] sm:$0xff] }
 0x2b3   : > { %v5593_v49 = vor.u32 %v5592_v17, %v5589_v14  ;;  %v10892_v39 = vrot.slane %v5596_v4, 5  ;;  %v5602_v1 = vrot.slane %v5600_v5, 4  ;;  %2540 = vst.msk [vmem:[#allocation3 + $0x48] sm:$0xff] %vm1516_vm6, %v2508_v46  ;;  %v12142_v48 = vsel %vm9607_vm12, %v10755_v27, %v10723_v42  ;;  %v5422_v27 = vld [vmem:[#allocation2 + $0x88] sm:$0xf]  ;;  %v12145_v46 = vld [vmem:[#allocation22_spill] sm:$0xff] }
 0x2b4   : > { %8785 = vmatmul.mubr.msk.bf16.gmra.mrb[156].mxu0 %vm1516_vm6, %v8134_v15  ;;  %v8072_v20 = vcombine.low %v12142_v48, %v5537_v24  ;;  %v10906_v47 = vrot.slane %v5582_v53, 5  ;;  %v5613_v0 = vrot.slane %v5611_v38, 4  ;;  %v5616_v51 = vrot.slane %v5614_v22, 5  ;;  %v10920_v24 = vpop.f32.mrb[72].mxu0  ;;  %v12144_v38 = vld [vmem:[#allocation21_spill] sm:$0xff] }
 0x2b5   : > { %8832 = vmatprep.mubr.msk.bf16.mxu0 %vm619_vm0, %v9020_v50  ;;  %v8073_v11 = vcombine.low %v5551_v45, %v5561_v41  ;;  %v5575_v12 = vsel %vm9607_vm12, %v10870_v63, %v10856_v58  ;;  %v10916_v57 = vrot.slane %v5579_v3, 4  ;;  %v10918_v42 = vrot.slane %v5606_v16, 5  ;;  %v10926_v21 = vpop.f32.mrb[73].mxu0  ;;  %v5424_v16 = vld [vmem:[#allocation2 + $0x90] sm:$0xf] }
 0x2b6   : > { %v10924_v54 = vrot.slane %v5620_v2, 5  ;;  %v5626_v36 = vrot.slane %v5624_v30, 4  ;;  %v5635_v10 = vshrl.u32 %v5418_v35, 16  ;;  %v5638_v37 = vshll.u32 %v5418_v35, 16  ;;  %v10932_v52 = vpop.f32.mrb[74].mxu0 }
 0x2b7   : > { %8721 = vmatmul.mubr.msk.bf16.vlgmr.msra.gmra.mrb[128].mxu1 %vm1516_vm6, %v10777_v28  ;;  %v10929_v33 = vrot.slane %v5593_v49, 4  ;;  %v5603_v40 = vor.u32 %v5602_v1, %v10892_v39  ;;  %v5644_v14 = vshll.u32 %v5419_v44, 16  ;;  %v5648_v4 = vshrl.u32 %v5419_v44, 16  ;;  %v3058_v23 = vld [vmem:[#allocation3 + $0x50] sm:$0xff]  ;;  %v10934_v5 = vpop.f32.mrb[75].mxu0  ;;  %v12146_v49 = vld [vmem:[#allocation23_spill] sm:$0xff] }
 0x2b8   : > { %8724 = vmatprep.mubr.msk.bf16.mxu1 %vm1516_vm6, %v8071_v55  ;;  %v5617_v25 = vor.u32 %v5616_v51, %v5613_v0  ;;  %v5659_v28 = vshrl.u32 %v5421_v34, 16  ;;  %v5662_v17 = vshll.u32 %v5421_v34, 16  ;;  %v3090_v18 = vadd.f32 %v12143_v32, %v3058_v23  ;;  %v3056_v61 = vld [vmem:[#allocation3 + $0x40] sm:$0xff]  ;;  %v5425_v0 = vld [vmem:[#allocation2 + $0x94] sm:$0xf] }
 0x2b9   : > { %v5630_v60 = vshll.u32 %v10908_v9, 16  ;;  %v5668_v15 = vshll.u32 %v5422_v27, 16  ;;  %v5672_v53 = vshrl.u32 %v5422_v27, 16  ;;  %v3088_v22 = vadd.f32 %v3056_v61, %v12144_v38  ;;  %v3059_v6 = vld [vmem:[#allocation3 + $0x58] sm:$0xff]  ;;  %v5420_v51 = vld [vmem:[#allocation2 + $0x80] sm:$0x1] }
 0x2ba   : > { %v5627_v56 = vor.u32 %v5626_v36, %v10924_v54  ;;  %v5637_v8 = vrot.slane %v5635_v10, 4  ;;  %v5640_v3 = vrot.slane %v5638_v37, 5  ;;  %3122 = vst.msk [vmem:[#allocation3 + $0x50] sm:$0xff] %vm1516_vm6, %v3090_v18  ;;  %v3091_v45 = vadd.f32 %v12145_v46, %v3059_v6  ;;  %v3057_v41 = vld [vmem:[#allocation3 + $0x48] sm:$0xff]  ;;  %v2482_v38 = vld [vmem:[#allocation3 + $0x78] sm:$0xff] }
 0x2bb   : > { %v5604_v2 = vrot.slane %v5603_v40, 4  ;;  %v10942_v30 = vrot.slane %v5644_v14, 5  ;;  %v5650_v55 = vrot.slane %v5648_v4, 4  ;;  %3120 = vst.msk [vmem:[#allocation3 + $0x40] sm:$0xff] %vm1516_vm6, %v3088_v22  ;;  %v3089_v1 = vadd.f32 %v3057_v41, %v12146_v49  ;;  %v5423_v4 = vld [vmem:[#allocation2 + $0x8c] sm:$0x1] }
 0x2bc   : > { %v5585_v35 = vsel %vm9607_vm12, %v10916_v57, %v10906_v47  ;;  %v5618_v44 = vrot.slane %v5617_v25, 4  ;;  %v5661_v48 = vrot.slane %v5659_v28, 4  ;;  %v5664_v9 = vrot.slane %v5662_v17, 5  ;;  %3123 = vst.msk [vmem:[#allocation3 + $0x58] sm:$0xff] %vm1516_vm6, %v3091_v45  ;;  %v2481_v28 = vld [vmem:[#allocation3 + $0x70] sm:$0xff] }
 0x2bd   : > { %v10951_v34 = vrot.slane %v5668_v15, 5  ;;  %v5674_v50 = vrot.slane %v5672_v53, 4  ;;  %v5683_v27 = vshrl.u32 %v5424_v16, 16  ;;  %v5686_v36 = vshll.u32 %v5424_v16, 16  ;;  %3121 = vst.msk [vmem:[#allocation3 + $0x48] sm:$0xff] %vm1516_vm6, %v3089_v1  ;;  %v2480_v16 = vld [vmem:[#allocation3 + $0x68] sm:$0xff] }
 0x2be   : > { %v5599_v47 = vsel %vm9607_vm12, %v10929_v33, %v10892_v39  ;;  %v5628_v57 = vrot.slane %v5627_v56, 4  ;;  %v5632_v10 = vrot.slane %v5630_v60, 5  ;;  %v5641_v37 = vor.u32 %v5640_v3, %v5637_v8  ;;  %v5427_v8 = vld [vmem:[#allocation2 + $0x9c] sm:$0xf] }
 0x2bf   : > { %8725 = vmatmul.mubr.msk.bf16.gmra.mrb[132].mxu1 %vm1516_vm6, %v8072_v20  ;;  %v5609_v40 = vsel %vm9607_vm12, %v5604_v2, %v10918_v42  ;;  %v5651_v14 = vor.u32 %v5650_v55, %v10942_v30  ;;  %v5692_v23 = vshll.u32 %v5425_v0, 16  ;;  %v5696_v25 = vshrl.u32 %v5425_v0, 16  ;;  %v8518_v20 = vpop.f32.mrb[44].mxu1  ;;  %v5428_v2 = vld [vmem:[#allocation2 + $0xa0] sm:$0xf] }
 0x2c0   : > { %8728 = vmatprep.mubr.msk.bf16.mxu1 %vm1516_vm6, %v8073_v11  ;;  %v5623_v39 = vsel %vm9607_vm12, %v5618_v44, %v10924_v54  ;;  %v5654_v33 = vshll.u32 %v5420_v51, 16  ;;  %v5665_v17 = vor.u32 %v5664_v9, %v5661_v48  ;;  %v2513_v32 = vadd.f32 %v8518_v20, %v2481_v28  ;;  %v2388_v18 = vpop.f32.mrb[45].mxu1  ;;  %v2479_v11 = vld [vmem:[#allocation3 + $0x60] sm:$0xff]  ;;  %v5430_v9 = vld [vmem:[#allocation2 + $0xa8] sm:$0xf] }
 0x2c1   : > { %v5675_v61 = vor.u32 %v5674_v50, %v10951_v34  ;;  %v5685_v60 = vrot.slane %v5683_v27, 4  ;;  %v5688_v42 = vrot.slane %v5686_v36, 5  ;;  %v2511_v15 = vadd.f32 %v2479_v11, %v2388_v18  ;;  %v8519_v53 = vpop.f32.mrb[46].mxu1  ;;  %v5431_v36 = vld [vmem:[#allocation2 + $0xac] sm:$0xf] }
 0x2c2   : > { %v5633_v22 = vsel %vm9607_vm12, %v5628_v57, %v5632_v10  ;;  %v10970_v6 = vrot.slane %v5641_v37, 4  ;;  %v5678_v56 = vshll.u32 %v5423_v4, 16  ;;  %2545 = vst.msk [vmem:[#allocation3 + $0x70] sm:$0xff] %vm1516_vm6, %v2513_v32  ;;  %v2514_v54 = vadd.f32 %v8519_v53, %v2482_v38  ;;  %v2391_v3 = vpop.f32.mrb[47].mxu1  ;;  %v10988_v57 = vpop.f32.mrb[76].mxu0  ;;  %v12147_v53 = vld [vmem:[#allocation24_spill] sm:$0xff] }
 0x2c3   : > { %v5652_v46 = vrot.slane %v5651_v14, 4  ;;  %v10973_v45 = vrot.slane %v5692_v23, 5  ;;  %v5698_v41 = vrot.slane %v5696_v25, 4  ;;  %2543 = vst.msk [vmem:[#allocation3 + $0x60] sm:$0xff] %vm1516_vm6, %v2511_v15  ;;  %v2512_v55 = vadd.f32 %v2480_v16, %v2391_v3  ;;  %v10994_v23 = vpop.f32.mrb[77].mxu0 }
 0x2c4   : > { %v8074_v49 = vcombine.low %v5575_v12, %v5585_v35  ;;  %v8075_v1 = vcombine.low %v5599_v47, %v5609_v40  ;;  %v5656_v44 = vrot.slane %v5654_v33, 5  ;;  %v5666_v48 = vrot.slane %v5665_v17, 4  ;;  %2546 = vst.msk [vmem:[#allocation3 + $0x78] sm:$0xff] %vm1516_vm6, %v2514_v54  ;;  %v5426_v12 = vld [vmem:[#allocation2 + $0x98] sm:$0x1] }
 0x2c5   : > { %v8076_v0 = vcombine.low %v5623_v39, %v5633_v22  ;;  %v5676_v51 = vrot.slane %v5675_v61, 4  ;;  %v5689_v50 = vor.u32 %v5688_v42, %v5685_v60  ;;  %v5707_v27 = vshrl.u32 %v5427_v8, 16  ;;  %2544 = vst.msk [vmem:[#allocation3 + $0x68] sm:$0xff] %vm1516_vm6, %v2512_v55  ;;  %v5429_v40 = vld [vmem:[#allocation2 + $0xa4] sm:$0x1]  ;;  %v10999_v39 = vpop.f32.mrb[78].mxu0 }
 0x2c6   : > { %v5647_v58 = vsel %vm9607_vm12, %v10970_v6, %v10942_v30  ;;  %v5680_v63 = vrot.slane %v5678_v56, 5  ;;  %v5710_v35 = vshll.u32 %v5427_v8, 16  ;;  %v5716_v47 = vshll.u32 %v5428_v2, 16  ;;  %v11003_v11 = vpop.f32.mrb[79].mxu0  ;;  %v12148_v8 = vld [vmem:[#allocation25_spill] sm:$0xff]  ;;  %v12149_v55 = vld [vmem:[#allocation26_spill] sm:$0xff] }
 0x2c7   : > { %8729 = vmatmul.mubr.msk.bf16.gmra.mrb[136].mxu1 %vm1516_vm6, %v8074_v49  ;;  %v5657_v10 = vsel %vm9607_vm12, %v5652_v46, %v5656_v44  ;;  %v5699_v37 = vor.u32 %v5698_v41, %v10973_v45  ;;  %v5720_v14 = vshrl.u32 %v5428_v2, 16  ;;  %v5731_v4 = vshrl.u32 %v5430_v9, 16  ;;  %v11009_v16 = vld [vmem:[#allocation2 + $0xb0] sm:$0x1] }
 0x2c8   : > { %8732 = vmatprep.mubr.msk.bf16.mxu1 %vm1516_vm6, %v8075_v1  ;;  %v5671_v30 = vsel %vm9607_vm12, %v5666_v48, %v10951_v34  ;;  %v5734_v25 = vshll.u32 %v5430_v9, 16  ;;  %v5740_v20 = vshll.u32 %v5431_v36, 16  ;;  %v5744_v28 = vshrl.u32 %v5431_v36, 16  ;;  %v5433_v9 = vld [vmem:[#allocation2 + $0xb4] sm:$0xf] }
 0x2c9   : > { %v5681_v33 = vsel %vm9607_vm12, %v5676_v51, %v5680_v63  ;;  %v5690_v17 = vrot.slane %v5689_v50, 4  ;;  %v5702_v32 = vshll.u32 %v5426_v12, 16  ;;  %v5709_v18 = vrot.slane %v5707_v27, 4  ;;  %v3062_v61 = vld [vmem:[#allocation3 + $0x70] sm:$0xff]  ;;  %v12150_v51 = vld [vmem:[#allocation27_spill] sm:$0xff] }
 0x2ca   : > { %v5712_v60 = vrot.slane %v5710_v35, 5  ;;  %v11005_v42 = vrot.slane %v5716_v47, 5  ;;  %v5726_v15 = vshll.u32 %v5429_v40, 16  ;;  %v3094_v34 = vadd.f32 %v12147_v53, %v3062_v61  ;;  %v3060_v38 = vld [vmem:[#allocation3 + $0x60] sm:$0xff]  ;;  %v5436_v35 = vld [vmem:[#allocation2 + $0xc0] sm:$0xf] }
 0x2cb   : > { %v5700_v22 = vrot.slane %v5699_v37, 4  ;;  %v5722_v6 = vrot.slane %v5720_v14, 4  ;;  %v5733_v56 = vrot.slane %v5731_v4, 4  ;;  %v3092_v54 = vadd.f32 %v3060_v38, %v12148_v8  ;;  %v3063_v3 = vld [vmem:[#allocation3 + $0x78] sm:$0xff]  ;;  %v5434_v12 = vld [vmem:[#allocation2 + $0xb8] sm:$0xf] }
 0x2cc   : > { %v5736_v46 = vrot.slane %v5734_v25, 5  ;;  %v11011_v41 = vrot.slane %v5740_v20, 5  ;;  %v5746_v2 = vrot.slane %v5744_v28, 4  ;;  %3126 = vst.msk [vmem:[#allocation3 + $0x70] sm:$0xff] %vm1516_vm6, %v3094_v34  ;;  %v3095_v49 = vadd.f32 %v12149_v55, %v3063_v3  ;;  %v3061_v1 = vld [vmem:[#allocation3 + $0x68] sm:$0xff]  ;;  %v2485_v25 = vld [vmem:[#allocation3 + $0x90] sm:$0xff] }
 0x2cd   : > { %v8077_v44 = vcombine.low %v5647_v58, %v5657_v10  ;;  %v5704_v48 = vrot.slane %v5702_v32, 5  ;;  %3124 = vst.msk [vmem:[#allocation3 + $0x60] sm:$0xff] %vm1516_vm6, %v3092_v54  ;;  %v3093_v50 = vadd.f32 %v3061_v1, %v12150_v51  ;;  %v8078_v27 = vcombine.low %v5671_v30, %v5681_v33  ;;  %v5437_v37 = vld [vmem:[#allocation2 + $0xc4] sm:$0xf]  ;;  %v8522_v30 = vpop.f32.mrb[48].mxu1  ;;  %v2486_v38 = vld [vmem:[#allocation3 + $0x98] sm:$0xff] }
 0x2ce   : > { %v5695_v36 = vsel %vm9607_vm12, %v5690_v17, %v10973_v45  ;;  %v11021_v63 = vrot.slane %v5726_v15, 5  ;;  %3127 = vst.msk [vmem:[#allocation3 + $0x78] sm:$0xff] %vm1516_vm6, %v3095_v49  ;;  %v5713_v47 = vor.u32 %v5712_v60, %v5709_v18  ;;  %v5723_v10 = vor.u32 %v5722_v6, %v11005_v42  ;;  %v2404_v32 = vpop.f32.mrb[49].mxu1  ;;  %v2483_v18 = vld [vmem:[#allocation3 + $0x80] sm:$0xff]  ;;  %v2484_v3 = vld [vmem:[#allocation3 + $0x88] sm:$0xff] }
 0x2cf   : > { %8733 = vmatmul.mubr.msk.bf16.gmra.mrb[140].mxu1 %vm1516_vm6, %v8076_v0  ;;  %v5705_v58 = vsel %vm9607_vm12, %v5700_v22, %v5704_v48  ;;  %v5750_v0 = vshll.u32 %v11009_v16, 16  ;;  %3125 = vst.msk [vmem:[#allocation3 + $0x68] sm:$0xff] %vm1516_vm6, %v3093_v50  ;;  %v5737_v45 = vor.u32 %v5736_v46, %v5733_v56  ;;  %v5747_v40 = vor.u32 %v5746_v2, %v11011_v41  ;;  %v8523_v34 = vpop.f32.mrb[50].mxu1  ;;  %v5439_v16 = vld [vmem:[#allocation2 + $0xcc] sm:$0xf] }
 0x2d0   : > { %8736 = vmatprep.mubr.msk.bf16.mxu1 %vm1516_vm6, %v8077_v44  ;;  %v5755_v14 = vshrl.u32 %v5433_v9, 16  ;;  %v5758_v4 = vshll.u32 %v5433_v9, 16  ;;  %v5764_v20 = vshll.u32 %v5434_v12, 16  ;;  %v5768_v28 = vshrl.u32 %v5434_v12, 16  ;;  %v2407_v54 = vpop.f32.mrb[51].mxu1 }
 0x2d1   : > { %v5779_v33 = vshrl.u32 %v5436_v35, 16  ;;  %v2517_v17 = vadd.f32 %v8522_v30, %v2485_v25  ;;  %v5782_v61 = vshll.u32 %v5436_v35, 16  ;;  %v5788_v60 = vshll.u32 %v5437_v37, 16  ;;  %v5440_v1 = vld [vmem:[#allocation2 + $0xd0] sm:$0xf] }
 0x2d2   : > { %v5792_v15 = vshrl.u32 %v5437_v37, 16  ;;  %v2515_v53 = vadd.f32 %v2483_v18, %v2404_v32  ;;  %v8079_v22 = vcombine.low %v5695_v36, %v5705_v58  ;;  %v5714_v6 = vrot.slane %v5713_v47, 4  ;;  %v5435_v50 = vld [vmem:[#allocation2 + $0xbc] sm:$0x1]  ;;  %v11041_v47 = vpop.f32.mrb[80].mxu0 }
 0x2d3   : > { %v5724_v56 = vrot.slane %v5723_v10, 4  ;;  %2549 = vst.msk [vmem:[#allocation3 + $0x90] sm:$0xff] %vm1516_vm6, %v2517_v17  ;;  %v2518_v8 = vadd.f32 %v8523_v34, %v2486_v38  ;;  %v5738_v46 = vrot.slane %v5737_v45, 4  ;;  %v5757_v2 = vrot.slane %v5755_v14, 4 }
 0x2d4   : > { %v5760_v55 = vrot.slane %v5758_v4, 5  ;;  %2547 = vst.msk [vmem:[#allocation3 + $0x80] sm:$0xff] %vm1516_vm6, %v2515_v53  ;;  %v2516_v49 = vadd.f32 %v2484_v3, %v2407_v54  ;;  %v5748_v44 = vrot.slane %v5747_v40, 4  ;;  %v11033_v48 = vrot.slane %v5764_v20, 5  ;;  %v11049_v4 = vpop.f32.mrb[81].mxu0  ;;  %v12151_v53 = vld [vmem:[#allocation28_spill] sm:$0xff] }
 0x2d5   : > { %v5770_v9 = vrot.slane %v5768_v28, 4  ;;  %v5781_v51 = vrot.slane %v5779_v33, 4  ;;  %2550 = vst.msk [vmem:[#allocation3 + $0x98] sm:$0xff] %vm1516_vm6, %v2518_v8  ;;  %v5784_v36 = vrot.slane %v5782_v61, 5  ;;  %v11037_v12 = vrot.slane %v5788_v60, 5  ;;  %v11055_v17 = vpop.f32.mrb[82].mxu0 }
 0x2d6   : > { %v5794_v35 = vrot.slane %v5792_v15, 4  ;;  %2548 = vst.msk [vmem:[#allocation3 + $0x88] sm:$0xff] %vm1516_vm6, %v2516_v49  ;;  %v5803_v58 = vshrl.u32 %v5439_v16, 16  ;;  %v5806_v10 = vshll.u32 %v5439_v16, 16  ;;  %v5812_v37 = vshll.u32 %v5440_v1, 16  ;;  %v11060_v18 = vpop.f32.mrb[83].mxu0 }
 0x2d7   : > { %8737 = vmatmul.mubr.msk.bf16.gmra.mrb[144].mxu1 %vm1516_vm6, %v8078_v27  ;;  %v5816_v45 = vshrl.u32 %v5440_v1, 16  ;;  %v5719_v40 = vsel %vm9607_vm12, %v5714_v6, %v11005_v42  ;;  %v5729_v27 = vsel %vm9607_vm12, %v5724_v56, %v11021_v63  ;;  %v5752_v14 = vrot.slane %v5750_v0, 5  ;;  %v5438_v33 = vld [vmem:[#allocation2 + $0xc8] sm:$0x1]  ;;  %v5441_v56 = vld [vmem:[#allocation2 + $0xd4] sm:$0x1] }
 0x2d8   : > { %8740 = vmatprep.mubr.msk.bf16.mxu1 %vm1516_vm6, %v8079_v22  ;;  %v5743_v30 = vsel %vm9607_vm12, %v5738_v46, %v11011_v41  ;;  %v5761_v25 = vor.u32 %v5760_v55, %v5757_v2  ;;  %v5771_v20 = vor.u32 %v5770_v9, %v11033_v48  ;;  %v5774_v28 = vshll.u32 %v5435_v50, 16  ;;  %v12152_v8 = vld [vmem:[#allocation29_spill] sm:$0xff]  ;;  %v12153_v55 = vld [vmem:[#allocation30_spill] sm:$0xff] }
 0x2d9   : > { %v5753_v42 = vsel %vm9607_vm12, %v5748_v44, %v5752_v14  ;;  %v5785_v32 = vor.u32 %v5784_v36, %v5781_v51  ;;  %v5795_v63 = vor.u32 %v5794_v35, %v11037_v12  ;;  %v5805_v0 = vrot.slane %v5803_v58, 4  ;;  %v12154_v51 = vld [vmem:[#allocation31_spill] sm:$0xff] }
 0x2da   : > { %v3066_v61 = vld [vmem:[#allocation3 + $0x90] sm:$0xff]  ;;  %v5808_v60 = vrot.slane %v5806_v10, 5  ;;  %v5814_v15 = vrot.slane %v5812_v37, 5  ;;  %v5818_v41 = vrot.slane %v5816_v45, 4  ;;  %v8080_v22 = vcombine.low %v5719_v40, %v5729_v27  ;;  %v8526_v37 = vpop.f32.mrb[52].mxu1 }
 0x2db   : > { %v3098_v34 = vadd.f32 %v12151_v53, %v3066_v61  ;;  %v3064_v38 = vld [vmem:[#allocation3 + $0x80] sm:$0xff]  ;;  %v5798_v6 = vshll.u32 %v5438_v33, 16  ;;  %v8081_v16 = vcombine.low %v5743_v30, %v5753_v42  ;;  %v5762_v46 = vrot.slane %v5761_v25, 4  ;;  %v2489_v45 = vld [vmem:[#allocation3 + $0xb0] sm:$0xff]  ;;  %v2420_v14 = vpop.f32.mrb[53].mxu1  ;;  %v2490_v42 = vld [vmem:[#allocation3 + $0xb8] sm:$0xff] }
 0x2dc   : > { %v3096_v54 = vadd.f32 %v3064_v38, %v12152_v8  ;;  %v3067_v3 = vld [vmem:[#allocation3 + $0x98] sm:$0xff]  ;;  %v5772_v2 = vrot.slane %v5771_v20, 4  ;;  %v5786_v44 = vrot.slane %v5785_v32, 4  ;;  %v5796_v9 = vrot.slane %v5795_v63, 4  ;;  %v2487_v30 = vld [vmem:[#allocation3 + $0xa0] sm:$0xff]  ;;  %v8527_v33 = vpop.f32.mrb[54].mxu1 }
 0x2dd   : > { %3130 = vst.msk [vmem:[#allocation3 + $0x90] sm:$0xff] %vm1516_vm6, %v3098_v34  ;;  %v3099_v49 = vadd.f32 %v12153_v55, %v3067_v3  ;;  %v3065_v1 = vld [vmem:[#allocation3 + $0x88] sm:$0xff]  ;;  %v5776_v36 = vrot.slane %v5774_v28, 5  ;;  %v5809_v35 = vor.u32 %v5808_v60, %v5805_v0  ;;  %v5819_v58 = vor.u32 %v5818_v41, %v5814_v15  ;;  %v2423_v61 = vpop.f32.mrb[55].mxu1 }
 0x2de   : > { %3128 = vst.msk [vmem:[#allocation3 + $0x80] sm:$0xff] %vm1516_vm6, %v3096_v54  ;;  %v3097_v50 = vadd.f32 %v3065_v1, %v12154_v51  ;;  %v5822_v10 = vshll.u32 %v5441_v56, 16  ;;  %v5800_v40 = vrot.slane %v5798_v6, 5  ;;  %v2521_v27 = vadd.f32 %v8526_v37, %v2489_v45  ;;  %v2488_v60 = vld [vmem:[#allocation3 + $0xa8] sm:$0xff]  ;;  %v2493_v37 = vld [vmem:[#allocation3 + $0xd0] sm:$0xff] }
 0x2df   : > { %8741 = vmatmul.mubr.msk.bf16.gmra.mrb[148].mxu1 %vm1516_vm6, %v8080_v22  ;;  %3131 = vst.msk [vmem:[#allocation3 + $0x98] sm:$0xff] %vm1516_vm6, %v3099_v49  ;;  %v5767_v25 = vsel %vm9607_vm12, %v5762_v46, %v11033_v48  ;;  %v5777_v20 = vsel %vm9607_vm12, %v5772_v2, %v5776_v36  ;;  %v2519_v28 = vadd.f32 %v2487_v30, %v2420_v14  ;;  %v5810_v41 = vrot.slane %v5809_v35, 4  ;;  %v12156_v49 = vld [vmem:[#allocation33_spill] sm:$0xff]  ;;  %v9013_v36 = vld [vmem:[%s12025_s10] sm:$0xff]  }
 0x2e0   : > { %8744 = vmatprep.mubr.msk.bf16.mxu1 %vm1516_vm6, %v8081_v16  ;;  %3129 = vst.msk [vmem:[#allocation3 + $0x88] sm:$0xff] %vm1516_vm6, %v3097_v50  ;;  %v5791_v32 = vsel %vm9607_vm12, %v5786_v44, %v11037_v12  ;;  %v5801_v63 = vsel %vm9607_vm12, %v5796_v9, %v5800_v40  ;;  %2553 = vst.msk [vmem:[#allocation3 + $0xb0] sm:$0xff] %vm1516_vm6, %v2521_v27  ;;  %v2522_v0 = vadd.f32 %v8527_v33, %v2490_v42  ;;  %v12155_v16 = vld [vmem:[#allocation32_spill] sm:$0xff]  ;;  %v9012_v50 = vld [vmem:[%s12018_s3] sm:$0xff]  }
 0x2e1   : > { %v5820_v48 = vrot.slane %v5819_v58, 4  ;;  %v5824_v53 = vrot.slane %v5822_v10, 5  ;;  %2551 = vst.msk [vmem:[#allocation3 + $0xa0] sm:$0xff] %vm1516_vm6, %v2519_v28  ;;  %v2520_v34 = vadd.f32 %v2488_v60, %v2423_v61  ;;  %v8082_v38 = vcombine.low %v5767_v25, %v5777_v20  ;;  %v12158_v35 = vld [vmem:[#allocation35_spill] sm:$0xff]  ;;  %8788 = vmatprep.subr.bf16.mxu1 %v9012_v50  ;;  %8824 = vmatprep.subr.bf16.mxu0 %v9013_v36  ;;  %v2491_v27 = vld [vmem:[#allocation3 + $0xc0] sm:$0xff]  ;;  %v2494_v25 = vld [vmem:[#allocation3 + $0xd8] sm:$0xff] }
 0x2e2   : > { %2554 = vst.msk [vmem:[#allocation3 + $0xb8] sm:$0xff] %vm1516_vm6, %v2522_v0  ;;  %v8083_v22 = vcombine.low %v5791_v32, %v5801_v63  ;;  %v5815_v12 = vsel %vm9607_vm12, %v5810_v41, %v5814_v15  ;;  %8789 = vmatpush3.bf16.msra.mxu1 %v9012_v50  ;;  %8825 = vmatpush3.bf16.msra.mxu0 %v9013_v36  ;;  %v2492_v33 = vld [vmem:[#allocation3 + $0xc8] sm:$0xff] }
 0x2e3   : > { %2552 = vst.msk [vmem:[#allocation3 + $0xa8] sm:$0xff] %vm1516_vm6, %v2520_v34  ;;  %v5825_v6 = vsel %vm9607_vm12, %v5820_v48, %v5824_v53  ;;  %v11092_v56 = vpop.f32.mrb[84].mxu0  ;;  %v9014_v53 = vld [vmem:[%s12025_s10 + $0x8] sm:$0xff]  }
 0x2e4   : > { %v8084_v54 = vcombine.low %v5815_v12, %v5825_v6  ;;  %v11094_v3 = vpop.f32.mrb[85].mxu0  ;;  %8826 = vmatprep.subr.bf16.mxu0 %v9014_v53  ;;  %v12159_v6 = vld [vmem:[#allocation36_spill] sm:$0xff] }
 0x2e5   : > { %v11097_v55 = vpop.f32.mrb[86].mxu0 }
 0x2e6   : > { %v11100_v9 = vpop.f32.mrb[87].mxu0  ;;  %8827 = vmatpush3.bf16.msra.mxu0 %v9014_v53  ;;  %v12161_v53 = vld [vmem:[#allocation38_spill] sm:$0xff] }
 0x2e7   : > { %8745 = vmatmul.mubr.msk.bf16.gmra.mrb[152].mxu1 %vm1516_vm6, %v8082_v38  ;;  %v3070_v8 = vld [vmem:[#allocation3 + $0xb0] sm:$0xff] }
 0x2e8   : > { %8748 = vmatprep.mubr.msk.bf16.mxu1 %vm1516_vm6, %v8083_v22  ;;  %v3102_v46 = vadd.f32 %v12155_v16, %v3070_v8  ;;  %v3068_v2 = vld [vmem:[#allocation3 + $0xa0] sm:$0xff] }
 0x2e9   : > { %v3100_v1 = vadd.f32 %v3068_v2, %v12156_v49  ;;  %v3071_v44 = vld [vmem:[#allocation3 + $0xb8] sm:$0xff] }
 0x2ea   : > { %3134 = vst.msk [vmem:[#allocation3 + $0xb0] sm:$0xff] %vm1516_vm6, %v3102_v46  ;;  %v3103_v15 = vadd.f32 %v12157_v19, %v3071_v44  ;;  %v3069_v51 = vld [vmem:[#allocation3 + $0xa8] sm:$0xff]  ;;  %v8530_v10 = vpop.f32.mrb[56].mxu1  ;;  %v2495_v46 = vld [vmem:[#allocation3 + $0xe0] sm:$0xff] }
 0x2eb   : > { %3132 = vst.msk [vmem:[#allocation3 + $0xa0] sm:$0xff] %vm1516_vm6, %v3100_v1  ;;  %v3101_v58 = vadd.f32 %v3069_v51, %v12158_v35  ;;  %v2525_v45 = vadd.f32 %v8530_v10, %v2493_v37  ;;  %v2436_v40 = vpop.f32.mrb[57].mxu1  ;;  %v2498_v1 = vld [vmem:[#allocation3 + $0xf8] sm:$0xff]  ;;  %v2496_v19 = vld [vmem:[#allocation3 + $0xe8] sm:$0xff] }
 0x2ec   : > { %3135 = vst.msk [vmem:[#allocation3 + $0xb8] sm:$0xff] %vm1516_vm6, %v3103_v15  ;;  %v2523_v14 = vadd.f32 %v2491_v27, %v2436_v40  ;;  %v8531_v30 = vpop.f32.mrb[58].mxu1  ;;  %v3483_v40 = vld [vmem:[#allocation3] sm:$0xff] }
 0x2ed   : > { %3133 = vst.msk [vmem:[#allocation3 + $0xa8] sm:$0xff] %vm1516_vm6, %v3101_v58  ;;  %2557 = vst.msk [vmem:[#allocation3 + $0xd0] sm:$0xff] %vm1516_vm6, %v2525_v45  ;;  %v2526_v20 = vadd.f32 %v8531_v30, %v2494_v25  ;;  %v2439_v28 = vpop.f32.mrb[59].mxu1  ;;  %v3485_v58 = vld [vmem:[#allocation3 + $0x10] sm:$0xff]  ;;  %v3486_v30 = vld [vmem:[#allocation3 + $0x18] sm:$0xff] }
 0x2ee   : > { %2555 = vst.msk [vmem:[#allocation3 + $0xc0] sm:$0xff] %vm1516_vm6, %v2523_v14  ;;  %v2524_v42 = vadd.f32 %v2492_v33, %v2439_v28  ;;  %v3484_v33 = vld [vmem:[#allocation3 + $0x8] sm:$0xff] }
 0x2ef   : > { %8749 = vmatmul.mubr.msk.bf16.gmra.mrb[156].mxu1 %vm1516_vm6, %v8084_v54  ;;  %2558 = vst.msk [vmem:[#allocation3 + $0xd8] sm:$0xff] %vm1516_vm6, %v2526_v20  ;;  %v2497_v54 = vld [vmem:[#allocation3 + $0xf0] sm:$0xff] }
 0x2f0   : > { %2556 = vst.msk [vmem:[#allocation3 + $0xc8] sm:$0xff] %vm1516_vm6, %v2524_v42  ;;  %v12160_v42 = vld [vmem:[#allocation37_spill] sm:$0xff] }
 0x2f2   : > { %v11119_v32 = vpop.f32.mrb[88].mxu0 }
 0x2f3   : > { %v11121_v63 = vpop.f32.mrb[89].mxu0 }
 0x2f4   : > { %v11123_v0 = vpop.f32.mrb[90].mxu0  ;;  %v3074_v61 = vld [vmem:[#allocation3 + $0xd0] sm:$0xff] }
 0x2f5   : > { %v11125_v60 = vpop.f32.mrb[91].mxu0  ;;  %v3106_v41 = vadd.f32 %v10531_v62, %v3074_v61  ;;  %v3072_v48 = vld [vmem:[#allocation3 + $0xc0] sm:$0xff] }
 0x2f6   : > { %v3104_v34 = vadd.f32 %v3072_v48, %v10537_v13  ;;  %v3075_v38 = vld [vmem:[#allocation3 + $0xd8] sm:$0xff] }
 0x2f7   : > { %3138 = vst.msk [vmem:[#allocation3 + $0xd0] sm:$0xff] %vm1516_vm6, %v3106_v41  ;;  %v3107_v22 = vadd.f32 %v10551_v59, %v3075_v38  ;;  %v3073_v12 = vld [vmem:[#allocation3 + $0xc8] sm:$0xff] }
 0x2f8   : > { %3136 = vst.msk [vmem:[#allocation3 + $0xc0] sm:$0xff] %vm1516_vm6, %v3104_v34  ;;  %v3105_v8 = vadd.f32 %v3073_v12, %v12159_v6  ;;  %v12162_v12 = vld [vmem:[#allocation39_spill] sm:$0xff] }
 0x2f9   : > { %3139 = vst.msk [vmem:[#allocation3 + $0xd8] sm:$0xff] %vm1516_vm6, %v3107_v22 }
 0x2fa   : > { %3137 = vst.msk [vmem:[#allocation3 + $0xc8] sm:$0xff] %vm1516_vm6, %v3105_v8 }
 0x2fb   : > { %v8534_v62 = vpop.f32.mrb[60].mxu1 }
 0x2fc   : > { %v2529_v16 = vadd.f32 %v8534_v62, %v2497_v54  ;;  %v2452_v13 = vpop.f32.mrb[61].mxu1  ;;  %v12163_v54 = vld [vmem:[#allocation40_spill] sm:$0xff] }
 0x2fd   : > { %v2527_v2 = vadd.f32 %v2495_v46, %v2452_v13  ;;  %v8535_v49 = vpop.f32.mrb[62].mxu1 }
 0x2fe   : > { %2561 = vst.msk [vmem:[#allocation3 + $0xf0] sm:$0xff] %vm1516_vm6, %v2529_v16  ;;  %v2530_v59 = vadd.f32 %v8535_v49, %v2498_v1  ;;  %v2455_v44 = vpop.f32.mrb[63].mxu1 }
 0x2ff   : > { %2559 = vst.msk [vmem:[#allocation3 + $0xe0] sm:$0xff] %vm1516_vm6, %v2527_v2  ;;  %v2528_v15 = vadd.f32 %v2496_v19, %v2455_v44  ;;  %v11141_v51 = vpop.f32.mrb[92].mxu0  ;;  %v3489_v2 = vld [vmem:[#allocation3 + $0x30] sm:$0xff]  ;;  %v3487_v44 = vld [vmem:[#allocation3 + $0x20] sm:$0xff] }
 0x300   : > { %2562 = vst.msk [vmem:[#allocation3 + $0xf8] sm:$0xff] %vm1516_vm6, %v2530_v59  ;;  %v11144_v50 = vpop.f32.mrb[93].mxu0 }
 0x301   : > { %2560 = vst.msk [vmem:[#allocation3 + $0xe8] sm:$0xff] %vm1516_vm6, %v2528_v15  ;;  %v11146_v36 = vpop.f32.mrb[94].mxu0 }
 0x302   : > { %v11148_v10 = vpop.f32.mrb[95].mxu0 }
 0x303   : > { %v8578_v35 = vpop.f32.mrb[64].mxu1 }
 0x304   : > { %v3517_v37 = vadd.f32 %v8578_v35, %v3485_v58  ;;  %v3356_v45 = vpop.f32.mrb[65].mxu1  ;;  %v3490_v35 = vld [vmem:[#allocation3 + $0x38] sm:$0xff] }
 0x305   : > { %v3515_v27 = vadd.f32 %v3483_v40, %v3356_v45  ;;  %v8579_v14 = vpop.f32.mrb[66].mxu1  ;;  %v3078_v25 = vld [vmem:[#allocation3 + $0xf0] sm:$0xff]  ;;  %v3488_v40 = vld [vmem:[#allocation3 + $0x28] sm:$0xff] }
 0x306   : > { %3549 = vst.msk [vmem:[#allocation3 + $0x10] sm:$0xff] %vm1516_vm6, %v3517_v37  ;;  %v3518_v20 = vadd.f32 %v8579_v14, %v3486_v30  ;;  %v3359_v28 = vpop.f32.mrb[67].mxu1  ;;  %v3110_v61 = vadd.f32 %v12160_v42, %v3078_v25  ;;  %v3076_v41 = vld [vmem:[#allocation3 + $0xe0] sm:$0xff] }
 0x307   : > { %3547 = vst.msk [vmem:[#allocation3] sm:$0xff] %vm1516_vm6, %v3515_v27  ;;  %v3516_v48 = vadd.f32 %v3484_v33, %v3359_v28  ;;  %v3108_v34 = vadd.f32 %v3076_v41, %v12161_v53  ;;  %v3079_v38 = vld [vmem:[#allocation3 + $0xf8] sm:$0xff]  ;;  %v11155_v22 = vpop.f32.mrb[96].mxu0  ;;  %v9015_v53 = vld [vmem:[%s12018_s3 + $0x8] sm:$0xff]  }
 0x308   : > { %3550 = vst.msk [vmem:[#allocation3 + $0x18] sm:$0xff] %vm1516_vm6, %v3518_v20  ;;  %3142 = vst.msk [vmem:[#allocation3 + $0xf0] sm:$0xff] %vm1516_vm6, %v3110_v61  ;;  %v3111_v6 = vadd.f32 %v12162_v12, %v3079_v38  ;;  %v3077_v8 = vld [vmem:[#allocation3 + $0xe8] sm:$0xff]  ;;  %v11160_v62 = vpop.f32.mrb[97].mxu0  ;;  %v12164_v27 = vld [vmem:[#allocation41_spill] sm:$0xff]  ;;  %8790 = vmatprep.subr.bf16.mxu1 %v9015_v53 }
 0x309   : > { %3548 = vst.msk [vmem:[#allocation3 + $0x8] sm:$0xff] %vm1516_vm6, %v3516_v48  ;;  %3140 = vst.msk [vmem:[#allocation3 + $0xe0] sm:$0xff] %vm1516_vm6, %v3108_v34  ;;  %v3109_v16 = vadd.f32 %v3077_v8, %v12163_v54  ;;  %v11164_v13 = vpop.f32.mrb[98].mxu0  ;;  %v12165_v20 = vld [vmem:[#allocation42_spill] sm:$0xff]  ;;  %v12166_v61 = vld [vmem:[#allocation43_spill] sm:$0xff]  ;;  %8791 = vmatpush3.bf16.msra.mxu1 %v9015_v53 }
 0x30a   : > { %3143 = vst.msk [vmem:[#allocation3 + $0xf8] sm:$0xff] %vm1516_vm6, %v3111_v6  ;;  %v11167_v49 = vpop.f32.mrb[99].mxu0  ;;  %v9016_v12 = vld [vmem:[%s12025_s10 + $0x10] sm:$0xff]   ;;  %v3493_v54 = vld [vmem:[#allocation3 + $0x50] sm:$0xff]  ;;  %v3495_v53 = vld [vmem:[#allocation3 + $0x60] sm:$0xff] }
 0x30b   : > { %v8582_v46 = vpop.f32.mrb[68].mxu1  ;;  %3141 = vst.msk [vmem:[#allocation3 + $0xe8] sm:$0xff] %vm1516_vm6, %v3109_v16  ;;  %8828 = vmatprep.subr.bf16.mxu0 %v9016_v12 }
 0x30c   : > { %v3521_v1 = vadd.f32 %v8582_v46, %v3489_v2  ;;  %v3372_v59 = vpop.f32.mrb[69].mxu1  ;;  %8829 = vmatpush3.bf16.msra.mxu0 %v9016_v12 }
 0x30d   : > { %v3519_v19 = vadd.f32 %v3487_v44, %v3372_v59  ;;  %v8583_v15 = vpop.f32.mrb[70].mxu1  ;;  %v4287_v58 = vld [vmem:[#allocation3 + $0x10] sm:$0xff]  ;;  %v3494_v44 = vld [vmem:[#allocation3 + $0x58] sm:$0xff] }
 0x30e   : > { %3553 = vst.msk [vmem:[#allocation3 + $0x30] sm:$0xff] %vm1516_vm6, %v3521_v1  ;;  %v3522_v37 = vadd.f32 %v8583_v15, %v3490_v35  ;;  %v3375_v45 = vpop.f32.mrb[71].mxu1  ;;  %v4319_v14 = vadd.f32 %v12164_v27, %v4287_v58  ;;  %v4285_v30 = vld [vmem:[#allocation3] sm:$0xff]  ;;  %v3492_v58 = vld [vmem:[#allocation3 + $0x48] sm:$0xff] }
 0x30f   : > { %3551 = vst.msk [vmem:[#allocation3 + $0x20] sm:$0xff] %vm1516_vm6, %v3519_v19  ;;  %v3520_v25 = vadd.f32 %v3488_v40, %v3375_v45  ;;  %v4317_v28 = vadd.f32 %v4285_v30, %v12165_v20  ;;  %v4288_v33 = vld [vmem:[#allocation3 + $0x18] sm:$0xff]  ;;  %v11175_v42 = vpop.f32.mrb[100].mxu0 }
 0x310   : > { %3554 = vst.msk [vmem:[#allocation3 + $0x38] sm:$0xff] %vm1516_vm6, %v3522_v37  ;;  %4351 = vst.msk [vmem:[#allocation3 + $0x10] sm:$0xff] %vm1516_vm6, %v4319_v14  ;;  %v4320_v41 = vadd.f32 %v12166_v61, %v4288_v33  ;;  %v4286_v48 = vld [vmem:[#allocation3 + $0x8] sm:$0xff]  ;;  %v11183_v34 = vpop.f32.mrb[101].mxu0  ;;  %v3497_v61 = vld [vmem:[#allocation3 + $0x70] sm:$0xff] }
 0x311   : > { %3552 = vst.msk [vmem:[#allocation3 + $0x28] sm:$0xff] %vm1516_vm6, %v3520_v25  ;;  %4349 = vst.msk [vmem:[#allocation3] sm:$0xff] %vm1516_vm6, %v4317_v28  ;;  %v4318_v38 = vadd.f32 %v4286_v48, %v10702_v31  ;;  %v11190_v6 = vpop.f32.mrb[102].mxu0  ;;  %v3491_v31 = vld [vmem:[#allocation3 + $0x40] sm:$0xff] }
 0x312   : > { %4352 = vst.msk [vmem:[#allocation3 + $0x18] sm:$0xff] %vm1516_vm6, %v4320_v41  ;;  %v11193_v16 = vpop.f32.mrb[103].mxu0 }
 0x313   : > { %v8586_v8 = vpop.f32.mrb[72].mxu1  ;;  %4350 = vst.msk [vmem:[#allocation3 + $0x8] sm:$0xff] %vm1516_vm6, %v4318_v38 }
 0x314   : > { %v3525_v46 = vadd.f32 %v8586_v8, %v3493_v54  ;;  %v3388_v2 = vpop.f32.mrb[73].mxu1  ;;  %v3498_v8 = vld [vmem:[#allocation3 + $0x78] sm:$0xff] }
 0x315   : > { %v3523_v1 = vadd.f32 %v3491_v31, %v3388_v2  ;;  %v8587_v59 = vpop.f32.mrb[74].mxu1  ;;  %v4291_v19 = vld [vmem:[#allocation3 + $0x30] sm:$0xff]  ;;  %v3496_v2 = vld [vmem:[#allocation3 + $0x68] sm:$0xff] }
 0x316   : > { %3557 = vst.msk [vmem:[#allocation3 + $0x50] sm:$0xff] %vm1516_vm6, %v3525_v46  ;;  %v3526_v15 = vadd.f32 %v8587_v59, %v3494_v44  ;;  %v3391_v35 = vpop.f32.mrb[75].mxu1  ;;  %v4323_v37 = vadd.f32 %v10793_v26, %v4291_v19  ;;  %v4289_v45 = vld [vmem:[#allocation3 + $0x20] sm:$0xff] }
 0x317   : > { %3555 = vst.msk [vmem:[#allocation3 + $0x40] sm:$0xff] %vm1516_vm6, %v3523_v1  ;;  %v3524_v40 = vadd.f32 %v3492_v58, %v3391_v35  ;;  %v4321_v27 = vadd.f32 %v4289_v45, %v10805_v29  ;;  %v4292_v14 = vld [vmem:[#allocation3 + $0x38] sm:$0xff]  ;;  %v11201_v30 = vpop.f32.mrb[104].mxu0 }
 0x318   : > { %3558 = vst.msk [vmem:[#allocation3 + $0x58] sm:$0xff] %vm1516_vm6, %v3526_v15  ;;  %4355 = vst.msk [vmem:[#allocation3 + $0x30] sm:$0xff] %vm1516_vm6, %v4323_v37  ;;  %v4324_v25 = vadd.f32 %v10816_v7, %v4292_v14  ;;  %v4290_v20 = vld [vmem:[#allocation3 + $0x28] sm:$0xff]  ;;  %v11206_v28 = vpop.f32.mrb[105].mxu0 }
 0x319   : > { %3556 = vst.msk [vmem:[#allocation3 + $0x48] sm:$0xff] %vm1516_vm6, %v3524_v40  ;;  %4353 = vst.msk [vmem:[#allocation3 + $0x20] sm:$0xff] %vm1516_vm6, %v4321_v27  ;;  %v4322_v26 = vadd.f32 %v4290_v20, %v10822_v43  ;;  %v11210_v33 = vpop.f32.mrb[106].mxu0  ;;  %v3499_v20 = vld [vmem:[#allocation3 + $0x80] sm:$0xff] }
 0x31a   : > { %4356 = vst.msk [vmem:[#allocation3 + $0x38] sm:$0xff] %vm1516_vm6, %v4324_v25  ;;  %v11213_v41 = vpop.f32.mrb[107].mxu0 }
 0x31b   : > { %v8590_v29 = vpop.f32.mrb[76].mxu1  ;;  %4354 = vst.msk [vmem:[#allocation3 + $0x28] sm:$0xff] %vm1516_vm6, %v4322_v26 }
 0x31c   : > { %v3529_v7 = vadd.f32 %v8590_v29, %v3497_v61  ;;  %v3404_v48 = vpop.f32.mrb[77].mxu1 }
 0x31d   : > { %v3527_v38 = vadd.f32 %v3495_v53, %v3404_v48  ;;  %v8591_v12 = vpop.f32.mrb[78].mxu1  ;;  %v4295_v54 = vld [vmem:[#allocation3 + $0x50] sm:$0xff]  ;;  %v3500_v53 = vld [vmem:[#allocation3 + $0x88] sm:$0xff] }
 0x31e   : > { %3561 = vst.msk [vmem:[#allocation3 + $0x70] sm:$0xff] %vm1516_vm6, %v3529_v7  ;;  %v3530_v43 = vadd.f32 %v8591_v12, %v3498_v8  ;;  %v3407_v46 = vpop.f32.mrb[79].mxu1  ;;  %v4327_v31 = vadd.f32 %v10920_v24, %v4295_v54  ;;  %v4293_v1 = vld [vmem:[#allocation3 + $0x40] sm:$0xff]  ;;  %v9021_v8 = vld [vmem:[%s9393_s8 + $0x8] sm:$0xff]  }
 0x31f   : > { %3559 = vst.msk [vmem:[#allocation3 + $0x60] sm:$0xff] %vm1516_vm6, %v3527_v38  ;;  %v3528_v59 = vadd.f32 %v3496_v2, %v3407_v46  ;;  %v4325_v44 = vadd.f32 %v4293_v1, %v10926_v21  ;;  %v4296_v19 = vld [vmem:[#allocation3 + $0x58] sm:$0xff]  ;;  %v11221_v15 = vpop.f32.mrb[108].mxu0  ;;  %v9017_v24 = vld [vmem:[%s12025_s10 + $0x18] sm:$0xff]   ;;  %v9022_v2 = vld [vmem:[%s9393_s8 + $0x10] sm:$0xff]  }
 0x320   : > { %3562 = vst.msk [vmem:[#allocation3 + $0x78] sm:$0xff] %vm1516_vm6, %v3530_v43  ;;  %4359 = vst.msk [vmem:[#allocation3 + $0x50] sm:$0xff] %vm1516_vm6, %v4327_v31  ;;  %v4328_v35 = vadd.f32 %v10932_v52, %v4296_v19  ;;  %v4294_v58 = vld [vmem:[#allocation3 + $0x48] sm:$0xff]  ;;  %v11229_v37 = vpop.f32.mrb[109].mxu0  ;;  %8830 = vmatprep.subr.bf16.mxu0 %v9017_v24  ;;  %v3501_v52 = vld [vmem:[#allocation3 + $0x90] sm:$0xff] }
 0x321   : > { %3560 = vst.msk [vmem:[#allocation3 + $0x68] sm:$0xff] %vm1516_vm6, %v3528_v59  ;;  %4357 = vst.msk [vmem:[#allocation3 + $0x40] sm:$0xff] %vm1516_vm6, %v4325_v44  ;;  %v4326_v21 = vadd.f32 %v4294_v58, %v10934_v5  ;;  %v11233_v45 = vpop.f32.mrb[110].mxu0  ;;  %8831 = vmatpush3.bf16.msra.mxu0 %v9017_v24  ;;  %v3502_v5 = vld [vmem:[#allocation3 + $0x98] sm:$0xff] }
 0x322   : > { %4360 = vst.msk [vmem:[#allocation3 + $0x58] sm:$0xff] %vm1516_vm6, %v4328_v35  ;;  %v11236_v27 = vpop.f32.mrb[111].mxu0  ;;  %v3505_v35 = vld [vmem:[#allocation3 + $0xb0] sm:$0xff] }
 0x323   : > { %v8594_v40 = vpop.f32.mrb[80].mxu1  ;;  %4358 = vst.msk [vmem:[#allocation3 + $0x48] sm:$0xff] %vm1516_vm6, %v4326_v21  ;;  %v3503_v21 = vld [vmem:[#allocation3 + $0xa0] sm:$0xff] }
 0x324   : > { %v3533_v14 = vadd.f32 %v8594_v40, %v3501_v52  ;;  %v3420_v25 = vpop.f32.mrb[81].mxu1  ;;  %8833 = vmatmul.mubr.msk.bf16.vlgmr.msra.gmra.mrb[160].mxu0 %vm619_vm0, %v9021_v8 }
 0x325   : > { %v3531_v26 = vadd.f32 %v3499_v20, %v3420_v25  ;;  %v8595_v29 = vpop.f32.mrb[82].mxu1  ;;  %v4299_v61 = vld [vmem:[#allocation3 + $0x70] sm:$0xff]  ;;  %8836 = vmatprep.mubr.msk.bf16.mxu0 %vm619_vm0, %v9022_v2 }
 0x326   : > { %3565 = vst.msk [vmem:[#allocation3 + $0x90] sm:$0xff] %vm1516_vm6, %v3533_v14  ;;  %v3534_v7 = vadd.f32 %v8595_v29, %v3502_v5  ;;  %v3423_v48 = vpop.f32.mrb[83].mxu1  ;;  %v4331_v38 = vadd.f32 %v10988_v57, %v4299_v61  ;;  %v4297_v12 = vld [vmem:[#allocation3 + $0x60] sm:$0xff]  ;;  %v3506_v14 = vld [vmem:[#allocation3 + $0xb8] sm:$0xff]  ;;  %v3509_v2 = vld [vmem:[#allocation3 + $0xd0] sm:$0xff] }
 0x327   : > { %3563 = vst.msk [vmem:[#allocation3 + $0x80] sm:$0xff] %vm1516_vm6, %v3531_v26  ;;  %v3532_v54 = vadd.f32 %v3500_v53, %v3423_v48  ;;  %v4329_v43 = vadd.f32 %v4297_v12, %v10994_v23  ;;  %v4300_v46 = vld [vmem:[#allocation3 + $0x78] sm:$0xff]  ;;  %v11248_v31 = vpop.f32.mrb[112].mxu0  ;;  %v3504_v26 = vld [vmem:[#allocation3 + $0xa8] sm:$0xff] }
 0x328   : > { %3566 = vst.msk [vmem:[#allocation3 + $0x98] sm:$0xff] %vm1516_vm6, %v3534_v7  ;;  %4363 = vst.msk [vmem:[#allocation3 + $0x70] sm:$0xff] %vm1516_vm6, %v4331_v38  ;;  %v4332_v57 = vadd.f32 %v10999_v39, %v4300_v46  ;;  %v4298_v1 = vld [vmem:[#allocation3 + $0x68] sm:$0xff]  ;;  %v11253_v59 = vpop.f32.mrb[113].mxu0  ;;  %v9023_v61 = vld [vmem:[%s9393_s8 + $0x18] sm:$0xff]  }
 0x329   : > { %3564 = vst.msk [vmem:[#allocation3 + $0x88] sm:$0xff] %vm1516_vm6, %v3532_v54  ;;  %4361 = vst.msk [vmem:[#allocation3 + $0x60] sm:$0xff] %vm1516_vm6, %v4329_v43  ;;  %v4330_v23 = vadd.f32 %v4298_v1, %v11003_v11  ;;  %v11257_v44 = vpop.f32.mrb[114].mxu0  ;;  %v9024_v38 = vld [vmem:[%s9393_s8 + $0x20] sm:$0xff]  }
 0x32a   : > { %4364 = vst.msk [vmem:[#allocation3 + $0x78] sm:$0xff] %vm1516_vm6, %v4332_v57  ;;  %v11260_v58 = vpop.f32.mrb[115].mxu0 }
 0x32b   : > { %v8598_v19 = vpop.f32.mrb[84].mxu1  ;;  %4362 = vst.msk [vmem:[#allocation3 + $0x68] sm:$0xff] %vm1516_vm6, %v4330_v23  ;;  %v3507_v23 = vld [vmem:[#allocation3 + $0xc0] sm:$0xff] }
 0x32c   : > { %v3537_v39 = vadd.f32 %v8598_v19, %v3505_v35  ;;  %v3436_v24 = vpop.f32.mrb[85].mxu1  ;;  %8837 = vmatmul.mubr.msk.bf16.gmra.mrb[164].mxu0 %vm619_vm0, %v9023_v61 }
 0x32d   : > { %v3535_v40 = vadd.f32 %v3503_v21, %v3436_v24  ;;  %v8599_v52 = vpop.f32.mrb[86].mxu1  ;;  %v4303_v25 = vld [vmem:[#allocation3 + $0x90] sm:$0xff]  ;;  %8840 = vmatprep.mubr.msk.bf16.mxu0 %vm619_vm0, %v9024_v38 }
 0x32e   : > { %3569 = vst.msk [vmem:[#allocation3 + $0xb0] sm:$0xff] %vm1516_vm6, %v3537_v39  ;;  %v3538_v11 = vadd.f32 %v8599_v52, %v3506_v14  ;;  %v3439_v20 = vpop.f32.mrb[87].mxu1  ;;  %v4335_v29 = vadd.f32 %v11041_v47, %v4303_v25  ;;  %v4301_v5 = vld [vmem:[#allocation3 + $0x80] sm:$0xff]  ;;  %v3510_v39 = vld [vmem:[#allocation3 + $0xd8] sm:$0xff]  ;;  %v9025_v25 = vld [vmem:[%s9393_s8 + $0x28] sm:$0xff]  }
 0x32f   : > { %3567 = vst.msk [vmem:[#allocation3 + $0xa0] sm:$0xff] %vm1516_vm6, %v3535_v40  ;;  %v3536_v7 = vadd.f32 %v3504_v26, %v3439_v20  ;;  %v4333_v48 = vadd.f32 %v4301_v5, %v11049_v4  ;;  %v4304_v53 = vld [vmem:[#allocation3 + $0x98] sm:$0xff]  ;;  %v11272_v12 = vpop.f32.mrb[116].mxu0  ;;  %v3508_v40 = vld [vmem:[#allocation3 + $0xc8] sm:$0xff]  ;;  %v3513_v38 = vld [vmem:[#allocation3 + $0xf0] sm:$0xff] }
 0x330   : > { %3570 = vst.msk [vmem:[#allocation3 + $0xb8] sm:$0xff] %vm1516_vm6, %v3538_v11  ;;  %4367 = vst.msk [vmem:[#allocation3 + $0x90] sm:$0xff] %vm1516_vm6, %v4335_v29  ;;  %v4336_v47 = vadd.f32 %v11055_v17, %v4304_v53  ;;  %v4302_v8 = vld [vmem:[#allocation3 + $0x88] sm:$0xff]  ;;  %v11277_v54 = vpop.f32.mrb[117].mxu0  ;;  %v9026_v29 = vld [vmem:[%s9393_s8 + $0x30] sm:$0xff]  }
 0x331   : > { %3568 = vst.msk [vmem:[#allocation3 + $0xa8] sm:$0xff] %vm1516_vm6, %v3536_v7  ;;  %4365 = vst.msk [vmem:[#allocation3 + $0x80] sm:$0xff] %vm1516_vm6, %v4333_v48  ;;  %v4334_v4 = vadd.f32 %v4302_v8, %v11060_v18  ;;  %v11281_v43 = vpop.f32.mrb[118].mxu0 }
 0x332   : > { %4368 = vst.msk [vmem:[#allocation3 + $0x98] sm:$0xff] %vm1516_vm6, %v4336_v47  ;;  %v11284_v57 = vpop.f32.mrb[119].mxu0 }
 0x333   : > { %v8602_v46 = vpop.f32.mrb[88].mxu1  ;;  %4366 = vst.msk [vmem:[#allocation3 + $0x88] sm:$0xff] %vm1516_vm6, %v4334_v4  ;;  %v3511_v4 = vld [vmem:[#allocation3 + $0xe0] sm:$0xff] }
 0x334   : > { %v3541_v17 = vadd.f32 %v8602_v46, %v3509_v2  ;;  %v3452_v1 = vpop.f32.mrb[89].mxu1  ;;  %8841 = vmatmul.mubr.msk.bf16.gmra.mrb[168].mxu0 %vm619_vm0, %v9025_v25 }
 0x335   : > { %v3539_v19 = vadd.f32 %v3507_v23, %v3452_v1  ;;  %v8603_v35 = vpop.f32.mrb[90].mxu1  ;;  %v4307_v24 = vld [vmem:[#allocation3 + $0xb0] sm:$0xff]  ;;  %8844 = vmatprep.mubr.msk.bf16.mxu0 %vm619_vm0, %v9026_v29 }
 0x336   : > { %3573 = vst.msk [vmem:[#allocation3 + $0xd0] sm:$0xff] %vm1516_vm6, %v3541_v17  ;;  %v3542_v18 = vadd.f32 %v8603_v35, %v3510_v39  ;;  %v3455_v21 = vpop.f32.mrb[91].mxu1  ;;  %v4339_v52 = vadd.f32 %v11092_v56, %v4307_v24  ;;  %v4305_v14 = vld [vmem:[#allocation3 + $0xa0] sm:$0xff]  ;;  %v3514_v17 = vld [vmem:[#allocation3 + $0xf8] sm:$0xff]  ;;  %v4865_v29 = vld [vmem:[#allocation3 + $0x10] sm:$0xff] }
 0x337   : > { %3571 = vst.msk [vmem:[#allocation3 + $0xc0] sm:$0xff] %vm1516_vm6, %v3539_v19  ;;  %v3540_v11 = vadd.f32 %v3508_v40, %v3455_v21  ;;  %v4337_v20 = vadd.f32 %v4305_v14, %v11094_v3  ;;  %v4308_v26 = vld [vmem:[#allocation3 + $0xb8] sm:$0xff]  ;;  %v11296_v5 = vpop.f32.mrb[120].mxu0  ;;  %v3512_v19 = vld [vmem:[#allocation3 + $0xe8] sm:$0xff] }
 0x338   : > { %3574 = vst.msk [vmem:[#allocation3 + $0xd8] sm:$0xff] %vm1516_vm6, %v3542_v18  ;;  %4371 = vst.msk [vmem:[#allocation3 + $0xb0] sm:$0xff] %vm1516_vm6, %v4339_v52  ;;  %v4340_v56 = vadd.f32 %v11097_v55, %v4308_v26  ;;  %v4306_v61 = vld [vmem:[#allocation3 + $0xa8] sm:$0xff]  ;;  %v11301_v7 = vpop.f32.mrb[121].mxu0  ;;  %v9027_v24 = vld [vmem:[%s9393_s8 + $0x38] sm:$0xff]  }
 0x339   : > { %3572 = vst.msk [vmem:[#allocation3 + $0xc8] sm:$0xff] %vm1516_vm6, %v3540_v11  ;;  %4369 = vst.msk [vmem:[#allocation3 + $0xa0] sm:$0xff] %vm1516_vm6, %v4337_v20  ;;  %v4338_v3 = vadd.f32 %v4306_v61, %v11100_v9  ;;  %v11305_v48 = vpop.f32.mrb[122].mxu0  ;;  %v9028_v52 = vld [vmem:[%s9393_s8 + $0x40] sm:$0xff]  }
 0x33a   : > { %4372 = vst.msk [vmem:[#allocation3 + $0xb8] sm:$0xff] %vm1516_vm6, %v4340_v56  ;;  %v11308_v47 = vpop.f32.mrb[123].mxu0 }
 0x33b   : > { %v8606_v53 = vpop.f32.mrb[92].mxu1  ;;  %4370 = vst.msk [vmem:[#allocation3 + $0xa8] sm:$0xff] %vm1516_vm6, %v4338_v3  ;;  %v4863_v3 = vld [vmem:[#allocation3] sm:$0xff] }
 0x33c   : > { %v3545_v55 = vadd.f32 %v8606_v53, %v3513_v38  ;;  %v3468_v8 = vpop.f32.mrb[93].mxu1  ;;  %8845 = vmatmul.mubr.msk.bf16.gmra.mrb[172].mxu0 %vm619_vm0, %v9027_v24 }
 0x33d   : > { %v3543_v46 = vadd.f32 %v3511_v4, %v3468_v8  ;;  %v8607_v2 = vpop.f32.mrb[94].mxu1  ;;  %v4311_v1 = vld [vmem:[#allocation3 + $0xd0] sm:$0xff]  ;;  %8848 = vmatprep.mubr.msk.bf16.mxu0 %vm619_vm0, %v9028_v52 }
 0x33e   : > { %3577 = vst.msk [vmem:[#allocation3 + $0xf0] sm:$0xff] %vm1516_vm6, %v3545_v55  ;;  %v3546_v9 = vadd.f32 %v8607_v2, %v3514_v17  ;;  %v3471_v23 = vpop.f32.mrb[95].mxu1  ;;  %v4343_v35 = vadd.f32 %v11119_v32, %v4311_v1  ;;  %v4309_v39 = vld [vmem:[#allocation3 + $0xc0] sm:$0xff]  ;;  %v4866_v55 = vld [vmem:[#allocation3 + $0x18] sm:$0xff]  ;;  %v9029_v1 = vld [vmem:[%s9393_s8 + $0x48] sm:$0xff]  }
 0x33f   : > { %3575 = vst.msk [vmem:[#allocation3 + $0xe0] sm:$0xff] %vm1516_vm6, %v3543_v46  ;;  %v3544_v18 = vadd.f32 %v3512_v19, %v3471_v23  ;;  %v4341_v21 = vadd.f32 %v4309_v39, %v11121_v63  ;;  %v4312_v40 = vld [vmem:[#allocation3 + $0xd8] sm:$0xff]  ;;  %v11320_v14 = vpop.f32.mrb[124].mxu0  ;;  %v4864_v46 = vld [vmem:[#allocation3 + $0x8] sm:$0xff]  ;;  %v4869_v52 = vld [vmem:[#allocation3 + $0x30] sm:$0xff] }
 0x340   : > { %3578 = vst.msk [vmem:[#allocation3 + $0xf8] sm:$0xff] %vm1516_vm6, %v3546_v9  ;;  %4375 = vst.msk [vmem:[#allocation3 + $0xd0] sm:$0xff] %vm1516_vm6, %v4343_v35  ;;  %v4344_v32 = vadd.f32 %v11123_v0, %v4312_v40  ;;  %v4310_v25 = vld [vmem:[#allocation3 + $0xc8] sm:$0xff]  ;;  %v11325_v11 = vpop.f32.mrb[125].mxu0  ;;  %v9030_v35 = vld [vmem:[%s9393_s8 + $0x50] sm:$0xff]  }
 0x341   : > { %3576 = vst.msk [vmem:[#allocation3 + $0xe8] sm:$0xff] %vm1516_vm6, %v3544_v18  ;;  %4373 = vst.msk [vmem:[#allocation3 + $0xc0] sm:$0xff] %vm1516_vm6, %v4341_v21  ;;  %v4342_v63 = vadd.f32 %v4310_v25, %v11125_v60  ;;  %v11329_v20 = vpop.f32.mrb[126].mxu0 }
 0x342   : > { %4376 = vst.msk [vmem:[#allocation3 + $0xd8] sm:$0xff] %vm1516_vm6, %v4344_v32  ;;  %v11332_v56 = vpop.f32.mrb[127].mxu0 }
 0x343   : > { %v8650_v26 = vpop.f32.mrb[96].mxu1  ;;  %4374 = vst.msk [vmem:[#allocation3 + $0xc8] sm:$0xff] %vm1516_vm6, %v4342_v63  ;;  %v4867_v63 = vld [vmem:[#allocation3 + $0x20] sm:$0xff] }
 0x344   : > { %v4897_v0 = vadd.f32 %v8650_v26, %v4865_v29  ;;  %v4736_v61 = vpop.f32.mrb[97].mxu1  ;;  %8849 = vmatmul.mubr.msk.bf16.gmra.mrb[176].mxu0 %vm619_vm0, %v9029_v1 }
 0x345   : > { %v4895_v53 = vadd.f32 %v4863_v3, %v4736_v61  ;;  %v8651_v38 = vpop.f32.mrb[98].mxu1  ;;  %v4315_v8 = vld [vmem:[#allocation3 + $0xf0] sm:$0xff]  ;;  %8852 = vmatprep.mubr.msk.bf16.mxu0 %vm619_vm0, %v9030_v35 }
 0x346   : > { %4929 = vst.msk [vmem:[#allocation3 + $0x10] sm:$0xff] %vm1516_vm6, %v4897_v0  ;;  %v4898_v60 = vadd.f32 %v8651_v38, %v4866_v55  ;;  %v4739_v4 = vpop.f32.mrb[99].mxu1  ;;  %v4347_v2 = vadd.f32 %v11141_v51, %v4315_v8  ;;  %v4313_v17 = vld [vmem:[#allocation3 + $0xe0] sm:$0xff]  ;;  %v4870_v0 = vld [vmem:[#allocation3 + $0x38] sm:$0xff]  ;;  %v4873_v35 = vld [vmem:[#allocation3 + $0x50] sm:$0xff] }
 0x347   : > { %4927 = vst.msk [vmem:[#allocation3] sm:$0xff] %vm1516_vm6, %v4895_v53  ;;  %v4896_v9 = vadd.f32 %v4864_v46, %v4739_v4  ;;  %v4345_v23 = vadd.f32 %v4313_v17, %v11144_v50  ;;  %v4316_v19 = vld [vmem:[#allocation3 + $0xf8] sm:$0xff]  ;;  %v11344_v39 = vpop.f32.mrb[128].mxu0  ;;  %v4868_v53 = vld [vmem:[#allocation3 + $0x28] sm:$0xff] }
 0x348   : > { %4930 = vst.msk [vmem:[#allocation3 + $0x18] sm:$0xff] %vm1516_vm6, %v4898_v60  ;;  %4379 = vst.msk [vmem:[#allocation3 + $0xf0] sm:$0xff] %vm1516_vm6, %v4347_v2  ;;  %v4348_v51 = vadd.f32 %v11146_v36, %v4316_v19  ;;  %v4314_v24 = vld [vmem:[#allocation3 + $0xe8] sm:$0xff]  ;;  %v11349_v18 = vpop.f32.mrb[129].mxu0  ;;  %v9031_v8 = vld [vmem:[%s9393_s8 + $0x58] sm:$0xff]  }
 0x349   : > { %4928 = vst.msk [vmem:[#allocation3 + $0x8] sm:$0xff] %vm1516_vm6, %v4896_v9  ;;  %4377 = vst.msk [vmem:[#allocation3 + $0xe0] sm:$0xff] %vm1516_vm6, %v4345_v23  ;;  %v4346_v50 = vadd.f32 %v4314_v24, %v11148_v10  ;;  %v11353_v21 = vpop.f32.mrb[130].mxu0  ;;  %v9032_v2 = vld [vmem:[%s9393_s8 + $0x60] sm:$0xff]  }
 0x34a   : > { %4380 = vst.msk [vmem:[#allocation3 + $0xf8] sm:$0xff] %vm1516_vm6, %v4348_v51  ;;  %v11356_v32 = vpop.f32.mrb[131].mxu0 }
 0x34b   : > { %4378 = vst.msk [vmem:[#allocation3 + $0xe8] sm:$0xff] %vm1516_vm6, %v4346_v50  ;;  %v4871_v50 = vld [vmem:[#allocation3 + $0x40] sm:$0xff] }
 0x34c   : > { %v8654_v40 = vpop.f32.mrb[100].mxu1  ;;  %8853 = vmatmul.mubr.msk.bf16.gmra.mrb[180].mxu0 %vm619_vm0, %v9031_v8 }
 0x34d   : > { %v4901_v36 = vadd.f32 %v8654_v40, %v4869_v52  ;;  %v4752_v25 = vpop.f32.mrb[101].mxu1  ;;  %v5300_v61 = vld [vmem:[#allocation3 + $0x10] sm:$0xff]  ;;  %8856 = vmatprep.mubr.msk.bf16.mxu0 %vm619_vm0, %v9032_v2 }
 0x34e   : > { %v4899_v26 = vadd.f32 %v4867_v63, %v4752_v25  ;;  %v8655_v29 = vpop.f32.mrb[102].mxu1  ;;  %v5332_v38 = vadd.f32 %v11155_v22, %v5300_v61  ;;  %v5298_v55 = vld [vmem:[#allocation3] sm:$0xff]  ;;  %v9033_v61 = vld [vmem:[%s9393_s8 + $0x68] sm:$0xff]   ;;  %v4877_v2 = vld [vmem:[#allocation3 + $0x70] sm:$0xff] }
 0x34f   : > { %4933 = vst.msk [vmem:[#allocation3 + $0x30] sm:$0xff] %vm1516_vm6, %v4901_v36  ;;  %v4902_v10 = vadd.f32 %v8655_v29, %v4870_v0  ;;  %v4755_v3 = vpop.f32.mrb[103].mxu1  ;;  %v5330_v4 = vadd.f32 %v5298_v55, %v11160_v62  ;;  %v5301_v46 = vld [vmem:[#allocation3 + $0x18] sm:$0xff] }
 0x350   : > { %4931 = vst.msk [vmem:[#allocation3 + $0x20] sm:$0xff] %vm1516_vm6, %v4899_v26  ;;  %v4900_v60 = vadd.f32 %v4868_v53, %v4755_v3  ;;  %5364 = vst.msk [vmem:[#allocation3 + $0x10] sm:$0xff] %vm1516_vm6, %v5332_v38  ;;  %v5333_v22 = vadd.f32 %v11164_v13, %v5301_v46  ;;  %v5299_v1 = vld [vmem:[#allocation3 + $0x8] sm:$0xff]  ;;  %v4874_v36 = vld [vmem:[#allocation3 + $0x58] sm:$0xff] }
 0x351   : > { %4934 = vst.msk [vmem:[#allocation3 + $0x38] sm:$0xff] %vm1516_vm6, %v4902_v10  ;;  %5362 = vst.msk [vmem:[#allocation3] sm:$0xff] %vm1516_vm6, %v5330_v4  ;;  %v5331_v62 = vadd.f32 %v5299_v1, %v11167_v49  ;;  %v4872_v26 = vld [vmem:[#allocation3 + $0x48] sm:$0xff]  ;;  %v9034_v38 = vld [vmem:[%s9393_s8 + $0x70] sm:$0xff]  }
 0x352   : > { %4932 = vst.msk [vmem:[#allocation3 + $0x28] sm:$0xff] %vm1516_vm6, %v4900_v60  ;;  %5365 = vst.msk [vmem:[#allocation3 + $0x18] sm:$0xff] %vm1516_vm6, %v5333_v22 }
 0x353   : > { %v11368_v17 = vpop.f32.mrb[132].mxu0  ;;  %5363 = vst.msk [vmem:[#allocation3 + $0x8] sm:$0xff] %vm1516_vm6, %v5331_v62  ;;  %v4875_v62 = vld [vmem:[#allocation3 + $0x60] sm:$0xff] }
 0x354   : > { %v11373_v9 = vpop.f32.mrb[133].mxu0  ;;  %8857 = vmatmul.mubr.msk.bf16.gmra.mrb[184].mxu0 %vm619_vm0, %v9033_v61 }
 0x355   : > { %v11377_v23 = vpop.f32.mrb[134].mxu0  ;;  %8860 = vmatprep.mubr.msk.bf16.mxu0 %vm619_vm0, %v9034_v38 }
 0x356   : > { %v8658_v19 = vpop.f32.mrb[104].mxu1  ;;  %v11380_v51 = vpop.f32.mrb[135].mxu0  ;;  %v5304_v25 = vld [vmem:[#allocation3 + $0x30] sm:$0xff] }
 0x357   : > { %v4905_v13 = vadd.f32 %v8658_v19, %v4873_v35  ;;  %v4768_v24 = vpop.f32.mrb[105].mxu1  ;;  %v5336_v29 = vadd.f32 %v11175_v42, %v5304_v25  ;;  %v5302_v0 = vld [vmem:[#allocation3 + $0x20] sm:$0xff]  ;;  %v9035_v25 = vld [vmem:[%s9393_s8 + $0x78] sm:$0xff]   ;;  %s12168_s8 = sld [smem:[#allocation45_spill]] }
 0x358   : > { %v4903_v40 = vadd.f32 %v4871_v50, %v4768_v24  ;;  %v8659_v52 = vpop.f32.mrb[106].mxu1  ;;  %v5334_v3 = vadd.f32 %v5302_v0, %v11183_v34  ;;  %v5305_v53 = vld [vmem:[#allocation3 + $0x38] sm:$0xff] }
 0x359   : > { %4937 = vst.msk [vmem:[#allocation3 + $0x50] sm:$0xff] %vm1516_vm6, %v4905_v13  ;;  %v4906_v49 = vadd.f32 %v8659_v52, %v4874_v36  ;;  %v4771_v63 = vpop.f32.mrb[107].mxu1  ;;  %5368 = vst.msk [vmem:[#allocation3 + $0x30] sm:$0xff] %vm1516_vm6, %v5336_v29  ;;  %v5337_v42 = vadd.f32 %v11190_v6, %v5305_v53  ;;  %v5303_v8 = vld [vmem:[#allocation3 + $0x28] sm:$0xff]  ;;  %v4878_v13 = vld [vmem:[#allocation3 + $0x78] sm:$0xff] }
 0x35a   : > { %4935 = vst.msk [vmem:[#allocation3 + $0x40] sm:$0xff] %vm1516_vm6, %v4903_v40  ;;  %v4904_v10 = vadd.f32 %v4872_v26, %v4771_v63  ;;  %5366 = vst.msk [vmem:[#allocation3 + $0x20] sm:$0xff] %vm1516_vm6, %v5334_v3  ;;  %v5335_v34 = vadd.f32 %v5303_v8, %v11193_v16  ;;  %v4876_v40 = vld [vmem:[#allocation3 + $0x68] sm:$0xff]  ;;  %v4881_v53 = vld [vmem:[#allocation3 + $0x90] sm:$0xff] }
 0x35b   : > { %4938 = vst.msk [vmem:[#allocation3 + $0x58] sm:$0xff] %vm1516_vm6, %v4906_v49  ;;  %5369 = vst.msk [vmem:[#allocation3 + $0x38] sm:$0xff] %vm1516_vm6, %v5337_v42  ;;  %v4879_v8 = vld [vmem:[#allocation3 + $0x80] sm:$0xff] }
 0x35c   : > { %v11392_v55 = vpop.f32.mrb[136].mxu0  ;;  %4936 = vst.msk [vmem:[#allocation3 + $0x48] sm:$0xff] %vm1516_vm6, %v4904_v10  ;;  %5367 = vst.msk [vmem:[#allocation3 + $0x28] sm:$0xff] %vm1516_vm6, %v5335_v34  ;;  %8861 = vmatmul.mubr.msk.bf16.gmra.mrb[188].mxu0 %vm619_vm0, %v9035_v25 }
 0x35d   : > { %v11397_v60 = vpop.f32.mrb[137].mxu0 }
 0x35e   : > { %v11401_v4 = vpop.f32.mrb[138].mxu0 }
 0x35f   : > { %v8662_v46 = vpop.f32.mrb[108].mxu1  ;;  %v11404_v22 = vpop.f32.mrb[139].mxu0 }
 0x360   : > { %v4909_v6 = vadd.f32 %v8662_v46, %v4877_v2  ;;  %v4784_v1 = vpop.f32.mrb[109].mxu1  ;;  %v5308_v24 = vld [vmem:[#allocation3 + $0x50] sm:$0xff]  ;;  %v4882_v2 = vld [vmem:[#allocation3 + $0x98] sm:$0xff] }
 0x361   : > { %v4907_v19 = vadd.f32 %v4875_v62, %v4784_v1  ;;  %v8663_v35 = vpop.f32.mrb[110].mxu1  ;;  %v5340_v52 = vadd.f32 %v11201_v30, %v5308_v24  ;;  %v5306_v36 = vld [vmem:[#allocation3 + $0x40] sm:$0xff]  ;;  %v4880_v62 = vld [vmem:[#allocation3 + $0x88] sm:$0xff] }
 0x362   : > { %4941 = vst.msk [vmem:[#allocation3 + $0x70] sm:$0xff] %vm1516_vm6, %v4909_v6  ;;  %v4910_v16 = vadd.f32 %v8663_v35, %v4878_v13  ;;  %v4787_v50 = vpop.f32.mrb[111].mxu1  ;;  %v5338_v63 = vadd.f32 %v5306_v36, %v11206_v28  ;;  %v5309_v26 = vld [vmem:[#allocation3 + $0x58] sm:$0xff] }
 0x363   : > { %4939 = vst.msk [vmem:[#allocation3 + $0x60] sm:$0xff] %vm1516_vm6, %v4907_v19  ;;  %v4908_v49 = vadd.f32 %v4876_v40, %v4787_v50  ;;  %5372 = vst.msk [vmem:[#allocation3 + $0x50] sm:$0xff] %vm1516_vm6, %v5340_v52  ;;  %v5341_v0 = vadd.f32 %v11210_v33, %v5309_v26  ;;  %v5307_v61 = vld [vmem:[#allocation3 + $0x48] sm:$0xff] }
 0x364   : > { %4942 = vst.msk [vmem:[#allocation3 + $0x78] sm:$0xff] %vm1516_vm6, %v4910_v16  ;;  %v11414_v29 = vpop.f32.mrb[140].mxu0  ;;  %5370 = vst.msk [vmem:[#allocation3 + $0x40] sm:$0xff] %vm1516_vm6, %v5338_v63  ;;  %v5339_v10 = vadd.f32 %v5307_v61, %v11213_v41 }
 0x365   : > { %4940 = vst.msk [vmem:[#allocation3 + $0x68] sm:$0xff] %vm1516_vm6, %v4908_v49  ;;  %v11419_v30 = vpop.f32.mrb[141].mxu0  ;;  %5373 = vst.msk [vmem:[#allocation3 + $0x58] sm:$0xff] %vm1516_vm6, %v5341_v0  ;;  %v4885_v49 = vld [vmem:[#allocation3 + $0xb0] sm:$0xff]  ;;  %v4883_v0 = vld [vmem:[#allocation3 + $0xa0] sm:$0xff] }
 0x366   : > { %v11423_v3 = vpop.f32.mrb[142].mxu0  ;;  %5371 = vst.msk [vmem:[#allocation3 + $0x48] sm:$0xff] %vm1516_vm6, %v5339_v10 }
 0x367   : > { %v11426_v38 = vpop.f32.mrb[143].mxu0 }
 0x368   : > { %v8666_v28 = vpop.f32.mrb[112].mxu1 }
 0x369   : > { %v4913_v33 = vadd.f32 %v8666_v28, %v4881_v53  ;;  %v4800_v42 = vpop.f32.mrb[113].mxu1  ;;  %v5312_v6 = vld [vmem:[#allocation3 + $0x70] sm:$0xff]  ;;  %v4886_v28 = vld [vmem:[#allocation3 + $0xb8] sm:$0xff] }
 0x36a   : > { %v4911_v34 = vadd.f32 %v4879_v8, %v4800_v42  ;;  %v8667_v46 = vpop.f32.mrb[114].mxu1  ;;  %v5344_v19 = vadd.f32 %v11221_v15, %v5312_v6  ;;  %v5310_v35 = vld [vmem:[#allocation3 + $0x60] sm:$0xff]  ;;  %v4884_v42 = vld [vmem:[#allocation3 + $0xa8] sm:$0xff] }
 0x36b   : > { %4945 = vst.msk [vmem:[#allocation3 + $0x90] sm:$0xff] %vm1516_vm6, %v4913_v33  ;;  %v4914_v41 = vadd.f32 %v8667_v46, %v4882_v2  ;;  %v4803_v1 = vpop.f32.mrb[115].mxu1  ;;  %v5342_v24 = vadd.f32 %v5310_v35, %v11229_v37  ;;  %v5313_v16 = vld [vmem:[#allocation3 + $0x78] sm:$0xff] }
 0x36c   : > { %4943 = vst.msk [vmem:[#allocation3 + $0x80] sm:$0xff] %vm1516_vm6, %v4911_v34  ;;  %v4912_v13 = vadd.f32 %v4880_v62, %v4803_v1  ;;  %5376 = vst.msk [vmem:[#allocation3 + $0x70] sm:$0xff] %vm1516_vm6, %v5344_v19  ;;  %v5345_v40 = vadd.f32 %v11233_v45, %v5313_v16  ;;  %v5311_v52 = vld [vmem:[#allocation3 + $0x68] sm:$0xff] }
 0x36d   : > { %4946 = vst.msk [vmem:[#allocation3 + $0x98] sm:$0xff] %vm1516_vm6, %v4914_v41  ;;  %v11434_v50 = vpop.f32.mrb[144].mxu0  ;;  %5374 = vst.msk [vmem:[#allocation3 + $0x60] sm:$0xff] %vm1516_vm6, %v5342_v24  ;;  %v5343_v15 = vadd.f32 %v5311_v52, %v11236_v27 }
 0x36e   : > { %4944 = vst.msk [vmem:[#allocation3 + $0x88] sm:$0xff] %vm1516_vm6, %v4912_v13  ;;  %v11439_v36 = vpop.f32.mrb[145].mxu0  ;;  %5377 = vst.msk [vmem:[#allocation3 + $0x78] sm:$0xff] %vm1516_vm6, %v5345_v40  ;;  %v4889_v13 = vld [vmem:[#allocation3 + $0xd0] sm:$0xff]  ;;  %v4887_v40 = vld [vmem:[#allocation3 + $0xc0] sm:$0xff] }
 0x36f   : > { %v11443_v25 = vpop.f32.mrb[146].mxu0  ;;  %5375 = vst.msk [vmem:[#allocation3 + $0x68] sm:$0xff] %vm1516_vm6, %v5343_v15 }
 0x370   : > { %v11446_v63 = vpop.f32.mrb[147].mxu0 }
 0x371   : > { %v8670_v37 = vpop.f32.mrb[116].mxu1 }
 0x372   : > { %v4917_v45 = vadd.f32 %v8670_v37, %v4885_v49  ;;  %v4816_v26 = vpop.f32.mrb[117].mxu1  ;;  %v5316_v53 = vld [vmem:[#allocation3 + $0x90] sm:$0xff]  ;;  %v4890_v37 = vld [vmem:[#allocation3 + $0xd8] sm:$0xff] }
 0x373   : > { %v4915_v61 = vadd.f32 %v4883_v0, %v4816_v26  ;;  %v8671_v10 = vpop.f32.mrb[118].mxu1  ;;  %v5348_v8 = vadd.f32 %v11248_v31, %v5316_v53  ;;  %v5314_v34 = vld [vmem:[#allocation3 + $0x80] sm:$0xff]  ;;  %v4888_v26 = vld [vmem:[#allocation3 + $0xc8] sm:$0xff] }
 0x374   : > { %4949 = vst.msk [vmem:[#allocation3 + $0xb0] sm:$0xff] %vm1516_vm6, %v4917_v45  ;;  %v4918_v27 = vadd.f32 %v8671_v10, %v4886_v28  ;;  %v4819_v33 = vpop.f32.mrb[119].mxu1  ;;  %v5346_v2 = vadd.f32 %v5314_v34, %v11253_v59  ;;  %v5317_v6 = vld [vmem:[#allocation3 + $0x98] sm:$0xff] }
 0x375   : > { %4947 = vst.msk [vmem:[#allocation3 + $0xa0] sm:$0xff] %vm1516_vm6, %v4915_v61  ;;  %v4916_v46 = vadd.f32 %v4884_v42, %v4819_v33  ;;  %5380 = vst.msk [vmem:[#allocation3 + $0x90] sm:$0xff] %vm1516_vm6, %v5348_v8  ;;  %v5349_v1 = vadd.f32 %v11257_v44, %v5317_v6  ;;  %v5315_v62 = vld [vmem:[#allocation3 + $0x88] sm:$0xff] }
 0x376   : > { %4950 = vst.msk [vmem:[#allocation3 + $0xb8] sm:$0xff] %vm1516_vm6, %v4918_v27  ;;  %v11454_v41 = vpop.f32.mrb[148].mxu0  ;;  %5378 = vst.msk [vmem:[#allocation3 + $0x80] sm:$0xff] %vm1516_vm6, %v5346_v2  ;;  %v5347_v31 = vadd.f32 %v5315_v62, %v11260_v58 }
 0x377   : > { %4948 = vst.msk [vmem:[#allocation3 + $0xa8] sm:$0xff] %vm1516_vm6, %v4916_v46  ;;  %v11459_v19 = vpop.f32.mrb[149].mxu0  ;;  %5381 = vst.msk [vmem:[#allocation3 + $0x98] sm:$0xff] %vm1516_vm6, %v5349_v1  ;;  %v4893_v46 = vld [vmem:[#allocation3 + $0xf0] sm:$0xff]  ;;  %v4891_v1 = vld [vmem:[#allocation3 + $0xe0] sm:$0xff] }
 0x378   : > { %v11463_v35 = vpop.f32.mrb[150].mxu0  ;;  %5379 = vst.msk [vmem:[#allocation3 + $0x88] sm:$0xff] %vm1516_vm6, %v5347_v31 }
 0x379   : > { %v11466_v24 = vpop.f32.mrb[151].mxu0 }
 0x37a   : > { %v8674_v59 = vpop.f32.mrb[120].mxu1 }
 0x37b   : > { %v4921_v44 = vadd.f32 %v8674_v59, %v4889_v13  ;;  %v4832_v16 = vpop.f32.mrb[121].mxu1  ;;  %v5320_v49 = vld [vmem:[#allocation3 + $0xb0] sm:$0xff]  ;;  %v4894_v59 = vld [vmem:[#allocation3 + $0xf8] sm:$0xff] }
 0x37c   : > { %v4919_v52 = vadd.f32 %v4887_v40, %v4832_v16  ;;  %v8675_v15 = vpop.f32.mrb[122].mxu1  ;;  %v5352_v0 = vadd.f32 %v11272_v12, %v5320_v49  ;;  %v5318_v61 = vld [vmem:[#allocation3 + $0xa0] sm:$0xff]  ;;  %v4892_v16 = vld [vmem:[#allocation3 + $0xe8] sm:$0xff] }
 0x37d   : > { %4953 = vst.msk [vmem:[#allocation3 + $0xd0] sm:$0xff] %vm1516_vm6, %v4921_v44  ;;  %v4922_v58 = vadd.f32 %v8675_v15, %v4890_v37  ;;  %v4835_v45 = vpop.f32.mrb[123].mxu1  ;;  %v5350_v28 = vadd.f32 %v5318_v61, %v11277_v54  ;;  %v5321_v53 = vld [vmem:[#allocation3 + $0xb8] sm:$0xff] }
 0x37e   : > { %4951 = vst.msk [vmem:[#allocation3 + $0xc0] sm:$0xff] %vm1516_vm6, %v4919_v52  ;;  %v4920_v10 = vadd.f32 %v4888_v26, %v4835_v45  ;;  %5384 = vst.msk [vmem:[#allocation3 + $0xb0] sm:$0xff] %vm1516_vm6, %v5352_v0  ;;  %v5353_v33 = vadd.f32 %v11281_v43, %v5321_v53  ;;  %v5319_v42 = vld [vmem:[#allocation3 + $0xa8] sm:$0xff] }
 0x37f   : > { %4954 = vst.msk [vmem:[#allocation3 + $0xd8] sm:$0xff] %vm1516_vm6, %v4922_v58  ;;  %v11474_v27 = vpop.f32.mrb[152].mxu0  ;;  %5382 = vst.msk [vmem:[#allocation3 + $0xa0] sm:$0xff] %vm1516_vm6, %v5350_v28  ;;  %v5351_v12 = vadd.f32 %v5319_v42, %v11284_v57 }
 0x380   : > { %4952 = vst.msk [vmem:[#allocation3 + $0xc8] sm:$0xff] %vm1516_vm6, %v4920_v10  ;;  %v11479_v8 = vpop.f32.mrb[153].mxu0  ;;  %5385 = vst.msk [vmem:[#allocation3 + $0xb8] sm:$0xff] %vm1516_vm6, %v5353_v33  ;;  %v6102_v10 = vld [vmem:[#allocation3 + $0x10] sm:$0xff]  ;;  %v6100_v33 = vld [vmem:[#allocation3] sm:$0xff] }
 0x381   : > { %v11483_v34 = vpop.f32.mrb[154].mxu0  ;;  %5383 = vst.msk [vmem:[#allocation3 + $0xa8] sm:$0xff] %vm1516_vm6, %v5351_v12 }
 0x382   : > { %v8678_v54 = vpop.f32.mrb[124].mxu1  ;;  %v11486_v2 = vpop.f32.mrb[155].mxu0 }
 0x383   : > { %v4925_v43 = vadd.f32 %v8678_v54, %v4893_v46  ;;  %v4848_v6 = vpop.f32.mrb[125].mxu1  ;;  %v6103_v54 = vld [vmem:[#allocation3 + $0x18] sm:$0xff] }
 0x384   : > { %v4923_v62 = vadd.f32 %v4891_v1, %v4848_v6  ;;  %v8679_v31 = vpop.f32.mrb[126].mxu1  ;;  %v5324_v13 = vld [vmem:[#allocation3 + $0xd0] sm:$0xff]  ;;  %v6101_v6 = vld [vmem:[#allocation3 + $0x8] sm:$0xff] }
 0x385   : > { %4957 = vst.msk [vmem:[#allocation3 + $0xf0] sm:$0xff] %vm1516_vm6, %v4925_v43  ;;  %v4926_v57 = vadd.f32 %v8679_v31, %v4894_v59  ;;  %v4851_v44 = vpop.f32.mrb[127].mxu1  ;;  %v5356_v40 = vadd.f32 %v11296_v5, %v5324_v13  ;;  %v5322_v52 = vld [vmem:[#allocation3 + $0xc0] sm:$0xff] }
 0x386   : > { %4955 = vst.msk [vmem:[#allocation3 + $0xe0] sm:$0xff] %vm1516_vm6, %v4923_v62  ;;  %v4924_v15 = vadd.f32 %v4892_v16, %v4851_v44  ;;  %v5354_v37 = vadd.f32 %v5322_v52, %v11301_v7  ;;  %v5325_v49 = vld [vmem:[#allocation3 + $0xd8] sm:$0xff] }
 0x387   : > { %4958 = vst.msk [vmem:[#allocation3 + $0xf8] sm:$0xff] %vm1516_vm6, %v4926_v57  ;;  %5388 = vst.msk [vmem:[#allocation3 + $0xd0] sm:$0xff] %vm1516_vm6, %v5356_v40  ;;  %v5357_v58 = vadd.f32 %v11305_v48, %v5325_v49  ;;  %v5323_v45 = vld [vmem:[#allocation3 + $0xc8] sm:$0xff]  ;;  %v11496_v26 = vpop.f32.mrb[156].mxu0  ;;  %v6106_v40 = vld [vmem:[#allocation3 + $0x30] sm:$0xff] }
 0x388   : > { %4956 = vst.msk [vmem:[#allocation3 + $0xe8] sm:$0xff] %vm1516_vm6, %v4924_v15  ;;  %5386 = vst.msk [vmem:[#allocation3 + $0xc0] sm:$0xff] %vm1516_vm6, %v5354_v37  ;;  %v5355_v5 = vadd.f32 %v5323_v45, %v11308_v47  ;;  %v11501_v0 = vpop.f32.mrb[157].mxu0  ;;  %v6104_v15 = vld [vmem:[#allocation3 + $0x20] sm:$0xff] }
 0x389   : > { %5389 = vst.msk [vmem:[#allocation3 + $0xd8] sm:$0xff] %vm1516_vm6, %v5357_v58  ;;  %v11504_v7 = vpop.f32.mrb[158].mxu0 }
 0x38a   : > { %v8722_v61 = vpop.f32.mrb[128].mxu1  ;;  %5387 = vst.msk [vmem:[#allocation3 + $0xc8] sm:$0xff] %vm1516_vm6, %v5355_v5  ;;  %v11507_v48 = vpop.f32.mrb[159].mxu0 }
 0x38b   : > { %v6134_v28 = vadd.f32 %v8722_v61, %v6102_v10  ;;  %v5973_v53 = vpop.f32.mrb[129].mxu1  ;;  %v6105_v10 = vld [vmem:[#allocation3 + $0x28] sm:$0xff] }
 0x38c   : > { %v6132_v42 = vadd.f32 %v6100_v33, %v5973_v53  ;;  %v8723_v12 = vpop.f32.mrb[130].mxu1  ;;  %v5328_v46 = vld [vmem:[#allocation3 + $0xf0] sm:$0xff] }
 0x38d   : > { %6166 = vst.msk [vmem:[#allocation3 + $0x10] sm:$0xff] %vm1516_vm6, %v6134_v28  ;;  %v6135_v47 = vadd.f32 %v8723_v12, %v6103_v54  ;;  %v5976_v43 = vpop.f32.mrb[131].mxu1  ;;  %v5360_v1 = vadd.f32 %v11320_v14, %v5328_v46  ;;  %v5326_v62 = vld [vmem:[#allocation3 + $0xe0] sm:$0xff]  ;;  %v6110_v54 = vld [vmem:[#allocation3 + $0x50] sm:$0xff] }
 0x38e   : > { %6164 = vst.msk [vmem:[#allocation3] sm:$0xff] %vm1516_vm6, %v6132_v42  ;;  %v6133_v31 = vadd.f32 %v6101_v6, %v5976_v43  ;;  %v5358_v59 = vadd.f32 %v5326_v62, %v11325_v11  ;;  %v5329_v13 = vld [vmem:[#allocation3 + $0xf8] sm:$0xff]  ;;  %v6108_v43 = vld [vmem:[#allocation3 + $0x40] sm:$0xff] }
 0x38f   : > { %6167 = vst.msk [vmem:[#allocation3 + $0x18] sm:$0xff] %vm1516_vm6, %v6135_v47  ;;  %5392 = vst.msk [vmem:[#allocation3 + $0xf0] sm:$0xff] %vm1516_vm6, %v5360_v1  ;;  %v5361_v57 = vadd.f32 %v11329_v20, %v5329_v13  ;;  %v5327_v44 = vld [vmem:[#allocation3 + $0xe8] sm:$0xff]  ;;  %v6107_v20 = vld [vmem:[#allocation3 + $0x38] sm:$0xff] }
 0x390   : > { %6165 = vst.msk [vmem:[#allocation3 + $0x8] sm:$0xff] %vm1516_vm6, %v6133_v31  ;;  %5390 = vst.msk [vmem:[#allocation3 + $0xe0] sm:$0xff] %vm1516_vm6, %v5358_v59  ;;  %v5359_v14 = vadd.f32 %v5327_v44, %v11332_v56  ;;  %v6111_v62 = vld [vmem:[#allocation3 + $0x58] sm:$0xff]  ;;  %v11536_v31 = vld [vmem:[%s12021_s6] ss:$0 sm:$0xff] }
 0x391   : > { %5393 = vst.msk [vmem:[#allocation3 + $0xf8] sm:$0xff] %vm1516_vm6, %v5361_v57  ;;  %v6109_v44 = vld [vmem:[#allocation3 + $0x48] sm:$0xff] }
 0x392   : > { %v8726_v16 = vpop.f32.mrb[132].mxu1  ;;  %5391 = vst.msk [vmem:[#allocation3 + $0xe8] sm:$0xff] %vm1516_vm6, %v5359_v14 }
 0x393   : > { %v6138_v11 = vadd.f32 %v8726_v16, %v6106_v40  ;;  %v5989_v52 = vpop.f32.mrb[133].mxu1 }
 0x394   : > { %v6680_v37 = vld [vmem:[#allocation3 + $0x10] sm:$0xff]  ;;  %v6136_v49 = vadd.f32 %v6104_v15, %v5989_v52  ;;  %v8727_v58 = vpop.f32.mrb[134].mxu1 }
 0x395   : > { %v6712_v45 = vadd.f32 %v11344_v39, %v6680_v37  ;;  %v6678_v5 = vld [vmem:[#allocation3] sm:$0xff]  ;;  %6170 = vst.msk [vmem:[#allocation3 + $0x30] sm:$0xff] %vm1516_vm6, %v6138_v11  ;;  %v6139_v61 = vadd.f32 %v8727_v58, %v6107_v20  ;;  %v5992_v56 = vpop.f32.mrb[135].mxu1  ;;  %v11548_v37 = vld [vmem:[%s12022_s7] ss:$0 sm:$0xff] }
 0x396   : > { %v6710_v28 = vadd.f32 %v6678_v5, %v11349_v18  ;;  %v6681_v53 = vld [vmem:[#allocation3 + $0x18] sm:$0xff]  ;;  %6168 = vst.msk [vmem:[#allocation3 + $0x20] sm:$0xff] %vm1516_vm6, %v6136_v49  ;;  %v6137_v33 = vadd.f32 %v6105_v10, %v5992_v56 }
 0x397   : > { %6744 = vst.msk [vmem:[#allocation3 + $0x10] sm:$0xff] %vm1516_vm6, %v6712_v45  ;;  %v6713_v42 = vadd.f32 %v11353_v21, %v6681_v53  ;;  %v6679_v12 = vld [vmem:[#allocation3 + $0x8] sm:$0xff]  ;;  %6171 = vst.msk [vmem:[#allocation3 + $0x38] sm:$0xff] %vm1516_vm6, %v6139_v61  ;;  %v6114_v61 = vld [vmem:[#allocation3 + $0x70] sm:$0xff] }
 0x398   : > { %6742 = vst.msk [vmem:[#allocation3] sm:$0xff] %vm1516_vm6, %v6710_v28  ;;  %v6711_v39 = vadd.f32 %v6679_v12, %v11356_v32  ;;  %6169 = vst.msk [vmem:[#allocation3 + $0x28] sm:$0xff] %vm1516_vm6, %v6137_v33  ;;  %v6112_v53 = vld [vmem:[#allocation3 + $0x60] sm:$0xff] }
 0x399   : > { %6745 = vst.msk [vmem:[#allocation3 + $0x18] sm:$0xff] %vm1516_vm6, %v6713_v42 }
 0x39a   : > { %6743 = vst.msk [vmem:[#allocation3 + $0x8] sm:$0xff] %vm1516_vm6, %v6711_v39  ;;  %v8730_v18 = vpop.f32.mrb[136].mxu1 }
 0x39b   : > { %v6142_v46 = vadd.f32 %v8730_v18, %v6110_v54  ;;  %v6005_v47 = vpop.f32.mrb[137].mxu1  ;;  %v6115_v54 = vld [vmem:[#allocation3 + $0x78] sm:$0xff] }
 0x39c   : > { %v6684_v6 = vld [vmem:[#allocation3 + $0x30] sm:$0xff]  ;;  %v6140_v21 = vadd.f32 %v6108_v43, %v6005_v47  ;;  %v8731_v1 = vpop.f32.mrb[138].mxu1 }
 0x39d   : > { %v6716_v32 = vadd.f32 %v11368_v17, %v6684_v6  ;;  %v6682_v59 = vld [vmem:[#allocation3 + $0x20] sm:$0xff]  ;;  %6174 = vst.msk [vmem:[#allocation3 + $0x50] sm:$0xff] %vm1516_vm6, %v6142_v46  ;;  %v6143_v13 = vadd.f32 %v8731_v1, %v6111_v62  ;;  %v6008_v57 = vpop.f32.mrb[139].mxu1  ;;  %v6113_v1 = vld [vmem:[#allocation3 + $0x68] sm:$0xff] }
 0x39e   : > { %v6714_v14 = vadd.f32 %v6682_v59, %v11373_v9  ;;  %v6685_v16 = vld [vmem:[#allocation3 + $0x38] sm:$0xff]  ;;  %6172 = vst.msk [vmem:[#allocation3 + $0x40] sm:$0xff] %vm1516_vm6, %v6140_v21  ;;  %v6141_v40 = vadd.f32 %v6109_v44, %v6008_v57  ;;  %v6776_v11 = vld [vmem:[#allocation3 + $0x10] sm:$0xff] }
 0x39f   : > { %6748 = vst.msk [vmem:[#allocation3 + $0x30] sm:$0xff] %vm1516_vm6, %v6716_v32  ;;  %v6717_v52 = vadd.f32 %v11377_v23, %v6685_v16  ;;  %v6683_v15 = vld [vmem:[#allocation3 + $0x28] sm:$0xff]  ;;  %6175 = vst.msk [vmem:[#allocation3 + $0x58] sm:$0xff] %vm1516_vm6, %v6143_v13  ;;  %v6774_v17 = vld [vmem:[#allocation3] sm:$0xff]  ;;  %v6815_v9 = vmul.f32 %v11536_v31, %v6776_v11 }
 0x3a0   : > { %6746 = vst.msk [vmem:[#allocation3 + $0x20] sm:$0xff] %vm1516_vm6, %v6714_v14  ;;  %v6715_v49 = vadd.f32 %v6683_v15, %v11380_v51  ;;  %6173 = vst.msk [vmem:[#allocation3 + $0x48] sm:$0xff] %vm1516_vm6, %v6141_v40  ;;  %v6813_v58 = vmul.f32 %v11536_v31, %v6774_v17  ;;  %v6777_v23 = vld [vmem:[#allocation3 + $0x18] sm:$0xff] }
 0x3a1   : > { %6749 = vst.msk [vmem:[#allocation3 + $0x38] sm:$0xff] %vm1516_vm6, %v6717_v52  ;;  %v6775_v20 = vld [vmem:[#allocation3 + $0x8] sm:$0xff]  ;;  %v6816_v45 = vmul.f32 %v11536_v31, %v6777_v23  ;;  %v6854_v33 = vadd.f32 %v11548_v37, %v6815_v9 }
 0x3a2   : > { %6747 = vst.msk [vmem:[#allocation3 + $0x28] sm:$0xff] %vm1516_vm6, %v6715_v49  ;;  %v8734_v5 = vpop.f32.mrb[140].mxu1  ;;  %v6814_v56 = vmul.f32 %v11536_v31, %v6775_v20  ;;  %v6852_v10 = vadd.f32 %v11548_v37, %v6813_v58  ;;  %v6118_v20 = vld [vmem:[#allocation3 + $0x90] sm:$0xff] }
 0x3a3   : > { %v6146_v28 = vadd.f32 %v8734_v5, %v6114_v61  ;;  %v6021_v51 = vpop.f32.mrb[141].mxu1  ;;  %v6855_v42 = vadd.f32 %v11548_v37, %v6816_v45  ;;  %v6886_v40 = vmax.f32 %v6854_v33, 0.0 }
 0x3a4   : > { %v6688_v12 = vld [vmem:[#allocation3 + $0x50] sm:$0xff]  ;;  %v6144_v39 = vadd.f32 %v6112_v53, %v6021_v51  ;;  %v8735_v18 = vpop.f32.mrb[142].mxu1  ;;  %v6853_v46 = vadd.f32 %v11548_v37, %v6814_v56  ;;  %v6884_v57 = vmax.f32 %v6852_v10, 0.0  ;;  %v6116_v56 = vld [vmem:[#allocation3 + $0x80] sm:$0xff] }
 0x3a5   : > { %v6720_v47 = vadd.f32 %v11392_v55, %v6688_v12  ;;  %v6686_v43 = vld [vmem:[#allocation3 + $0x40] sm:$0xff]  ;;  %6178 = vst.msk [vmem:[#allocation3 + $0x70] sm:$0xff] %vm1516_vm6, %v6146_v28  ;;  %v6147_v6 = vadd.f32 %v8735_v18, %v6115_v54  ;;  %v6024_v21 = vpop.f32.mrb[143].mxu1  ;;  %v6887_v62 = vmax.f32 %v6855_v42, 0.0  ;;  %v6119_v42 = vld [vmem:[#allocation3 + $0x98] sm:$0xff] }
 0x3a6   : > { %v6718_v32 = vadd.f32 %v6686_v43, %v11397_v60  ;;  %v6689_v59 = vld [vmem:[#allocation3 + $0x58] sm:$0xff]  ;;  %6176 = vst.msk [vmem:[#allocation3 + $0x60] sm:$0xff] %vm1516_vm6, %v6144_v39  ;;  %v6145_v13 = vadd.f32 %v6113_v1, %v6024_v21  ;;  %v6885_v44 = vmax.f32 %v6853_v46, 0.0  ;;  %v6780_v14 = vld [vmem:[#allocation3 + $0x30] sm:$0xff] }
 0x3a7   : > { %6752 = vst.msk [vmem:[#allocation3 + $0x50] sm:$0xff] %vm1516_vm6, %v6720_v47  ;;  %v6721_v55 = vadd.f32 %v11401_v4, %v6689_v59  ;;  %v6687_v16 = vld [vmem:[#allocation3 + $0x48] sm:$0xff]  ;;  %6179 = vst.msk [vmem:[#allocation3 + $0x78] sm:$0xff] %vm1516_vm6, %v6147_v6  ;;  %v6778_v11 = vld [vmem:[#allocation3 + $0x20] sm:$0xff]  ;;  %v6819_v52 = vmul.f32 %v11536_v31, %v6780_v14  ;;  %v6917_v4 = vpack.c.bf16 %v6887_v62, %v6886_v40 }
 0x3a8   : > { %6750 = vst.msk [vmem:[#allocation3 + $0x40] sm:$0xff] %vm1516_vm6, %v6718_v32  ;;  %v6719_v60 = vadd.f32 %v6687_v16, %v11404_v22  ;;  %6177 = vst.msk [vmem:[#allocation3 + $0x68] sm:$0xff] %vm1516_vm6, %v6145_v13  ;;  %v6916_v15 = vpack.c.bf16 %v6885_v44, %v6884_v57  ;;  %v6817_v17 = vmul.f32 %v11536_v31, %v6778_v11  ;;  %v6781_v9 = vld [vmem:[#allocation3 + $0x38] sm:$0xff]  ;;  %v6117_v47 = vld [vmem:[#allocation3 + $0x88] sm:$0xff] }
 0x3a9   : > { %6753 = vst.msk [vmem:[#allocation3 + $0x58] sm:$0xff] %vm1516_vm6, %v6721_v55  ;;  %v6779_v49 = vld [vmem:[#allocation3 + $0x28] sm:$0xff]  ;;  %v6820_v58 = vmul.f32 %v11536_v31, %v6781_v9  ;;  %v6858_v10 = vadd.f32 %v11548_v37, %v6819_v52 }
 0x3aa   : > { %6751 = vst.msk [vmem:[#allocation3 + $0x48] sm:$0xff] %vm1516_vm6, %v6719_v60  ;;  %v8738_v23 = vpop.f32.mrb[144].mxu1  ;;  %8792 = vmatprep.mubr.msk.bf16.mxu1 %vm1516_vm6, %v6916_v15  ;;  %v6818_v22 = vmul.f32 %v11536_v31, %v6779_v49  ;;  %v6856_v45 = vadd.f32 %v11548_v37, %v6817_v17  ;;  %v6122_v15 = vld [vmem:[#allocation3 + $0xb0] sm:$0xff]  ;;  %v6120_v49 = vld [vmem:[#allocation3 + $0xa0] sm:$0xff] }
 0x3ab   : > { %v6150_v5 = vadd.f32 %v8738_v23, %v6118_v20  ;;  %v6037_v61 = vpop.f32.mrb[145].mxu1  ;;  %8793 = vmatmul.mubr.msk.bf16.vlgmr.msra.gmra.mrb[160].mxu1 %vm1516_vm6, %v6917_v4  ;;  %v6859_v28 = vadd.f32 %v11548_v37, %v6820_v58  ;;  %v6890_v57 = vmax.f32 %v6858_v10, 0.0 }
 0x3ac   : > { %v6692_v51 = vld [vmem:[#allocation3 + $0x70] sm:$0xff]  ;;  %v6148_v53 = vadd.f32 %v6116_v56, %v6037_v61  ;;  %v8739_v33 = vpop.f32.mrb[146].mxu1  ;;  %v6857_v12 = vadd.f32 %v11548_v37, %v6818_v22  ;;  %v6888_v62 = vmax.f32 %v6856_v45, 0.0 }
 0x3ad   : > { %v6724_v39 = vadd.f32 %v11414_v29, %v6692_v51  ;;  %v6690_v18 = vld [vmem:[#allocation3 + $0x60] sm:$0xff]  ;;  %6182 = vst.msk [vmem:[#allocation3 + $0x90] sm:$0xff] %vm1516_vm6, %v6150_v5  ;;  %v6151_v54 = vadd.f32 %v8739_v33, %v6119_v42  ;;  %v6040_v46 = vpop.f32.mrb[147].mxu1  ;;  %v6891_v43 = vmax.f32 %v6859_v28, 0.0  ;;  %v6123_v5 = vld [vmem:[#allocation3 + $0xb8] sm:$0xff] }
 0x3ae   : > { %v6722_v6 = vadd.f32 %v6690_v18, %v11419_v30  ;;  %v6693_v21 = vld [vmem:[#allocation3 + $0x78] sm:$0xff]  ;;  %6180 = vst.msk [vmem:[#allocation3 + $0x80] sm:$0xff] %vm1516_vm6, %v6148_v53  ;;  %v6149_v1 = vadd.f32 %v6117_v47, %v6040_v46  ;;  %v6889_v32 = vmax.f32 %v6857_v12, 0.0  ;;  %v6784_v59 = vld [vmem:[#allocation3 + $0x50] sm:$0xff]  ;;  %v6121_v53 = vld [vmem:[#allocation3 + $0xa8] sm:$0xff] }
 0x3af   : > { %6756 = vst.msk [vmem:[#allocation3 + $0x70] sm:$0xff] %vm1516_vm6, %v6724_v39  ;;  %v6725_v29 = vadd.f32 %v11423_v3, %v6693_v21  ;;  %v6691_v13 = vld [vmem:[#allocation3 + $0x68] sm:$0xff]  ;;  %6183 = vst.msk [vmem:[#allocation3 + $0x98] sm:$0xff] %vm1516_vm6, %v6151_v54  ;;  %v6782_v44 = vld [vmem:[#allocation3 + $0x40] sm:$0xff]  ;;  %v6823_v14 = vmul.f32 %v11536_v31, %v6784_v59  ;;  %v6919_v3 = vpack.c.bf16 %v6891_v43, %v6890_v57 }
 0x3b0   : > { %6754 = vst.msk [vmem:[#allocation3 + $0x60] sm:$0xff] %vm1516_vm6, %v6722_v6  ;;  %v6723_v30 = vadd.f32 %v6691_v13, %v11426_v38  ;;  %6181 = vst.msk [vmem:[#allocation3 + $0x88] sm:$0xff] %vm1516_vm6, %v6149_v1  ;;  %v6918_v55 = vpack.c.bf16 %v6889_v32, %v6888_v62  ;;  %v6821_v16 = vmul.f32 %v11536_v31, %v6782_v44  ;;  %v6785_v40 = vld [vmem:[#allocation3 + $0x58] sm:$0xff]  ;;  %v6126_v57 = vld [vmem:[#allocation3 + $0xd0] sm:$0xff] }
 0x3b1   : > { %6757 = vst.msk [vmem:[#allocation3 + $0x78] sm:$0xff] %vm1516_vm6, %v6725_v29  ;;  %v6783_v11 = vld [vmem:[#allocation3 + $0x48] sm:$0xff]  ;;  %v6824_v52 = vmul.f32 %v11536_v31, %v6785_v40  ;;  %v6862_v58 = vadd.f32 %v11548_v37, %v6823_v14 }
 0x3b2   : > { %6755 = vst.msk [vmem:[#allocation3 + $0x68] sm:$0xff] %vm1516_vm6, %v6723_v30  ;;  %v8742_v60 = vpop.f32.mrb[148].mxu1  ;;  %8796 = vmatprep.mubr.msk.bf16.mxu1 %vm1516_vm6, %v6918_v55  ;;  %v6822_v38 = vmul.f32 %v11536_v31, %v6783_v11  ;;  %v6860_v17 = vadd.f32 %v11548_v37, %v6821_v16  ;;  %v6124_v55 = vld [vmem:[#allocation3 + $0xc0] sm:$0xff] }
 0x3b3   : > { %v6154_v9 = vadd.f32 %v8742_v60, %v6122_v15  ;;  %v6053_v4 = vpop.f32.mrb[149].mxu1  ;;  %8797 = vmatmul.mubr.msk.bf16.gmra.mrb[164].mxu1 %vm1516_vm6, %v6919_v3  ;;  %v6863_v23 = vadd.f32 %v11548_v37, %v6824_v52  ;;  %v6894_v43 = vmax.f32 %v6862_v58, 0.0  ;;  %v6127_v60 = vld [vmem:[#allocation3 + $0xd8] sm:$0xff] }
 0x3b4   : > { %v6696_v20 = vld [vmem:[#allocation3 + $0x90] sm:$0xff]  ;;  %v6152_v22 = vadd.f32 %v6120_v49, %v6053_v4  ;;  %v8743_v45 = vpop.f32.mrb[150].mxu1  ;;  %v6861_v61 = vadd.f32 %v11548_v37, %v6822_v38  ;;  %v6892_v18 = vmax.f32 %v6860_v17, 0.0  ;;  %v6125_v49 = vld [vmem:[#allocation3 + $0xc8] sm:$0xff] }
 0x3b5   : > { %v6728_v56 = vadd.f32 %v11434_v50, %v6696_v20  ;;  %v6694_v10 = vld [vmem:[#allocation3 + $0x80] sm:$0xff]  ;;  %6186 = vst.msk [vmem:[#allocation3 + $0xb0] sm:$0xff] %vm1516_vm6, %v6154_v9  ;;  %v6155_v28 = vadd.f32 %v8743_v45, %v6123_v5  ;;  %v6056_v51 = vpop.f32.mrb[151].mxu1  ;;  %v6895_v33 = vmax.f32 %v6863_v23, 0.0 }
 0x3b6   : > { %v6726_v42 = vadd.f32 %v6694_v10, %v11439_v36  ;;  %v6697_v12 = vld [vmem:[#allocation3 + $0x98] sm:$0xff]  ;;  %6184 = vst.msk [vmem:[#allocation3 + $0xa0] sm:$0xff] %vm1516_vm6, %v6152_v22  ;;  %v6153_v39 = vadd.f32 %v6121_v53, %v6056_v51  ;;  %v6893_v54 = vmax.f32 %v6861_v61, 0.0  ;;  %v6788_v46 = vld [vmem:[#allocation3 + $0x70] sm:$0xff] }
 0x3b7   : > { %6760 = vst.msk [vmem:[#allocation3 + $0x90] sm:$0xff] %vm1516_vm6, %v6728_v56  ;;  %v6729_v50 = vadd.f32 %v11443_v25, %v6697_v12  ;;  %v6695_v47 = vld [vmem:[#allocation3 + $0x88] sm:$0xff]  ;;  %6187 = vst.msk [vmem:[#allocation3 + $0xb8] sm:$0xff] %vm1516_vm6, %v6155_v28  ;;  %v6786_v6 = vld [vmem:[#allocation3 + $0x60] sm:$0xff]  ;;  %v6827_v21 = vmul.f32 %v11536_v31, %v6788_v46  ;;  %v6921_v25 = vpack.c.bf16 %v6895_v33, %v6894_v43 }
 0x3b8   : > { %6758 = vst.msk [vmem:[#allocation3 + $0x80] sm:$0xff] %vm1516_vm6, %v6726_v42  ;;  %v6727_v36 = vadd.f32 %v6695_v47, %v11446_v63  ;;  %6185 = vst.msk [vmem:[#allocation3 + $0xa8] sm:$0xff] %vm1516_vm6, %v6153_v39  ;;  %v6920_v1 = vpack.c.bf16 %v6893_v54, %v6892_v18  ;;  %v6825_v62 = vmul.f32 %v11536_v31, %v6786_v6  ;;  %v6789_v32 = vld [vmem:[#allocation3 + $0x78] sm:$0xff]  ;;  %v6130_v54 = vld [vmem:[#allocation3 + $0xf0] sm:$0xff] }
 0x3b9   : > { %6761 = vst.msk [vmem:[#allocation3 + $0x98] sm:$0xff] %vm1516_vm6, %v6729_v50  ;;  %v6787_v59 = vld [vmem:[#allocation3 + $0x68] sm:$0xff]  ;;  %v6828_v29 = vmul.f32 %v11536_v31, %v6789_v32  ;;  %v6866_v16 = vadd.f32 %v11548_v37, %v6827_v21  ;;  %v6128_v43 = vld [vmem:[#allocation3 + $0xe0] sm:$0xff]  ;;  %v6131_v32 = vld [vmem:[#allocation3 + $0xf8] sm:$0xff] }
 0x3ba   : > { %6759 = vst.msk [vmem:[#allocation3 + $0x88] sm:$0xff] %vm1516_vm6, %v6727_v36  ;;  %v8746_v13 = vpop.f32.mrb[152].mxu1  ;;  %8800 = vmatprep.mubr.msk.bf16.mxu1 %vm1516_vm6, %v6920_v1  ;;  %v6826_v63 = vmul.f32 %v11536_v31, %v6787_v59  ;;  %v6864_v44 = vadd.f32 %v11548_v37, %v6825_v62 }
 0x3bb   : > { %v6158_v14 = vadd.f32 %v8746_v13, %v6126_v57  ;;  %v6069_v30 = vpop.f32.mrb[153].mxu1  ;;  %8801 = vmatmul.mubr.msk.bf16.gmra.mrb[168].mxu1 %vm1516_vm6, %v6921_v25  ;;  %v6867_v40 = vadd.f32 %v11548_v37, %v6828_v29  ;;  %v6898_v10 = vmax.f32 %v6866_v16, 0.0 }
 0x3bc   : > { %v6700_v3 = vld [vmem:[#allocation3 + $0xb0] sm:$0xff]  ;;  %v6156_v11 = vadd.f32 %v6124_v55, %v6069_v30  ;;  %v8747_v52 = vpop.f32.mrb[154].mxu1  ;;  %v6865_v15 = vadd.f32 %v11548_v37, %v6826_v63  ;;  %v6896_v45 = vmax.f32 %v6864_v44, 0.0  ;;  %v6129_v63 = vld [vmem:[#allocation3 + $0xe8] sm:$0xff] }
 0x3bd   : > { %v6732_v38 = vadd.f32 %v11454_v41, %v6700_v3  ;;  %v6698_v17 = vld [vmem:[#allocation3 + $0xa0] sm:$0xff]  ;;  %6190 = vst.msk [vmem:[#allocation3 + $0xd0] sm:$0xff] %vm1516_vm6, %v6158_v14  ;;  %v6159_v9 = vadd.f32 %v8747_v52, %v6127_v60  ;;  %v6072_v4 = vpop.f32.mrb[155].mxu1  ;;  %v6899_v58 = vmax.f32 %v6867_v40, 0.0 }
 0x3be   : > { %v6730_v23 = vadd.f32 %v6698_v17, %v11459_v19  ;;  %v6701_v20 = vld [vmem:[#allocation3 + $0xb8] sm:$0xff]  ;;  %6188 = vst.msk [vmem:[#allocation3 + $0xc0] sm:$0xff] %vm1516_vm6, %v6156_v11  ;;  %v6157_v22 = vadd.f32 %v6125_v49, %v6072_v4  ;;  %v6897_v5 = vmax.f32 %v6865_v15, 0.0  ;;  %v6792_v61 = vld [vmem:[#allocation3 + $0x90] sm:$0xff] }
 0x3bf   : > { %6764 = vst.msk [vmem:[#allocation3 + $0xb0] sm:$0xff] %vm1516_vm6, %v6732_v38  ;;  %v6733_v41 = vadd.f32 %v11463_v35, %v6701_v20  ;;  %v6699_v56 = vld [vmem:[#allocation3 + $0xa8] sm:$0xff]  ;;  %6191 = vst.msk [vmem:[#allocation3 + $0xd8] sm:$0xff] %vm1516_vm6, %v6159_v9  ;;  %v6790_v28 = vld [vmem:[#allocation3 + $0x80] sm:$0xff]  ;;  %v6831_v51 = vmul.f32 %v11536_v31, %v6792_v61  ;;  %v6923_v35 = vpack.c.bf16 %v6899_v58, %v6898_v10 }
 0x3c0   : > { %6762 = vst.msk [vmem:[#allocation3 + $0xa0] sm:$0xff] %vm1516_vm6, %v6730_v23  ;;  %v6731_v19 = vadd.f32 %v6699_v56, %v11466_v24  ;;  %6189 = vst.msk [vmem:[#allocation3 + $0xc8] sm:$0xff] %vm1516_vm6, %v6157_v22  ;;  %v6922_v53 = vpack.c.bf16 %v6897_v5, %v6896_v45  ;;  %v6829_v33 = vmul.f32 %v11536_v31, %v6790_v28  ;;  %v6793_v42 = vld [vmem:[#allocation3 + $0x98] sm:$0xff] }
 0x3c1   : > { %6765 = vst.msk [vmem:[#allocation3 + $0xb8] sm:$0xff] %vm1516_vm6, %v6733_v41  ;;  %v6791_v12 = vld [vmem:[#allocation3 + $0x88] sm:$0xff]  ;;  %v6832_v39 = vmul.f32 %v11536_v31, %v6793_v42  ;;  %v6870_v6 = vadd.f32 %v11548_v37, %v6831_v51 }
 0x3c2   : > { %6763 = vst.msk [vmem:[#allocation3 + $0xa8] sm:$0xff] %vm1516_vm6, %v6731_v19  ;;  %v8750_v18 = vpop.f32.mrb[156].mxu1  ;;  %8804 = vmatprep.mubr.msk.bf16.mxu1 %vm1516_vm6, %v6922_v53  ;;  %v6830_v24 = vmul.f32 %v11536_v31, %v6791_v12  ;;  %v6868_v46 = vadd.f32 %v11548_v37, %v6829_v33 }
 0x3c3   : > { %v6162_v50 = vadd.f32 %v8750_v18, %v6130_v54  ;;  %v6085_v47 = vpop.f32.mrb[157].mxu1  ;;  %8805 = vmatmul.mubr.msk.bf16.gmra.mrb[172].mxu1 %vm1516_vm6, %v6923_v35  ;;  %v6871_v21 = vadd.f32 %v11548_v37, %v6832_v39  ;;  %v6902_v52 = vmax.f32 %v6870_v6, 0.0 }
 0x3c4   : > { %v6704_v36 = vld [vmem:[#allocation3 + $0xd0] sm:$0xff]  ;;  %v6160_v1 = vadd.f32 %v6128_v43, %v6085_v47  ;;  %v8751_v62 = vpop.f32.mrb[158].mxu1  ;;  %v6869_v25 = vadd.f32 %v11548_v37, %v6830_v24  ;;  %v6900_v16 = vmax.f32 %v6868_v46, 0.0 }
 0x3c5   : > { %v6736_v59 = vadd.f32 %v11474_v27, %v6704_v36  ;;  %v6702_v29 = vld [vmem:[#allocation3 + $0xc0] sm:$0xff]  ;;  %6194 = vst.msk [vmem:[#allocation3 + $0xf0] sm:$0xff] %vm1516_vm6, %v6162_v50  ;;  %v6163_v13 = vadd.f32 %v8751_v62, %v6131_v32  ;;  %v6088_v57 = vpop.f32.mrb[159].mxu1  ;;  %v6903_v44 = vmax.f32 %v6871_v21, 0.0 }
 0x3c6   : > { %v6734_v14 = vadd.f32 %v6702_v29, %v11479_v8  ;;  %v6705_v30 = vld [vmem:[#allocation3 + $0xd8] sm:$0xff]  ;;  %6192 = vst.msk [vmem:[#allocation3 + $0xe0] sm:$0xff] %vm1516_vm6, %v6160_v1  ;;  %v6161_v55 = vadd.f32 %v6129_v63, %v6088_v57  ;;  %v6901_v40 = vmax.f32 %v6869_v25, 0.0  ;;  %v6796_v3 = vld [vmem:[#allocation3 + $0xb0] sm:$0xff] }
 0x3c7   : > { %6768 = vst.msk [vmem:[#allocation3 + $0xd0] sm:$0xff] %vm1516_vm6, %v6736_v59  ;;  %v6737_v27 = vadd.f32 %v11483_v34, %v6705_v30  ;;  %v6703_v11 = vld [vmem:[#allocation3 + $0xc8] sm:$0xff]  ;;  %6195 = vst.msk [vmem:[#allocation3 + $0xf8] sm:$0xff] %vm1516_vm6, %v6163_v13  ;;  %v6794_v60 = vld [vmem:[#allocation3 + $0xa0] sm:$0xff]  ;;  %v6835_v15 = vmul.f32 %v11536_v31, %v6796_v3  ;;  %v6925_v34 = vpack.c.bf16 %v6903_v44, %v6902_v52 }
 0x3c8   : > { %6766 = vst.msk [vmem:[#allocation3 + $0xc0] sm:$0xff] %vm1516_vm6, %v6734_v14  ;;  %v6735_v8 = vadd.f32 %v6703_v11, %v11486_v2  ;;  %6193 = vst.msk [vmem:[#allocation3 + $0xe8] sm:$0xff] %vm1516_vm6, %v6161_v55  ;;  %v6924_v38 = vpack.c.bf16 %v6901_v40, %v6900_v16  ;;  %v6833_v17 = vmul.f32 %v11536_v31, %v6794_v60  ;;  %v6797_v9 = vld [vmem:[#allocation3 + $0xb8] sm:$0xff] }
 0x3c9   : > { %6769 = vst.msk [vmem:[#allocation3 + $0xd8] sm:$0xff] %vm1516_vm6, %v6737_v27  ;;  %v6795_v4 = vld [vmem:[#allocation3 + $0xa8] sm:$0xff]  ;;  %v6836_v49 = vmul.f32 %v11536_v31, %v6797_v9  ;;  %v6874_v23 = vadd.f32 %v11548_v37, %v6835_v15 }
 0x3ca   : > { %6767 = vst.msk [vmem:[#allocation3 + $0xc8] sm:$0xff] %vm1516_vm6, %v6735_v8  ;;  %8808 = vmatprep.mubr.msk.bf16.mxu1 %vm1516_vm6, %v6924_v38  ;;  %v6834_v58 = vmul.f32 %v11536_v31, %v6795_v4  ;;  %v6872_v2 = vadd.f32 %v11548_v37, %v6833_v17 }
 0x3cb   : > { %8809 = vmatmul.mubr.msk.bf16.gmra.mrb[176].mxu1 %vm1516_vm6, %v6925_v34  ;;  %v6875_v20 = vadd.f32 %v11548_v37, %v6836_v49  ;;  %v6906_v42 = vmax.f32 %v6874_v23, 0.0 }
 0x3cc   : > { %v6708_v22 = vld [vmem:[#allocation3 + $0xf0] sm:$0xff]  ;;  %v6873_v45 = vadd.f32 %v11548_v37, %v6834_v58  ;;  %v6904_v28 = vmax.f32 %v6872_v2, 0.0 }
 0x3cd   : > { %v6740_v5 = vadd.f32 %v11496_v26, %v6708_v22  ;;  %v6706_v61 = vld [vmem:[#allocation3 + $0xe0] sm:$0xff]  ;;  %v6907_v41 = vmax.f32 %v6875_v20, 0.0 }
 0x3ce   : > { %v6738_v56 = vadd.f32 %v6706_v61, %v11501_v0  ;;  %v6709_v10 = vld [vmem:[#allocation3 + $0xf8] sm:$0xff]  ;;  %v6905_v51 = vmax.f32 %v6873_v45, 0.0  ;;  %v6800_v19 = vld [vmem:[#allocation3 + $0xd0] sm:$0xff] }
 0x3cf   : > { %6772 = vst.msk [vmem:[#allocation3 + $0xf0] sm:$0xff] %vm1516_vm6, %v6740_v5  ;;  %v6741_v53 = vadd.f32 %v11504_v7, %v6709_v10  ;;  %v6707_v33 = vld [vmem:[#allocation3 + $0xe8] sm:$0xff]  ;;  %v6798_v35 = vld [vmem:[#allocation3 + $0xc0] sm:$0xff]  ;;  %v6839_v12 = vmul.f32 %v11536_v31, %v6800_v19  ;;  %v6927_v54 = vpack.c.bf16 %v6907_v41, %v6906_v42 }
 0x3d0   : > { %6770 = vst.msk [vmem:[#allocation3 + $0xe0] sm:$0xff] %vm1516_vm6, %v6738_v56  ;;  %v6739_v26 = vadd.f32 %v6707_v33, %v11507_v48  ;;  %v6926_v39 = vpack.c.bf16 %v6905_v51, %v6904_v28  ;;  %v6837_v0 = vmul.f32 %v11536_v31, %v6798_v35  ;;  %v6801_v18 = vld [vmem:[#allocation3 + $0xd8] sm:$0xff] }
 0x3d1   : > { %6773 = vst.msk [vmem:[#allocation3 + $0xf8] sm:$0xff] %vm1516_vm6, %v6741_v53  ;;  %v6799_v24 = vld [vmem:[#allocation3 + $0xc8] sm:$0xff]  ;;  %v6840_v46 = vmul.f32 %v11536_v31, %v6801_v18  ;;  %v6878_v48 = vadd.f32 %v11548_v37, %v6839_v12 }
 0x3d2   : > { %6771 = vst.msk [vmem:[#allocation3 + $0xe8] sm:$0xff] %vm1516_vm6, %v6739_v26  ;;  %8812 = vmatprep.mubr.msk.bf16.mxu1 %vm1516_vm6, %v6926_v39  ;;  %v6838_v7 = vmul.f32 %v11536_v31, %v6799_v24  ;;  %v6876_v50 = vadd.f32 %v11548_v37, %v6837_v0 }
 0x3d3   : > { %8813 = vmatmul.mubr.msk.bf16.gmra.mrb[180].mxu1 %vm1516_vm6, %v6927_v54  ;;  %v6879_v47 = vadd.f32 %v11548_v37, %v6840_v46  ;;  %v6910_v62 = vmax.f32 %v6878_v48, 0.0  ;;  %v11758_v54 = vld [vmem:[%s12026_s11] ss:$0 sm:$0xff] }
 0x3d4   : > { %v6877_v43 = vadd.f32 %v11548_v37, %v6838_v7  ;;  %v6908_v21 = vmax.f32 %v6876_v50, 0.0  ;;  %v11764_v46 = vld [vmem:[%s12027_s12] ss:$0 sm:$0xff] }
 0x3d5   : > { %v6911_v6 = vmax.f32 %v6879_v47, 0.0  ;;  %v11770_v50 = vld [vmem:[%s12167_s15] ss:$0 sm:$0xff]  ;;  %s9171_s15 = smov [#allocation9]  }
 0x3d6   : > { %v6909_v36 = vmax.f32 %v6877_v43, 0.0  ;;  %v6804_v1 = vld [vmem:[#allocation3 + $0xf0] sm:$0xff]  ;;  %v11775_v47 = vld [vmem:[%s12168_s8] ss:$0 sm:$0xff]  ;;  %s9098_s18 = sshll.u32 %s9171_s15, 4  ;;  %s9099_s18 = int_to_ptr.vmem [resolvable:$false] %s9098_s18 }
 0x3d7   : > { %v6802_v32 = vld [vmem:[#allocation3 + $0xe0] sm:$0xff]  ;;  %v6843_v25 = vmul.f32 %v11536_v31, %v6804_v1  ;;  %v6929_v57 = vpack.c.bf16 %v6911_v6, %v6910_v62  ;;  %s9100_s19 = scalar_lea.vmem %s9099_s18, 8192  ;;  %p9101_p10 = scmp.lt.s32.totalorder %s11968_s21, %s9099_s18 }
 0x3d8   : > { %v6928_v59 = vpack.c.bf16 %v6909_v36, %v6908_v21  ;;  %v6841_v29 = vmul.f32 %v11536_v31, %v6802_v32  ;;  %v6805_v13 = vld [vmem:[#allocation3 + $0xf8] sm:$0xff]  ;;  %p9102_p13 = scmp.lt.s32.totalorder %s9100_s19, %s9094_s17 }
 0x3d9   : > { %v6803_v63 = vld [vmem:[#allocation3 + $0xe8] sm:$0xff]  ;;  %v6844_v44 = vmul.f32 %v11536_v31, %v6805_v13  ;;  %v6882_v55 = vadd.f32 %v11548_v37, %v6843_v25 }
 0x3da   : > { %8816 = vmatprep.mubr.msk.bf16.mxu1 %vm1516_vm6, %v6928_v59  ;;  %v6842_v14 = vmul.f32 %v11536_v31, %v6803_v63  ;;  %v6880_v30 = vadd.f32 %v11548_v37, %v6841_v29  ;;  %p9103_p3 = por %p9102_p13, %p9101_p10 }
 0x3db   : > { %8817 = vmatmul.mubr.msk.bf16.gmra.mrb[184].mxu1 %vm1516_vm6, %v6929_v57  ;;  %v6883_v16 = vadd.f32 %v11548_v37, %v6844_v44  ;;  %v6914_v52 = vmax.f32 %v6882_v55, 0.0 }
 0x3dc   : > { %v6881_v40 = vadd.f32 %v11548_v37, %v6842_v14  ;;  %v6912_v27 = vmax.f32 %v6880_v30, 0.0  ;;  %p9104_p7 = pnand %p9103_p3, %p9097_p8 }
 0x3dd   : > { %v6915_v3 = vmax.f32 %v6883_v16, 0.0 }
 0x3de   : > { %v6913_v11 = vmax.f32 %v6881_v40, 0.0 }
 0x3df   : > { %v6931_v15 = vpack.c.bf16 %v6915_v3, %v6914_v52 }
 0x3e0   : > { %v6930_v60 = vpack.c.bf16 %v6913_v11, %v6912_v27 }
 0x3e2   : > { %8820 = vmatprep.mubr.msk.bf16.mxu1 %vm1516_vm6, %v6930_v60 }
 0x3e3   : > { %8821 = vmatmul.mubr.msk.bf16.gmra.mrb[188].mxu1 %vm1516_vm6, %v6931_v15 }
 0x3f7   : > { %v8834_v31 = vpop.f32.mrb[160].mxu0 }
 0x3f8   : > { %v7301_v8 = vpop.f32.mrb[161].mxu0  ;;  %v7437_v24 = vmul.f32 %v8834_v31, %v11758_v54 }
 0x3f9   : > { %v8835_v38 = vpop.f32.mrb[162].mxu0  ;;  %v7435_v7 = vmul.f32 %v11758_v54, %v7301_v8 }
 0x3fa   : > { %v7304_v17 = vpop.f32.mrb[163].mxu0  ;;  %v7476_v43 = vadd.f32 %v11764_v46, %v7437_v24  ;;  %v7438_v6 = vmul.f32 %v8835_v38, %v11758_v54 }
 0x3fb   : > { %v7474_v1 = vadd.f32 %v11764_v46, %v7435_v7  ;;  %v7436_v62 = vmul.f32 %v11758_v54, %v7304_v17 }
 0x3fc   : > { %v7477_v44 = vadd.f32 %v11764_v46, %v7438_v6 }
 0x3fd   : > { %v7475_v16 = vadd.f32 %v11764_v46, %v7436_v62 }
 0x3ff   : > { %v8838_v9 = vpop.f32.mrb[164].mxu0 }
 0x400   : > { %v7317_v34 = vpop.f32.mrb[165].mxu0  ;;  %v7441_v55 = vmul.f32 %v8838_v9, %v11758_v54 }
 0x401   : > { %v11703_v4 = vpop.f32.mrb[166].mxu0  ;;  %v7439_v27 = vmul.f32 %v11758_v54, %v7317_v34 }
 0x402   : > { %v11705_v49 = vpop.f32.mrb[167].mxu0  ;;  %v7480_v38 = vadd.f32 %v11764_v46, %v7441_v55  ;;  %v7442_v17 = vmul.f32 %v11703_v4, %v11758_v54 }
 0x403   : > { %v7478_v7 = vadd.f32 %v11764_v46, %v7439_v27 }
 0x407   : > { %v11707_v37 = vpop.f32.mrb[168].mxu0 }
 0x408   : > { %v11709_v58 = vpop.f32.mrb[169].mxu0 }
 0x409   : > { %v11711_v2 = vpop.f32.mrb[170].mxu0 }
 0x40a   : > { %v11713_v23 = vpop.f32.mrb[171].mxu0 }
 0x40f   : > { %v11715_v20 = vpop.f32.mrb[172].mxu0 }
 0x410   : > { %v11717_v22 = vpop.f32.mrb[173].mxu0 }
 0x411   : > { %v11719_v45 = vpop.f32.mrb[174].mxu0 }
 0x412   : > { %v11721_v5 = vpop.f32.mrb[175].mxu0 }
 0x417   : > { %v11723_v61 = vpop.f32.mrb[176].mxu0 }
 0x418   : > { %v11725_v41 = vpop.f32.mrb[177].mxu0 }
 0x419   : > { %v11727_v56 = vpop.f32.mrb[178].mxu0 }
 0x41a   : > { %v11729_v10 = vpop.f32.mrb[179].mxu0 }
 0x41f   : > { %v11731_v28 = vpop.f32.mrb[180].mxu0 }
 0x420   : > { %v11733_v51 = vpop.f32.mrb[181].mxu0 }
 0x421   : > { %v11735_v19 = vpop.f32.mrb[182].mxu0 }
 0x422   : > { %v11737_v53 = vpop.f32.mrb[183].mxu0 }
 0x427   : > { %v11739_v33 = vpop.f32.mrb[184].mxu0 }
 0x428   : > { %v11741_v42 = vpop.f32.mrb[185].mxu0 }
 0x429   : > { %v11743_v35 = vpop.f32.mrb[186].mxu0 }
 0x42a   : > { %v11745_v12 = vpop.f32.mrb[187].mxu0 }
 0x42f   : > { %v11747_v26 = vpop.f32.mrb[188].mxu0 }
 0x430   : > { %v11749_v39 = vpop.f32.mrb[189].mxu0 }
 0x431   : > { %v11751_v0 = vpop.f32.mrb[190].mxu0 }
 0x432   : > { %v11753_v18 = vpop.f32.mrb[191].mxu0 }
 0x47e   : > { %v8794_v48 = vpop.f32.mrb[160].mxu1 }
 0x47f   : > { %v7166_v21 = vmul.f32 %v8794_v48, %v11770_v50  ;;  %v7030_v36 = vpop.f32.mrb[161].mxu1  ;;  %v7440_v48 = vmul.f32 %v11758_v54, %v11705_v49 }
 0x480   : > { %v7164_v32 = vmul.f32 %v11770_v50, %v7030_v36  ;;  %v8795_v25 = vpop.f32.mrb[162].mxu1 }
 0x481   : > { %v7205_v59 = vadd.f32 %v11775_v47, %v7166_v21  ;;  %v7167_v29 = vmul.f32 %v8795_v25, %v11770_v50  ;;  %v7033_v13 = vpop.f32.mrb[163].mxu1 }
 0x482   : > { %v7203_v57 = vadd.f32 %v11775_v47, %v7164_v32  ;;  %v7165_v63 = vmul.f32 %v11770_v50, %v7033_v13  ;;  %v7481_v32 = vadd.f32 %v11764_v46, %v7442_v17 }
 0x483   : > { %v7508_v14 = vadd.f32 %v7476_v43, %v7205_v59  ;;  %v7206_v30 = vadd.f32 %v11775_v47, %v7167_v29  ;;  %v7445_v59 = vmul.f32 %v11707_v37, %v11758_v54  ;;  %v7479_v29 = vadd.f32 %v11764_v46, %v7440_v48 }
 0x484   : > { %v7506_v40 = vadd.f32 %v7474_v1, %v7203_v57  ;;  %v7204_v3 = vadd.f32 %v11775_v47, %v7165_v63  ;;  %v7443_v63 = vmul.f32 %v11758_v54, %v11709_v58 }
 0x485   : > { %v7540_v11 = vmax.f32 %v7508_v14, 0.0  ;;  %v7509_v52 = vadd.f32 %v7477_v44, %v7206_v30  ;;  %v7484_v37 = vadd.f32 %v11764_v46, %v7445_v59 }
 0x486   : > { %v7538_v60 = vmax.f32 %v7506_v40, 0.0  ;;  %v7507_v15 = vadd.f32 %v7475_v16, %v7204_v3  ;;  %v8798_v31 = vpop.f32.mrb[164].mxu1  ;;  %v7446_v3 = vmul.f32 %v11711_v2, %v11758_v54  ;;  %v7482_v58 = vadd.f32 %v11764_v46, %v7443_v63 }
 0x487   : > { %7572 = vst [vmem:[%s11794_s13 + $0x10] sm:$0xff] %v7540_v11  ;;  %v7541_v8 = vmax.f32 %v7509_v52, 0.0  ;;  %v7170_v9 = vmul.f32 %v8798_v31, %v11770_v50  ;;  %v7046_v34 = vpop.f32.mrb[165].mxu1 }
 0x488   : > { %7570 = vst [vmem:[%s11794_s13] sm:$0xff] %v7538_v60  ;;  %v7539_v24 = vmax.f32 %v7507_v15, 0.0  ;;  %v7168_v43 = vmul.f32 %v11770_v50, %v7046_v34  ;;  %v8799_v6 = vpop.f32.mrb[166].mxu1  ;;  %v7444_v60 = vmul.f32 %v11758_v54, %v11713_v23  ;;  %v7485_v34 = vadd.f32 %v11764_v46, %v7446_v3 }
 0x489   : > { %7573 = vst [vmem:[%s11794_s13 + $0x18] sm:$0xff] %v7541_v8  ;;  %v7209_v21 = vadd.f32 %v11775_v47, %v7170_v9  ;;  %v7171_v36 = vmul.f32 %v8799_v6, %v11770_v50  ;;  %v7049_v1 = vpop.f32.mrb[167].mxu1  ;;  %v7453_v3 = vmul.f32 %v11723_v61, %v11758_v54 }
 0x48a   : > { %7571 = vst [vmem:[%s11794_s13 + $0x8] sm:$0xff] %v7539_v24  ;;  %v7207_v4 = vadd.f32 %v11775_v47, %v7168_v43  ;;  %v7169_v62 = vmul.f32 %v11770_v50, %v7049_v1  ;;  %v7483_v48 = vadd.f32 %v11764_v46, %v7444_v60 }
 0x48b   : > { %v7512_v25 = vadd.f32 %v7480_v38, %v7209_v21  ;;  %v7210_v49 = vadd.f32 %v11775_v47, %v7171_v36  ;;  %v7447_v21 = vmul.f32 %v11758_v54, %v11717_v22  ;;  %v7492_v61 = vadd.f32 %v11764_v46, %v7453_v3 }
 0x48c   : > { %v7510_v13 = vadd.f32 %v7478_v7, %v7207_v4  ;;  %v7208_v57 = vadd.f32 %v11775_v47, %v7169_v62  ;;  %v7449_v7 = vmul.f32 %v11715_v20, %v11758_v54 }
 0x48d   : > { %v7544_v44 = vmax.f32 %v7512_v25, 0.0  ;;  %v7513_v14 = vadd.f32 %v7481_v32, %v7210_v49  ;;  %v7450_v49 = vmul.f32 %v11719_v45, %v11758_v54  ;;  %v7486_v22 = vadd.f32 %v11764_v46, %v7447_v21 }
 0x48e   : > { %v7542_v30 = vmax.f32 %v7510_v13, 0.0  ;;  %v7511_v55 = vadd.f32 %v7479_v29, %v7208_v57  ;;  %v8802_v16 = vpop.f32.mrb[168].mxu1  ;;  %v7488_v20 = vadd.f32 %v11764_v46, %v7449_v7  ;;  %v7448_v57 = vmul.f32 %v11758_v54, %v11721_v5 }
 0x48f   : > { %7576 = vst [vmem:[%s11794_s13 + $0x30] sm:$0xff] %v7544_v44  ;;  %v7545_v40 = vmax.f32 %v7513_v14, 0.0  ;;  %v7174_v27 = vmul.f32 %v8802_v16, %v11770_v50  ;;  %v7062_v11 = vpop.f32.mrb[169].mxu1 }
 0x490   : > { %7574 = vst [vmem:[%s11794_s13 + $0x20] sm:$0xff] %v7542_v30  ;;  %v7543_v52 = vmax.f32 %v7511_v55, 0.0  ;;  %v7172_v15 = vmul.f32 %v11770_v50, %v7062_v11  ;;  %v8803_v31 = vpop.f32.mrb[170].mxu1 }
 0x491   : > { %7577 = vst [vmem:[%s11794_s13 + $0x38] sm:$0xff] %v7545_v40  ;;  %v7213_v8 = vadd.f32 %v11775_v47, %v7174_v27  ;;  %v7175_v38 = vmul.f32 %v8803_v31, %v11770_v50  ;;  %v7065_v17 = vpop.f32.mrb[171].mxu1  ;;  %v7489_v40 = vadd.f32 %v11764_v46, %v7450_v49  ;;  %v7487_v27 = vadd.f32 %v11764_v46, %v7448_v57 }
 0x492   : > { %7575 = vst [vmem:[%s11794_s13 + $0x28] sm:$0xff] %v7543_v52  ;;  %v7211_v2 = vadd.f32 %v11775_v47, %v7172_v15  ;;  %v7173_v9 = vmul.f32 %v11770_v50, %v7065_v17  ;;  %v7455_v49 = vmul.f32 %v11758_v54, %v11733_v51 }
 0x493   : > { %v7516_v24 = vadd.f32 %v7484_v37, %v7213_v8  ;;  %v7214_v23 = vadd.f32 %v11775_v47, %v7175_v38 }
 0x494   : > { %v7514_v43 = vadd.f32 %v7482_v58, %v7211_v2  ;;  %v7212_v6 = vadd.f32 %v11775_v47, %v7173_v9  ;;  %v7451_v58 = vmul.f32 %v11758_v54, %v11725_v41  ;;  %v7454_v2 = vmul.f32 %v11727_v56, %v11758_v54 }
 0x495   : > { %v7548_v36 = vmax.f32 %v7516_v24, 0.0  ;;  %v7517_v1 = vadd.f32 %v7485_v34, %v7214_v23  ;;  %v7452_v23 = vmul.f32 %v11758_v54, %v11729_v10  ;;  %v7494_v51 = vadd.f32 %v11764_v46, %v7455_v49 }
 0x496   : > { %v7546_v4 = vmax.f32 %v7514_v43, 0.0  ;;  %v7515_v62 = vadd.f32 %v7483_v48, %v7212_v6  ;;  %v8806_v32 = vpop.f32.mrb[172].mxu1  ;;  %v7490_v41 = vadd.f32 %v11764_v46, %v7451_v58  ;;  %v7461_v58 = vmul.f32 %v11739_v33, %v11758_v54 }
 0x497   : > { %7580 = vst [vmem:[%s11794_s13 + $0x50] sm:$0xff] %v7548_v36  ;;  %v7549_v25 = vmax.f32 %v7517_v1, 0.0  ;;  %v7178_v59 = vmul.f32 %v8806_v32, %v11770_v50  ;;  %v7078_v29 = vpop.f32.mrb[173].mxu1  ;;  %v7493_v1 = vadd.f32 %v11764_v46, %v7454_v2  ;;  %v7491_v32 = vadd.f32 %v11764_v46, %v7452_v23 }
 0x498   : > { %7578 = vst [vmem:[%s11794_s13 + $0x40] sm:$0xff] %v7546_v4  ;;  %v7547_v13 = vmax.f32 %v7515_v62, 0.0  ;;  %v7176_v63 = vmul.f32 %v11770_v50, %v7078_v29  ;;  %v8807_v44 = vpop.f32.mrb[174].mxu1  ;;  %v7457_v62 = vmul.f32 %v11731_v28, %v11758_v54  ;;  %v7500_v33 = vadd.f32 %v11764_v46, %v7461_v58 }
 0x499   : > { %7581 = vst [vmem:[%s11794_s13 + $0x58] sm:$0xff] %v7549_v25  ;;  %v7217_v14 = vadd.f32 %v11775_v47, %v7178_v59  ;;  %v7179_v30 = vmul.f32 %v8807_v44, %v11770_v50  ;;  %v7081_v55 = vpop.f32.mrb[175].mxu1  ;;  %v7458_v44 = vmul.f32 %v11735_v19, %v11758_v54  ;;  %v7463_v49 = vmul.f32 %v11758_v54, %v11749_v39 }
 0x49a   : > { %7579 = vst [vmem:[%s11794_s13 + $0x48] sm:$0xff] %v7547_v13  ;;  %v7215_v45 = vadd.f32 %v11775_v47, %v7176_v63  ;;  %v7177_v16 = vmul.f32 %v11770_v50, %v7081_v55  ;;  %v7496_v28 = vadd.f32 %v11764_v46, %v7457_v62  ;;  %v7465_v62 = vmul.f32 %v11747_v26, %v11758_v54 }
 0x49b   : > { %v7520_v37 = vadd.f32 %v7488_v20, %v7217_v14  ;;  %v7218_v5 = vadd.f32 %v11775_v47, %v7179_v30  ;;  %v7502_v39 = vadd.f32 %v11764_v46, %v7463_v49 }
 0x49c   : > { %v7518_v11 = vadd.f32 %v7486_v22, %v7215_v45  ;;  %v7216_v52 = vadd.f32 %v11775_v47, %v7177_v16  ;;  %v7456_v45 = vmul.f32 %v11758_v54, %v11737_v53  ;;  %v7504_v26 = vadd.f32 %v11764_v46, %v7465_v62 }
 0x49d   : > { %v7552_v60 = vmax.f32 %v7520_v37, 0.0  ;;  %v7521_v15 = vadd.f32 %v7489_v40, %v7218_v5 }
 0x49e   : > { %v7550_v31 = vmax.f32 %v7518_v11, 0.0  ;;  %v7519_v8 = vadd.f32 %v7487_v27, %v7216_v52  ;;  %v8810_v38 = vpop.f32.mrb[176].mxu1  ;;  %v7497_v11 = vadd.f32 %v11764_v46, %v7458_v44 }
 0x49f   : > { %7584 = vst [vmem:[%s11794_s13 + $0x70] sm:$0xff] %v7552_v60  ;;  %v7553_v17 = vmax.f32 %v7521_v15, 0.0  ;;  %v7182_v9 = vmul.f32 %v8810_v38, %v11770_v50  ;;  %v7094_v34 = vpop.f32.mrb[177].mxu1  ;;  %v7495_v60 = vadd.f32 %v11764_v46, %v7456_v45 }
 0x4a0   : > { %7582 = vst [vmem:[%s11794_s13 + $0x60] sm:$0xff] %v7550_v31  ;;  %v7551_v24 = vmax.f32 %v7519_v8, 0.0  ;;  %v7180_v7 = vmul.f32 %v11770_v50, %v7094_v34  ;;  %v8811_v48 = vpop.f32.mrb[178].mxu1  ;;  %v7459_v8 = vmul.f32 %v11758_v54, %v11741_v42 }
 0x4a1   : > { %7585 = vst [vmem:[%s11794_s13 + $0x78] sm:$0xff] %v7553_v17  ;;  %v7221_v43 = vadd.f32 %v11775_v47, %v7182_v9  ;;  %v7183_v6 = vmul.f32 %v8811_v48, %v11770_v50  ;;  %v7097_v21 = vpop.f32.mrb[179].mxu1  ;;  %v7460_v48 = vmul.f32 %v11758_v54, %v11745_v12 }
 0x4a2   : > { %7583 = vst [vmem:[%s11794_s13 + $0x68] sm:$0xff] %v7551_v24  ;;  %v7219_v56 = vadd.f32 %v11775_v47, %v7180_v7  ;;  %v7181_v36 = vmul.f32 %v11770_v50, %v7097_v21  ;;  %v7462_v24 = vmul.f32 %v11743_v35, %v11758_v54  ;;  %v7498_v42 = vadd.f32 %v11764_v46, %v7459_v8 }
 0x4a3   : > { %v7524_v4 = vadd.f32 %v7492_v61, %v7221_v43  ;;  %v7222_v10 = vadd.f32 %v11775_v47, %v7183_v6 }
 0x4a4   : > { %v7522_v25 = vadd.f32 %v7490_v41, %v7219_v56  ;;  %v7220_v20 = vadd.f32 %v11775_v47, %v7181_v36 }
 0x4a5   : > { %v7556_v59 = vmax.f32 %v7524_v4, 0.0  ;;  %v7525_v29 = vadd.f32 %v7493_v1, %v7222_v10  ;;  %v7501_v4 = vadd.f32 %v11764_v46, %v7462_v24 }
 0x4a6   : > { %v7554_v13 = vmax.f32 %v7522_v25, 0.0  ;;  %v7523_v22 = vadd.f32 %v7491_v32, %v7220_v20  ;;  %v8814_v57 = vpop.f32.mrb[180].mxu1  ;;  %v7499_v32 = vadd.f32 %v11764_v46, %v7460_v48 }
 0x4a7   : > { %7588 = vst [vmem:[%s11794_s13 + $0x90] sm:$0xff] %v7556_v59  ;;  %v7557_v63 = vmax.f32 %v7525_v29, 0.0  ;;  %v7186_v14 = vmul.f32 %v8814_v57, %v11770_v50  ;;  %v7110_v30 = vpop.f32.mrb[181].mxu1 }
 0x4a8   : > { %7586 = vst [vmem:[%s11794_s13 + $0x80] sm:$0xff] %v7554_v13  ;;  %v7555_v55 = vmax.f32 %v7523_v22, 0.0  ;;  %v7184_v16 = vmul.f32 %v11770_v50, %v7110_v30  ;;  %v8815_v40 = vpop.f32.mrb[182].mxu1 }
 0x4a9   : > { %7589 = vst [vmem:[%s11794_s13 + $0x98] sm:$0xff] %v7557_v63  ;;  %v7225_v37 = vadd.f32 %v11775_v47, %v7186_v14  ;;  %v7187_v5 = vmul.f32 %v8815_v40, %v11770_v50  ;;  %v7113_v3 = vpop.f32.mrb[183].mxu1 }
 0x4aa   : > { %7587 = vst [vmem:[%s11794_s13 + $0x88] sm:$0xff] %v7555_v55  ;;  %v7223_v19 = vadd.f32 %v11775_v47, %v7184_v16  ;;  %v7185_v27 = vmul.f32 %v11770_v50, %v7113_v3  ;;  %v7464_v55 = vmul.f32 %v11758_v54, %v11753_v18 }
 0x4ab   : > { %v7528_v52 = vadd.f32 %v7496_v28, %v7225_v37  ;;  %v7226_v53 = vadd.f32 %v11775_v47, %v7187_v5  ;;  %v7466_v28 = vmul.f32 %v11751_v0, %v11758_v54 }
 0x4ac   : > { %v7526_v15 = vadd.f32 %v7494_v51, %v7223_v19  ;;  %v7224_v31 = vadd.f32 %v11775_v47, %v7185_v27  ;;  %v7503_v19 = vadd.f32 %v11764_v46, %v7464_v55 }
 0x4ad   : > { %v7560_v38 = vmax.f32 %v7528_v52, 0.0  ;;  %v7529_v17 = vadd.f32 %v7497_v11, %v7226_v53  ;;  %v7505_v3 = vadd.f32 %v11764_v46, %v7466_v28 }
 0x4ae   : > { %v7558_v61 = vmax.f32 %v7526_v15, 0.0  ;;  %v7527_v2 = vadd.f32 %v7495_v60, %v7224_v31  ;;  %v8818_v9 = vpop.f32.mrb[184].mxu1 }
 0x4af   : > { %7592 = vst [vmem:[%s11794_s13 + $0xb0] sm:$0xff] %v7560_v38  ;;  %v7561_v34 = vmax.f32 %v7529_v17, 0.0  ;;  %v7190_v41 = vmul.f32 %v8818_v9, %v11770_v50  ;;  %v7126_v23 = vpop.f32.mrb[185].mxu1 }
 0x4b0   : > { %7590 = vst [vmem:[%s11794_s13 + $0xa0] sm:$0xff] %v7558_v61  ;;  %v7559_v7 = vmax.f32 %v7527_v2, 0.0  ;;  %v7188_v43 = vmul.f32 %v11770_v50, %v7126_v23  ;;  %v8819_v6 = vpop.f32.mrb[186].mxu1 }
 0x4b1   : > { %7593 = vst [vmem:[%s11794_s13 + $0xb8] sm:$0xff] %v7561_v34  ;;  %v7229_v21 = vadd.f32 %v11775_v47, %v7190_v41  ;;  %v7191_v56 = vmul.f32 %v8819_v6, %v11770_v50  ;;  %v7129_v36 = vpop.f32.mrb[187].mxu1 }
 0x4b2   : > { %7591 = vst [vmem:[%s11794_s13 + $0xa8] sm:$0xff] %v7559_v7  ;;  %v7227_v35 = vadd.f32 %v11775_v47, %v7188_v43  ;;  %v7189_v1 = vmul.f32 %v11770_v50, %v7129_v36 }
 0x4b3   : > { %v7532_v10 = vadd.f32 %v7500_v33, %v7229_v21  ;;  %v7230_v12 = vadd.f32 %v11775_v47, %v7191_v56 }
 0x4b4   : > { %v7530_v25 = vadd.f32 %v7498_v42, %v7227_v35  ;;  %v7228_v20 = vadd.f32 %v11775_v47, %v7189_v1 }
 0x4b5   : > { %v7564_v59 = vmax.f32 %v7532_v10, 0.0  ;;  %v7533_v29 = vadd.f32 %v7501_v4, %v7230_v12 }
 0x4b6   : > { %v7562_v13 = vmax.f32 %v7530_v25, 0.0  ;;  %v7531_v22 = vadd.f32 %v7499_v32, %v7228_v20  ;;  %v8822_v57 = vpop.f32.mrb[188].mxu1 }
 0x4b7   : > { %7596 = vst [vmem:[%s11794_s13 + $0xd0] sm:$0xff] %v7564_v59  ;;  %v7565_v63 = vmax.f32 %v7533_v29, 0.0  ;;  %v7194_v44 = vmul.f32 %v8822_v57, %v11770_v50  ;;  %v7142_v14 = vpop.f32.mrb[189].mxu1 }
 0x4b8   : > { %7594 = vst [vmem:[%s11794_s13 + $0xc0] sm:$0xff] %v7562_v13  ;;  %v7563_v30 = vmax.f32 %v7531_v22, 0.0  ;;  %v7192_v51 = vmul.f32 %v11770_v50, %v7142_v14  ;;  %v8823_v45 = vpop.f32.mrb[190].mxu1 }
 0x4b9   : > { %7597 = vst [vmem:[%s11794_s13 + $0xd8] sm:$0xff] %v7565_v63  ;;  %v7233_v16 = vadd.f32 %v11775_v47, %v7194_v44  ;;  %v7195_v0 = vmul.f32 %v8823_v45, %v11770_v50  ;;  %v7145_v40 = vpop.f32.mrb[191].mxu1 }
 0x4ba   : > { %7595 = vst [vmem:[%s11794_s13 + $0xc8] sm:$0xff] %v7563_v30  ;;  %v7231_v37 = vadd.f32 %v11775_v47, %v7192_v51  ;;  %v7193_v5 = vmul.f32 %v11770_v50, %v7145_v40 }
 0x4bb   : > { %v7536_v18 = vadd.f32 %v7504_v26, %v7233_v16  ;;  %v7234_v54 = vadd.f32 %v11775_v47, %v7195_v0 }
 0x4bc   : > { %v7534_v27 = vadd.f32 %v7502_v39, %v7231_v37  ;;  %v7232_v11 = vadd.f32 %v11775_v47, %v7193_v5 }
 0x4bd   : > { %v7568_v52 = vmax.f32 %v7536_v18, 0.0  ;;  %v7537_v53 = vadd.f32 %v7505_v3, %v7234_v54 }
 0x4be   : > { %v7566_v50 = vmax.f32 %v7534_v27, 0.0  ;;  %v7535_v58 = vadd.f32 %v7503_v19, %v7232_v11 }
 0x4bf   : > { %7600 = vst [vmem:[%s11794_s13 + $0xf0] sm:$0xff] %v7568_v52  ;;  %v7569_v60 = vmax.f32 %v7537_v53, 0.0 }
 0x4c0   : > { %7598 = vst [vmem:[%s11794_s13 + $0xe0] sm:$0xff] %v7566_v50  ;;  %v7567_v46 = vmax.f32 %v7535_v58, 0.0 }
 0x4c1   : > { %7601 = vst [vmem:[%s11794_s13 + $0xf8] sm:$0xff] %v7569_v60 }
 0x4c2   : > { %7599 = vst [vmem:[%s11794_s13 + $0xe8] sm:$0xff] %v7567_v46 }
 0x4c3   : > { %9107 = shalt.err (!%p9104_p7)
}
 0x4c4   : > { %s9108_s8 = scalar_lea.hbm %s11966_s9, 4096  ;;  %s9112_s25 = scalar_lea.hbm %s12169_s20, 8192 }
 0x4c5   : > { %p9109_p9 = scmp.ne.s32.totalorder %s11966_s9, %s9108_s8  ;;  %p9113_p5 = scmp.lt.u32.totalorder %s11966_s9, %s12169_s20 }
 0x4c6   : > { %p9114_p11 = scmp.lt.u32.totalorder %s9112_s25, %s9108_s8  ;;  %p9116_p4 = scmp.lt.u32.totalorder %s9108_s8, %s11966_s9 }
 0x4c7   : > { %p9110_p1 = pnand %p9109_p9, %p9338_p12 }
 0x4c8   : > { %p9115_p2 = por %p9114_p11, %p9113_p5 }
 0x4c9   : > { %p9111_p0 = pneg %p9110_p1 }
 0x4ca   : > { %p9117_p6 = por %p9116_p4, %p9115_p2 }
 0x4cc   : > { %p9118_p8 = pnand %p9117_p6, %p9111_p0 }
 0x4ce   : > { %9121 = shalt.err (!%p9118_p8)
}
 0x4cf   : > { %s9172_s17 = smov 128   ;;  %s9173_s15 = smov 8  }
 0x4d0   : > { %8870 = dma.vmem_to_hbm [thread:$0]  (%p9338_p12), %s11968_s21, 4096, %s11966_s9, %s7603_s29, %s9172_s17, %s9172_s17, %s9173_s15  }
 0x4d1 PF: > { %s12170_s18 = sld [smem:[#allocation13_spill]]  ;;  %s12171_s19 = sld [smem:[#allocation14_spill]] }
 0x4d2   : > { %p12173_p13 = scmp.ge.s32.totalorder %s9164_s28, 2 }
 0x4d7   : > { %s7631_s16 = sand.u32 1, %s12170_s18   ;;  %p12172_p10 = scmp.ne.s32.totalorder %s12171_s19, 0 }
 0x4d8   : > { %s7632_s8 = scalar_lea.sflag [#allocation6], %s7631_s16 }
 0x4d9   : > { %p8881_p3 = pnand %p12173_p13, %p12172_p10 }
 0x4db   : > { %9147 = dma.done.wait (!%p8881_p3), %s7632_s8, 4096  }
 0x4dc   : > { %9149 = vsyncadd (!%p8881_p3), %s7632_s8, 4294963200  ;;  %s12174_s28 = sld [smem:[#allocation15_spill]]  ;;  %s12175_s25 = smov %s9156_s26 }
 0x4dd   : > { %s12176_s26 = smov %s9160_s27  ;;  %s12177_s27 = smov %s9334_s23 }
 0x4e2   : > { %p27_p7 = scmp.ge.s32.totalorder %s12174_s28, 4  }
 0x4e4   :  { %29 = sbr.rel (!%p27_p7) target bundleno = 10 (0xa), region = 131 }
 0x4eb   :  { %7637 = vsyncpa [#allocation5], 1 }
 0x4ec   :  { %7639 = vsyncpa [#allocation5 + $0x1], 1 }
 0x4ed   :  { %7640 = vsyncpa [#allocation8], 1 }
 0x4ee   :  { %7641 = vsyncpa [#allocation6], 1 }
 0x4ef   :  { %7643 = vsyncpa [#allocation6 + $0x1], 1 }

</bundles_post_ra>
